<compile_context>
chip_gen: v6e
topology: v6e:2x2x1
jax: 0.10.0
libtpu: 0.0.40
codegen_flags: <defaults>
</compile_context>

<pallas_src>
import functools
import math

import jax
import jax.numpy as jnp
from jax.experimental import pallas as pl
from jax.experimental.pallas import tpu as pltpu


VMEM_LIMIT = 32 * 1024 * 1024  # well under v7x's 64 MiB physical VMEM; actual use is ~1-2 MiB


def _round_up(x, m):
    return ((x + m - 1) // m) * m


# ----------------------------------------------------------------------------
# Fused "chain" kernel: executes a static list of conv / strided-conv / res-block stages on one
# batch element, keeping the activation in vregs and a single VMEM halo scratch between stages.
# ----------------------------------------------------------------------------
def _write_padded(scr, body, pad):
    """Write `body` (T, C) into scratch rows [pad, pad+T) with zeroed halo rows on both sides."""
    T, C = body.shape
    body = body.astype(scr.dtype)
    if pad > 0:
        z = jnp.zeros((pad, C), scr.dtype)
        scr[0:pad, 0:C] = z
        scr[pad + T:pad + T + pad, 0:C] = z
    scr[pad:pad + T, 0:C] = body


def _chain_kernel(*refs, stages):
    # refs = (x_ref, w/b refs..., o_ref, scratch)
    x_ref = refs[0]
    o_ref = refs[-2]
    scr = refs[-1]
    wrefs = refs[1:-2]

    h = x_ref[0]                                   # (T, C) in the input dtype (bf16 / f32)
    wi = 0

    def taps_dot(tap_slices, w_ref, b_ref):
        # single MXU matmul over all taps: concat taps along lanes -> (T, K*Cin) @ (K*Cin, Cout)
        parts = [scr[rs, cs].astype(jnp.bfloat16) for rs, cs in tap_slices]
        xcat = parts[0] if len(parts) == 1 else jnp.concatenate(parts, axis=-1)
        return jnp.dot(xcat, w_ref[...], preferred_element_type=jnp.float32) + b_ref[...]

    for st in stages:
        kind = st[0]
        T, C = h.shape
        if kind == "conv":
            # plain stride-1 conv: taps at sublane offsets k*dil in a pad-haloed scratch
            _, K, dil, pad, relu = st
            w_ref, b_ref = wrefs[wi], wrefs[wi + 1]
            wi += 2
            T_out = T + 2 * pad - dil * (K - 1)
            _write_padded(scr, h, pad)
            sl = [(pl.ds(k * dil, T_out), slice(0, C)) for k in range(K)]
            h = taps_dot(sl, w_ref, b_ref)
            if relu:
                h = jnp.maximum(h, 0.0)
        elif kind == "dconv":
            # strided (stride=s, K=2s, pad=s//2) conv on the channel-folded input (T, s*C0):
            # tap k -> scratch row offset 1 + (k-p)//s, lane half ((k-p) % s) * C0.
            _, s = st
            w_ref, b_ref = wrefs[wi], wrefs[wi + 1]
            wi += 2
            K, p = 2 * s, s // 2
            C0 = C // s
            _write_padded(scr, h, 1)
            sl = []
            for k in range(K):
                roff = 1 + (k - p) // s
                loff = ((k - p) % s) * C0
                sl.append((pl.ds(roff, T), slice(loff, loff + C0)))
            h = taps_dot(sl, w_ref, b_ref)                       # T_out == folded T
        else:  # "res"  : x + conv_k1(relu(conv_k3_dil(relu(x))))
            _, dil = st
            w1, b1, w2, b2 = wrefs[wi], wrefs[wi + 1], wrefs[wi + 2], wrefs[wi + 3]
            wi += 4
            _write_padded(scr, jnp.maximum(h, 0.0), dil)
            sl = [(pl.ds(k * dil, T), slice(0, C)) for k in range(3)]
            t1 = jnp.maximum(taps_dot(sl, w1, b1), 0.0).astype(jnp.bfloat16)
            # residual reuses `h` already in vregs (no reload)
            h = h + (jnp.dot(t1, w2[...], preferred_element_type=jnp.float32) + b2[...])

    o_ref[0] = h.astype(o_ref.dtype)


def _chain_call(x, stage_params, out_dtype):
    """Run a fused stage chain over a (N, T, C) activation; grid = batch ('parallel')."""
    N, T_in, C_in = x.shape

    # Replay stages to determine output shape, scratch extents and the flat weight list.
    T, C = T_in, C_in
    max_tpad, max_c = 8, C_in
    stages, tensors = [], []
    for sp in stage_params:
        if sp["kind"] == "conv":
            K, dil, pad, relu = sp["K"], sp["dil"], sp["pad"], sp["relu"]
            max_tpad = max(max_tpad, T + 2 * pad)
            max_c = max(max_c, C)
            stages.append(("conv", K, dil, pad, relu))
            tensors += [sp["w"], sp["b"]]
            T = T + 2 * pad - dil * (K - 1)
            C = sp["w"].shape[1]
        elif sp["kind"] == "dconv":
            s = sp["stride"]
            max_tpad = max(max_tpad, T + 2)
            max_c = max(max_c, C)
            stages.append(("dconv", s))
            tensors += [sp["w"], sp["b"]]
            C = sp["w"].shape[1]            # folded T is unchanged (== original T / stride)
        else:  # res
            dil = sp["dil"]
            max_tpad = max(max_tpad, T + 2 * dil)
            max_c = max(max_c, C)
            stages.append(("res", dil))
            tensors += [sp["w1"], sp["b1"], sp["w2"], sp["b2"]]
    T_out, C_out = T, C
    max_tpad = _round_up(max_tpad, 8)

    in_specs = [pl.BlockSpec((1, T_in, C_in), lambda n: (n, 0, 0))]
    for t in tensors:
        in_specs.append(pl.BlockSpec(t.shape, lambda n: (0, 0)))   # all weights/biases are 2-D

    return pl.pallas_call(
        functools.partial(_chain_kernel, stages=tuple(stages)),
        out_shape=jax.ShapeDtypeStruct((N, T_out, C_out), out_dtype),
        grid=(N,),
        in_specs=in_specs,
        out_specs=pl.BlockSpec((1, T_out, C_out), lambda n: (n, 0, 0)),
        scratch_shapes=[pltpu.VMEM((max_tpad, max_c), jnp.float32)],
        compiler_params=pltpu.CompilerParams(
            dimension_semantics=("parallel",),
            vmem_limit_bytes=VMEM_LIMIT),
    )(x, *tensors)


# ----------------------------------------------------------------------------
# VQ (nearest-codebook) kernel
# ----------------------------------------------------------------------------
def _vq_kernel(x_ref, cb_ref, c2_ref, xd_ref, idx_ref, cnt_ref, *, m_valid):
    i = pl.program_id(0)
    x = x_ref[...]                                   # (tile, D) f32
    cb = cb_ref[...]                                 # (C, D)  f32
    nb_code = cb.shape[0]
    # x^2 term dropped: constant per row, argmin-invariant (codebook norms hoisted outside).
    xc = jax.lax.dot_general(x, cb, (((1,), (1,)), ((), ())),
                             preferred_element_type=jnp.float32)   # (tile, C)
    dist = c2_ref[...] - 2.0 * xc
    min_d = jnp.min(dist, axis=-1, keepdims=True)
    iota_c = jax.lax.broadcasted_iota(jnp.int32, dist.shape, 1)
    # first index attaining the minimum (torch.argmin semantics)
    idx = jnp.min(jnp.where(dist == min_d, iota_c, nb_code), axis=-1, keepdims=True)
    onehot = (iota_c == idx).astype(jnp.float32)
    xd_ref[...] = jnp.dot(onehot, cb, preferred_element_type=jnp.float32)
    # TODO(synk): idx stays a width-1 column (masked stores); fine at tiny M, widen for large N*T.
    idx_ref[...] = idx.astype(jnp.int32)
    # per-tile PARTIAL counts (no cross-step accumulator -> grid axis stays 'parallel'); pad rows masked
    tile = x.shape[0]
    row = jax.lax.broadcasted_iota(jnp.int32, (tile, 1), 0) + i * tile
    valid = (row < m_valid).astype(jnp.float32)
    cnt = jnp.sum(onehot * valid, axis=0, keepdims=True)           # (1, C)
    cnt_ref[0:1, :] = cnt
    cnt_ref[1:8, :] = jnp.zeros((7, cnt.shape[1]), jnp.float32)


def pallas_vq(x, codebook, tm=256):
    """Nearest-codebook quantization. Returns (x_dequant, code_idx, per-code counts)."""
    M, D = x.shape
    C, _ = codebook.shape
    tile = min(tm, _round_up(M, 8))
    Mp = _round_up(M, tile)
    xp = x if Mp == M else jnp.pad(x, ((0, Mp - M), (0, 0)))
    c2 = jnp.sum(codebook * codebook, axis=-1, keepdims=True).T      # (1, C), hoisted
    ntiles = Mp // tile

    xd, idx, pcnt = pl.pallas_call(
        functools.partial(_vq_kernel, m_valid=M),
        out_shape=(
            jax.ShapeDtypeStruct((Mp, D), jnp.float32),
            jax.ShapeDtypeStruct((Mp, 1), jnp.int32),
            jax.ShapeDtypeStruct((ntiles * 8, C), jnp.float32),
        ),
        grid=(ntiles,),
        in_specs=[
            pl.BlockSpec((tile, D), lambda i: (i, 0)),
            pl.BlockSpec((C, D), lambda i: (0, 0)),
            pl.BlockSpec((1, C), lambda i: (0, 0)),
        ],
        out_specs=(
            pl.BlockSpec((tile, D), lambda i: (i, 0)),
            pl.BlockSpec((tile, 1), lambda i: (i, 0)),
            pl.BlockSpec((8, C), lambda i: (i, 0)),
        ),
        compiler_params=pltpu.CompilerParams(
            dimension_semantics=("parallel",),
            vmem_limit_bytes=VMEM_LIMIT),
    )(xp, codebook, c2)
    counts = jnp.sum(pcnt, axis=0)     # partial rows + zero filler rows
    return xd[:M], idx[:M, 0], counts


# ----------------------------------------------------------------------------
# Model: Encoder / QuantizeEMAReset (eval path) / Decoder
# ----------------------------------------------------------------------------
def quantizer_forward(codebook, x_enc):
    N, T, D = x_enc.shape
    x_flat = x_enc.reshape(N * T, D)
    x_d, code_idx, counts = pallas_vq(x_flat, codebook)
    # TODO(synk): QuantizeEMAReset commitment weighting (beta) / detach structure is training-side;
    # plain MSE reported here.
    commit_loss = jnp.mean((x_flat - x_d) ** 2)
    prob = counts / (N * T)
    perplexity = jnp.exp(-jnp.sum(prob * jnp.log(prob + 1e-7)))
    # TODO(synk): the exact EMA-usage "activate" statistic is training-only; report codes hit here.
    activate = jnp.sum(counts > 0).astype(jnp.float32)
    # straight-through x + (x_d - x).detach() is numerically x_d in the forward pass
    return x_d.reshape(N, T, D), commit_loss, perplexity, activate, code_idx.reshape(N, T)


def _conv_stage(p, K=3, dil=1, pad=1, relu=False):
    return {"kind": "conv", "K": K, "dil": dil, "pad": pad, "relu": relu,
            "w": p["w"], "b": p["b"]}


def _res_stage(p, dil):
    return {"kind": "res", "dil": dil, "w1": p["w1"], "b1": p["b1"],
            "w2": p["w2"], "b2": p["b2"]}


def vqvae_forward(params, x, *, down_t, stride_t, drate, out_dim):
    assert stride_t % 2 == 0, "fused strided conv assumes even stride"  # TODO(synk): odd strides
    enc, dec = params["enc"], params["dec"]
    N, T, Cin = x.shape

    # channels 251 -> 256 (lane-dense); inter-kernel activations bf16
    cin_pad = enc["conv_in"]["w"].shape[0] // 3 - Cin
    h = jnp.pad(x, ((0, 0), (0, 0), (0, cin_pad))).astype(jnp.bfloat16)

    # ---- Encoder ----
    h = _chain_call(h, [_conv_stage(enc["conv_in"], relu=True)], jnp.bfloat16)
    for i in range(down_t):
        blk = enc["down"][i]
        Nh, Th, Ch = h.shape
        assert Th % stride_t == 0
        hf = h.reshape(Nh, Th // stride_t, stride_t * Ch)   # channel fold: pure reshape, no pad/copy of halos
        stages = [{"kind": "dconv", "stride": stride_t,
                   "w": blk["dconv"]["w"], "b": blk["dconv"]["b"]}]
        stages += [_res_stage(p, drate ** d) for d, p in enumerate(blk["res"])]
        last = (i == down_t - 1)
        if last:
            stages.append(_conv_stage(enc["conv_out"]))     # conv_out fused into the last level
        h = _chain_call(hf, stages, jnp.float32 if last else jnp.bfloat16)

    # ---- Quantizer (ema_reset, eval path) ----
    x_q, loss, perplexity, activate, indices = quantizer_forward(params["codebook"], h)

    # ---- Decoder ----
    g = x_q
    for i in range(down_t):
        blk = dec["up"][i]
        depth = len(blk["res"])
        stages = []
        if i == 0:
            stages.append(_conv_stage(dec["conv_in"], relu=True))   # conv_in fused into level 0
        stages += [_res_stage(blk["res"][d], drate ** d) for d in reversed(range(depth))]
        stages.append(_conv_stage(blk["uconv"]))            # Upsample(2)+Conv folded: 2*C phase channels
        g = _chain_call(g, stages, jnp.bfloat16)
        Ng, Tg, C2 = g.shape
        g = g.reshape(Ng, Tg, 2, C2 // 2).reshape(Ng, 2 * Tg, C2 // 2)   # interleave even/odd phases

    y = _chain_call(g, [_conv_stage(dec["conv_pen"], relu=True),
                        _conv_stage(dec["conv_out"])], jnp.float32)       # conv_pen+conv_out fused
    x_out = y[..., :out_dim]                                              # 256 -> 251
    return x_out, loss, perplexity, activate, indices


# ----------------------------------------------------------------------------
# Deterministic parameter init (PyTorch Conv1d-style uniform init), packed kernel-side:
#   conv weights -> (K*Cin, Cout) bf16 (tap-major rows), biases -> (1, Cout) f32,
#   boundary convs channel-padded to 256, upsample convs pre-folded to 2*Cout phase channels.
# ----------------------------------------------------------------------------
class _KeyGen:
    def __init__(self, key):
        self._key = key

    def __call__(self):
        self._key, sub = jax.random.split(self._key)
        return sub


def init_vqvae_params(key, in_dim, out_emb, nb_code, code_dim,
                      down_t, stride_t, width, depth):
    kg = _KeyGen(key)
    in_dim_pad = _round_up(in_dim, 128)

    def torch_conv(cout, cin, k):
        bound = 1.0 / math.sqrt(cin * k)
        w = jax.random.uniform(kg(), (cout, cin, k), jnp.float32, -bound, bound)
        b = jax.random.uniform(kg(), (cout,), jnp.float32, -bound, bound)
        return w, b

    def pack_conv(w, b, cin_pad=None, cout_pad=None):
        cout, cin, k = w.shape
        if cin_pad:
            w = jnp.pad(w, ((0, 0), (0, cin_pad - cin), (0, 0)))
        if cout_pad:
            w = jnp.pad(w, ((0, cout_pad - cout), (0, 0), (0, 0)))
            b = jnp.pad(b, ((0, cout_pad - cout),))
        co, ci, kk = w.shape
        wf = jnp.transpose(w, (2, 1, 0)).reshape(kk * ci, co)   # row block k = w[:, :, k].T
        return {"w": wf.astype(jnp.bfloat16), "b": b.reshape(1, -1).astype(jnp.float32)}

    def pack_upsample(w, b):
        # Fold Upsample(2,'nearest')+Conv1d(k3,p1): even phase = w0*g[t-1]+(w1+w2)*g[t],
        # odd phase = (w0+w1)*g[t]+w2*g[t+1]  ->  K=3 conv with 2*Cout channels.
        w0, w1, w2 = w[:, :, 0].T, w[:, :, 1].T, w[:, :, 2].T       # (Cin, Cout)
        z = jnp.zeros_like(w0)
        wf = jnp.concatenate([
            jnp.concatenate([w0, z], axis=1),
            jnp.concatenate([w1 + w2, w0 + w1], axis=1),
            jnp.concatenate([z, w2], axis=1)], axis=0)              # (3*Cin, 2*Cout)
        return {"w": wf.astype(jnp.bfloat16),
                "b": jnp.concatenate([b, b]).reshape(1, -1).astype(jnp.float32)}

    def pack_res(w1, b1, w2, b2):
        d1, d2 = pack_conv(w1, b1), pack_conv(w2, b2)
        return {"w1": d1["w"], "b1": d1["b"], "w2": d2["w"], "b2": d2["b"]}

    filter_t = stride_t * 2
    enc = {
        "conv_in": pack_conv(*torch_conv(width, in_dim, 3), cin_pad=in_dim_pad),
        "down": [
            {"dconv": pack_conv(*torch_conv(width, width, filter_t)),
             "res": [pack_res(*torch_conv(width, width, 3), *torch_conv(width, width, 1))
                     for _ in range(depth)]}
            for _ in range(down_t)
        ],
        "conv_out": pack_conv(*torch_conv(out_emb, width, 3)),
    }
    dec = {
        "conv_in": pack_conv(*torch_conv(width, out_emb, 3)),
        "up": [
            {"res": [pack_res(*torch_conv(width, width, 3), *torch_conv(width, width, 1))
                     for _ in range(depth)],
             "uconv": pack_upsample(*torch_conv(width, width, 3))}
            for _ in range(down_t)
        ],
        "conv_pen": pack_conv(*torch_conv(width, width, 3)),
        "conv_out": pack_conv(*torch_conv(in_dim, width, 3), cout_pad=in_dim_pad),
    }
    # codebook kept f32: VQ distances / argmin / dequant stay exact
    codebook = jax.random.normal(kg(), (nb_code, code_dim), jnp.float32) / math.sqrt(code_dim)
    return {"enc": enc, "dec": dec, "codebook": codebook}


# ----------------------------------------------------------------------------
if __name__ == "__main__":
    # Small, self-consistent hyperparameters (dataname='kit' -> 251 input features),
    # widths chosen lane-dense (128).
    N, T = 2, 64
    IN_DIM = 251
    WIDTH = 128
    OUT_EMB = 128
    CODE_DIM = 128
    NB_CODE = 128
    DOWN_T = 2
    STRIDE_T = 2
    DEPTH = 2
    DRATE = 3

    key = jax.random.PRNGKey(0)
    pkey, xkey = jax.random.split(key)
    params = init_vqvae_params(pkey, IN_DIM, OUT_EMB, NB_CODE, CODE_DIM,
                               DOWN_T, STRIDE_T, WIDTH, DEPTH)
    x = jax.random.normal(xkey, (N, T, IN_DIM), jnp.float32)

    fwd = jax.jit(functools.partial(vqvae_forward, down_t=DOWN_T, stride_t=STRIDE_T,
                                    drate=DRATE, out_dim=IN_DIM))
    x_out, loss, perplexity, activate, indices = fwd(params, x)
    jax.block_until_ready((x_out, loss, perplexity, activate, indices))

    assert x_out.shape == (N, T, IN_DIM), x_out.shape
    assert indices.shape == (N, T // (STRIDE_T ** DOWN_T)), indices.shape
    assert bool(jnp.all(jnp.isfinite(x_out)))
    print("KERNEL_OK")
</pallas_src>

<mosaic_0001>
module attributes {stable_mosaic.version = 11 : i64} {
  func.func @_chain_kernel(%arg0: i32, %arg1: memref<1x64x256xbf16, #tpu.memory_space<vmem>>, %arg2: memref<768x128xbf16, #tpu.memory_space<vmem>>, %arg3: memref<1x128xf32, #tpu.memory_space<vmem>>, %arg4: memref<1x64x128xbf16, #tpu.memory_space<vmem>>, %arg5: memref<72x256xf32, #tpu.memory_space<vmem>>) attributes {dimension_semantics = [#tpu.dimension_semantics<parallel>], iteration_bounds = array<i64: 2>, scalar_prefetch = 0 : i64, scratch_operands = 1 : i64, tpu.core_type = #tpu.core_type<tc>, window_params = [{transform_indices = @transform_0, window_bounds = array<i64: 1, 64, 256>}, {pipeline_mode = #tpu.pipeline_mode<synchronous>, transform_indices = @transform_1, window_bounds = array<i64: 768, 128>}, {pipeline_mode = #tpu.pipeline_mode<synchronous>, transform_indices = @transform_2, window_bounds = array<i64: 1, 128>}, {transform_indices = @transform_3, window_bounds = array<i64: 1, 64, 128>}]} {
    %c0 = arith.constant 0 : index
    %c0_0 = arith.constant 0 : index
    %c0_1 = arith.constant 0 : index
    %0 = vector.load %arg1[%c0, %c0_0, %c0_1] : memref<1x64x256xbf16, #tpu.memory_space<vmem>>, vector<1x64x256xbf16>
    %1 = vector.shape_cast %0 : vector<1x64x256xbf16> to vector<64x256xbf16>
    %2 = arith.extf %1 : vector<64x256xbf16> to vector<64x256xf32>
    %cst = arith.constant 0.000000e+00 : f32
    %3 = vector.broadcast %cst : f32 to vector<1x256xf32>
    %c0_2 = arith.constant 0 : index
    %c0_3 = arith.constant 0 : index
    %4 = vector.load %arg5[%c0_2, %c0_3] : memref<72x256xf32, #tpu.memory_space<vmem>>, vector<1x256xf32>
    tpu.vector_store %arg5[%c0_2, %c0_3], %3 {strides = array<i32>} : memref<72x256xf32, #tpu.memory_space<vmem>>, vector<1x256xf32>,
    %c65 = arith.constant 65 : index
    %c0_4 = arith.constant 0 : index
    %5 = vector.load %arg5[%c65, %c0_4] : memref<72x256xf32, #tpu.memory_space<vmem>>, vector<1x256xf32>
    tpu.vector_store %arg5[%c65, %c0_4], %3 {strides = array<i32>} : memref<72x256xf32, #tpu.memory_space<vmem>>, vector<1x256xf32>,
    %c1 = arith.constant 1 : index
    %c0_5 = arith.constant 0 : index
    %6 = vector.load %arg5[%c1, %c0_5] : memref<72x256xf32, #tpu.memory_space<vmem>>, vector<64x256xf32>
    tpu.vector_store %arg5[%c1, %c0_5], %2 {strides = array<i32>} : memref<72x256xf32, #tpu.memory_space<vmem>>, vector<64x256xf32>,
    %c0_6 = arith.constant 0 : index
    %c0_7 = arith.constant 0 : index
    %7 = vector.load %arg5[%c0_6, %c0_7] : memref<72x256xf32, #tpu.memory_space<vmem>>, vector<64x256xf32>
    %8 = arith.truncf %7 : vector<64x256xf32> to vector<64x256xbf16>
    %c1_8 = arith.constant 1 : index
    %c0_9 = arith.constant 0 : index
    %9 = vector.load %arg5[%c1_8, %c0_9] : memref<72x256xf32, #tpu.memory_space<vmem>>, vector<64x256xf32>
    %10 = arith.truncf %9 : vector<64x256xf32> to vector<64x256xbf16>
    %c2 = arith.constant 2 : index
    %c0_10 = arith.constant 0 : index
    %11 = vector.load %arg5[%c2, %c0_10] : memref<72x256xf32, #tpu.memory_space<vmem>>, vector<64x256xf32>
    %12 = arith.truncf %11 : vector<64x256xf32> to vector<64x256xbf16>
    %13 = tpu.concatenate %8, %10, %12 in 1 : vector<64x256xbf16>, vector<64x256xbf16>, vector<64x256xbf16> -> vector<64x768xbf16>
    %c0_11 = arith.constant 0 : index
    %c0_12 = arith.constant 0 : index
    %14 = vector.load %arg2[%c0_11, %c0_12] : memref<768x128xbf16, #tpu.memory_space<vmem>>, vector<768x128xbf16>
    %cst_13 = arith.constant dense<0.000000e+00> : vector<64x128xf32>
    %15 = tpu.matmul %13, %14, %cst_13 {dimension_numbers = #tpu.dot_dimension_numbers<[1], [0], [0], [1], [0, 0, 1, 1], [], []>} : vector<64x768xbf16>, vector<768x128xbf16>, vector<64x128xf32> -> vector<64x128xf32>
    %c0_14 = arith.constant 0 : index
    %c0_15 = arith.constant 0 : index
    %16 = vector.load %arg3[%c0_14, %c0_15] : memref<1x128xf32, #tpu.memory_space<vmem>>, vector<1x128xf32>
    %17 = vector.broadcast %16 : vector<1x128xf32> to vector<64x128xf32>
    %18 = arith.addf %15, %17 : vector<64x128xf32>
    %cst_16 = arith.constant 0.000000e+00 : f32
    %19 = vector.broadcast %cst_16 : f32 to vector<64x128xf32>
    %20 = arith.maximumf %18, %19 : vector<64x128xf32>
    %21 = arith.truncf %20 : vector<64x128xf32> to vector<64x128xbf16>
    %c0_17 = arith.constant 0 : index
    %c0_18 = arith.constant 0 : index
    %c0_19 = arith.constant 0 : index
    %22 = vector.load %arg4[%c0_17, %c0_18, %c0_19] : memref<1x64x128xbf16, #tpu.memory_space<vmem>>, vector<1x64x128xbf16>
    %23 = vector.shape_cast %22 : vector<1x64x128xbf16> to vector<64x128xbf16>
    %24 = vector.shape_cast %21 : vector<64x128xbf16> to vector<1x64x128xbf16>
    tpu.vector_store %arg4[%c0_17, %c0_18, %c0_19], %24 {strides = array<i32>} : memref<1x64x128xbf16, #tpu.memory_space<vmem>>, vector<1x64x128xbf16>,
    return
  }
  func.func @transform_0(%arg0: i32) -> (i32, i32, i32) {
    %c0_i32 = arith.constant 0 : i32
    %c0_i32_0 = arith.constant 0 : i32
    %c0_i32_1 = arith.constant 0 : i32
    return %arg0, %c0_i32, %c0_i32_0 : i32, i32, i32
  }
  func.func @transform_1(%arg0: i32) -> (i32, i32) {
    %c0_i32 = arith.constant 0 : i32
    %c0_i32_0 = arith.constant 0 : i32
    %c0_i32_1 = arith.constant 0 : i32
    return %c0_i32, %c0_i32_0 : i32, i32
  }
  func.func @transform_2(%arg0: i32) -> (i32, i32) {
    %c0_i32 = arith.constant 0 : i32
    %c0_i32_0 = arith.constant 0 : i32
    %c0_i32_1 = arith.constant 0 : i32
    return %c0_i32, %c0_i32_0 : i32, i32
  }
  func.func @transform_3(%arg0: i32) -> (i32, i32, i32) {
    %c0_i32 = arith.constant 0 : i32
    %c0_i32_0 = arith.constant 0 : i32
    %c0_i32_1 = arith.constant 0 : i32
    return %arg0, %c0_i32, %c0_i32_0 : i32, i32, i32
  }
}

module attributes {stable_mosaic.version = 11 : i64} {
  func.func @_chain_kernel(%arg0: i32, %arg1: memref<1x16x256xbf16, #tpu.memory_space<vmem>>, %arg2: memref<512x128xbf16, #tpu.memory_space<vmem>>, %arg3: memref<1x128xf32, #tpu.memory_space<vmem>>, %arg4: memref<384x128xbf16, #tpu.memory_space<vmem>>, %arg5: memref<1x128xf32, #tpu.memory_space<vmem>>, %arg6: memref<128x128xbf16, #tpu.memory_space<vmem>>, %arg7: memref<1x128xf32, #tpu.memory_space<vmem>>, %arg8: memref<384x128xbf16, #tpu.memory_space<vmem>>, %arg9: memref<1x128xf32, #tpu.memory_space<vmem>>, %arg10: memref<128x128xbf16, #tpu.memory_space<vmem>>, %arg11: memref<1x128xf32, #tpu.memory_space<vmem>>, %arg12: memref<384x128xbf16, #tpu.memory_space<vmem>>, %arg13: memref<1x128xf32, #tpu.memory_space<vmem>>, %arg14: memref<1x16x128xf32, #tpu.memory_space<vmem>>, %arg15: memref<24x256xf32, #tpu.memory_space<vmem>>) attributes {dimension_semantics = [#tpu.dimension_semantics<parallel>], iteration_bounds = array<i64: 2>, scalar_prefetch = 0 : i64, scratch_operands = 1 : i64, tpu.core_type = #tpu.core_type<tc>, window_params = [{transform_indices = @transform_0, window_bounds = array<i64: 1, 16, 256>}, {pipeline_mode = #tpu.pipeline_mode<synchronous>, transform_indices = @transform_1, window_bounds = array<i64: 512, 128>}, {pipeline_mode = #tpu.pipeline_mode<synchronous>, transform_indices = @transform_2, window_bounds = array<i64: 1, 128>}, {pipeline_mode = #tpu.pipeline_mode<synchronous>, transform_indices = @transform_3, window_bounds = array<i64: 384, 128>}, {pipeline_mode = #tpu.pipeline_mode<synchronous>, transform_indices = @transform_4, window_bounds = array<i64: 1, 128>}, {pipeline_mode = #tpu.pipeline_mode<synchronous>, transform_indices = @transform_5, window_bounds = array<i64: 128, 128>}, {pipeline_mode = #tpu.pipeline_mode<synchronous>, transform_indices = @transform_6, window_bounds = array<i64: 1, 128>}, {pipeline_mode = #tpu.pipeline_mode<synchronous>, transform_indices = @transform_7, window_bounds = array<i64: 384, 128>}, {pipeline_mode = #tpu.pipeline_mode<synchronous>, transform_indices = @transform_8, window_bounds = array<i64: 1, 128>}, {pipeline_mode = #tpu.pipeline_mode<synchronous>, transform_indices = @transform_9, window_bounds = array<i64: 128, 128>}, {pipeline_mode = #tpu.pipeline_mode<synchronous>, transform_indices = @transform_10, window_bounds = array<i64: 1, 128>}, {pipeline_mode = #tpu.pipeline_mode<synchronous>, transform_indices = @transform_11, window_bounds = array<i64: 384, 128>}, {pipeline_mode = #tpu.pipeline_mode<synchronous>, transform_indices = @transform_12, window_bounds = array<i64: 1, 128>}, {transform_indices = @transform_13, window_bounds = array<i64: 1, 16, 128>}]} {
    %c0 = arith.constant 0 : index
    %c0_0 = arith.constant 0 : index
    %c0_1 = arith.constant 0 : index
    %0 = vector.load %arg1[%c0, %c0_0, %c0_1] : memref<1x16x256xbf16, #tpu.memory_space<vmem>>, vector<1x16x256xbf16>
    %1 = vector.shape_cast %0 : vector<1x16x256xbf16> to vector<16x256xbf16>
    %2 = arith.extf %1 : vector<16x256xbf16> to vector<16x256xf32>
    %cst = arith.constant 0.000000e+00 : f32
    %3 = vector.broadcast %cst : f32 to vector<1x256xf32>
    %c0_2 = arith.constant 0 : index
    %c0_3 = arith.constant 0 : index
    %4 = vector.load %arg15[%c0_2, %c0_3] : memref<24x256xf32, #tpu.memory_space<vmem>>, vector<1x256xf32>
    tpu.vector_store %arg15[%c0_2, %c0_3], %3 {strides = array<i32>} : memref<24x256xf32, #tpu.memory_space<vmem>>, vector<1x256xf32>,
    %c17 = arith.constant 17 : index
    %c0_4 = arith.constant 0 : index
    %5 = vector.load %arg15[%c17, %c0_4] : memref<24x256xf32, #tpu.memory_space<vmem>>, vector<1x256xf32>
    tpu.vector_store %arg15[%c17, %c0_4], %3 {strides = array<i32>} : memref<24x256xf32, #tpu.memory_space<vmem>>, vector<1x256xf32>,
    %c1 = arith.constant 1 : index
    %c0_5 = arith.constant 0 : index
    %6 = vector.load %arg15[%c1, %c0_5] : memref<24x256xf32, #tpu.memory_space<vmem>>, vector<16x256xf32>
    tpu.vector_store %arg15[%c1, %c0_5], %2 {strides = array<i32>} : memref<24x256xf32, #tpu.memory_space<vmem>>, vector<16x256xf32>,
    %c0_6 = arith.constant 0 : index
    %c128 = arith.constant 128 : index
    %7 = vector.load %arg15[%c0_6, %c128] : memref<24x256xf32, #tpu.memory_space<vmem>>, vector<16x128xf32>
    %8 = arith.truncf %7 : vector<16x128xf32> to vector<16x128xbf16>
    %c1_7 = arith.constant 1 : index
    %c0_8 = arith.constant 0 : index
    %9 = vector.load %arg15[%c1_7, %c0_8] : memref<24x256xf32, #tpu.memory_space<vmem>>, vector<16x128xf32>
    %10 = arith.truncf %9 : vector<16x128xf32> to vector<16x128xbf16>
    %c1_9 = arith.constant 1 : index
    %c128_10 = arith.constant 128 : index
    %11 = vector.load %arg15[%c1_9, %c128_10] : memref<24x256xf32, #tpu.memory_space<vmem>>, vector<16x128xf32>
    %12 = arith.truncf %11 : vector<16x128xf32> to vector<16x128xbf16>
    %c2 = arith.constant 2 : index
    %c0_11 = arith.constant 0 : index
    %13 = vector.load %arg15[%c2, %c0_11] : memref<24x256xf32, #tpu.memory_space<vmem>>, vector<16x128xf32>
    %14 = arith.truncf %13 : vector<16x128xf32> to vector<16x128xbf16>
    %15 = tpu.concatenate %8, %10, %12, %14 in 1 : vector<16x128xbf16>, vector<16x128xbf16>, vector<16x128xbf16>, vector<16x128xbf16> -> vector<16x512xbf16>
    %c0_12 = arith.constant 0 : index
    %c0_13 = arith.constant 0 : index
    %16 = vector.load %arg2[%c0_12, %c0_13] : memref<512x128xbf16, #tpu.memory_space<vmem>>, vector<512x128xbf16>
    %cst_14 = arith.constant dense<0.000000e+00> : vector<16x128xf32>
    %17 = tpu.matmul %15, %16, %cst_14 {dimension_numbers = #tpu.dot_dimension_numbers<[1], [0], [0], [1], [0, 0, 1, 1], [], []>} : vector<16x512xbf16>, vector<512x128xbf16>, vector<16x128xf32> -> vector<16x128xf32>
    %c0_15 = arith.constant 0 : index
    %c0_16 = arith.constant 0 : index
    %18 = vector.load %arg3[%c0_15, %c0_16] : memref<1x128xf32, #tpu.memory_space<vmem>>, vector<1x128xf32>
    %19 = vector.broadcast %18 : vector<1x128xf32> to vector<16x128xf32>
    %20 = arith.addf %17, %19 : vector<16x128xf32>
    %cst_17 = arith.constant 0.000000e+00 : f32
    %21 = vector.broadcast %cst_17 : f32 to vector<16x128xf32>
    %22 = arith.maximumf %20, %21 : vector<16x128xf32>
    %cst_18 = arith.constant 0.000000e+00 : f32
    %23 = vector.broadcast %cst_18 : f32 to vector<1x128xf32>
    %c0_19 = arith.constant 0 : index
    %c0_20 = arith.constant 0 : index
    %24 = vector.load %arg15[%c0_19, %c0_20] : memref<24x256xf32, #tpu.memory_space<vmem>>, vector<1x128xf32>
    tpu.vector_store %arg15[%c0_19, %c0_20], %23 {strides = array<i32>} : memref<24x256xf32, #tpu.memory_space<vmem>>, vector<1x128xf32>,
    %c17_21 = arith.constant 17 : index
    %c0_22 = arith.constant 0 : index
    %25 = vector.load %arg15[%c17_21, %c0_22] : memref<24x256xf32, #tpu.memory_space<vmem>>, vector<1x128xf32>
    tpu.vector_store %arg15[%c17_21, %c0_22], %23 {strides = array<i32>} : memref<24x256xf32, #tpu.memory_space<vmem>>, vector<1x128xf32>,
    %c1_23 = arith.constant 1 : index
    %c0_24 = arith.constant 0 : index
    %26 = vector.load %arg15[%c1_23, %c0_24] : memref<24x256xf32, #tpu.memory_space<vmem>>, vector<16x128xf32>
    tpu.vector_store %arg15[%c1_23, %c0_24], %22 {strides = array<i32>} : memref<24x256xf32, #tpu.memory_space<vmem>>, vector<16x128xf32>,
    %c0_25 = arith.constant 0 : index
    %c0_26 = arith.constant 0 : index
    %27 = vector.load %arg15[%c0_25, %c0_26] : memref<24x256xf32, #tpu.memory_space<vmem>>, vector<16x128xf32>
    %28 = arith.truncf %27 : vector<16x128xf32> to vector<16x128xbf16>
    %c1_27 = arith.constant 1 : index
    %c0_28 = arith.constant 0 : index
    %29 = vector.load %arg15[%c1_27, %c0_28] : memref<24x256xf32, #tpu.memory_space<vmem>>, vector<16x128xf32>
    %30 = arith.truncf %29 : vector<16x128xf32> to vector<16x128xbf16>
    %c2_29 = arith.constant 2 : index
    %c0_30 = arith.constant 0 : index
    %31 = vector.load %arg15[%c2_29, %c0_30] : memref<24x256xf32, #tpu.memory_space<vmem>>, vector<16x128xf32>
    %32 = arith.truncf %31 : vector<16x128xf32> to vector<16x128xbf16>
    %33 = tpu.concatenate %28, %30, %32 in 1 : vector<16x128xbf16>, vector<16x128xbf16>, vector<16x128xbf16> -> vector<16x384xbf16>
    %c0_31 = arith.constant 0 : index
    %c0_32 = arith.constant 0 : index
    %34 = vector.load %arg4[%c0_31, %c0_32] : memref<384x128xbf16, #tpu.memory_space<vmem>>, vector<384x128xbf16>
    %cst_33 = arith.constant dense<0.000000e+00> : vector<16x128xf32>
    %35 = tpu.matmul %33, %34, %cst_33 {dimension_numbers = #tpu.dot_dimension_numbers<[1], [0], [0], [1], [0, 0, 1, 1], [], []>} : vector<16x384xbf16>, vector<384x128xbf16>, vector<16x128xf32> -> vector<16x128xf32>
    %c0_34 = arith.constant 0 : index
    %c0_35 = arith.constant 0 : index
    %36 = vector.load %arg5[%c0_34, %c0_35] : memref<1x128xf32, #tpu.memory_space<vmem>>, vector<1x128xf32>
    %37 = vector.broadcast %36 : vector<1x128xf32> to vector<16x128xf32>
    %38 = arith.addf %35, %37 : vector<16x128xf32>
    %cst_36 = arith.constant 0.000000e+00 : f32
    %39 = vector.broadcast %cst_36 : f32 to vector<16x128xf32>
    %40 = arith.maximumf %38, %39 : vector<16x128xf32>
    %41 = arith.truncf %40 : vector<16x128xf32> to vector<16x128xbf16>
    %c0_37 = arith.constant 0 : index
    %c0_38 = arith.constant 0 : index
    %42 = vector.load %arg6[%c0_37, %c0_38] : memref<128x128xbf16, #tpu.memory_space<vmem>>, vector<128x128xbf16>
    %cst_39 = arith.constant dense<0.000000e+00> : vector<16x128xf32>
    %43 = tpu.matmul %41, %42, %cst_39 {dimension_numbers = #tpu.dot_dimension_numbers<[1], [0], [0], [1], [0, 0, 1, 1], [], []>} : vector<16x128xbf16>, vector<128x128xbf16>, vector<16x128xf32> -> vector<16x128xf32>
    %c0_40 = arith.constant 0 : index
    %c0_41 = arith.constant 0 : index
    %44 = vector.load %arg7[%c0_40, %c0_41] : memref<1x128xf32, #tpu.memory_space<vmem>>, vector<1x128xf32>
    %45 = vector.broadcast %44 : vector<1x128xf32> to vector<16x128xf32>
    %46 = arith.addf %43, %45 : vector<16x128xf32>
    %47 = arith.addf %20, %46 : vector<16x128xf32>
    %cst_42 = arith.constant 0.000000e+00 : f32
    %48 = vector.broadcast %cst_42 : f32 to vector<16x128xf32>
    %49 = arith.maximumf %47, %48 : vector<16x128xf32>
    %cst_43 = arith.constant 0.000000e+00 : f32
    %50 = vector.broadcast %cst_43 : f32 to vector<3x128xf32>
    %c0_44 = arith.constant 0 : index
    %c0_45 = arith.constant 0 : index
    %51 = vector.load %arg15[%c0_44, %c0_45] : memref<24x256xf32, #tpu.memory_space<vmem>>, vector<3x128xf32>
    tpu.vector_store %arg15[%c0_44, %c0_45], %50 {strides = array<i32>} : memref<24x256xf32, #tpu.memory_space<vmem>>, vector<3x128xf32>,
    %c19 = arith.constant 19 : index
    %c0_46 = arith.constant 0 : index
    %52 = vector.load %arg15[%c19, %c0_46] : memref<24x256xf32, #tpu.memory_space<vmem>>, vector<3x128xf32>
    tpu.vector_store %arg15[%c19, %c0_46], %50 {strides = array<i32>} : memref<24x256xf32, #tpu.memory_space<vmem>>, vector<3x128xf32>,
    %c3 = arith.constant 3 : index
    %c0_47 = arith.constant 0 : index
    %53 = vector.load %arg15[%c3, %c0_47] : memref<24x256xf32, #tpu.memory_space<vmem>>, vector<16x128xf32>
    tpu.vector_store %arg15[%c3, %c0_47], %49 {strides = array<i32>} : memref<24x256xf32, #tpu.memory_space<vmem>>, vector<16x128xf32>,
    %c0_48 = arith.constant 0 : index
    %c0_49 = arith.constant 0 : index
    %54 = vector.load %arg15[%c0_48, %c0_49] : memref<24x256xf32, #tpu.memory_space<vmem>>, vector<16x128xf32>
    %55 = arith.truncf %54 : vector<16x128xf32> to vector<16x128xbf16>
    %c3_50 = arith.constant 3 : index
    %c0_51 = arith.constant 0 : index
    %56 = vector.load %arg15[%c3_50, %c0_51] : memref<24x256xf32, #tpu.memory_space<vmem>>, vector<16x128xf32>
    %57 = arith.truncf %56 : vector<16x128xf32> to vector<16x128xbf16>
    %c6 = arith.constant 6 : index
    %c0_52 = arith.constant 0 : index
    %58 = vector.load %arg15[%c6, %c0_52] : memref<24x256xf32, #tpu.memory_space<vmem>>, vector<16x128xf32>
    %59 = arith.truncf %58 : vector<16x128xf32> to vector<16x128xbf16>
    %60 = tpu.concatenate %55, %57, %59 in 1 : vector<16x128xbf16>, vector<16x128xbf16>, vector<16x128xbf16> -> vector<16x384xbf16>
    %c0_53 = arith.constant 0 : index
    %c0_54 = arith.constant 0 : index
    %61 = vector.load %arg8[%c0_53, %c0_54] : memref<384x128xbf16, #tpu.memory_space<vmem>>, vector<384x128xbf16>
    %cst_55 = arith.constant dense<0.000000e+00> : vector<16x128xf32>
    %62 = tpu.matmul %60, %61, %cst_55 {dimension_numbers = #tpu.dot_dimension_numbers<[1], [0], [0], [1], [0, 0, 1, 1], [], []>} : vector<16x384xbf16>, vector<384x128xbf16>, vector<16x128xf32> -> vector<16x128xf32>
    %c0_56 = arith.constant 0 : index
    %c0_57 = arith.constant 0 : index
    %63 = vector.load %arg9[%c0_56, %c0_57] : memref<1x128xf32, #tpu.memory_space<vmem>>, vector<1x128xf32>
    %64 = vector.broadcast %63 : vector<1x128xf32> to vector<16x128xf32>
    %65 = arith.addf %62, %64 : vector<16x128xf32>
    %cst_58 = arith.constant 0.000000e+00 : f32
    %66 = vector.broadcast %cst_58 : f32 to vector<16x128xf32>
    %67 = arith.maximumf %65, %66 : vector<16x128xf32>
    %68 = arith.truncf %67 : vector<16x128xf32> to vector<16x128xbf16>
    %c0_59 = arith.constant 0 : index
    %c0_60 = arith.constant 0 : index
    %69 = vector.load %arg10[%c0_59, %c0_60] : memref<128x128xbf16, #tpu.memory_space<vmem>>, vector<128x128xbf16>
    %cst_61 = arith.constant dense<0.000000e+00> : vector<16x128xf32>
    %70 = tpu.matmul %68, %69, %cst_61 {dimension_numbers = #tpu.dot_dimension_numbers<[1], [0], [0], [1], [0, 0, 1, 1], [], []>} : vector<16x128xbf16>, vector<128x128xbf16>, vector<16x128xf32> -> vector<16x128xf32>
    %c0_62 = arith.constant 0 : index
    %c0_63 = arith.constant 0 : index
    %71 = vector.load %arg11[%c0_62, %c0_63] : memref<1x128xf32, #tpu.memory_space<vmem>>, vector<1x128xf32>
    %72 = vector.broadcast %71 : vector<1x128xf32> to vector<16x128xf32>
    %73 = arith.addf %70, %72 : vector<16x128xf32>
    %74 = arith.addf %47, %73 : vector<16x128xf32>
    %cst_64 = arith.constant 0.000000e+00 : f32
    %75 = vector.broadcast %cst_64 : f32 to vector<1x128xf32>
    %c0_65 = arith.constant 0 : index
    %c0_66 = arith.constant 0 : index
    %76 = vector.load %arg15[%c0_65, %c0_66] : memref<24x256xf32, #tpu.memory_space<vmem>>, vector<1x128xf32>
    tpu.vector_store %arg15[%c0_65, %c0_66], %75 {strides = array<i32>} : memref<24x256xf32, #tpu.memory_space<vmem>>, vector<1x128xf32>,
    %c17_67 = arith.constant 17 : index
    %c0_68 = arith.constant 0 : index
    %77 = vector.load %arg15[%c17_67, %c0_68] : memref<24x256xf32, #tpu.memory_space<vmem>>, vector<1x128xf32>
    tpu.vector_store %arg15[%c17_67, %c0_68], %75 {strides = array<i32>} : memref<24x256xf32, #tpu.memory_space<vmem>>, vector<1x128xf32>,
    %c1_69 = arith.constant 1 : index
    %c0_70 = arith.constant 0 : index
    %78 = vector.load %arg15[%c1_69, %c0_70] : memref<24x256xf32, #tpu.memory_space<vmem>>, vector<16x128xf32>
    tpu.vector_store %arg15[%c1_69, %c0_70], %74 {strides = array<i32>} : memref<24x256xf32, #tpu.memory_space<vmem>>, vector<16x128xf32>,
    %c0_71 = arith.constant 0 : index
    %c0_72 = arith.constant 0 : index
    %79 = vector.load %arg15[%c0_71, %c0_72] : memref<24x256xf32, #tpu.memory_space<vmem>>, vector<16x128xf32>
    %80 = arith.truncf %79 : vector<16x128xf32> to vector<16x128xbf16>
    %c1_73 = arith.constant 1 : index
    %c0_74 = arith.constant 0 : index
    %81 = vector.load %arg15[%c1_73, %c0_74] : memref<24x256xf32, #tpu.memory_space<vmem>>, vector<16x128xf32>
    %82 = arith.truncf %81 : vector<16x128xf32> to vector<16x128xbf16>
    %c2_75 = arith.constant 2 : index
    %c0_76 = arith.constant 0 : index
    %83 = vector.load %arg15[%c2_75, %c0_76] : memref<24x256xf32, #tpu.memory_space<vmem>>, vector<16x128xf32>
    %84 = arith.truncf %83 : vector<16x128xf32> to vector<16x128xbf16>
    %85 = tpu.concatenate %80, %82, %84 in 1 : vector<16x128xbf16>, vector<16x128xbf16>, vector<16x128xbf16> -> vector<16x384xbf16>
    %c0_77 = arith.constant 0 : index
    %c0_78 = arith.constant 0 : index
    %86 = vector.load %arg12[%c0_77, %c0_78] : memref<384x128xbf16, #tpu.memory_space<vmem>>, vector<384x128xbf16>
    %cst_79 = arith.constant dense<0.000000e+00> : vector<16x128xf32>
    %87 = tpu.matmul %85, %86, %cst_79 {dimension_numbers = #tpu.dot_dimension_numbers<[1], [0], [0], [1], [0, 0, 1, 1], [], []>} : vector<16x384xbf16>, vector<384x128xbf16>, vector<16x128xf32> -> vector<16x128xf32>
    %c0_80 = arith.constant 0 : index
    %c0_81 = arith.constant 0 : index
    %88 = vector.load %arg13[%c0_80, %c0_81] : memref<1x128xf32, #tpu.memory_space<vmem>>, vector<1x128xf32>
    %89 = vector.broadcast %88 : vector<1x128xf32> to vector<16x128xf32>
    %90 = arith.addf %87, %89 : vector<16x128xf32>
    %c0_82 = arith.constant 0 : index
    %c0_83 = arith.constant 0 : index
    %c0_84 = arith.constant 0 : index
    %91 = vector.load %arg14[%c0_82, %c0_83, %c0_84] : memref<1x16x128xf32, #tpu.memory_space<vmem>>, vector<1x16x128xf32>
    %92 = vector.shape_cast %91 : vector<1x16x128xf32> to vector<16x128xf32>
    %93 = vector.shape_cast %90 : vector<16x128xf32> to vector<1x16x128xf32>
    tpu.vector_store %arg14[%c0_82, %c0_83, %c0_84], %93 {strides = array<i32>} : memref<1x16x128xf32, #tpu.memory_space<vmem>>, vector<1x16x128xf32>,
    return
  }
  func.func @transform_0(%arg0: i32) -> (i32, i32, i32) {
    %c0_i32 = arith.constant 0 : i32
    %c0_i32_0 = arith.constant 0 : i32
    %c0_i32_1 = arith.constant 0 : i32
    return %arg0, %c0_i32, %c0_i32_0 : i32, i32, i32
  }
  func.func @transform_1(%arg0: i32) -> (i32, i32) {
    %c0_i32 = arith.constant 0 : i32
    %c0_i32_0 = arith.constant 0 : i32
    %c0_i32_1 = arith.constant 0 : i32
    return %c0_i32, %c0_i32_0 : i32, i32
  }
  func.func @transform_2(%arg0: i32) -> (i32, i32) {
    %c0_i32 = arith.constant 0 : i32
    %c0_i32_0 = arith.constant 0 : i32
    %c0_i32_1 = arith.constant 0 : i32
    return %c0_i32, %c0_i32_0 : i32, i32
  }
  func.func @transform_3(%arg0: i32) -> (i32, i32) {
    %c0_i32 = arith.constant 0 : i32
    %c0_i32_0 = arith.constant 0 : i32
    %c0_i32_1 = arith.constant 0 : i32
    return %c0_i32, %c0_i32_0 : i32, i32
  }
  func.func @transform_4(%arg0: i32) -> (i32, i32) {
    %c0_i32 = arith.constant 0 : i32
    %c0_i32_0 = arith.constant 0 : i32
    %c0_i32_1 = arith.constant 0 : i32
    return %c0_i32, %c0_i32_0 : i32, i32
  }
  func.func @transform_5(%arg0: i32) -> (i32, i32) {
    %c0_i32 = arith.constant 0 : i32
    %c0_i32_0 = arith.constant 0 : i32
    %c0_i32_1 = arith.constant 0 : i32
    return %c0_i32, %c0_i32_0 : i32, i32
  }
  func.func @transform_6(%arg0: i32) -> (i32, i32) {
    %c0_i32 = arith.constant 0 : i32
    %c0_i32_0 = arith.constant 0 : i32
    %c0_i32_1 = arith.constant 0 : i32
    return %c0_i32, %c0_i32_0 : i32, i32
  }
  func.func @transform_7(%arg0: i32) -> (i32, i32) {
    %c0_i32 = arith.constant 0 : i32
    %c0_i32_0 = arith.constant 0 : i32
    %c0_i32_1 = arith.constant 0 : i32
    return %c0_i32, %c0_i32_0 : i32, i32
  }
  func.func @transform_8(%arg0: i32) -> (i32, i32) {
    %c0_i32 = arith.constant 0 : i32
    %c0_i32_0 = arith.constant 0 : i32
    %c0_i32_1 = arith.constant 0 : i32
    return %c0_i32, %c0_i32_0 : i32, i32
  }
  func.func @transform_9(%arg0: i32) -> (i32, i32) {
    %c0_i32 = arith.constant 0 : i32
    %c0_i32_0 = arith.constant 0 : i32
    %c0_i32_1 = arith.constant 0 : i32
    return %c0_i32, %c0_i32_0 : i32, i32
  }
  func.func @transform_10(%arg0: i32) -> (i32, i32) {
    %c0_i32 = arith.constant 0 : i32
    %c0_i32_0 = arith.constant 0 : i32
    %c0_i32_1 = arith.constant 0 : i32
    return %c0_i32, %c0_i32_0 : i32, i32
  }
  func.func @transform_11(%arg0: i32) -> (i32, i32) {
    %c0_i32 = arith.constant 0 : i32
    %c0_i32_0 = arith.constant 0 : i32
    %c0_i32_1 = arith.constant 0 : i32
    return %c0_i32, %c0_i32_0 : i32, i32
  }
  func.func @transform_12(%arg0: i32) -> (i32, i32) {
    %c0_i32 = arith.constant 0 : i32
    %c0_i32_0 = arith.constant 0 : i32
    %c0_i32_1 = arith.constant 0 : i32
    return %c0_i32, %c0_i32_0 : i32, i32
  }
  func.func @transform_13(%arg0: i32) -> (i32, i32, i32) {
    %c0_i32 = arith.constant 0 : i32
    %c0_i32_0 = arith.constant 0 : i32
    %c0_i32_1 = arith.constant 0 : i32
    return %arg0, %c0_i32, %c0_i32_0 : i32, i32, i32
  }
}

module attributes {stable_mosaic.version = 11 : i64} {
  func.func @_chain_kernel(%arg0: i32, %arg1: memref<1x32x256xbf16, #tpu.memory_space<vmem>>, %arg2: memref<512x128xbf16, #tpu.memory_space<vmem>>, %arg3: memref<1x128xf32, #tpu.memory_space<vmem>>, %arg4: memref<384x128xbf16, #tpu.memory_space<vmem>>, %arg5: memref<1x128xf32, #tpu.memory_space<vmem>>, %arg6: memref<128x128xbf16, #tpu.memory_space<vmem>>, %arg7: memref<1x128xf32, #tpu.memory_space<vmem>>, %arg8: memref<384x128xbf16, #tpu.memory_space<vmem>>, %arg9: memref<1x128xf32, #tpu.memory_space<vmem>>, %arg10: memref<128x128xbf16, #tpu.memory_space<vmem>>, %arg11: memref<1x128xf32, #tpu.memory_space<vmem>>, %arg12: memref<1x32x128xbf16, #tpu.memory_space<vmem>>, %arg13: memref<40x256xf32, #tpu.memory_space<vmem>>) attributes {dimension_semantics = [#tpu.dimension_semantics<parallel>], iteration_bounds = array<i64: 2>, scalar_prefetch = 0 : i64, scratch_operands = 1 : i64, tpu.core_type = #tpu.core_type<tc>, window_params = [{transform_indices = @transform_0, window_bounds = array<i64: 1, 32, 256>}, {pipeline_mode = #tpu.pipeline_mode<synchronous>, transform_indices = @transform_1, window_bounds = array<i64: 512, 128>}, {pipeline_mode = #tpu.pipeline_mode<synchronous>, transform_indices = @transform_2, window_bounds = array<i64: 1, 128>}, {pipeline_mode = #tpu.pipeline_mode<synchronous>, transform_indices = @transform_3, window_bounds = array<i64: 384, 128>}, {pipeline_mode = #tpu.pipeline_mode<synchronous>, transform_indices = @transform_4, window_bounds = array<i64: 1, 128>}, {pipeline_mode = #tpu.pipeline_mode<synchronous>, transform_indices = @transform_5, window_bounds = array<i64: 128, 128>}, {pipeline_mode = #tpu.pipeline_mode<synchronous>, transform_indices = @transform_6, window_bounds = array<i64: 1, 128>}, {pipeline_mode = #tpu.pipeline_mode<synchronous>, transform_indices = @transform_7, window_bounds = array<i64: 384, 128>}, {pipeline_mode = #tpu.pipeline_mode<synchronous>, transform_indices = @transform_8, window_bounds = array<i64: 1, 128>}, {pipeline_mode = #tpu.pipeline_mode<synchronous>, transform_indices = @transform_9, window_bounds = array<i64: 128, 128>}, {pipeline_mode = #tpu.pipeline_mode<synchronous>, transform_indices = @transform_10, window_bounds = array<i64: 1, 128>}, {transform_indices = @transform_11, window_bounds = array<i64: 1, 32, 128>}]} {
    %c0 = arith.constant 0 : index
    %c0_0 = arith.constant 0 : index
    %c0_1 = arith.constant 0 : index
    %0 = vector.load %arg1[%c0, %c0_0, %c0_1] : memref<1x32x256xbf16, #tpu.memory_space<vmem>>, vector<1x32x256xbf16>
    %1 = vector.shape_cast %0 : vector<1x32x256xbf16> to vector<32x256xbf16>
    %2 = arith.extf %1 : vector<32x256xbf16> to vector<32x256xf32>
    %cst = arith.constant 0.000000e+00 : f32
    %3 = vector.broadcast %cst : f32 to vector<1x256xf32>
    %c0_2 = arith.constant 0 : index
    %c0_3 = arith.constant 0 : index
    %4 = vector.load %arg13[%c0_2, %c0_3] : memref<40x256xf32, #tpu.memory_space<vmem>>, vector<1x256xf32>
    tpu.vector_store %arg13[%c0_2, %c0_3], %3 {strides = array<i32>} : memref<40x256xf32, #tpu.memory_space<vmem>>, vector<1x256xf32>,
    %c33 = arith.constant 33 : index
    %c0_4 = arith.constant 0 : index
    %5 = vector.load %arg13[%c33, %c0_4] : memref<40x256xf32, #tpu.memory_space<vmem>>, vector<1x256xf32>
    tpu.vector_store %arg13[%c33, %c0_4], %3 {strides = array<i32>} : memref<40x256xf32, #tpu.memory_space<vmem>>, vector<1x256xf32>,
    %c1 = arith.constant 1 : index
    %c0_5 = arith.constant 0 : index
    %6 = vector.load %arg13[%c1, %c0_5] : memref<40x256xf32, #tpu.memory_space<vmem>>, vector<32x256xf32>
    tpu.vector_store %arg13[%c1, %c0_5], %2 {strides = array<i32>} : memref<40x256xf32, #tpu.memory_space<vmem>>, vector<32x256xf32>,
    %c0_6 = arith.constant 0 : index
    %c128 = arith.constant 128 : index
    %7 = vector.load %arg13[%c0_6, %c128] : memref<40x256xf32, #tpu.memory_space<vmem>>, vector<32x128xf32>
    %8 = arith.truncf %7 : vector<32x128xf32> to vector<32x128xbf16>
    %c1_7 = arith.constant 1 : index
    %c0_8 = arith.constant 0 : index
    %9 = vector.load %arg13[%c1_7, %c0_8] : memref<40x256xf32, #tpu.memory_space<vmem>>, vector<32x128xf32>
    %10 = arith.truncf %9 : vector<32x128xf32> to vector<32x128xbf16>
    %c1_9 = arith.constant 1 : index
    %c128_10 = arith.constant 128 : index
    %11 = vector.load %arg13[%c1_9, %c128_10] : memref<40x256xf32, #tpu.memory_space<vmem>>, vector<32x128xf32>
    %12 = arith.truncf %11 : vector<32x128xf32> to vector<32x128xbf16>
    %c2 = arith.constant 2 : index
    %c0_11 = arith.constant 0 : index
    %13 = vector.load %arg13[%c2, %c0_11] : memref<40x256xf32, #tpu.memory_space<vmem>>, vector<32x128xf32>
    %14 = arith.truncf %13 : vector<32x128xf32> to vector<32x128xbf16>
    %15 = tpu.concatenate %8, %10, %12, %14 in 1 : vector<32x128xbf16>, vector<32x128xbf16>, vector<32x128xbf16>, vector<32x128xbf16> -> vector<32x512xbf16>
    %c0_12 = arith.constant 0 : index
    %c0_13 = arith.constant 0 : index
    %16 = vector.load %arg2[%c0_12, %c0_13] : memref<512x128xbf16, #tpu.memory_space<vmem>>, vector<512x128xbf16>
    %cst_14 = arith.constant dense<0.000000e+00> : vector<32x128xf32>
    %17 = tpu.matmul %15, %16, %cst_14 {dimension_numbers = #tpu.dot_dimension_numbers<[1], [0], [0], [1], [0, 0, 1, 1], [], []>} : vector<32x512xbf16>, vector<512x128xbf16>, vector<32x128xf32> -> vector<32x128xf32>
    %c0_15 = arith.constant 0 : index
    %c0_16 = arith.constant 0 : index
    %18 = vector.load %arg3[%c0_15, %c0_16] : memref<1x128xf32, #tpu.memory_space<vmem>>, vector<1x128xf32>
    %19 = vector.broadcast %18 : vector<1x128xf32> to vector<32x128xf32>
    %20 = arith.addf %17, %19 : vector<32x128xf32>
    %cst_17 = arith.constant 0.000000e+00 : f32
    %21 = vector.broadcast %cst_17 : f32 to vector<32x128xf32>
    %22 = arith.maximumf %20, %21 : vector<32x128xf32>
    %cst_18 = arith.constant 0.000000e+00 : f32
    %23 = vector.broadcast %cst_18 : f32 to vector<1x128xf32>
    %c0_19 = arith.constant 0 : index
    %c0_20 = arith.constant 0 : index
    %24 = vector.load %arg13[%c0_19, %c0_20] : memref<40x256xf32, #tpu.memory_space<vmem>>, vector<1x128xf32>
    tpu.vector_store %arg13[%c0_19, %c0_20], %23 {strides = array<i32>} : memref<40x256xf32, #tpu.memory_space<vmem>>, vector<1x128xf32>,
    %c33_21 = arith.constant 33 : index
    %c0_22 = arith.constant 0 : index
    %25 = vector.load %arg13[%c33_21, %c0_22] : memref<40x256xf32, #tpu.memory_space<vmem>>, vector<1x128xf32>
    tpu.vector_store %arg13[%c33_21, %c0_22], %23 {strides = array<i32>} : memref<40x256xf32, #tpu.memory_space<vmem>>, vector<1x128xf32>,
    %c1_23 = arith.constant 1 : index
    %c0_24 = arith.constant 0 : index
    %26 = vector.load %arg13[%c1_23, %c0_24] : memref<40x256xf32, #tpu.memory_space<vmem>>, vector<32x128xf32>
    tpu.vector_store %arg13[%c1_23, %c0_24], %22 {strides = array<i32>} : memref<40x256xf32, #tpu.memory_space<vmem>>, vector<32x128xf32>,
    %c0_25 = arith.constant 0 : index
    %c0_26 = arith.constant 0 : index
    %27 = vector.load %arg13[%c0_25, %c0_26] : memref<40x256xf32, #tpu.memory_space<vmem>>, vector<32x128xf32>
    %28 = arith.truncf %27 : vector<32x128xf32> to vector<32x128xbf16>
    %c1_27 = arith.constant 1 : index
    %c0_28 = arith.constant 0 : index
    %29 = vector.load %arg13[%c1_27, %c0_28] : memref<40x256xf32, #tpu.memory_space<vmem>>, vector<32x128xf32>
    %30 = arith.truncf %29 : vector<32x128xf32> to vector<32x128xbf16>
    %c2_29 = arith.constant 2 : index
    %c0_30 = arith.constant 0 : index
    %31 = vector.load %arg13[%c2_29, %c0_30] : memref<40x256xf32, #tpu.memory_space<vmem>>, vector<32x128xf32>
    %32 = arith.truncf %31 : vector<32x128xf32> to vector<32x128xbf16>
    %33 = tpu.concatenate %28, %30, %32 in 1 : vector<32x128xbf16>, vector<32x128xbf16>, vector<32x128xbf16> -> vector<32x384xbf16>
    %c0_31 = arith.constant 0 : index
    %c0_32 = arith.constant 0 : index
    %34 = vector.load %arg4[%c0_31, %c0_32] : memref<384x128xbf16, #tpu.memory_space<vmem>>, vector<384x128xbf16>
    %cst_33 = arith.constant dense<0.000000e+00> : vector<32x128xf32>
    %35 = tpu.matmul %33, %34, %cst_33 {dimension_numbers = #tpu.dot_dimension_numbers<[1], [0], [0], [1], [0, 0, 1, 1], [], []>} : vector<32x384xbf16>, vector<384x128xbf16>, vector<32x128xf32> -> vector<32x128xf32>
    %c0_34 = arith.constant 0 : index
    %c0_35 = arith.constant 0 : index
    %36 = vector.load %arg5[%c0_34, %c0_35] : memref<1x128xf32, #tpu.memory_space<vmem>>, vector<1x128xf32>
    %37 = vector.broadcast %36 : vector<1x128xf32> to vector<32x128xf32>
    %38 = arith.addf %35, %37 : vector<32x128xf32>
    %cst_36 = arith.constant 0.000000e+00 : f32
    %39 = vector.broadcast %cst_36 : f32 to vector<32x128xf32>
    %40 = arith.maximumf %38, %39 : vector<32x128xf32>
    %41 = arith.truncf %40 : vector<32x128xf32> to vector<32x128xbf16>
    %c0_37 = arith.constant 0 : index
    %c0_38 = arith.constant 0 : index
    %42 = vector.load %arg6[%c0_37, %c0_38] : memref<128x128xbf16, #tpu.memory_space<vmem>>, vector<128x128xbf16>
    %cst_39 = arith.constant dense<0.000000e+00> : vector<32x128xf32>
    %43 = tpu.matmul %41, %42, %cst_39 {dimension_numbers = #tpu.dot_dimension_numbers<[1], [0], [0], [1], [0, 0, 1, 1], [], []>} : vector<32x128xbf16>, vector<128x128xbf16>, vector<32x128xf32> -> vector<32x128xf32>
    %c0_40 = arith.constant 0 : index
    %c0_41 = arith.constant 0 : index
    %44 = vector.load %arg7[%c0_40, %c0_41] : memref<1x128xf32, #tpu.memory_space<vmem>>, vector<1x128xf32>
    %45 = vector.broadcast %44 : vector<1x128xf32> to vector<32x128xf32>
    %46 = arith.addf %43, %45 : vector<32x128xf32>
    %47 = arith.addf %20, %46 : vector<32x128xf32>
    %cst_42 = arith.constant 0.000000e+00 : f32
    %48 = vector.broadcast %cst_42 : f32 to vector<32x128xf32>
    %49 = arith.maximumf %47, %48 : vector<32x128xf32>
    %cst_43 = arith.constant 0.000000e+00 : f32
    %50 = vector.broadcast %cst_43 : f32 to vector<3x128xf32>
    %c0_44 = arith.constant 0 : index
    %c0_45 = arith.constant 0 : index
    %51 = vector.load %arg13[%c0_44, %c0_45] : memref<40x256xf32, #tpu.memory_space<vmem>>, vector<3x128xf32>
    tpu.vector_store %arg13[%c0_44, %c0_45], %50 {strides = array<i32>} : memref<40x256xf32, #tpu.memory_space<vmem>>, vector<3x128xf32>,
    %c35 = arith.constant 35 : index
    %c0_46 = arith.constant 0 : index
    %52 = vector.load %arg13[%c35, %c0_46] : memref<40x256xf32, #tpu.memory_space<vmem>>, vector<3x128xf32>
    tpu.vector_store %arg13[%c35, %c0_46], %50 {strides = array<i32>} : memref<40x256xf32, #tpu.memory_space<vmem>>, vector<3x128xf32>,
    %c3 = arith.constant 3 : index
    %c0_47 = arith.constant 0 : index
    %53 = vector.load %arg13[%c3, %c0_47] : memref<40x256xf32, #tpu.memory_space<vmem>>, vector<32x128xf32>
    tpu.vector_store %arg13[%c3, %c0_47], %49 {strides = array<i32>} : memref<40x256xf32, #tpu.memory_space<vmem>>, vector<32x128xf32>,
    %c0_48 = arith.constant 0 : index
    %c0_49 = arith.constant 0 : index
    %54 = vector.load %arg13[%c0_48, %c0_49] : memref<40x256xf32, #tpu.memory_space<vmem>>, vector<32x128xf32>
    %55 = arith.truncf %54 : vector<32x128xf32> to vector<32x128xbf16>
    %c3_50 = arith.constant 3 : index
    %c0_51 = arith.constant 0 : index
    %56 = vector.load %arg13[%c3_50, %c0_51] : memref<40x256xf32, #tpu.memory_space<vmem>>, vector<32x128xf32>
    %57 = arith.truncf %56 : vector<32x128xf32> to vector<32x128xbf16>
    %c6 = arith.constant 6 : index
    %c0_52 = arith.constant 0 : index
    %58 = vector.load %arg13[%c6, %c0_52] : memref<40x256xf32, #tpu.memory_space<vmem>>, vector<32x128xf32>
    %59 = arith.truncf %58 : vector<32x128xf32> to vector<32x128xbf16>
    %60 = tpu.concatenate %55, %57, %59 in 1 : vector<32x128xbf16>, vector<32x128xbf16>, vector<32x128xbf16> -> vector<32x384xbf16>
    %c0_53 = arith.constant 0 : index
    %c0_54 = arith.constant 0 : index
    %61 = vector.load %arg8[%c0_53, %c0_54] : memref<384x128xbf16, #tpu.memory_space<vmem>>, vector<384x128xbf16>
    %cst_55 = arith.constant dense<0.000000e+00> : vector<32x128xf32>
    %62 = tpu.matmul %60, %61, %cst_55 {dimension_numbers = #tpu.dot_dimension_numbers<[1], [0], [0], [1], [0, 0, 1, 1], [], []>} : vector<32x384xbf16>, vector<384x128xbf16>, vector<32x128xf32> -> vector<32x128xf32>
    %c0_56 = arith.constant 0 : index
    %c0_57 = arith.constant 0 : index
    %63 = vector.load %arg9[%c0_56, %c0_57] : memref<1x128xf32, #tpu.memory_space<vmem>>, vector<1x128xf32>
    %64 = vector.broadcast %63 : vector<1x128xf32> to vector<32x128xf32>
    %65 = arith.addf %62, %64 : vector<32x128xf32>
    %cst_58 = arith.constant 0.000000e+00 : f32
    %66 = vector.broadcast %cst_58 : f32 to vector<32x128xf32>
    %67 = arith.maximumf %65, %66 : vector<32x128xf32>
    %68 = arith.truncf %67 : vector<32x128xf32> to vector<32x128xbf16>
    %c0_59 = arith.constant 0 : index
    %c0_60 = arith.constant 0 : index
    %69 = vector.load %arg10[%c0_59, %c0_60] : memref<128x128xbf16, #tpu.memory_space<vmem>>, vector<128x128xbf16>
    %cst_61 = arith.constant dense<0.000000e+00> : vector<32x128xf32>
    %70 = tpu.matmul %68, %69, %cst_61 {dimension_numbers = #tpu.dot_dimension_numbers<[1], [0], [0], [1], [0, 0, 1, 1], [], []>} : vector<32x128xbf16>, vector<128x128xbf16>, vector<32x128xf32> -> vector<32x128xf32>
    %c0_62 = arith.constant 0 : index
    %c0_63 = arith.constant 0 : index
    %71 = vector.load %arg11[%c0_62, %c0_63] : memref<1x128xf32, #tpu.memory_space<vmem>>, vector<1x128xf32>
    %72 = vector.broadcast %71 : vector<1x128xf32> to vector<32x128xf32>
    %73 = arith.addf %70, %72 : vector<32x128xf32>
    %74 = arith.addf %47, %73 : vector<32x128xf32>
    %75 = arith.truncf %74 : vector<32x128xf32> to vector<32x128xbf16>
    %c0_64 = arith.constant 0 : index
    %c0_65 = arith.constant 0 : index
    %c0_66 = arith.constant 0 : index
    %76 = vector.load %arg12[%c0_64, %c0_65, %c0_66] : memref<1x32x128xbf16, #tpu.memory_space<vmem>>, vector<1x32x128xbf16>
    %77 = vector.shape_cast %76 : vector<1x32x128xbf16> to vector<32x128xbf16>
    %78 = vector.shape_cast %75 : vector<32x128xbf16> to vector<1x32x128xbf16>
    tpu.vector_store %arg12[%c0_64, %c0_65, %c0_66], %78 {strides = array<i32>} : memref<1x32x128xbf16, #tpu.memory_space<vmem>>, vector<1x32x128xbf16>,
    return
  }
  func.func @transform_0(%arg0: i32) -> (i32, i32, i32) {
    %c0_i32 = arith.constant 0 : i32
    %c0_i32_0 = arith.constant 0 : i32
    %c0_i32_1 = arith.constant 0 : i32
    return %arg0, %c0_i32, %c0_i32_0 : i32, i32, i32
  }
  func.func @transform_1(%arg0: i32) -> (i32, i32) {
    %c0_i32 = arith.constant 0 : i32
    %c0_i32_0 = arith.constant 0 : i32
    %c0_i32_1 = arith.constant 0 : i32
    return %c0_i32, %c0_i32_0 : i32, i32
  }
  func.func @transform_2(%arg0: i32) -> (i32, i32) {
    %c0_i32 = arith.constant 0 : i32
    %c0_i32_0 = arith.constant 0 : i32
    %c0_i32_1 = arith.constant 0 : i32
    return %c0_i32, %c0_i32_0 : i32, i32
  }
  func.func @transform_3(%arg0: i32) -> (i32, i32) {
    %c0_i32 = arith.constant 0 : i32
    %c0_i32_0 = arith.constant 0 : i32
    %c0_i32_1 = arith.constant 0 : i32
    return %c0_i32, %c0_i32_0 : i32, i32
  }
  func.func @transform_4(%arg0: i32) -> (i32, i32) {
    %c0_i32 = arith.constant 0 : i32
    %c0_i32_0 = arith.constant 0 : i32
    %c0_i32_1 = arith.constant 0 : i32
    return %c0_i32, %c0_i32_0 : i32, i32
  }
  func.func @transform_5(%arg0: i32) -> (i32, i32) {
    %c0_i32 = arith.constant 0 : i32
    %c0_i32_0 = arith.constant 0 : i32
    %c0_i32_1 = arith.constant 0 : i32
    return %c0_i32, %c0_i32_0 : i32, i32
  }
  func.func @transform_6(%arg0: i32) -> (i32, i32) {
    %c0_i32 = arith.constant 0 : i32
    %c0_i32_0 = arith.constant 0 : i32
    %c0_i32_1 = arith.constant 0 : i32
    return %c0_i32, %c0_i32_0 : i32, i32
  }
  func.func @transform_7(%arg0: i32) -> (i32, i32) {
    %c0_i32 = arith.constant 0 : i32
    %c0_i32_0 = arith.constant 0 : i32
    %c0_i32_1 = arith.constant 0 : i32
    return %c0_i32, %c0_i32_0 : i32, i32
  }
  func.func @transform_8(%arg0: i32) -> (i32, i32) {
    %c0_i32 = arith.constant 0 : i32
    %c0_i32_0 = arith.constant 0 : i32
    %c0_i32_1 = arith.constant 0 : i32
    return %c0_i32, %c0_i32_0 : i32, i32
  }
  func.func @transform_9(%arg0: i32) -> (i32, i32) {
    %c0_i32 = arith.constant 0 : i32
    %c0_i32_0 = arith.constant 0 : i32
    %c0_i32_1 = arith.constant 0 : i32
    return %c0_i32, %c0_i32_0 : i32, i32
  }
  func.func @transform_10(%arg0: i32) -> (i32, i32) {
    %c0_i32 = arith.constant 0 : i32
    %c0_i32_0 = arith.constant 0 : i32
    %c0_i32_1 = arith.constant 0 : i32
    return %c0_i32, %c0_i32_0 : i32, i32
  }
  func.func @transform_11(%arg0: i32) -> (i32, i32, i32) {
    %c0_i32 = arith.constant 0 : i32
    %c0_i32_0 = arith.constant 0 : i32
    %c0_i32_1 = arith.constant 0 : i32
    return %arg0, %c0_i32, %c0_i32_0 : i32, i32, i32
  }
}

module attributes {stable_mosaic.version = 11 : i64} {
  func.func @_vq_kernel(%arg0: i32, %arg1: memref<32x128xf32, #tpu.memory_space<vmem>>, %arg2: memref<128x128xf32, #tpu.memory_space<vmem>>, %arg3: memref<1x128xf32, #tpu.memory_space<vmem>>, %arg4: memref<32x128xf32, #tpu.memory_space<vmem>>, %arg5: memref<32x1xi32, #tpu.memory_space<vmem>>, %arg6: memref<8x128xf32, #tpu.memory_space<vmem>>) attributes {dimension_semantics = [#tpu.dimension_semantics<parallel>], iteration_bounds = array<i64: 1>, scalar_prefetch = 0 : i64, scratch_operands = 0 : i64, tpu.core_type = #tpu.core_type<tc>, window_params = [{transform_indices = @transform_0, window_bounds = array<i64: 32, 128>}, {pipeline_mode = #tpu.pipeline_mode<synchronous>, transform_indices = @transform_1, window_bounds = array<i64: 128, 128>}, {pipeline_mode = #tpu.pipeline_mode<synchronous>, transform_indices = @transform_2, window_bounds = array<i64: 1, 128>}, {transform_indices = @transform_3, window_bounds = array<i64: 32, 128>}, {transform_indices = @transform_4, window_bounds = array<i64: 32, 1>}, {transform_indices = @transform_5, window_bounds = array<i64: 8, 128>}]} {
    %c0 = arith.constant 0 : index
    %c0_0 = arith.constant 0 : index
    %0 = vector.load %arg1[%c0, %c0_0] : memref<32x128xf32, #tpu.memory_space<vmem>>, vector<32x128xf32>
    %c0_1 = arith.constant 0 : index
    %c0_2 = arith.constant 0 : index
    %1 = vector.load %arg2[%c0_1, %c0_2] : memref<128x128xf32, #tpu.memory_space<vmem>>, vector<128x128xf32>
    %cst = arith.constant dense<0.000000e+00> : vector<32x128xf32>
    %2 = tpu.matmul %0, %1, %cst {dimension_numbers = #tpu.dot_dimension_numbers<[1], [1], [0], [0], [0, 0, 1, 0], [], []>} : vector<32x128xf32>, vector<128x128xf32>, vector<32x128xf32> -> vector<32x128xf32>
    %c0_3 = arith.constant 0 : index
    %c0_4 = arith.constant 0 : index
    %3 = vector.load %arg3[%c0_3, %c0_4] : memref<1x128xf32, #tpu.memory_space<vmem>>, vector<1x128xf32>
    %cst_5 = arith.constant 2.000000e+00 : f32
    %4 = vector.broadcast %cst_5 : f32 to vector<32x128xf32>
    %5 = arith.mulf %4, %2 : vector<32x128xf32>
    %6 = vector.broadcast %3 : vector<1x128xf32> to vector<32x128xf32>
    %7 = arith.subf %6, %5 : vector<32x128xf32>
    %cst_6 = arith.constant dense<0x7F800000> : vector<32xf32>
    %8 = vector.multi_reduction <minimumf>, %7, %cst_6 [1] : vector<32x128xf32> to vector<32xf32>
    %9 = vector.shape_cast %8 : vector<32xf32> to vector<32x1xf32>
    %10 = tpu.iota {dimensions = array<i32: 1>} : vector<32x128xi32>
    %11 = vector.broadcast %9 : vector<32x1xf32> to vector<32x128xf32>
    %12 = arith.cmpf oeq, %7, %11 : vector<32x128xf32>
    %c128_i32 = arith.constant 128 : i32
    %13 = vector.broadcast %c128_i32 : i32 to vector<32x128xi32>
    %14 = arith.select %12, %10, %13 : vector<32x128xi1>, vector<32x128xi32>
    %cst_7 = arith.constant dense<2147483647> : vector<32xi32>
    %15 = vector.multi_reduction <minsi>, %14, %cst_7 [1] : vector<32x128xi32> to vector<32xi32>
    %16 = vector.shape_cast %15 : vector<32xi32> to vector<32x1xi32>
    %17 = vector.broadcast %16 : vector<32x1xi32> to vector<32x128xi32>
    %18 = arith.cmpi eq, %10, %17 : vector<32x128xi32>
    %19 = arith.extui %18 : vector<32x128xi1> to vector<32x128xi32>
    %20 = arith.sitofp %19 : vector<32x128xi32> to vector<32x128xf32>
    %cst_8 = arith.constant dense<0.000000e+00> : vector<32x128xf32>
    %21 = tpu.matmul %20, %1, %cst_8 {dimension_numbers = #tpu.dot_dimension_numbers<[1], [0], [0], [1], [0, 0, 1, 1], [], []>} : vector<32x128xf32>, vector<128x128xf32>, vector<32x128xf32> -> vector<32x128xf32>
    %c0_9 = arith.constant 0 : index
    %c0_10 = arith.constant 0 : index
    %22 = vector.load %arg4[%c0_9, %c0_10] : memref<32x128xf32, #tpu.memory_space<vmem>>, vector<32x128xf32>
    tpu.vector_store %arg4[%c0_9, %c0_10], %21 {strides = array<i32>} : memref<32x128xf32, #tpu.memory_space<vmem>>, vector<32x128xf32>,
    %c0_11 = arith.constant 0 : index
    %c0_12 = arith.constant 0 : index
    %23 = vector.load %arg5[%c0_11, %c0_12] : memref<32x1xi32, #tpu.memory_space<vmem>>, vector<32x1xi32>
    tpu.vector_store %arg5[%c0_11, %c0_12], %16 {strides = array<i32>} : memref<32x1xi32, #tpu.memory_space<vmem>>, vector<32x1xi32>,
    %24 = tpu.iota {dimensions = array<i32: 0>} : vector<32x1xi32>
    %c32_i32 = arith.constant 32 : i32
    %25 = arith.muli %arg0, %c32_i32 : i32
    %26 = vector.broadcast %25 : i32 to vector<32x1xi32>
    %27 = arith.addi %24, %26 : vector<32x1xi32>
    %c32_i32_13 = arith.constant 32 : i32
    %28 = vector.broadcast %c32_i32_13 : i32 to vector<32x1xi32>
    %29 = arith.cmpi slt, %27, %28 : vector<32x1xi32>
    %30 = arith.extui %29 : vector<32x1xi1> to vector<32x1xi32>
    %31 = arith.sitofp %30 : vector<32x1xi32> to vector<32x1xf32>
    %32 = vector.broadcast %31 : vector<32x1xf32> to vector<32x128xf32>
    %33 = arith.mulf %20, %32 : vector<32x128xf32>
    %cst_14 = arith.constant dense<0.000000e+00> : vector<128xf32>
    %34 = vector.multi_reduction <add>, %33, %cst_14 [0] : vector<32x128xf32> to vector<128xf32>
    %35 = vector.shape_cast %34 : vector<128xf32> to vector<1x128xf32>
    %c0_15 = arith.constant 0 : index
    %c0_16 = arith.constant 0 : index
    %36 = vector.load %arg6[%c0_15, %c0_16] : memref<8x128xf32, #tpu.memory_space<vmem>>, vector<1x128xf32>
    tpu.vector_store %arg6[%c0_15, %c0_16], %35 {strides = array<i32>} : memref<8x128xf32, #tpu.memory_space<vmem>>, vector<1x128xf32>,
    %cst_17 = arith.constant 0.000000e+00 : f32
    %37 = vector.broadcast %cst_17 : f32 to vector<7x128xf32>
    %c1 = arith.constant 1 : index
    %c0_18 = arith.constant 0 : index
    %38 = vector.load %arg6[%c1, %c0_18] : memref<8x128xf32, #tpu.memory_space<vmem>>, vector<7x128xf32>
    tpu.vector_store %arg6[%c1, %c0_18], %37 {strides = array<i32>} : memref<8x128xf32, #tpu.memory_space<vmem>>, vector<7x128xf32>,
    return
  }
  func.func @transform_0(%arg0: i32) -> (i32, i32) {
    %c0_i32 = arith.constant 0 : i32
    %c0_i32_0 = arith.constant 0 : i32
    return %arg0, %c0_i32 : i32, i32
  }
  func.func @transform_1(%arg0: i32) -> (i32, i32) {
    %c0_i32 = arith.constant 0 : i32
    %c0_i32_0 = arith.constant 0 : i32
    %c0_i32_1 = arith.constant 0 : i32
    return %c0_i32, %c0_i32_0 : i32, i32
  }
  func.func @transform_2(%arg0: i32) -> (i32, i32) {
    %c0_i32 = arith.constant 0 : i32
    %c0_i32_0 = arith.constant 0 : i32
    %c0_i32_1 = arith.constant 0 : i32
    return %c0_i32, %c0_i32_0 : i32, i32
  }
  func.func @transform_3(%arg0: i32) -> (i32, i32) {
    %c0_i32 = arith.constant 0 : i32
    %c0_i32_0 = arith.constant 0 : i32
    return %arg0, %c0_i32 : i32, i32
  }
  func.func @transform_4(%arg0: i32) -> (i32, i32) {
    %c0_i32 = arith.constant 0 : i32
    %c0_i32_0 = arith.constant 0 : i32
    return %arg0, %c0_i32 : i32, i32
  }
  func.func @transform_5(%arg0: i32) -> (i32, i32) {
    %c0_i32 = arith.constant 0 : i32
    %c0_i32_0 = arith.constant 0 : i32
    return %arg0, %c0_i32 : i32, i32
  }
}

module attributes {stable_mosaic.version = 11 : i64} {
  func.func @_chain_kernel(%arg0: i32, %arg1: memref<1x32x128xbf16, #tpu.memory_space<vmem>>, %arg2: memref<384x128xbf16, #tpu.memory_space<vmem>>, %arg3: memref<1x128xf32, #tpu.memory_space<vmem>>, %arg4: memref<128x128xbf16, #tpu.memory_space<vmem>>, %arg5: memref<1x128xf32, #tpu.memory_space<vmem>>, %arg6: memref<384x128xbf16, #tpu.memory_space<vmem>>, %arg7: memref<1x128xf32, #tpu.memory_space<vmem>>, %arg8: memref<128x128xbf16, #tpu.memory_space<vmem>>, %arg9: memref<1x128xf32, #tpu.memory_space<vmem>>, %arg10: memref<384x256xbf16, #tpu.memory_space<vmem>>, %arg11: memref<1x256xf32, #tpu.memory_space<vmem>>, %arg12: memref<1x32x256xbf16, #tpu.memory_space<vmem>>, %arg13: memref<40x128xf32, #tpu.memory_space<vmem>>) attributes {dimension_semantics = [#tpu.dimension_semantics<parallel>], iteration_bounds = array<i64: 2>, scalar_prefetch = 0 : i64, scratch_operands = 1 : i64, tpu.core_type = #tpu.core_type<tc>, window_params = [{transform_indices = @transform_0, window_bounds = array<i64: 1, 32, 128>}, {pipeline_mode = #tpu.pipeline_mode<synchronous>, transform_indices = @transform_1, window_bounds = array<i64: 384, 128>}, {pipeline_mode = #tpu.pipeline_mode<synchronous>, transform_indices = @transform_2, window_bounds = array<i64: 1, 128>}, {pipeline_mode = #tpu.pipeline_mode<synchronous>, transform_indices = @transform_3, window_bounds = array<i64: 128, 128>}, {pipeline_mode = #tpu.pipeline_mode<synchronous>, transform_indices = @transform_4, window_bounds = array<i64: 1, 128>}, {pipeline_mode = #tpu.pipeline_mode<synchronous>, transform_indices = @transform_5, window_bounds = array<i64: 384, 128>}, {pipeline_mode = #tpu.pipeline_mode<synchronous>, transform_indices = @transform_6, window_bounds = array<i64: 1, 128>}, {pipeline_mode = #tpu.pipeline_mode<synchronous>, transform_indices = @transform_7, window_bounds = array<i64: 128, 128>}, {pipeline_mode = #tpu.pipeline_mode<synchronous>, transform_indices = @transform_8, window_bounds = array<i64: 1, 128>}, {pipeline_mode = #tpu.pipeline_mode<synchronous>, transform_indices = @transform_9, window_bounds = array<i64: 384, 256>}, {pipeline_mode = #tpu.pipeline_mode<synchronous>, transform_indices = @transform_10, window_bounds = array<i64: 1, 256>}, {transform_indices = @transform_11, window_bounds = array<i64: 1, 32, 256>}]} {
    %c0 = arith.constant 0 : index
    %c0_0 = arith.constant 0 : index
    %c0_1 = arith.constant 0 : index
    %0 = vector.load %arg1[%c0, %c0_0, %c0_1] : memref<1x32x128xbf16, #tpu.memory_space<vmem>>, vector<1x32x128xbf16>
    %1 = vector.shape_cast %0 : vector<1x32x128xbf16> to vector<32x128xbf16>
    %cst = arith.constant 0.000000e+00 : bf16
    %2 = vector.broadcast %cst : bf16 to vector<32x128xbf16>
    %3 = arith.maximumf %1, %2 : vector<32x128xbf16>
    %4 = arith.extf %3 : vector<32x128xbf16> to vector<32x128xf32>
    %cst_2 = arith.constant 0.000000e+00 : f32
    %5 = vector.broadcast %cst_2 : f32 to vector<3x128xf32>
    %c0_3 = arith.constant 0 : index
    %c0_4 = arith.constant 0 : index
    %6 = vector.load %arg13[%c0_3, %c0_4] : memref<40x128xf32, #tpu.memory_space<vmem>>, vector<3x128xf32>
    tpu.vector_store %arg13[%c0_3, %c0_4], %5 {strides = array<i32>} : memref<40x128xf32, #tpu.memory_space<vmem>>, vector<3x128xf32>,
    %c35 = arith.constant 35 : index
    %c0_5 = arith.constant 0 : index
    %7 = vector.load %arg13[%c35, %c0_5] : memref<40x128xf32, #tpu.memory_space<vmem>>, vector<3x128xf32>
    tpu.vector_store %arg13[%c35, %c0_5], %5 {strides = array<i32>} : memref<40x128xf32, #tpu.memory_space<vmem>>, vector<3x128xf32>,
    %c3 = arith.constant 3 : index
    %c0_6 = arith.constant 0 : index
    %8 = vector.load %arg13[%c3, %c0_6] : memref<40x128xf32, #tpu.memory_space<vmem>>, vector<32x128xf32>
    tpu.vector_store %arg13[%c3, %c0_6], %4 {strides = array<i32>} : memref<40x128xf32, #tpu.memory_space<vmem>>, vector<32x128xf32>,
    %c0_7 = arith.constant 0 : index
    %c0_8 = arith.constant 0 : index
    %9 = vector.load %arg13[%c0_7, %c0_8] : memref<40x128xf32, #tpu.memory_space<vmem>>, vector<32x128xf32>
    %10 = arith.truncf %9 : vector<32x128xf32> to vector<32x128xbf16>
    %c3_9 = arith.constant 3 : index
    %c0_10 = arith.constant 0 : index
    %11 = vector.load %arg13[%c3_9, %c0_10] : memref<40x128xf32, #tpu.memory_space<vmem>>, vector<32x128xf32>
    %12 = arith.truncf %11 : vector<32x128xf32> to vector<32x128xbf16>
    %c6 = arith.constant 6 : index
    %c0_11 = arith.constant 0 : index
    %13 = vector.load %arg13[%c6, %c0_11] : memref<40x128xf32, #tpu.memory_space<vmem>>, vector<32x128xf32>
    %14 = arith.truncf %13 : vector<32x128xf32> to vector<32x128xbf16>
    %15 = tpu.concatenate %10, %12, %14 in 1 : vector<32x128xbf16>, vector<32x128xbf16>, vector<32x128xbf16> -> vector<32x384xbf16>
    %c0_12 = arith.constant 0 : index
    %c0_13 = arith.constant 0 : index
    %16 = vector.load %arg2[%c0_12, %c0_13] : memref<384x128xbf16, #tpu.memory_space<vmem>>, vector<384x128xbf16>
    %cst_14 = arith.constant dense<0.000000e+00> : vector<32x128xf32>
    %17 = tpu.matmul %15, %16, %cst_14 {dimension_numbers = #tpu.dot_dimension_numbers<[1], [0], [0], [1], [0, 0, 1, 1], [], []>} : vector<32x384xbf16>, vector<384x128xbf16>, vector<32x128xf32> -> vector<32x128xf32>
    %c0_15 = arith.constant 0 : index
    %c0_16 = arith.constant 0 : index
    %18 = vector.load %arg3[%c0_15, %c0_16] : memref<1x128xf32, #tpu.memory_space<vmem>>, vector<1x128xf32>
    %19 = vector.broadcast %18 : vector<1x128xf32> to vector<32x128xf32>
    %20 = arith.addf %17, %19 : vector<32x128xf32>
    %cst_17 = arith.constant 0.000000e+00 : f32
    %21 = vector.broadcast %cst_17 : f32 to vector<32x128xf32>
    %22 = arith.maximumf %20, %21 : vector<32x128xf32>
    %23 = arith.truncf %22 : vector<32x128xf32> to vector<32x128xbf16>
    %c0_18 = arith.constant 0 : index
    %c0_19 = arith.constant 0 : index
    %24 = vector.load %arg4[%c0_18, %c0_19] : memref<128x128xbf16, #tpu.memory_space<vmem>>, vector<128x128xbf16>
    %cst_20 = arith.constant dense<0.000000e+00> : vector<32x128xf32>
    %25 = tpu.matmul %23, %24, %cst_20 {dimension_numbers = #tpu.dot_dimension_numbers<[1], [0], [0], [1], [0, 0, 1, 1], [], []>} : vector<32x128xbf16>, vector<128x128xbf16>, vector<32x128xf32> -> vector<32x128xf32>
    %c0_21 = arith.constant 0 : index
    %c0_22 = arith.constant 0 : index
    %26 = vector.load %arg5[%c0_21, %c0_22] : memref<1x128xf32, #tpu.memory_space<vmem>>, vector<1x128xf32>
    %27 = vector.broadcast %26 : vector<1x128xf32> to vector<32x128xf32>
    %28 = arith.addf %25, %27 : vector<32x128xf32>
    %29 = arith.extf %1 : vector<32x128xbf16> to vector<32x128xf32>
    %30 = arith.addf %29, %28 : vector<32x128xf32>
    %cst_23 = arith.constant 0.000000e+00 : f32
    %31 = vector.broadcast %cst_23 : f32 to vector<32x128xf32>
    %32 = arith.maximumf %30, %31 : vector<32x128xf32>
    %cst_24 = arith.constant 0.000000e+00 : f32
    %33 = vector.broadcast %cst_24 : f32 to vector<1x128xf32>
    %c0_25 = arith.constant 0 : index
    %c0_26 = arith.constant 0 : index
    %34 = vector.load %arg13[%c0_25, %c0_26] : memref<40x128xf32, #tpu.memory_space<vmem>>, vector<1x128xf32>
    tpu.vector_store %arg13[%c0_25, %c0_26], %33 {strides = array<i32>} : memref<40x128xf32, #tpu.memory_space<vmem>>, vector<1x128xf32>,
    %c33 = arith.constant 33 : index
    %c0_27 = arith.constant 0 : index
    %35 = vector.load %arg13[%c33, %c0_27] : memref<40x128xf32, #tpu.memory_space<vmem>>, vector<1x128xf32>
    tpu.vector_store %arg13[%c33, %c0_27], %33 {strides = array<i32>} : memref<40x128xf32, #tpu.memory_space<vmem>>, vector<1x128xf32>,
    %c1 = arith.constant 1 : index
    %c0_28 = arith.constant 0 : index
    %36 = vector.load %arg13[%c1, %c0_28] : memref<40x128xf32, #tpu.memory_space<vmem>>, vector<32x128xf32>
    tpu.vector_store %arg13[%c1, %c0_28], %32 {strides = array<i32>} : memref<40x128xf32, #tpu.memory_space<vmem>>, vector<32x128xf32>,
    %c0_29 = arith.constant 0 : index
    %c0_30 = arith.constant 0 : index
    %37 = vector.load %arg13[%c0_29, %c0_30] : memref<40x128xf32, #tpu.memory_space<vmem>>, vector<32x128xf32>
    %38 = arith.truncf %37 : vector<32x128xf32> to vector<32x128xbf16>
    %c1_31 = arith.constant 1 : index
    %c0_32 = arith.constant 0 : index
    %39 = vector.load %arg13[%c1_31, %c0_32] : memref<40x128xf32, #tpu.memory_space<vmem>>, vector<32x128xf32>
    %40 = arith.truncf %39 : vector<32x128xf32> to vector<32x128xbf16>
    %c2 = arith.constant 2 : index
    %c0_33 = arith.constant 0 : index
    %41 = vector.load %arg13[%c2, %c0_33] : memref<40x128xf32, #tpu.memory_space<vmem>>, vector<32x128xf32>
    %42 = arith.truncf %41 : vector<32x128xf32> to vector<32x128xbf16>
    %43 = tpu.concatenate %38, %40, %42 in 1 : vector<32x128xbf16>, vector<32x128xbf16>, vector<32x128xbf16> -> vector<32x384xbf16>
    %c0_34 = arith.constant 0 : index
    %c0_35 = arith.constant 0 : index
    %44 = vector.load %arg6[%c0_34, %c0_35] : memref<384x128xbf16, #tpu.memory_space<vmem>>, vector<384x128xbf16>
    %cst_36 = arith.constant dense<0.000000e+00> : vector<32x128xf32>
    %45 = tpu.matmul %43, %44, %cst_36 {dimension_numbers = #tpu.dot_dimension_numbers<[1], [0], [0], [1], [0, 0, 1, 1], [], []>} : vector<32x384xbf16>, vector<384x128xbf16>, vector<32x128xf32> -> vector<32x128xf32>
    %c0_37 = arith.constant 0 : index
    %c0_38 = arith.constant 0 : index
    %46 = vector.load %arg7[%c0_37, %c0_38] : memref<1x128xf32, #tpu.memory_space<vmem>>, vector<1x128xf32>
    %47 = vector.broadcast %46 : vector<1x128xf32> to vector<32x128xf32>
    %48 = arith.addf %45, %47 : vector<32x128xf32>
    %cst_39 = arith.constant 0.000000e+00 : f32
    %49 = vector.broadcast %cst_39 : f32 to vector<32x128xf32>
    %50 = arith.maximumf %48, %49 : vector<32x128xf32>
    %51 = arith.truncf %50 : vector<32x128xf32> to vector<32x128xbf16>
    %c0_40 = arith.constant 0 : index
    %c0_41 = arith.constant 0 : index
    %52 = vector.load %arg8[%c0_40, %c0_41] : memref<128x128xbf16, #tpu.memory_space<vmem>>, vector<128x128xbf16>
    %cst_42 = arith.constant dense<0.000000e+00> : vector<32x128xf32>
    %53 = tpu.matmul %51, %52, %cst_42 {dimension_numbers = #tpu.dot_dimension_numbers<[1], [0], [0], [1], [0, 0, 1, 1], [], []>} : vector<32x128xbf16>, vector<128x128xbf16>, vector<32x128xf32> -> vector<32x128xf32>
    %c0_43 = arith.constant 0 : index
    %c0_44 = arith.constant 0 : index
    %54 = vector.load %arg9[%c0_43, %c0_44] : memref<1x128xf32, #tpu.memory_space<vmem>>, vector<1x128xf32>
    %55 = vector.broadcast %54 : vector<1x128xf32> to vector<32x128xf32>
    %56 = arith.addf %53, %55 : vector<32x128xf32>
    %57 = arith.addf %30, %56 : vector<32x128xf32>
    %cst_45 = arith.constant 0.000000e+00 : f32
    %58 = vector.broadcast %cst_45 : f32 to vector<1x128xf32>
    %c0_46 = arith.constant 0 : index
    %c0_47 = arith.constant 0 : index
    %59 = vector.load %arg13[%c0_46, %c0_47] : memref<40x128xf32, #tpu.memory_space<vmem>>, vector<1x128xf32>
    tpu.vector_store %arg13[%c0_46, %c0_47], %58 {strides = array<i32>} : memref<40x128xf32, #tpu.memory_space<vmem>>, vector<1x128xf32>,
    %c33_48 = arith.constant 33 : index
    %c0_49 = arith.constant 0 : index
    %60 = vector.load %arg13[%c33_48, %c0_49] : memref<40x128xf32, #tpu.memory_space<vmem>>, vector<1x128xf32>
    tpu.vector_store %arg13[%c33_48, %c0_49], %58 {strides = array<i32>} : memref<40x128xf32, #tpu.memory_space<vmem>>, vector<1x128xf32>,
    %c1_50 = arith.constant 1 : index
    %c0_51 = arith.constant 0 : index
    %61 = vector.load %arg13[%c1_50, %c0_51] : memref<40x128xf32, #tpu.memory_space<vmem>>, vector<32x128xf32>
    tpu.vector_store %arg13[%c1_50, %c0_51], %57 {strides = array<i32>} : memref<40x128xf32, #tpu.memory_space<vmem>>, vector<32x128xf32>,
    %c0_52 = arith.constant 0 : index
    %c0_53 = arith.constant 0 : index
    %62 = vector.load %arg13[%c0_52, %c0_53] : memref<40x128xf32, #tpu.memory_space<vmem>>, vector<32x128xf32>
    %63 = arith.truncf %62 : vector<32x128xf32> to vector<32x128xbf16>
    %c1_54 = arith.constant 1 : index
    %c0_55 = arith.constant 0 : index
    %64 = vector.load %arg13[%c1_54, %c0_55] : memref<40x128xf32, #tpu.memory_space<vmem>>, vector<32x128xf32>
    %65 = arith.truncf %64 : vector<32x128xf32> to vector<32x128xbf16>
    %c2_56 = arith.constant 2 : index
    %c0_57 = arith.constant 0 : index
    %66 = vector.load %arg13[%c2_56, %c0_57] : memref<40x128xf32, #tpu.memory_space<vmem>>, vector<32x128xf32>
    %67 = arith.truncf %66 : vector<32x128xf32> to vector<32x128xbf16>
    %68 = tpu.concatenate %63, %65, %67 in 1 : vector<32x128xbf16>, vector<32x128xbf16>, vector<32x128xbf16> -> vector<32x384xbf16>
    %c0_58 = arith.constant 0 : index
    %c0_59 = arith.constant 0 : index
    %69 = vector.load %arg10[%c0_58, %c0_59] : memref<384x256xbf16, #tpu.memory_space<vmem>>, vector<384x256xbf16>
    %cst_60 = arith.constant dense<0.000000e+00> : vector<32x256xf32>
    %70 = tpu.matmul %68, %69, %cst_60 {dimension_numbers = #tpu.dot_dimension_numbers<[1], [0], [0], [1], [0, 0, 1, 1], [], []>} : vector<32x384xbf16>, vector<384x256xbf16>, vector<32x256xf32> -> vector<32x256xf32>
    %c0_61 = arith.constant 0 : index
    %c0_62 = arith.constant 0 : index
    %71 = vector.load %arg11[%c0_61, %c0_62] : memref<1x256xf32, #tpu.memory_space<vmem>>, vector<1x256xf32>
    %72 = vector.broadcast %71 : vector<1x256xf32> to vector<32x256xf32>
    %73 = arith.addf %70, %72 : vector<32x256xf32>
    %74 = arith.truncf %73 : vector<32x256xf32> to vector<32x256xbf16>
    %c0_63 = arith.constant 0 : index
    %c0_64 = arith.constant 0 : index
    %c0_65 = arith.constant 0 : index
    %75 = vector.load %arg12[%c0_63, %c0_64, %c0_65] : memref<1x32x256xbf16, #tpu.memory_space<vmem>>, vector<1x32x256xbf16>
    %76 = vector.shape_cast %75 : vector<1x32x256xbf16> to vector<32x256xbf16>
    %77 = vector.shape_cast %74 : vector<32x256xbf16> to vector<1x32x256xbf16>
    tpu.vector_store %arg12[%c0_63, %c0_64, %c0_65], %77 {strides = array<i32>} : memref<1x32x256xbf16, #tpu.memory_space<vmem>>, vector<1x32x256xbf16>,
    return
  }
  func.func @transform_0(%arg0: i32) -> (i32, i32, i32) {
    %c0_i32 = arith.constant 0 : i32
    %c0_i32_0 = arith.constant 0 : i32
    %c0_i32_1 = arith.constant 0 : i32
    return %arg0, %c0_i32, %c0_i32_0 : i32, i32, i32
  }
  func.func @transform_1(%arg0: i32) -> (i32, i32) {
    %c0_i32 = arith.constant 0 : i32
    %c0_i32_0 = arith.constant 0 : i32
    %c0_i32_1 = arith.constant 0 : i32
    return %c0_i32, %c0_i32_0 : i32, i32
  }
  func.func @transform_2(%arg0: i32) -> (i32, i32) {
    %c0_i32 = arith.constant 0 : i32
    %c0_i32_0 = arith.constant 0 : i32
    %c0_i32_1 = arith.constant 0 : i32
    return %c0_i32, %c0_i32_0 : i32, i32
  }
  func.func @transform_3(%arg0: i32) -> (i32, i32) {
    %c0_i32 = arith.constant 0 : i32
    %c0_i32_0 = arith.constant 0 : i32
    %c0_i32_1 = arith.constant 0 : i32
    return %c0_i32, %c0_i32_0 : i32, i32
  }
  func.func @transform_4(%arg0: i32) -> (i32, i32) {
    %c0_i32 = arith.constant 0 : i32
    %c0_i32_0 = arith.constant 0 : i32
    %c0_i32_1 = arith.constant 0 : i32
    return %c0_i32, %c0_i32_0 : i32, i32
  }
  func.func @transform_5(%arg0: i32) -> (i32, i32) {
    %c0_i32 = arith.constant 0 : i32
    %c0_i32_0 = arith.constant 0 : i32
    %c0_i32_1 = arith.constant 0 : i32
    return %c0_i32, %c0_i32_0 : i32, i32
  }
  func.func @transform_6(%arg0: i32) -> (i32, i32) {
    %c0_i32 = arith.constant 0 : i32
    %c0_i32_0 = arith.constant 0 : i32
    %c0_i32_1 = arith.constant 0 : i32
    return %c0_i32, %c0_i32_0 : i32, i32
  }
  func.func @transform_7(%arg0: i32) -> (i32, i32) {
    %c0_i32 = arith.constant 0 : i32
    %c0_i32_0 = arith.constant 0 : i32
    %c0_i32_1 = arith.constant 0 : i32
    return %c0_i32, %c0_i32_0 : i32, i32
  }
  func.func @transform_8(%arg0: i32) -> (i32, i32) {
    %c0_i32 = arith.constant 0 : i32
    %c0_i32_0 = arith.constant 0 : i32
    %c0_i32_1 = arith.constant 0 : i32
    return %c0_i32, %c0_i32_0 : i32, i32
  }
  func.func @transform_9(%arg0: i32) -> (i32, i32) {
    %c0_i32 = arith.constant 0 : i32
    %c0_i32_0 = arith.constant 0 : i32
    %c0_i32_1 = arith.constant 0 : i32
    return %c0_i32, %c0_i32_0 : i32, i32
  }
  func.func @transform_10(%arg0: i32) -> (i32, i32) {
    %c0_i32 = arith.constant 0 : i32
    %c0_i32_0 = arith.constant 0 : i32
    %c0_i32_1 = arith.constant 0 : i32
    return %c0_i32, %c0_i32_0 : i32, i32
  }
  func.func @transform_11(%arg0: i32) -> (i32, i32, i32) {
    %c0_i32 = arith.constant 0 : i32
    %c0_i32_0 = arith.constant 0 : i32
    %c0_i32_1 = arith.constant 0 : i32
    return %arg0, %c0_i32, %c0_i32_0 : i32, i32, i32
  }
}

module attributes {stable_mosaic.version = 11 : i64} {
  func.func @_chain_kernel(%arg0: i32, %arg1: memref<1x16x128xf32, #tpu.memory_space<vmem>>, %arg2: memref<384x128xbf16, #tpu.memory_space<vmem>>, %arg3: memref<1x128xf32, #tpu.memory_space<vmem>>, %arg4: memref<384x128xbf16, #tpu.memory_space<vmem>>, %arg5: memref<1x128xf32, #tpu.memory_space<vmem>>, %arg6: memref<128x128xbf16, #tpu.memory_space<vmem>>, %arg7: memref<1x128xf32, #tpu.memory_space<vmem>>, %arg8: memref<384x128xbf16, #tpu.memory_space<vmem>>, %arg9: memref<1x128xf32, #tpu.memory_space<vmem>>, %arg10: memref<128x128xbf16, #tpu.memory_space<vmem>>, %arg11: memref<1x128xf32, #tpu.memory_space<vmem>>, %arg12: memref<384x256xbf16, #tpu.memory_space<vmem>>, %arg13: memref<1x256xf32, #tpu.memory_space<vmem>>, %arg14: memref<1x16x256xbf16, #tpu.memory_space<vmem>>, %arg15: memref<24x128xf32, #tpu.memory_space<vmem>>) attributes {dimension_semantics = [#tpu.dimension_semantics<parallel>], iteration_bounds = array<i64: 2>, scalar_prefetch = 0 : i64, scratch_operands = 1 : i64, tpu.core_type = #tpu.core_type<tc>, window_params = [{transform_indices = @transform_0, window_bounds = array<i64: 1, 16, 128>}, {pipeline_mode = #tpu.pipeline_mode<synchronous>, transform_indices = @transform_1, window_bounds = array<i64: 384, 128>}, {pipeline_mode = #tpu.pipeline_mode<synchronous>, transform_indices = @transform_2, window_bounds = array<i64: 1, 128>}, {pipeline_mode = #tpu.pipeline_mode<synchronous>, transform_indices = @transform_3, window_bounds = array<i64: 384, 128>}, {pipeline_mode = #tpu.pipeline_mode<synchronous>, transform_indices = @transform_4, window_bounds = array<i64: 1, 128>}, {pipeline_mode = #tpu.pipeline_mode<synchronous>, transform_indices = @transform_5, window_bounds = array<i64: 128, 128>}, {pipeline_mode = #tpu.pipeline_mode<synchronous>, transform_indices = @transform_6, window_bounds = array<i64: 1, 128>}, {pipeline_mode = #tpu.pipeline_mode<synchronous>, transform_indices = @transform_7, window_bounds = array<i64: 384, 128>}, {pipeline_mode = #tpu.pipeline_mode<synchronous>, transform_indices = @transform_8, window_bounds = array<i64: 1, 128>}, {pipeline_mode = #tpu.pipeline_mode<synchronous>, transform_indices = @transform_9, window_bounds = array<i64: 128, 128>}, {pipeline_mode = #tpu.pipeline_mode<synchronous>, transform_indices = @transform_10, window_bounds = array<i64: 1, 128>}, {pipeline_mode = #tpu.pipeline_mode<synchronous>, transform_indices = @transform_11, window_bounds = array<i64: 384, 256>}, {pipeline_mode = #tpu.pipeline_mode<synchronous>, transform_indices = @transform_12, window_bounds = array<i64: 1, 256>}, {transform_indices = @transform_13, window_bounds = array<i64: 1, 16, 256>}]} {
    %c0 = arith.constant 0 : index
    %c0_0 = arith.constant 0 : index
    %c0_1 = arith.constant 0 : index
    %0 = vector.load %arg1[%c0, %c0_0, %c0_1] : memref<1x16x128xf32, #tpu.memory_space<vmem>>, vector<1x16x128xf32>
    %1 = vector.shape_cast %0 : vector<1x16x128xf32> to vector<16x128xf32>
    %cst = arith.constant 0.000000e+00 : f32
    %2 = vector.broadcast %cst : f32 to vector<1x128xf32>
    %c0_2 = arith.constant 0 : index
    %c0_3 = arith.constant 0 : index
    %3 = vector.load %arg15[%c0_2, %c0_3] : memref<24x128xf32, #tpu.memory_space<vmem>>, vector<1x128xf32>
    tpu.vector_store %arg15[%c0_2, %c0_3], %2 {strides = array<i32>} : memref<24x128xf32, #tpu.memory_space<vmem>>, vector<1x128xf32>,
    %c17 = arith.constant 17 : index
    %c0_4 = arith.constant 0 : index
    %4 = vector.load %arg15[%c17, %c0_4] : memref<24x128xf32, #tpu.memory_space<vmem>>, vector<1x128xf32>
    tpu.vector_store %arg15[%c17, %c0_4], %2 {strides = array<i32>} : memref<24x128xf32, #tpu.memory_space<vmem>>, vector<1x128xf32>,
    %c1 = arith.constant 1 : index
    %c0_5 = arith.constant 0 : index
    %5 = vector.load %arg15[%c1, %c0_5] : memref<24x128xf32, #tpu.memory_space<vmem>>, vector<16x128xf32>
    tpu.vector_store %arg15[%c1, %c0_5], %1 {strides = array<i32>} : memref<24x128xf32, #tpu.memory_space<vmem>>, vector<16x128xf32>,
    %c0_6 = arith.constant 0 : index
    %c0_7 = arith.constant 0 : index
    %6 = vector.load %arg15[%c0_6, %c0_7] : memref<24x128xf32, #tpu.memory_space<vmem>>, vector<16x128xf32>
    %7 = arith.truncf %6 : vector<16x128xf32> to vector<16x128xbf16>
    %c1_8 = arith.constant 1 : index
    %c0_9 = arith.constant 0 : index
    %8 = vector.load %arg15[%c1_8, %c0_9] : memref<24x128xf32, #tpu.memory_space<vmem>>, vector<16x128xf32>
    %9 = arith.truncf %8 : vector<16x128xf32> to vector<16x128xbf16>
    %c2 = arith.constant 2 : index
    %c0_10 = arith.constant 0 : index
    %10 = vector.load %arg15[%c2, %c0_10] : memref<24x128xf32, #tpu.memory_space<vmem>>, vector<16x128xf32>
    %11 = arith.truncf %10 : vector<16x128xf32> to vector<16x128xbf16>
    %12 = tpu.concatenate %7, %9, %11 in 1 : vector<16x128xbf16>, vector<16x128xbf16>, vector<16x128xbf16> -> vector<16x384xbf16>
    %c0_11 = arith.constant 0 : index
    %c0_12 = arith.constant 0 : index
    %13 = vector.load %arg2[%c0_11, %c0_12] : memref<384x128xbf16, #tpu.memory_space<vmem>>, vector<384x128xbf16>
    %cst_13 = arith.constant dense<0.000000e+00> : vector<16x128xf32>
    %14 = tpu.matmul %12, %13, %cst_13 {dimension_numbers = #tpu.dot_dimension_numbers<[1], [0], [0], [1], [0, 0, 1, 1], [], []>} : vector<16x384xbf16>, vector<384x128xbf16>, vector<16x128xf32> -> vector<16x128xf32>
    %c0_14 = arith.constant 0 : index
    %c0_15 = arith.constant 0 : index
    %15 = vector.load %arg3[%c0_14, %c0_15] : memref<1x128xf32, #tpu.memory_space<vmem>>, vector<1x128xf32>
    %16 = vector.broadcast %15 : vector<1x128xf32> to vector<16x128xf32>
    %17 = arith.addf %14, %16 : vector<16x128xf32>
    %cst_16 = arith.constant 0.000000e+00 : f32
    %18 = vector.broadcast %cst_16 : f32 to vector<16x128xf32>
    %19 = arith.maximumf %17, %18 : vector<16x128xf32>
    %cst_17 = arith.constant 0.000000e+00 : f32
    %20 = vector.broadcast %cst_17 : f32 to vector<16x128xf32>
    %21 = arith.maximumf %19, %20 : vector<16x128xf32>
    %cst_18 = arith.constant 0.000000e+00 : f32
    %22 = vector.broadcast %cst_18 : f32 to vector<3x128xf32>
    %c0_19 = arith.constant 0 : index
    %c0_20 = arith.constant 0 : index
    %23 = vector.load %arg15[%c0_19, %c0_20] : memref<24x128xf32, #tpu.memory_space<vmem>>, vector<3x128xf32>
    tpu.vector_store %arg15[%c0_19, %c0_20], %22 {strides = array<i32>} : memref<24x128xf32, #tpu.memory_space<vmem>>, vector<3x128xf32>,
    %c19 = arith.constant 19 : index
    %c0_21 = arith.constant 0 : index
    %24 = vector.load %arg15[%c19, %c0_21] : memref<24x128xf32, #tpu.memory_space<vmem>>, vector<3x128xf32>
    tpu.vector_store %arg15[%c19, %c0_21], %22 {strides = array<i32>} : memref<24x128xf32, #tpu.memory_space<vmem>>, vector<3x128xf32>,
    %c3 = arith.constant 3 : index
    %c0_22 = arith.constant 0 : index
    %25 = vector.load %arg15[%c3, %c0_22] : memref<24x128xf32, #tpu.memory_space<vmem>>, vector<16x128xf32>
    tpu.vector_store %arg15[%c3, %c0_22], %21 {strides = array<i32>} : memref<24x128xf32, #tpu.memory_space<vmem>>, vector<16x128xf32>,
    %c0_23 = arith.constant 0 : index
    %c0_24 = arith.constant 0 : index
    %26 = vector.load %arg15[%c0_23, %c0_24] : memref<24x128xf32, #tpu.memory_space<vmem>>, vector<16x128xf32>
    %27 = arith.truncf %26 : vector<16x128xf32> to vector<16x128xbf16>
    %c3_25 = arith.constant 3 : index
    %c0_26 = arith.constant 0 : index
    %28 = vector.load %arg15[%c3_25, %c0_26] : memref<24x128xf32, #tpu.memory_space<vmem>>, vector<16x128xf32>
    %29 = arith.truncf %28 : vector<16x128xf32> to vector<16x128xbf16>
    %c6 = arith.constant 6 : index
    %c0_27 = arith.constant 0 : index
    %30 = vector.load %arg15[%c6, %c0_27] : memref<24x128xf32, #tpu.memory_space<vmem>>, vector<16x128xf32>
    %31 = arith.truncf %30 : vector<16x128xf32> to vector<16x128xbf16>
    %32 = tpu.concatenate %27, %29, %31 in 1 : vector<16x128xbf16>, vector<16x128xbf16>, vector<16x128xbf16> -> vector<16x384xbf16>
    %c0_28 = arith.constant 0 : index
    %c0_29 = arith.constant 0 : index
    %33 = vector.load %arg4[%c0_28, %c0_29] : memref<384x128xbf16, #tpu.memory_space<vmem>>, vector<384x128xbf16>
    %cst_30 = arith.constant dense<0.000000e+00> : vector<16x128xf32>
    %34 = tpu.matmul %32, %33, %cst_30 {dimension_numbers = #tpu.dot_dimension_numbers<[1], [0], [0], [1], [0, 0, 1, 1], [], []>} : vector<16x384xbf16>, vector<384x128xbf16>, vector<16x128xf32> -> vector<16x128xf32>
    %c0_31 = arith.constant 0 : index
    %c0_32 = arith.constant 0 : index
    %35 = vector.load %arg5[%c0_31, %c0_32] : memref<1x128xf32, #tpu.memory_space<vmem>>, vector<1x128xf32>
    %36 = vector.broadcast %35 : vector<1x128xf32> to vector<16x128xf32>
    %37 = arith.addf %34, %36 : vector<16x128xf32>
    %cst_33 = arith.constant 0.000000e+00 : f32
    %38 = vector.broadcast %cst_33 : f32 to vector<16x128xf32>
    %39 = arith.maximumf %37, %38 : vector<16x128xf32>
    %40 = arith.truncf %39 : vector<16x128xf32> to vector<16x128xbf16>
    %c0_34 = arith.constant 0 : index
    %c0_35 = arith.constant 0 : index
    %41 = vector.load %arg6[%c0_34, %c0_35] : memref<128x128xbf16, #tpu.memory_space<vmem>>, vector<128x128xbf16>
    %cst_36 = arith.constant dense<0.000000e+00> : vector<16x128xf32>
    %42 = tpu.matmul %40, %41, %cst_36 {dimension_numbers = #tpu.dot_dimension_numbers<[1], [0], [0], [1], [0, 0, 1, 1], [], []>} : vector<16x128xbf16>, vector<128x128xbf16>, vector<16x128xf32> -> vector<16x128xf32>
    %c0_37 = arith.constant 0 : index
    %c0_38 = arith.constant 0 : index
    %43 = vector.load %arg7[%c0_37, %c0_38] : memref<1x128xf32, #tpu.memory_space<vmem>>, vector<1x128xf32>
    %44 = vector.broadcast %43 : vector<1x128xf32> to vector<16x128xf32>
    %45 = arith.addf %42, %44 : vector<16x128xf32>
    %46 = arith.addf %19, %45 : vector<16x128xf32>
    %cst_39 = arith.constant 0.000000e+00 : f32
    %47 = vector.broadcast %cst_39 : f32 to vector<16x128xf32>
    %48 = arith.maximumf %46, %47 : vector<16x128xf32>
    %cst_40 = arith.constant 0.000000e+00 : f32
    %49 = vector.broadcast %cst_40 : f32 to vector<1x128xf32>
    %c0_41 = arith.constant 0 : index
    %c0_42 = arith.constant 0 : index
    %50 = vector.load %arg15[%c0_41, %c0_42] : memref<24x128xf32, #tpu.memory_space<vmem>>, vector<1x128xf32>
    tpu.vector_store %arg15[%c0_41, %c0_42], %49 {strides = array<i32>} : memref<24x128xf32, #tpu.memory_space<vmem>>, vector<1x128xf32>,
    %c17_43 = arith.constant 17 : index
    %c0_44 = arith.constant 0 : index
    %51 = vector.load %arg15[%c17_43, %c0_44] : memref<24x128xf32, #tpu.memory_space<vmem>>, vector<1x128xf32>
    tpu.vector_store %arg15[%c17_43, %c0_44], %49 {strides = array<i32>} : memref<24x128xf32, #tpu.memory_space<vmem>>, vector<1x128xf32>,
    %c1_45 = arith.constant 1 : index
    %c0_46 = arith.constant 0 : index
    %52 = vector.load %arg15[%c1_45, %c0_46] : memref<24x128xf32, #tpu.memory_space<vmem>>, vector<16x128xf32>
    tpu.vector_store %arg15[%c1_45, %c0_46], %48 {strides = array<i32>} : memref<24x128xf32, #tpu.memory_space<vmem>>, vector<16x128xf32>,
    %c0_47 = arith.constant 0 : index
    %c0_48 = arith.constant 0 : index
    %53 = vector.load %arg15[%c0_47, %c0_48] : memref<24x128xf32, #tpu.memory_space<vmem>>, vector<16x128xf32>
    %54 = arith.truncf %53 : vector<16x128xf32> to vector<16x128xbf16>
    %c1_49 = arith.constant 1 : index
    %c0_50 = arith.constant 0 : index
    %55 = vector.load %arg15[%c1_49, %c0_50] : memref<24x128xf32, #tpu.memory_space<vmem>>, vector<16x128xf32>
    %56 = arith.truncf %55 : vector<16x128xf32> to vector<16x128xbf16>
    %c2_51 = arith.constant 2 : index
    %c0_52 = arith.constant 0 : index
    %57 = vector.load %arg15[%c2_51, %c0_52] : memref<24x128xf32, #tpu.memory_space<vmem>>, vector<16x128xf32>
    %58 = arith.truncf %57 : vector<16x128xf32> to vector<16x128xbf16>
    %59 = tpu.concatenate %54, %56, %58 in 1 : vector<16x128xbf16>, vector<16x128xbf16>, vector<16x128xbf16> -> vector<16x384xbf16>
    %c0_53 = arith.constant 0 : index
    %c0_54 = arith.constant 0 : index
    %60 = vector.load %arg8[%c0_53, %c0_54] : memref<384x128xbf16, #tpu.memory_space<vmem>>, vector<384x128xbf16>
    %cst_55 = arith.constant dense<0.000000e+00> : vector<16x128xf32>
    %61 = tpu.matmul %59, %60, %cst_55 {dimension_numbers = #tpu.dot_dimension_numbers<[1], [0], [0], [1], [0, 0, 1, 1], [], []>} : vector<16x384xbf16>, vector<384x128xbf16>, vector<16x128xf32> -> vector<16x128xf32>
    %c0_56 = arith.constant 0 : index
    %c0_57 = arith.constant 0 : index
    %62 = vector.load %arg9[%c0_56, %c0_57] : memref<1x128xf32, #tpu.memory_space<vmem>>, vector<1x128xf32>
    %63 = vector.broadcast %62 : vector<1x128xf32> to vector<16x128xf32>
    %64 = arith.addf %61, %63 : vector<16x128xf32>
    %cst_58 = arith.constant 0.000000e+00 : f32
    %65 = vector.broadcast %cst_58 : f32 to vector<16x128xf32>
    %66 = arith.maximumf %64, %65 : vector<16x128xf32>
    %67 = arith.truncf %66 : vector<16x128xf32> to vector<16x128xbf16>
    %c0_59 = arith.constant 0 : index
    %c0_60 = arith.constant 0 : index
    %68 = vector.load %arg10[%c0_59, %c0_60] : memref<128x128xbf16, #tpu.memory_space<vmem>>, vector<128x128xbf16>
    %cst_61 = arith.constant dense<0.000000e+00> : vector<16x128xf32>
    %69 = tpu.matmul %67, %68, %cst_61 {dimension_numbers = #tpu.dot_dimension_numbers<[1], [0], [0], [1], [0, 0, 1, 1], [], []>} : vector<16x128xbf16>, vector<128x128xbf16>, vector<16x128xf32> -> vector<16x128xf32>
    %c0_62 = arith.constant 0 : index
    %c0_63 = arith.constant 0 : index
    %70 = vector.load %arg11[%c0_62, %c0_63] : memref<1x128xf32, #tpu.memory_space<vmem>>, vector<1x128xf32>
    %71 = vector.broadcast %70 : vector<1x128xf32> to vector<16x128xf32>
    %72 = arith.addf %69, %71 : vector<16x128xf32>
    %73 = arith.addf %46, %72 : vector<16x128xf32>
    %cst_64 = arith.constant 0.000000e+00 : f32
    %74 = vector.broadcast %cst_64 : f32 to vector<1x128xf32>
    %c0_65 = arith.constant 0 : index
    %c0_66 = arith.constant 0 : index
    %75 = vector.load %arg15[%c0_65, %c0_66] : memref<24x128xf32, #tpu.memory_space<vmem>>, vector<1x128xf32>
    tpu.vector_store %arg15[%c0_65, %c0_66], %74 {strides = array<i32>} : memref<24x128xf32, #tpu.memory_space<vmem>>, vector<1x128xf32>,
    %c17_67 = arith.constant 17 : index
    %c0_68 = arith.constant 0 : index
    %76 = vector.load %arg15[%c17_67, %c0_68] : memref<24x128xf32, #tpu.memory_space<vmem>>, vector<1x128xf32>
    tpu.vector_store %arg15[%c17_67, %c0_68], %74 {strides = array<i32>} : memref<24x128xf32, #tpu.memory_space<vmem>>, vector<1x128xf32>,
    %c1_69 = arith.constant 1 : index
    %c0_70 = arith.constant 0 : index
    %77 = vector.load %arg15[%c1_69, %c0_70] : memref<24x128xf32, #tpu.memory_space<vmem>>, vector<16x128xf32>
    tpu.vector_store %arg15[%c1_69, %c0_70], %73 {strides = array<i32>} : memref<24x128xf32, #tpu.memory_space<vmem>>, vector<16x128xf32>,
    %c0_71 = arith.constant 0 : index
    %c0_72 = arith.constant 0 : index
    %78 = vector.load %arg15[%c0_71, %c0_72] : memref<24x128xf32, #tpu.memory_space<vmem>>, vector<16x128xf32>
    %79 = arith.truncf %78 : vector<16x128xf32> to vector<16x128xbf16>
    %c1_73 = arith.constant 1 : index
    %c0_74 = arith.constant 0 : index
    %80 = vector.load %arg15[%c1_73, %c0_74] : memref<24x128xf32, #tpu.memory_space<vmem>>, vector<16x128xf32>
    %81 = arith.truncf %80 : vector<16x128xf32> to vector<16x128xbf16>
    %c2_75 = arith.constant 2 : index
    %c0_76 = arith.constant 0 : index
    %82 = vector.load %arg15[%c2_75, %c0_76] : memref<24x128xf32, #tpu.memory_space<vmem>>, vector<16x128xf32>
    %83 = arith.truncf %82 : vector<16x128xf32> to vector<16x128xbf16>
    %84 = tpu.concatenate %79, %81, %83 in 1 : vector<16x128xbf16>, vector<16x128xbf16>, vector<16x128xbf16> -> vector<16x384xbf16>
    %c0_77 = arith.constant 0 : index
    %c0_78 = arith.constant 0 : index
    %85 = vector.load %arg12[%c0_77, %c0_78] : memref<384x256xbf16, #tpu.memory_space<vmem>>, vector<384x256xbf16>
    %cst_79 = arith.constant dense<0.000000e+00> : vector<16x256xf32>
    %86 = tpu.matmul %84, %85, %cst_79 {dimension_numbers = #tpu.dot_dimension_numbers<[1], [0], [0], [1], [0, 0, 1, 1], [], []>} : vector<16x384xbf16>, vector<384x256xbf16>, vector<16x256xf32> -> vector<16x256xf32>
    %c0_80 = arith.constant 0 : index
    %c0_81 = arith.constant 0 : index
    %87 = vector.load %arg13[%c0_80, %c0_81] : memref<1x256xf32, #tpu.memory_space<vmem>>, vector<1x256xf32>
    %88 = vector.broadcast %87 : vector<1x256xf32> to vector<16x256xf32>
    %89 = arith.addf %86, %88 : vector<16x256xf32>
    %90 = arith.truncf %89 : vector<16x256xf32> to vector<16x256xbf16>
    %c0_82 = arith.constant 0 : index
    %c0_83 = arith.constant 0 : index
    %c0_84 = arith.constant 0 : index
    %91 = vector.load %arg14[%c0_82, %c0_83, %c0_84] : memref<1x16x256xbf16, #tpu.memory_space<vmem>>, vector<1x16x256xbf16>
    %92 = vector.shape_cast %91 : vector<1x16x256xbf16> to vector<16x256xbf16>
    %93 = vector.shape_cast %90 : vector<16x256xbf16> to vector<1x16x256xbf16>
    tpu.vector_store %arg14[%c0_82, %c0_83, %c0_84], %93 {strides = array<i32>} : memref<1x16x256xbf16, #tpu.memory_space<vmem>>, vector<1x16x256xbf16>,
    return
  }
  func.func @transform_0(%arg0: i32) -> (i32, i32, i32) {
    %c0_i32 = arith.constant 0 : i32
    %c0_i32_0 = arith.constant 0 : i32
    %c0_i32_1 = arith.constant 0 : i32
    return %arg0, %c0_i32, %c0_i32_0 : i32, i32, i32
  }
  func.func @transform_1(%arg0: i32) -> (i32, i32) {
    %c0_i32 = arith.constant 0 : i32
    %c0_i32_0 = arith.constant 0 : i32
    %c0_i32_1 = arith.constant 0 : i32
    return %c0_i32, %c0_i32_0 : i32, i32
  }
  func.func @transform_2(%arg0: i32) -> (i32, i32) {
    %c0_i32 = arith.constant 0 : i32
    %c0_i32_0 = arith.constant 0 : i32
    %c0_i32_1 = arith.constant 0 : i32
    return %c0_i32, %c0_i32_0 : i32, i32
  }
  func.func @transform_3(%arg0: i32) -> (i32, i32) {
    %c0_i32 = arith.constant 0 : i32
    %c0_i32_0 = arith.constant 0 : i32
    %c0_i32_1 = arith.constant 0 : i32
    return %c0_i32, %c0_i32_0 : i32, i32
  }
  func.func @transform_4(%arg0: i32) -> (i32, i32) {
    %c0_i32 = arith.constant 0 : i32
    %c0_i32_0 = arith.constant 0 : i32
    %c0_i32_1 = arith.constant 0 : i32
    return %c0_i32, %c0_i32_0 : i32, i32
  }
  func.func @transform_5(%arg0: i32) -> (i32, i32) {
    %c0_i32 = arith.constant 0 : i32
    %c0_i32_0 = arith.constant 0 : i32
    %c0_i32_1 = arith.constant 0 : i32
    return %c0_i32, %c0_i32_0 : i32, i32
  }
  func.func @transform_6(%arg0: i32) -> (i32, i32) {
    %c0_i32 = arith.constant 0 : i32
    %c0_i32_0 = arith.constant 0 : i32
    %c0_i32_1 = arith.constant 0 : i32
    return %c0_i32, %c0_i32_0 : i32, i32
  }
  func.func @transform_7(%arg0: i32) -> (i32, i32) {
    %c0_i32 = arith.constant 0 : i32
    %c0_i32_0 = arith.constant 0 : i32
    %c0_i32_1 = arith.constant 0 : i32
    return %c0_i32, %c0_i32_0 : i32, i32
  }
  func.func @transform_8(%arg0: i32) -> (i32, i32) {
    %c0_i32 = arith.constant 0 : i32
    %c0_i32_0 = arith.constant 0 : i32
    %c0_i32_1 = arith.constant 0 : i32
    return %c0_i32, %c0_i32_0 : i32, i32
  }
  func.func @transform_9(%arg0: i32) -> (i32, i32) {
    %c0_i32 = arith.constant 0 : i32
    %c0_i32_0 = arith.constant 0 : i32
    %c0_i32_1 = arith.constant 0 : i32
    return %c0_i32, %c0_i32_0 : i32, i32
  }
  func.func @transform_10(%arg0: i32) -> (i32, i32) {
    %c0_i32 = arith.constant 0 : i32
    %c0_i32_0 = arith.constant 0 : i32
    %c0_i32_1 = arith.constant 0 : i32
    return %c0_i32, %c0_i32_0 : i32, i32
  }
  func.func @transform_11(%arg0: i32) -> (i32, i32) {
    %c0_i32 = arith.constant 0 : i32
    %c0_i32_0 = arith.constant 0 : i32
    %c0_i32_1 = arith.constant 0 : i32
    return %c0_i32, %c0_i32_0 : i32, i32
  }
  func.func @transform_12(%arg0: i32) -> (i32, i32) {
    %c0_i32 = arith.constant 0 : i32
    %c0_i32_0 = arith.constant 0 : i32
    %c0_i32_1 = arith.constant 0 : i32
    return %c0_i32, %c0_i32_0 : i32, i32
  }
  func.func @transform_13(%arg0: i32) -> (i32, i32, i32) {
    %c0_i32 = arith.constant 0 : i32
    %c0_i32_0 = arith.constant 0 : i32
    %c0_i32_1 = arith.constant 0 : i32
    return %arg0, %c0_i32, %c0_i32_0 : i32, i32, i32
  }
}

module attributes {stable_mosaic.version = 11 : i64} {
  func.func @_chain_kernel(%arg0: i32, %arg1: memref<1x64x128xbf16, #tpu.memory_space<vmem>>, %arg2: memref<384x128xbf16, #tpu.memory_space<vmem>>, %arg3: memref<1x128xf32, #tpu.memory_space<vmem>>, %arg4: memref<384x256xbf16, #tpu.memory_space<vmem>>, %arg5: memref<1x256xf32, #tpu.memory_space<vmem>>, %arg6: memref<1x64x256xf32, #tpu.memory_space<vmem>>, %arg7: memref<72x128xf32, #tpu.memory_space<vmem>>) attributes {dimension_semantics = [#tpu.dimension_semantics<parallel>], iteration_bounds = array<i64: 2>, scalar_prefetch = 0 : i64, scratch_operands = 1 : i64, tpu.core_type = #tpu.core_type<tc>, window_params = [{transform_indices = @transform_0, window_bounds = array<i64: 1, 64, 128>}, {pipeline_mode = #tpu.pipeline_mode<synchronous>, transform_indices = @transform_1, window_bounds = array<i64: 384, 128>}, {pipeline_mode = #tpu.pipeline_mode<synchronous>, transform_indices = @transform_2, window_bounds = array<i64: 1, 128>}, {pipeline_mode = #tpu.pipeline_mode<synchronous>, transform_indices = @transform_3, window_bounds = array<i64: 384, 256>}, {pipeline_mode = #tpu.pipeline_mode<synchronous>, transform_indices = @transform_4, window_bounds = array<i64: 1, 256>}, {transform_indices = @transform_5, window_bounds = array<i64: 1, 64, 256>}]} {
    %c0 = arith.constant 0 : index
    %c0_0 = arith.constant 0 : index
    %c0_1 = arith.constant 0 : index
    %0 = vector.load %arg1[%c0, %c0_0, %c0_1] : memref<1x64x128xbf16, #tpu.memory_space<vmem>>, vector<1x64x128xbf16>
    %1 = vector.shape_cast %0 : vector<1x64x128xbf16> to vector<64x128xbf16>
    %2 = arith.extf %1 : vector<64x128xbf16> to vector<64x128xf32>
    %cst = arith.constant 0.000000e+00 : f32
    %3 = vector.broadcast %cst : f32 to vector<1x128xf32>
    %c0_2 = arith.constant 0 : index
    %c0_3 = arith.constant 0 : index
    %4 = vector.load %arg7[%c0_2, %c0_3] : memref<72x128xf32, #tpu.memory_space<vmem>>, vector<1x128xf32>
    tpu.vector_store %arg7[%c0_2, %c0_3], %3 {strides = array<i32>} : memref<72x128xf32, #tpu.memory_space<vmem>>, vector<1x128xf32>,
    %c65 = arith.constant 65 : index
    %c0_4 = arith.constant 0 : index
    %5 = vector.load %arg7[%c65, %c0_4] : memref<72x128xf32, #tpu.memory_space<vmem>>, vector<1x128xf32>
    tpu.vector_store %arg7[%c65, %c0_4], %3 {strides = array<i32>} : memref<72x128xf32, #tpu.memory_space<vmem>>, vector<1x128xf32>,
    %c1 = arith.constant 1 : index
    %c0_5 = arith.constant 0 : index
    %6 = vector.load %arg7[%c1, %c0_5] : memref<72x128xf32, #tpu.memory_space<vmem>>, vector<64x128xf32>
    tpu.vector_store %arg7[%c1, %c0_5], %2 {strides = array<i32>} : memref<72x128xf32, #tpu.memory_space<vmem>>, vector<64x128xf32>,
    %c0_6 = arith.constant 0 : index
    %c0_7 = arith.constant 0 : index
    %7 = vector.load %arg7[%c0_6, %c0_7] : memref<72x128xf32, #tpu.memory_space<vmem>>, vector<64x128xf32>
    %8 = arith.truncf %7 : vector<64x128xf32> to vector<64x128xbf16>
    %c1_8 = arith.constant 1 : index
    %c0_9 = arith.constant 0 : index
    %9 = vector.load %arg7[%c1_8, %c0_9] : memref<72x128xf32, #tpu.memory_space<vmem>>, vector<64x128xf32>
    %10 = arith.truncf %9 : vector<64x128xf32> to vector<64x128xbf16>
    %c2 = arith.constant 2 : index
    %c0_10 = arith.constant 0 : index
    %11 = vector.load %arg7[%c2, %c0_10] : memref<72x128xf32, #tpu.memory_space<vmem>>, vector<64x128xf32>
    %12 = arith.truncf %11 : vector<64x128xf32> to vector<64x128xbf16>
    %13 = tpu.concatenate %8, %10, %12 in 1 : vector<64x128xbf16>, vector<64x128xbf16>, vector<64x128xbf16> -> vector<64x384xbf16>
    %c0_11 = arith.constant 0 : index
    %c0_12 = arith.constant 0 : index
    %14 = vector.load %arg2[%c0_11, %c0_12] : memref<384x128xbf16, #tpu.memory_space<vmem>>, vector<384x128xbf16>
    %cst_13 = arith.constant dense<0.000000e+00> : vector<64x128xf32>
    %15 = tpu.matmul %13, %14, %cst_13 {dimension_numbers = #tpu.dot_dimension_numbers<[1], [0], [0], [1], [0, 0, 1, 1], [], []>} : vector<64x384xbf16>, vector<384x128xbf16>, vector<64x128xf32> -> vector<64x128xf32>
    %c0_14 = arith.constant 0 : index
    %c0_15 = arith.constant 0 : index
    %16 = vector.load %arg3[%c0_14, %c0_15] : memref<1x128xf32, #tpu.memory_space<vmem>>, vector<1x128xf32>
    %17 = vector.broadcast %16 : vector<1x128xf32> to vector<64x128xf32>
    %18 = arith.addf %15, %17 : vector<64x128xf32>
    %cst_16 = arith.constant 0.000000e+00 : f32
    %19 = vector.broadcast %cst_16 : f32 to vector<64x128xf32>
    %20 = arith.maximumf %18, %19 : vector<64x128xf32>
    %cst_17 = arith.constant 0.000000e+00 : f32
    %21 = vector.broadcast %cst_17 : f32 to vector<1x128xf32>
    %c0_18 = arith.constant 0 : index
    %c0_19 = arith.constant 0 : index
    %22 = vector.load %arg7[%c0_18, %c0_19] : memref<72x128xf32, #tpu.memory_space<vmem>>, vector<1x128xf32>
    tpu.vector_store %arg7[%c0_18, %c0_19], %21 {strides = array<i32>} : memref<72x128xf32, #tpu.memory_space<vmem>>, vector<1x128xf32>,
    %c65_20 = arith.constant 65 : index
    %c0_21 = arith.constant 0 : index
    %23 = vector.load %arg7[%c65_20, %c0_21] : memref<72x128xf32, #tpu.memory_space<vmem>>, vector<1x128xf32>
    tpu.vector_store %arg7[%c65_20, %c0_21], %21 {strides = array<i32>} : memref<72x128xf32, #tpu.memory_space<vmem>>, vector<1x128xf32>,
    %c1_22 = arith.constant 1 : index
    %c0_23 = arith.constant 0 : index
    %24 = vector.load %arg7[%c1_22, %c0_23] : memref<72x128xf32, #tpu.memory_space<vmem>>, vector<64x128xf32>
    tpu.vector_store %arg7[%c1_22, %c0_23], %20 {strides = array<i32>} : memref<72x128xf32, #tpu.memory_space<vmem>>, vector<64x128xf32>,
    %c0_24 = arith.constant 0 : index
    %c0_25 = arith.constant 0 : index
    %25 = vector.load %arg7[%c0_24, %c0_25] : memref<72x128xf32, #tpu.memory_space<vmem>>, vector<64x128xf32>
    %26 = arith.truncf %25 : vector<64x128xf32> to vector<64x128xbf16>
    %c1_26 = arith.constant 1 : index
    %c0_27 = arith.constant 0 : index
    %27 = vector.load %arg7[%c1_26, %c0_27] : memref<72x128xf32, #tpu.memory_space<vmem>>, vector<64x128xf32>
    %28 = arith.truncf %27 : vector<64x128xf32> to vector<64x128xbf16>
    %c2_28 = arith.constant 2 : index
    %c0_29 = arith.constant 0 : index
    %29 = vector.load %arg7[%c2_28, %c0_29] : memref<72x128xf32, #tpu.memory_space<vmem>>, vector<64x128xf32>
    %30 = arith.truncf %29 : vector<64x128xf32> to vector<64x128xbf16>
    %31 = tpu.concatenate %26, %28, %30 in 1 : vector<64x128xbf16>, vector<64x128xbf16>, vector<64x128xbf16> -> vector<64x384xbf16>
    %c0_30 = arith.constant 0 : index
    %c0_31 = arith.constant 0 : index
    %32 = vector.load %arg4[%c0_30, %c0_31] : memref<384x256xbf16, #tpu.memory_space<vmem>>, vector<384x256xbf16>
    %cst_32 = arith.constant dense<0.000000e+00> : vector<64x256xf32>
    %33 = tpu.matmul %31, %32, %cst_32 {dimension_numbers = #tpu.dot_dimension_numbers<[1], [0], [0], [1], [0, 0, 1, 1], [], []>} : vector<64x384xbf16>, vector<384x256xbf16>, vector<64x256xf32> -> vector<64x256xf32>
    %c0_33 = arith.constant 0 : index
    %c0_34 = arith.constant 0 : index
    %34 = vector.load %arg5[%c0_33, %c0_34] : memref<1x256xf32, #tpu.memory_space<vmem>>, vector<1x256xf32>
    %35 = vector.broadcast %34 : vector<1x256xf32> to vector<64x256xf32>
    %36 = arith.addf %33, %35 : vector<64x256xf32>
    %c0_35 = arith.constant 0 : index
    %c0_36 = arith.constant 0 : index
    %c0_37 = arith.constant 0 : index
    %37 = vector.load %arg6[%c0_35, %c0_36, %c0_37] : memref<1x64x256xf32, #tpu.memory_space<vmem>>, vector<1x64x256xf32>
    %38 = vector.shape_cast %37 : vector<1x64x256xf32> to vector<64x256xf32>
    %39 = vector.shape_cast %36 : vector<64x256xf32> to vector<1x64x256xf32>
    tpu.vector_store %arg6[%c0_35, %c0_36, %c0_37], %39 {strides = array<i32>} : memref<1x64x256xf32, #tpu.memory_space<vmem>>, vector<1x64x256xf32>,
    return
  }
  func.func @transform_0(%arg0: i32) -> (i32, i32, i32) {
    %c0_i32 = arith.constant 0 : i32
    %c0_i32_0 = arith.constant 0 : i32
    %c0_i32_1 = arith.constant 0 : i32
    return %arg0, %c0_i32, %c0_i32_0 : i32, i32, i32
  }
  func.func @transform_1(%arg0: i32) -> (i32, i32) {
    %c0_i32 = arith.constant 0 : i32
    %c0_i32_0 = arith.constant 0 : i32
    %c0_i32_1 = arith.constant 0 : i32
    return %c0_i32, %c0_i32_0 : i32, i32
  }
  func.func @transform_2(%arg0: i32) -> (i32, i32) {
    %c0_i32 = arith.constant 0 : i32
    %c0_i32_0 = arith.constant 0 : i32
    %c0_i32_1 = arith.constant 0 : i32
    return %c0_i32, %c0_i32_0 : i32, i32
  }
  func.func @transform_3(%arg0: i32) -> (i32, i32) {
    %c0_i32 = arith.constant 0 : i32
    %c0_i32_0 = arith.constant 0 : i32
    %c0_i32_1 = arith.constant 0 : i32
    return %c0_i32, %c0_i32_0 : i32, i32
  }
  func.func @transform_4(%arg0: i32) -> (i32, i32) {
    %c0_i32 = arith.constant 0 : i32
    %c0_i32_0 = arith.constant 0 : i32
    %c0_i32_1 = arith.constant 0 : i32
    return %c0_i32, %c0_i32_0 : i32, i32
  }
  func.func @transform_5(%arg0: i32) -> (i32, i32, i32) {
    %c0_i32 = arith.constant 0 : i32
    %c0_i32_0 = arith.constant 0 : i32
    %c0_i32_1 = arith.constant 0 : i32
    return %arg0, %c0_i32, %c0_i32_0 : i32, i32, i32
  }
}

</mosaic_0001>

<bundles_post_ra>
// kernel: vqvae_forward.7
= control target key start
LH: loop header
LB: loop body
LE: loop exit
PB: predicated region body
PF: predicated region fallthrough
CT: control target
= control target key end

     0   :  { %s1478_s12 = smov 0   ;;  %s1767_s0 = inlined_call_operand.vmem [shape: bf16[2,64,256], index: 0, kind: input, shape index: {}]   ;;  %s1768_s1 = inlined_call_operand.vmem [shape: bf16[768,128], index: 1, kind: input, shape index: {}]   ;;  %s1769_s2 = inlined_call_operand.vmem [shape: f32[1,128], index: 2, kind: input, shape index: {}]   ;;  %s1770_s3 = inlined_call_operand.vmem [shape: bf16[2,64,128], index: 3, kind: output, shape index: {}]  }
   0x1 LB: > { %s1155_s13 = sadd.s32 4294967295, %s1455_s12   ;;  %p1159_p0 = scmp.ge.s32.totalorder %s1455_s12, 1  ;;  %s1455_s12 = sphi %s1478_s12, %s13_s12  }
   0x2   : > { %p137_p1 = scmp.lt.s32.totalorder %s1455_s12, 3 }
   0x4   : > { %p138_p2 = pnand %p1159_p0, %p137_p1 }
   0x5   : > { %p161_p3 = scmp.lt.s32.totalorder (!%p138_p2), %s1155_s13, 1 }
   0x6   : > { %141 = sbr.rel (%p138_p2) target bundleno = 298 (0x12a), region = 32 }
   0xb   : > { %v1401_v0 = vld [vmem:[%s1768_s1 + $0x78] sm:$0xff]   ;;  %v196_v1 = vlaneseq  ;;  %v1405_v5 = vld [vmem:[%s1768_s1 + $0x70] sm:$0xff]   ;;  %v1457_v6 = vmov 0.0   ;;  %v1409_v10 = vld [vmem:[%s1768_s1 + $0x68] sm:$0xff]   ;;  %s1772_s13 = smov (!%p161_p3, %s1155_s13), 1  ;;  %vm221_vm1 = vcmask 1040384  }
   0xc   : > { %v1402_v2 = vld [vmem:[%s1768_s1 + $0xf8] sm:$0xff]   ;;  %1256 = vmatprep.subr.bf16.mxu0 %v1401_v0  ;;  %v1406_v7 = vld [vmem:[%s1768_s1 + $0xf0] sm:$0xff]   ;;  %v1410_v11 = vld [vmem:[%s1768_s1 + $0xe8] sm:$0xff]   ;;  %s1223_s18 = sshll.u32 %s1772_s13, 6  ;;  %vm348_vm2 = vsmask.f32 7424 }
   0xd   : > { %v1403_v3 = vld [vmem:[%s1768_s1 + $0x38] sm:$0xff]   ;;  %1296 = vmatprep.subr.bf16.mxu1 %v1402_v2  ;;  %vm198_vm0 = vcmp.lt.s32.totalorder %v196_v1, 256  ;;  %v1407_v8 = vld [vmem:[%s1768_s1 + $0x30] sm:$0xff]   ;;  %v1411_v12 = vld [vmem:[%s1768_s1 + $0x28] sm:$0xff]   ;;  %s1586_s27 = scalar_lea.vmem %s1767_s0, %s1223_s18  ;;  %vm439_vm3 = vcmask 1046528   ;;  %s1224_s16 = sshll.u32 %s1772_s13, 5 }
   0xe   : > { %v1404_v4 = vld [vmem:[%s1768_s1 + $0xb8] sm:$0xff]   ;;  %1257 = vmatpush3.bf16.msra.mxu0 %v1403_v3  ;;  %200 = vst.msk [vmem:[#allocation2] ss:$8 sm:$0x3] %vm198_vm0, %v1457_v6  ;;  %v1408_v9 = vld [vmem:[%s1768_s1 + $0xb0] sm:$0xff]   ;;  %v1412_v13 = vld [vmem:[%s1768_s1 + $0xa8] sm:$0xff]   ;;  %s1755_s19 = scalar_lea.vmem %s1770_s3, %s1224_s16 }
   0xf   : > { %203 = vst.msk [vmem:[#allocation2 + $0x81] ss:$8 sm:$0x3] %vm198_vm0, %v1457_v6  ;;  %1297 = vmatpush3.bf16.msra.mxu1 %v1404_v4  ;;  %1258 = vmatprep.subr.bf16.mxu0 %v1405_v5  ;;  %v1413_v14 = vld [vmem:[%s1768_s1 + $0x60] sm:$0xff]   ;;  %v1417_v18 = vld [vmem:[%s1768_s1 + $0x58] sm:$0xff]   ;;  %v1421_v22 = vld [vmem:[%s1768_s1 + $0x50] sm:$0xff]  }
  0x10   : > { %1298 = vmatprep.subr.bf16.mxu1 %v1406_v7  ;;  %v1414_v15 = vld [vmem:[%s1768_s1 + $0xe0] sm:$0xff]   ;;  %v1418_v19 = vld [vmem:[%s1768_s1 + $0xd8] sm:$0xff]   ;;  %v1422_v23 = vld [vmem:[%s1768_s1 + $0xd0] sm:$0xff]  }
  0x11   : > { %v1415_v16 = vld [vmem:[%s1768_s1 + $0x20] sm:$0xff]   ;;  %v1419_v20 = vld [vmem:[%s1768_s1 + $0x18] sm:$0xff]   ;;  %v1423_v24 = vld [vmem:[%s1768_s1 + $0x10] sm:$0xff]  }
  0x12   : > { %1259 = vmatpush3.bf16.msra.mxu0 %v1407_v8  ;;  %v1416_v17 = vld [vmem:[%s1768_s1 + $0xa0] sm:$0xff]   ;;  %v1420_v21 = vld [vmem:[%s1768_s1 + $0x98] sm:$0xff]   ;;  %v1424_v25 = vld [vmem:[%s1768_s1 + $0x90] sm:$0xff]  }
  0x13   : > { %1299 = vmatpush3.bf16.msra.mxu1 %v1408_v9  ;;  %1260 = vmatprep.subr.bf16.mxu0 %v1409_v10  ;;  %v1425_v26 = vld [vmem:[%s1768_s1 + $0x48] sm:$0xff]   ;;  %v1429_v30 = vld [vmem:[%s1768_s1 + $0x40] sm:$0xff]   ;;  %v174_v36 = vld [vmem:[%s1586_s27 + $0x10] sm:$0xff] }
  0x14   : > { %1300 = vmatprep.subr.bf16.mxu1 %v1410_v11  ;;  %v1426_v27 = vld [vmem:[%s1768_s1 + $0xc8] sm:$0xff]   ;;  %v1430_v31 = vld [vmem:[%s1768_s1 + $0xc0] sm:$0xff]   ;;  %v175_v41 = vld [vmem:[%s1586_s27 + $0x18] sm:$0xff]  ;;  %v184_v42 = vunpack.c.l.bf16 %v174_v36  ;;  %v185_v43 = vunpack.c.h.bf16 %v174_v36 }
  0x15   : > { %v1427_v28 = vld [vmem:[%s1768_s1 + $0x8] sm:$0xff]   ;;  %v1431_v32 = vld [vmem:[%s1768_s1] sm:$0xff]   ;;  %v187_v44 = vunpack.c.h.bf16 %v175_v41  ;;  %v186_v45 = vunpack.c.l.bf16 %v175_v41  ;;  %v1433_v46 = vld [vmem:[%s1768_s1 + $0x178] sm:$0xff]  }
  0x16   : > { %1261 = vmatpush3.bf16.msra.mxu0 %v1411_v12  ;;  %v1428_v29 = vld [vmem:[%s1768_s1 + $0x88] sm:$0xff]   ;;  %v1432_v33 = vld [vmem:[%s1768_s1 + $0x80] sm:$0xff]   ;;  %v230_v51 = vrot.slane %v185_v43, 7  ;;  %v228_v53 = vrot.slane %v184_v42, 7  ;;  %v1624_v11 = vld [vmem:[%s1768_s1 + $0x138] sm:$0xff]  }
  0x17   : > { %1301 = vmatpush3.bf16.msra.mxu1 %v1412_v13  ;;  %1262 = vmatprep.subr.bf16.mxu0 %v1413_v14  ;;  %v172_v34 = vld [vmem:[%s1586_s27] sm:$0xff]  ;;  %v173_v35 = vld [vmem:[%s1586_s27 + $0x8] sm:$0xff]  ;;  %v234_v52 = vrot.slane %v187_v44, 7  ;;  %v232_v54 = vrot.slane %v186_v45, 7 }
  0x18   : > { %1302 = vmatprep.subr.bf16.mxu1 %v1414_v15  ;;  %v180_v37 = vunpack.c.l.bf16 %v172_v34  ;;  %v181_v38 = vunpack.c.h.bf16 %v172_v34  ;;  %v182_v39 = vunpack.c.l.bf16 %v173_v35  ;;  %v183_v40 = vunpack.c.h.bf16 %v173_v35  ;;  %v176_v61 = vld [vmem:[%s1586_s27 + $0x20] sm:$0xff]  ;;  %v177_v62 = vld [vmem:[%s1586_s27 + $0x28] sm:$0xff] }
  0x19   : > { %v235_v58 = vsel %vm221_vm1, %v230_v51, %v234_v52  ;;  %v233_v60 = vsel %vm221_vm1, %v228_v53, %v232_v54  ;;  %v189_v1 = vunpack.c.h.bf16 %v176_v61  ;;  %v191_v2 = vunpack.c.h.bf16 %v177_v62 }
  0x1a   : > { %1263 = vmatpush3.bf16.msra.mxu0 %v1415_v16  ;;  %v222_v47 = vrot.slane %v180_v37, 7  ;;  %v223_v48 = vrot.slane %v181_v38, 7  ;;  %v224_v49 = vrot.slane %v182_v39, 7  ;;  %v226_v50 = vrot.slane %v183_v40, 7  ;;  %v1436_v37 = vld [vmem:[%s1768_s1 + $0x130] sm:$0xff]  }
  0x1b   : > { %1303 = vmatpush3.bf16.msra.mxu1 %v1416_v17  ;;  %1264 = vmatprep.subr.bf16.mxu0 %v1417_v18  ;;  %v188_v3 = vunpack.c.l.bf16 %v176_v61  ;;  %v190_v4 = vunpack.c.l.bf16 %v177_v62  ;;  %v238_v6 = vrot.slane %v189_v1, 7  ;;  %v242_v7 = vrot.slane %v191_v2, 7  ;;  %v1631_v17 = vld [vmem:[%s1768_s1 + $0x170] sm:$0xff]   ;;  %v1438_v1 = vld [vmem:[%s1768_s1 + $0x128] sm:$0xff]   ;;  %v1439_v2 = vld [vmem:[%s1768_s1 + $0x160] sm:$0xff]  }
  0x1c   : > { %1304 = vmatprep.subr.bf16.mxu1 %v1418_v19  ;;  %v1602_v55 = vsel %vm221_vm1, %v223_v48, %v226_v50  ;;  %271 = vst [vmem:[#allocation2 + $0x8] sm:$0xfe] %v223_v48  ;;  %270 = vst [vmem:[#allocation2] sm:$0xfe] %v222_v47  ;;  %v1605_v56 = vsel %vm221_vm1, %v222_v47, %v224_v49  ;;  %v231_v57 = vsel %vm221_vm1, %v226_v50, %v230_v51  ;;  %v1437_v47 = vld [vmem:[%s1768_s1 + $0x168] sm:$0xff]  }
  0x1d   : > { %v229_v59 = vsel %vm221_vm1, %v224_v49, %v228_v53  ;;  %v1613_v63 = vpack.c.bf16 %v235_v58, %v231_v57  ;;  %v236_v8 = vrot.slane %v188_v3, 7  ;;  %v1618_v9 = vrot.slane %v190_v4, 7 }
  0x1e   : > { %1265 = vmatpush3.bf16.msra.mxu0 %v1419_v20  ;;  %v1615_v0 = vpack.c.bf16 %v233_v60, %v229_v59  ;;  %v239_v12 = vsel %vm221_vm1, %v234_v52, %v238_v6  ;;  %v243_v13 = vsel %vm221_vm1, %v238_v6, %v242_v7 }
  0x1f   : > { %1305 = vmatpush3.bf16.msra.mxu1 %v1420_v21  ;;  %1266 = vmatprep.subr.bf16.mxu0 %v1421_v22  ;;  %v369_v5 = vshll.u32 %v1613_v63, 16  ;;  %v1633_v18 = vpack.c.bf16 %v243_v13, %v239_v12  ;;  %v381_v19 = vshrl.u32 %v1613_v63, 16  ;;  %v237_v20 = vsel %vm221_vm1, %v232_v54, %v236_v8 }
  0x20   : > { %1306 = vmatprep.subr.bf16.mxu1 %v1422_v23  ;;  %v357_v10 = vshll.u32 %v1615_v0, 16  ;;  %v241_v21 = vsel %vm221_vm1, %v236_v8, %v1618_v9 }
  0x21   : > { %v1649_v39 = vpack.c.bf16 %v241_v21, %v237_v20  ;;  %v397_v60 = vshrl.u32 %v1633_v18, 16 }
  0x22   : > { %1267 = vmatpush3.bf16.msra.mxu0 %v1423_v24  ;;  %v371_v24 = vrot.slane %v369_v5, 1  ;;  %v359_v45 = vrot.slane %v357_v10, 1 }
  0x23   : > { %1307 = vmatpush3.bf16.msra.mxu1 %v1424_v25  ;;  %1268 = vmatprep.subr.bf16.mxu0 %v1425_v26  ;;  %v289_v14 = vld [vmem:[#allocation2 + $0x8] sm:$0xff]  ;;  %v288_v16 = vld [vmem:[#allocation2] sm:$0xff]  ;;  %v377_v53 = vshll.u32 %v1649_v39, 16 }
  0x24   : > { %1308 = vmatprep.subr.bf16.mxu1 %v1426_v27  ;;  %v313_v15 = vld [vmem:[#allocation2 + $0x8] sm:$0xfe]  ;;  %v305_v22 = vpack.c.bf16 %v1602_v55, %v289_v14  ;;  %v304_v25 = vpack.c.bf16 %v1605_v56, %v288_v16  ;;  %v312_v26 = vld [vmem:[#allocation2] sm:$0xfe]  ;;  %v178_v27 = vld [vmem:[%s1586_s27 + $0x30] sm:$0xff]  ;;  %v383_v38 = vor.u32 %v381_v19, %v371_v24 }
  0x25   : > { %v331_v23 = vpack.c.bf16 %v1602_v55, %v313_v15  ;;  %v192_v48 = vunpack.c.l.bf16 %v178_v27  ;;  %v1441_v14 = vld [vmem:[%s1768_s1 + $0x158] sm:$0xff]   ;;  %v341_v20 = vld [vmem:[#allocation2 + $0x8] sm:$0xfc] }
  0x26   : > { %1269 = vmatpush3.bf16.msra.mxu0 %v1427_v28  ;;  %v330_v28 = vpack.c.bf16 %v1605_v56, %v312_v26  ;;  %889 = vmatprep.mubr.bf16.mxu0 %v305_v22 }
  0x27   : > { %1309 = vmatpush3.bf16.msra.mxu1 %v1428_v29  ;;  %1270 = vmatprep.subr.bf16.mxu0 %v1429_v30  ;;  %v385_v29 = vshll.u32 %v1633_v18, 16  ;;  %v179_v30 = vld [vmem:[%s1586_s27 + $0x38] sm:$0xff]  ;;  %v244_v61 = vrot.slane %v192_v48, 7 }
  0x28   : > { %1310 = vmatprep.subr.bf16.mxu1 %v1430_v31  ;;  %v362_v31 = vshrl.u32 %v331_v23, 16  ;;  %v195_v34 = vunpack.c.h.bf16 %v179_v30  ;;  %v350_v35 = vshrl.u32 %v330_v28, 16  ;;  %v352_v36 = vshll.u32 %v330_v28, 16 }
  0x29   : > { %v387_v41 = vrot.slane %v385_v29, 1  ;;  %v194_v57 = vunpack.c.l.bf16 %v179_v30  ;;  %v245_v5 = vsel %vm221_vm1, %v1618_v9, %v244_v61  ;;  %v1440_v9 = vld [vmem:[%s1768_s1 + $0x120] sm:$0xff]  }
  0x2a   : > { %1271 = vmatpush3.bf16.msra.mxu0 %v1431_v32  ;;  %v364_v32 = vshll.u32 %v331_v23, 16  ;;  %v250_v43 = vrot.slane %v195_v34, 7  ;;  %v354_v44 = vrot.slane %v352_v36, 1  ;;  %v340_v36 = vld [vmem:[#allocation2] sm:$0xfc] }
  0x2b   : > { %1311 = vmatpush3.bf16.msra.mxu1 %v1432_v33  ;;  %1336 = vmatprep.subr.bf16.mxu0 %v1433_v46  ;;  %v193_v33 = vunpack.c.h.bf16 %v178_v27  ;;  %v388_v59 = vsel %vm348_vm2, %v383_v38, %v387_v41  ;;  %v248_v4 = vrot.slane %v194_v57, 7  ;;  %v399_v10 = vor.u32 %v397_v60, %v387_v41 }
  0x2c   : > { %1376 = vmatprep.subr.bf16.mxu1 %v1433_v46  ;;  %v366_v40 = vrot.slane %v364_v32, 1  ;;  %v373_v46 = vshrl.u32 %v1615_v0, 16  ;;  %287 = vst [vmem:[#allocation2 + $0x88] sm:$0x1] %v250_v43  ;;  %v355_v52 = vor.u32 %v354_v44, %v350_v35  ;;  %v345_v27 = vpack.c.bf16 %v1602_v55, %v341_v20  ;;  %v1445_v55 = vld [vmem:[%s1768_s1 + $0x148] sm:$0xff]  }
  0x2d   : > { %890 = vmatmul.mubr.bf16.vlgmr.msra.gmra.mxu0 %v304_v25  ;;  %v246_v42 = vrot.slane %v193_v33, 7  ;;  %v249_v8 = vsel %vm221_vm1, %v244_v61, %v248_v4  ;;  %286 = vst [vmem:[#allocation2 + $0x80] sm:$0x1] %v248_v4  ;;  %v1443_v25 = vld [vmem:[%s1768_s1 + $0x150] sm:$0xff]   ;;  %v444_v35 = vrot.slane %v1613_v63, 1 }
  0x2e   : > { %1337 = vmatpush3.bf16.msra.mxu0 %v1624_v11  ;;  %897 = vmatprep.mubr.bf16.mxu0 %v1613_v63  ;;  %v367_v49 = vor.u32 %v366_v40, %v362_v31  ;;  %v360_v62 = vsel %vm348_vm2, %v355_v52, %v359_v45  ;;  %v375_v6 = vor.u32 %v373_v46, %v359_v45  ;;  %v1444_v33 = vld [vmem:[%s1768_s1 + $0x110] sm:$0xff]   ;;  %v443_v34 = vrot.slane %v345_v27, 1  ;;  %v1447_v63 = vld [vmem:[%s1768_s1 + $0x140] sm:$0xff]  }
  0x2f   : > { %1338 = vmatprep.subr.bf16.mxu0 %v1631_v17  ;;  %v247_v50 = vsel %vm221_vm1, %v242_v7, %v246_v42  ;;  %v251_v51 = vsel %vm221_vm1, %v246_v42, %v250_v43  ;;  %v379_v7 = vrot.slane %v377_v53, 1  ;;  %v1680_v13 = vpack.c.bf16 %v249_v8, %v245_v5  ;;  %v1446_v42 = vld [vmem:[%s1768_s1 + $0x108] sm:$0xff]  }
  0x30   : > { %v1661_v54 = vpack.c.bf16 %v251_v51, %v247_v50  ;;  %v372_v58 = vsel %vm348_vm2, %v367_v49, %v371_v24  ;;  %v1442_v24 = vld [vmem:[%s1768_s1 + $0x118] sm:$0xff]   ;;  %v344_v43 = vpack.c.bf16 %v1605_v56, %v340_v36  ;;  %v445_v44 = vsel %vm439_vm3, %v443_v34, %v444_v35  ;;  %v1448_v56 = vld [vmem:[%s1768_s1 + $0x100] sm:$0xff]  }
  0x31   : > { %954 = vmatprep.mubr.bf16.mxu1 %v372_v58  ;;  %v380_v16 = vsel %vm348_vm2, %v375_v6, %v379_v7  ;;  %v393_v19 = vshll.u32 %v1680_v13, 16  ;;  %v405_v38 = vshrl.u32 %v1680_v13, 16  ;;  %v441_v50 = vrot.slane %v1615_v0, 1 }
  0x32   : > { %1339 = vmatpush3.bf16.msra.mxu0 %v1436_v37  ;;  %v401_v3 = vshll.u32 %v1661_v54, 16  ;;  %955 = vmatmul.mubr.bf16.vlgmr.msra.gmra.mxu1 %v360_v62  ;;  %v413_v22 = vshrl.u32 %v1661_v54, 16  ;;  %v452_v48 = vrot.slane %v1661_v54, 1  ;;  %v440_v49 = vrot.slane %v344_v43, 1 }
  0x33   : > { %1340 = vmatprep.subr.bf16.mxu0 %v1437_v47  ;;  %1384 = vmatpush3.bf16.msra.mxu1 %v1624_v11  ;;  %v329_v11 = vld [vmem:[#allocation2 + $0x88] sm:$0x1]  ;;  %v395_v29 = vrot.slane %v393_v19, 1  ;;  %v446_v58 = vrot.slane %v1649_v39, 1 }
  0x34   : > { %962 = vmatprep.mubr.bf16.mxu1 %v388_v59  ;;  %1377 = vmatprep.subr.bf16.mxu1 %v1631_v17  ;;  %v403_v12 = vrot.slane %v401_v3, 1  ;;  %v339_v15 = vpack.c.bf16 %v329_v11, %v329_v11  ;;  %v389_v17 = vshrl.u32 %v1649_v39, 16  ;;  %v328_v26 = vld [vmem:[#allocation2 + $0x80] sm:$0x1]  ;;  %v343_v51 = vld [vmem:[#allocation2 + $0x88] sm:$0x3] }
  0x35   : > { %898 = vmatmul.mubr.bf16.gmra.mxu0 %v1615_v0  ;;  %v338_v30 = vpack.c.bf16 %v328_v26, %v328_v26  ;;  %v407_v45 = vor.u32 %v405_v38, %v395_v29  ;;  %v450_v0 = vrot.slane %v1680_v13, 1  ;;  %v342_v60 = vld [vmem:[#allocation2 + $0x80] sm:$0x3] }
  0x36   : > { %1341 = vmatpush3.bf16.msra.mxu0 %v1438_v1  ;;  %905 = vmatprep.mubr.bf16.mxu0 %v1633_v18  ;;  %v404_v21 = vsel %vm348_vm2, %v399_v10, %v403_v12  ;;  %v417_v23 = vshll.u32 %v339_v15, 16  ;;  %v391_v28 = vor.u32 %v389_v17, %v379_v7  ;;  %v415_v31 = vor.u32 %v413_v22, %v403_v12 }
  0x37   : > { %1342 = vmatprep.subr.bf16.mxu0 %v1439_v2  ;;  %1385 = vmatpush3.bf16.msra.mxu1 %v1436_v37  ;;  %v409_v40 = vshll.u32 %v338_v30, 16  ;;  %v451_v61 = vsel %vm439_vm3, %v446_v58, %v450_v0  ;;  %v346_v62 = vpack.c.bf16 %v342_v60, %v342_v60 }
  0x38   : > { %1378 = vmatprep.subr.bf16.mxu1 %v1437_v47  ;;  %v419_v32 = vrot.slane %v417_v23, 1  ;;  %v396_v37 = vsel %vm348_vm2, %v391_v28, %v395_v29  ;;  %v448_v47 = vrot.slane %v1633_v18, 1  ;;  %v347_v18 = vpack.c.bf16 %v343_v51, %v343_v51 }
  0x39   : > { %v411_v46 = vrot.slane %v409_v40, 1  ;;  %v454_v3 = vrot.slane %v346_v62, 1 }
  0x3a   : > { %1343 = vmatpush3.bf16.msra.mxu0 %v1440_v9  ;;  %963 = vmatmul.mubr.bf16.gmra.mxu1 %v380_v16  ;;  %v420_v41 = vsel %vm348_vm2, %v415_v31, %v419_v32  ;;  %v453_v53 = vsel %vm439_vm3, %v448_v47, %v452_v48  ;;  %v449_v57 = vsel %vm439_vm3, %v444_v35, %v448_v47  ;;  %v456_v59 = vrot.slane %v347_v18, 1 }
  0x3b   : > { %1344 = vmatprep.subr.bf16.mxu0 %v1441_v14  ;;  %1386 = vmatpush3.bf16.msra.mxu1 %v1438_v1  ;;  %v412_v52 = vsel %vm348_vm2, %v407_v45, %v411_v46 }
  0x3c   : > { %970 = vmatprep.mubr.bf16.mxu1 %v404_v21  ;;  %1379 = vmatprep.subr.bf16.mxu1 %v1439_v2  ;;  %v457_v1 = vsel %vm439_vm3, %v452_v48, %v456_v59  ;;  %v447_v2 = vsel %vm439_vm3, %v441_v50, %v446_v58 }
  0x3d   : > { %906 = vmatmul.mubr.bf16.gmra.mxu0 %v1649_v39  ;;  %v455_v39 = vsel %vm439_vm3, %v450_v0, %v454_v3 }
  0x3e   : > { %1345 = vmatpush3.bf16.msra.mxu0 %v1442_v24  ;;  %913 = vmatprep.mubr.bf16.mxu0 %v1661_v54  ;;  %v442_v54 = vsel %vm439_vm3, %v440_v49, %v441_v50 }
  0x3f   : > { %1346 = vmatprep.subr.bf16.mxu0 %v1443_v25  ;;  %1387 = vmatpush3.bf16.msra.mxu1 %v1440_v9 }
  0x40   : > { %1380 = vmatprep.subr.bf16.mxu1 %v1441_v14 }
  0x42   : > { %1347 = vmatpush3.bf16.msra.mxu0 %v1444_v33  ;;  %971 = vmatmul.mubr.bf16.gmra.mxu1 %v396_v37 }
  0x43   : > { %1348 = vmatprep.subr.bf16.mxu0 %v1445_v55  ;;  %1388 = vmatpush3.bf16.msra.mxu1 %v1442_v24 }
  0x44   : > { %978 = vmatprep.mubr.bf16.mxu1 %v420_v41  ;;  %1381 = vmatprep.subr.bf16.mxu1 %v1443_v25 }
  0x45   : > { %914 = vmatmul.mubr.bf16.gmra.mxu0 %v1680_v13 }
  0x46   : > { %1349 = vmatpush3.bf16.msra.mxu0 %v1446_v42  ;;  %1019 = vmatprep.mubr.bf16.mxu0 %v445_v44 }
  0x47   : > { %1350 = vmatprep.subr.bf16.mxu0 %v1447_v63  ;;  %1389 = vmatpush3.bf16.msra.mxu1 %v1444_v33  ;;  %v1741_v33 = vld [vmem:[%s1769_s2] ss:$0 sm:$0xff] }
  0x48   : > { %1382 = vmatprep.subr.bf16.mxu1 %v1445_v55 }
  0x4a   : > { %1351 = vmatpush3.bf16.msra.mxu0 %v1448_v56  ;;  %979 = vmatmul.mubr.bf16.gmra.mxu1 %v412_v52 }
  0x4b   : > { %1390 = vmatpush3.bf16.msra.mxu1 %v1446_v42  ;;  %1035 = vmatprep.mubr.bf16.mxu1 %v453_v53 }
  0x4c   : > { %1383 = vmatprep.subr.bf16.mxu1 %v1447_v63 }
  0x4d   : > { %1020 = vmatmul.mubr.bf16.vlgmr.msra.gmra.mxu0 %v442_v54 }
  0x4e   : > { %1027 = vmatprep.mubr.bf16.mxu0 %v449_v57 }
  0x4f   : > { %1391 = vmatpush3.bf16.msra.mxu1 %v1448_v56 }
  0x52   : > { %1036 = vmatmul.mubr.bf16.vlgmr.msra.gmra.mxu1 %v451_v61 }
  0x53   : > { %1043 = vmatprep.mubr.bf16.mxu1 %v457_v1 }
  0x55   : > { %1028 = vmatmul.mubr.bf16.gmra.mxu0 %v447_v2 }
  0x5a   : > { %1044 = vmatmul.mubr.bf16.gmra.mxu1 %v455_v39 }
  0xed   : > { %v1272_v4 = vpop.f32.mrf.mxu0 }
  0xef   : > { %v1273_v5 = vpop.f32.mrf.mxu0 }
  0xf0   : > { %v1274_v32 = vadd.f32 %v1273_v5, %v1272_v4 }
  0xf1   : > { %v1275_v6 = vpop.f32.mrf.mxu0 }
  0xf2   : > { %v1312_v8 = vpop.f32.mrf.mxu1  ;;  %v892_v38 = vadd.f32 %v1274_v32, %v1741_v33 }
  0xf3   : > { %v1276_v7 = vpop.f32.mrf.mxu0 }
  0xf4   : > { %v1313_v10 = vpop.f32.mrf.mxu1  ;;  %v1277_v35 = vadd.f32 %v1276_v7, %v1275_v6 }
  0xf5   : > { %v1278_v12 = vpop.f32.mrf.mxu0  ;;  %v1314_v43 = vadd.f32 %v1313_v10, %v1312_v8 }
  0xf6   : > { %v1315_v13 = vpop.f32.mrf.mxu1  ;;  %v895_v63 = vadd.f32 %v1277_v35, %v1741_v33 }
  0xf7   : > { %v1279_v9 = vpop.f32.mrf.mxu0  ;;  %v957_v48 = vadd.f32 %v1314_v43, %v892_v38 }
  0xf8   : > { %v1316_v11 = vpop.f32.mrf.mxu1  ;;  %v1280_v45 = vadd.f32 %v1279_v9, %v1278_v12 }
  0xf9   : > { %v1281_v14 = vpop.f32.mrf.mxu0  ;;  %v1317_v56 = vadd.f32 %v1316_v11, %v1315_v13 }
  0xfa   : > { %v1318_v15 = vpop.f32.mrf.mxu1  ;;  %v900_v58 = vadd.f32 %v1280_v45, %v1741_v33 }
  0xfb   : > { %v1282_v16 = vpop.f32.mrf.mxu0  ;;  %v960_v18 = vadd.f32 %v1317_v56, %v895_v63 }
  0xfc   : > { %v1319_v17 = vpop.f32.mrf.mxu1  ;;  %v1283_v50 = vadd.f32 %v1282_v16, %v1281_v14 }
  0xfd   : > { %v1284_v19 = vpop.f32.mrf.mxu0  ;;  %v1320_v2 = vadd.f32 %v1319_v17, %v1318_v15 }
  0xfe   : > { %v1321_v20 = vpop.f32.mrf.mxu1  ;;  %v903_v3 = vadd.f32 %v1283_v50, %v1741_v33 }
  0xff   : > { %v1285_v21 = vpop.f32.mrf.mxu0  ;;  %v965_v13 = vadd.f32 %v1320_v2, %v900_v58 }
 0x100   : > { %v1322_v22 = vpop.f32.mrf.mxu1  ;;  %v1286_v40 = vadd.f32 %v1285_v21, %v1284_v19 }
 0x101   : > { %v1287_v23 = vpop.f32.mrf.mxu0  ;;  %v1323_v9 = vadd.f32 %v1322_v22, %v1321_v20 }
 0x102   : > { %v1324_v24 = vpop.f32.mrf.mxu1  ;;  %v908_v51 = vadd.f32 %v1286_v40, %v1741_v33 }
 0x103   : > { %v1288_v25 = vpop.f32.mrf.mxu0 }
 0x104   : > { %v1325_v26 = vpop.f32.mrf.mxu1  ;;  %v1289_v49 = vadd.f32 %v1288_v25, %v1287_v23 }
 0x105   : > { %v1290_v27 = vpop.f32.mrf.mxu0  ;;  %v1326_v0 = vadd.f32 %v1325_v26, %v1324_v24  ;;  %v968_v26 = vadd.f32 %v1323_v9, %v903_v3 }
 0x106   : > { %v1327_v28 = vpop.f32.mrf.mxu1  ;;  %v911_v61 = vadd.f32 %v1289_v49, %v1741_v33 }
 0x107   : > { %v1291_v29 = vpop.f32.mrf.mxu0  ;;  %v973_v39 = vadd.f32 %v1326_v0, %v908_v51 }
 0x108   : > { %v1328_v30 = vpop.f32.mrf.mxu1  ;;  %v1292_v4 = vadd.f32 %v1291_v29, %v1290_v27 }
 0x109   : > { %v1293_v31 = vpop.f32.mrf.mxu0  ;;  %v1329_v7 = vadd.f32 %v1328_v30, %v1327_v28 }
 0x10a   : > { %v1330_v55 = vpop.f32.mrf.mxu1  ;;  %v916_v23 = vadd.f32 %v1292_v4, %v1741_v33 }
 0x10b   : > { %v1294_v34 = vpop.f32.mrf.mxu0  ;;  %v976_v16 = vadd.f32 %v1329_v7, %v911_v61 }
 0x10c   : > { %v1331_v36 = vpop.f32.mrf.mxu1  ;;  %v1295_v11 = vadd.f32 %v1294_v34, %v1293_v31 }
 0x10d   : > { %v1352_v37 = vpop.f32.mrf.mxu0  ;;  %v1332_v28 = vadd.f32 %v1331_v36, %v1330_v55 }
 0x10e   : > { %v1744_v41 = vpop.f32.mrf.mxu1  ;;  %v919_v29 = vadd.f32 %v1295_v11, %v1741_v33 }
 0x10f   : > { %v1353_v42 = vpop.f32.mrf.mxu0 }
 0x110   : > { %v1354_v44 = vadd.f32 %v1353_v42, %v1352_v37  ;;  %v1334_v46 = vpop.f32.mrf.mxu1  ;;  %v981_v37 = vadd.f32 %v1332_v28, %v916_v23 }
 0x111   : > { %v1355_v47 = vpop.f32.mrf.mxu0  ;;  %v1335_v40 = vadd.f32 %v1334_v46, %v1744_v41 }
 0x112   : > { %v1364_v52 = vpop.f32.mrf.mxu1  ;;  %v1022_v54 = vadd.f32 %v1354_v44, %v957_v48 }
 0x113   : > { %v1356_v53 = vpop.f32.mrf.mxu0  ;;  %v984_v45 = vadd.f32 %v1335_v40, %v919_v29 }
 0x114   : > { %v1357_v57 = vadd.f32 %v1356_v53, %v1355_v47  ;;  %v1365_v59 = vpop.f32.mrf.mxu1  ;;  %v1052_v8 = vmax.f32 %v1022_v54, 0.0 }
 0x115   : > { %v1358_v60 = vpop.f32.mrf.mxu0  ;;  %v1366_v62 = vadd.f32 %v1365_v59, %v1364_v52 }
 0x116   : > { %v1025_v1 = vadd.f32 %v1357_v57, %v960_v18  ;;  %v1367_v5 = vpop.f32.mrf.mxu1 }
 0x117   : > { %v1359_v6 = vpop.f32.mrf.mxu0  ;;  %v1038_v17 = vadd.f32 %v1366_v62, %v973_v39 }
 0x118   : > { %v1053_v10 = vmax.f32 %v1025_v1, 0.0  ;;  %v1360_v12 = vadd.f32 %v1359_v6, %v1358_v60  ;;  %v1368_v14 = vpop.f32.mrf.mxu1 }
 0x119   : > { %v1361_v15 = vpop.f32.mrf.mxu0  ;;  %v1369_v21 = vadd.f32 %v1368_v14, %v1367_v5  ;;  %v1056_v31 = vmax.f32 %v1038_v17, 0.0 }
 0x11a   : > { %v1236_v19 = vpack.c.bf16 %v1053_v10, %v1052_v8  ;;  %v1370_v24 = vpop.f32.mrf.mxu1  ;;  %v1030_v22 = vadd.f32 %v1360_v12, %v965_v13 }
 0x11b   : > { %v1362_v25 = vpop.f32.mrf.mxu0  ;;  %v1041_v20 = vadd.f32 %v1369_v21, %v976_v16 }
 0x11c   : > { %1237 = vst [vmem:[%s1755_s19] sm:$0xff] %v1236_v19   ;;  %v1363_v27 = vadd.f32 %v1362_v25, %v1361_v15  ;;  %v1371_v30 = vpop.f32.mrf.mxu1  ;;  %v1054_v43 = vmax.f32 %v1030_v22, 0.0 }
 0x11d   : > { %v1057_v32 = vmax.f32 %v1041_v20, 0.0  ;;  %v1372_v34 = vadd.f32 %v1371_v30, %v1370_v24 }
 0x11e   : > { %v1033_v35 = vadd.f32 %v1363_v27, %v968_v26  ;;  %v1373_v38 = vpop.f32.mrf.mxu1 }
 0x11f   : > { %v1246_v42 = vpack.c.bf16 %v1057_v32, %v1056_v31  ;;  %v1046_v55 = vadd.f32 %v1372_v34, %v981_v37 }
 0x120   : > { %v1055_v63 = vmax.f32 %v1033_v35, 0.0  ;;  %v1374_v44 = vpop.f32.mrf.mxu1 }
 0x121   : > { %1254 = vst [vmem:[%s1755_s19 + $0x10] sm:$0xff] %v1246_v42   ;;  %v1375_v33 = vadd.f32 %v1374_v44, %v1373_v38  ;;  %v1058_v48 = vmax.f32 %v1046_v55, 0.0 }
 0x122   : > { %v1241_v36 = vpack.c.bf16 %v1055_v63, %v1054_v43 }
 0x123   : > { %v1049_v47 = vadd.f32 %v1375_v33, %v984_v45 }
 0x124   : > { %1253 = vst [vmem:[%s1755_s19 + $0x8] sm:$0xff] %v1241_v36  }
 0x125   : > { %v1059_v56 = vmax.f32 %v1049_v47, 0.0 }
 0x127   : > { %v1251_v49 = vpack.c.bf16 %v1059_v56, %v1058_v48 }
 0x129   : > { %1255 = vst [vmem:[%s1755_s19 + $0x18] sm:$0xff] %v1251_v49  }
 0x12a PF: > { %s13_s12 = sadd.s32 1, %s1455_s12  }
 0x12b   : > { %p10_p4 = scmp.ge.s32.totalorder %s13_s12, 4  }
 0x12d   :  { %12 = sbr.rel (!%p10_p4) target bundleno = 1 (0x1), region = 63 }

// kernel: vqvae_forward.10
= control target key start
LH: loop header
LB: loop body
LE: loop exit
PB: predicated region body
PF: predicated region fallthrough
CT: control target
= control target key end

     0   :  { %v145_v33 = vlaneseq  ;;  %vm312_vm8 = vcmask 7168   ;;  %s633_s1 = inlined_call_operand.vmem [shape: f32[128,128], index: 1, kind: input, shape index: {}]   ;;  %s634_s0 = inlined_call_operand.vmem [shape: f32[32,128], index: 0, kind: input, shape index: {}]   ;;  %s635_s2 = inlined_call_operand.vmem [shape: f32[1,128], index: 2, kind: input, shape index: {}]   ;;  %s636_s5 = inlined_call_operand.vmem [shape: f32[8,128], index: 5, kind: output, shape index: {2}]   ;;  %s637_s4 = inlined_call_operand.vmem [shape: s32[32,1], index: 4, kind: output, shape index: {1}]   ;;  %s638_s3 = inlined_call_operand.vmem [shape: f32[32,128], index: 3, kind: output, shape index: {0}]  }
   0x1   :  { %v36_v0 = vld [vmem:[%s633_s1 + $0x78] sm:$0xff]  ;;  %v35_v1 = vld [vmem:[%s633_s1 + $0x70] sm:$0xff]  ;;  %v34_v2 = vld [vmem:[%s633_s1 + $0x68] sm:$0xff] }
   0x2   :  { %416 = vmatprep.subr.mxu0 %v36_v0  ;;  %454 = vmatprep.subr.mxu1 %v36_v0  ;;  %v17_v3 = vld [vmem:[%s634_s0] sm:$0xff]  ;;  %v32_v5 = vld [vmem:[%s633_s1 + $0x58] sm:$0xff]  ;;  %v31_v6 = vld [vmem:[%s633_s1 + $0x50] sm:$0xff]  ;;  %v589_v34 = vand.u32 127, %v145_v33 }
   0x3   :  { %417 = vmatpush3.xpose.msra.mxu0 %v36_v0  ;;  %455 = vmatpush3.msra.mxu1 %v36_v0  ;;  %v33_v4 = vld [vmem:[%s633_s1 + $0x60] sm:$0xff]  ;;  %v30_v7 = vld [vmem:[%s633_s1 + $0x48] sm:$0xff]  ;;  %v28_v9 = vld [vmem:[%s633_s1 + $0x38] sm:$0xff] }
   0x4   :  { %418 = vmatprep.subr.mxu0 %v35_v1  ;;  %456 = vmatprep.subr.mxu1 %v35_v1  ;;  %v29_v8 = vld [vmem:[%s633_s1 + $0x40] sm:$0xff]  ;;  %v27_v10 = vld [vmem:[%s633_s1 + $0x30] sm:$0xff]  ;;  %v26_v11 = vld [vmem:[%s633_s1 + $0x28] sm:$0xff] }
   0x5   :  { %457 = vmatpush3.msra.mxu1 %v35_v1  ;;  %448 = vmatprep.mubr.f32.mxu0 %v17_v3  ;;  %v25_v12 = vld [vmem:[%s633_s1 + $0x20] sm:$0xff]  ;;  %v24_v13 = vld [vmem:[%s633_s1 + $0x18] sm:$0xff]  ;;  %v23_v14 = vld [vmem:[%s633_s1 + $0x10] sm:$0xff]  ;;  %v494_v3 = vmov 0.0  }
   0x6   :  { %458 = vmatprep.subr.mxu1 %v34_v2  ;;  %v22_v15 = vld [vmem:[%s633_s1 + $0x8] sm:$0xff]  ;;  %v21_v16 = vld [vmem:[%s633_s1] sm:$0xff]  ;;  %v19_v18 = vld [vmem:[%s634_s0 + $0x10] sm:$0xff]  ;;  %354 = vst [vmem:[%s636_s5 + $0x1] sm:$0x7f] %v494_v3 }
   0x7   :  { %419 = vmatpush3.xpose.msra.mxu0 %v35_v1  ;;  %459 = vmatpush3.msra.mxu1 %v34_v2  ;;  %v18_v17 = vld [vmem:[%s634_s0 + $0x8] sm:$0xff]  ;;  %v20_v19 = vld [vmem:[%s634_s0 + $0x18] sm:$0xff]  ;;  %v367_v24 = vld [vmem:[%s635_s2] ss:$0 sm:$0xff] }
   0x8   :  { %420 = vmatprep.subr.mxu0 %v34_v2  ;;  %460 = vmatprep.subr.mxu1 %v33_v4 }
   0x9   :  { %461 = vmatpush3.msra.mxu1 %v33_v4 }
   0xa   :  { %462 = vmatprep.subr.mxu1 %v32_v5 }
   0xb   :  { %421 = vmatpush3.xpose.msra.mxu0 %v34_v2  ;;  %463 = vmatpush3.msra.mxu1 %v32_v5 }
   0xc   :  { %422 = vmatprep.subr.mxu0 %v33_v4  ;;  %464 = vmatprep.subr.mxu1 %v31_v6 }
   0xd   :  { %465 = vmatpush3.msra.mxu1 %v31_v6 }
   0xe   :  { %466 = vmatprep.subr.mxu1 %v30_v7 }
   0xf   :  { %423 = vmatpush3.xpose.msra.mxu0 %v33_v4  ;;  %467 = vmatpush3.msra.mxu1 %v30_v7 }
  0x10   :  { %424 = vmatprep.subr.mxu0 %v32_v5  ;;  %468 = vmatprep.subr.mxu1 %v29_v8 }
  0x11   :  { %469 = vmatpush3.msra.mxu1 %v29_v8 }
  0x12   :  { %470 = vmatprep.subr.mxu1 %v28_v9 }
  0x13   :  { %425 = vmatpush3.xpose.msra.mxu0 %v32_v5  ;;  %471 = vmatpush3.msra.mxu1 %v28_v9 }
  0x14   :  { %426 = vmatprep.subr.mxu0 %v31_v6  ;;  %472 = vmatprep.subr.mxu1 %v27_v10 }
  0x15   :  { %473 = vmatpush3.msra.mxu1 %v27_v10 }
  0x16   :  { %474 = vmatprep.subr.mxu1 %v26_v11 }
  0x17   :  { %427 = vmatpush3.xpose.msra.mxu0 %v31_v6  ;;  %475 = vmatpush3.msra.mxu1 %v26_v11 }
  0x18   :  { %428 = vmatprep.subr.mxu0 %v30_v7  ;;  %476 = vmatprep.subr.mxu1 %v25_v12 }
  0x19   :  { %477 = vmatpush3.msra.mxu1 %v25_v12 }
  0x1a   :  { %478 = vmatprep.subr.mxu1 %v24_v13 }
  0x1b   :  { %429 = vmatpush3.xpose.msra.mxu0 %v30_v7  ;;  %479 = vmatpush3.msra.mxu1 %v24_v13 }
  0x1c   :  { %430 = vmatprep.subr.mxu0 %v29_v8  ;;  %480 = vmatprep.subr.mxu1 %v23_v14 }
  0x1d   :  { %481 = vmatpush3.msra.mxu1 %v23_v14 }
  0x1e   :  { %482 = vmatprep.subr.mxu1 %v22_v15 }
  0x1f   :  { %431 = vmatpush3.xpose.msra.mxu0 %v29_v8  ;;  %483 = vmatpush3.msra.mxu1 %v22_v15 }
  0x20   :  { %432 = vmatprep.subr.mxu0 %v28_v9  ;;  %484 = vmatprep.subr.mxu1 %v21_v16 }
  0x21   :  { %485 = vmatpush3.msra.mxu1 %v21_v16 }
  0x23   :  { %433 = vmatpush3.xpose.msra.mxu0 %v28_v9 }
  0x24   :  { %434 = vmatprep.subr.mxu0 %v27_v10 }
  0x27   :  { %435 = vmatpush3.xpose.msra.mxu0 %v27_v10 }
  0x28   :  { %436 = vmatprep.subr.mxu0 %v26_v11 }
  0x2b   :  { %437 = vmatpush3.xpose.msra.mxu0 %v26_v11 }
  0x2c   :  { %438 = vmatprep.subr.mxu0 %v25_v12 }
  0x2f   :  { %439 = vmatpush3.xpose.msra.mxu0 %v25_v12 }
  0x30   :  { %440 = vmatprep.subr.mxu0 %v24_v13 }
  0x33   :  { %441 = vmatpush3.xpose.msra.mxu0 %v24_v13 }
  0x34   :  { %442 = vmatprep.subr.mxu0 %v23_v14 }
  0x37   :  { %443 = vmatpush3.xpose.msra.mxu0 %v23_v14 }
  0x38   :  { %444 = vmatprep.subr.mxu0 %v22_v15 }
  0x3b   :  { %445 = vmatpush3.xpose.msra.mxu0 %v22_v15 }
  0x3c   :  { %446 = vmatprep.subr.mxu0 %v21_v16 }
  0x3f   :  { %447 = vmatpush3.xpose.msra.mxu0 %v21_v16 }
  0x42   :  { %449 = vmatmul.mubr.f32.vlgmr.msra.gmra.mxu0 %v18_v17 }
  0x43   :  { %451 = vmatprep.mubr.f32.mxu0 %v19_v18  ;;  %v495_v18 = vmov 1.0  }
  0x46   :  { %452 = vmatmul.mubr.f32.gmra.mxu0 %v20_v19 }
 0x102   :  { %v450_v20 = vpop.f32.mrf.mxu0 }
 0x103   :  { %v124_v25 = vmul.f32 2.0, %v450_v20 }
 0x104   :  { %v103_v21 = vpop.f32.mrf.mxu0 }
 0x105   :  { %v123_v22 = vmul.f32 2.0, %v103_v21  ;;  %v134_v30 = vsub.f32 %v367_v24, %v124_v25 }
 0x106   :  { %v453_v23 = vpop.f32.mrf.mxu0 }
 0x107   :  { %v133_v26 = vsub.f32 %v367_v24, %v123_v22  ;;  %v126_v29 = vmul.f32 2.0, %v453_v23 }
 0x108   :  { %v113_v27 = vpop.f32.mrf.mxu0 }
 0x109   :  { %v125_v28 = vmul.f32 2.0, %v113_v27  ;;  %137 = vmin.xlane.f32.xlu0 %v133_v26  ;;  %v136_v32 = vsub.f32 %v367_v24, %v126_v29 }
 0x10b   :  { %v135_v31 = vsub.f32 %v367_v24, %v125_v28 }
 0x10d   :  { %139 = vmin.xlane.f32.xlu0 %v134_v30  ;;  %141 = vmin.xlane.f32.xlu1 %v135_v31 }
 0x111   :  { %143 = vmin.xlane.f32.xlu1 %v136_v32 }
 0x192   :  { %v138_v35 = vpop.xlane.xlu0 %137 }
 0x193   :  { %vm147_vm0 = vcmp.eq.f32.partialorder %v133_v26, %v138_v35 }
 0x194   :  { %v151_v36 = vsel %vm147_vm0, %v589_v34, 128 }
 0x195   :  { %v156_v37 = vshra.s32 %v151_v36, 16  ;;  %v155_v51 = vand.u32 65535, %v151_v36 }
 0x196   :  { %v140_v38 = vpop.xlane.xlu0 %139  ;;  %v142_v39 = vpop.xlane.xlu1 %141 }
 0x197   :  { %vm148_vm1 = vcmp.eq.f32.partialorder %v134_v30, %v140_v38  ;;  %vm149_vm2 = vcmp.eq.f32.partialorder %v135_v31, %v142_v39  ;;  %v158_v40 = vcvt.s32.f32 %v156_v37  ;;  %v157_v55 = vcvt.s32.f32 %v155_v51 }
 0x198   :  { %v152_v41 = vsel %vm148_vm1, %v589_v34, 128  ;;  %v153_v42 = vsel %vm149_vm2, %v589_v34, 128 }
 0x199   :  { %159 = vmin.xlane.f32.xlu0 %v158_v40  ;;  %v170_v43 = vshra.s32 %v152_v41, 16  ;;  %v184_v44 = vshra.s32 %v153_v42, 16  ;;  %v169_v52 = vand.u32 65535, %v152_v41  ;;  %v183_v53 = vand.u32 65535, %v153_v42 }
 0x19a   :  { %v144_v45 = vpop.xlane.xlu1 %143 }
 0x19b   :  { %vm150_vm3 = vcmp.eq.f32.partialorder %v136_v32, %v144_v45  ;;  %v172_v46 = vcvt.s32.f32 %v170_v43  ;;  %v186_v47 = vcvt.s32.f32 %v184_v44  ;;  %v185_v60 = vcvt.s32.f32 %v183_v53 }
 0x19c   :  { %v154_v48 = vsel %vm150_vm3, %v589_v34, 128  ;;  %v171_v61 = vcvt.s32.f32 %v169_v52 }
 0x19d   :  { %173 = vmin.xlane.f32.xlu1 %v172_v46  ;;  %187 = vmin.xlane.f32.xlu0 %v186_v47  ;;  %v198_v49 = vshra.s32 %v154_v48, 16  ;;  %v197_v57 = vand.u32 65535, %v154_v48 }
 0x19f   :  { %v200_v50 = vcvt.s32.f32 %v198_v49  ;;  %v199_v1 = vcvt.s32.f32 %v197_v57 }
 0x1a1   :  { %201 = vmin.xlane.f32.xlu1 %v200_v50 }
 0x222   :  { %v160_v54 = vpop.xlane.xlu0 %159 }
 0x223   :  { %vm161_vm4 = vcmp.eq.f32.partialorder %v158_v40, %v160_v54  ;;  %v166_v4 = vcvt.f32.s32 %v160_v54 }
 0x224   :  { %v162_v56 = vsel %vm161_vm4, %v157_v55, inf }
 0x225   :  { %163 = vmin.xlane.f32.xlu0 %v162_v56  ;;  %v167_v8 = vshll.u32 %v166_v4, 16 }
 0x226   :  { %v188_v58 = vpop.xlane.xlu0 %187  ;;  %v174_v59 = vpop.xlane.xlu1 %173 }
 0x227   :  { %vm189_vm5 = vcmp.eq.f32.partialorder %v186_v47, %v188_v58  ;;  %vm175_vm6 = vcmp.eq.f32.partialorder %v172_v46, %v174_v59  ;;  %v194_v5 = vcvt.f32.s32 %v188_v58  ;;  %v180_v6 = vcvt.f32.s32 %v174_v59 }
 0x228   :  { %v190_v62 = vsel %vm189_vm5, %v185_v60, inf  ;;  %v176_v63 = vsel %vm175_vm6, %v171_v61, inf }
 0x229   :  { %191 = vmin.xlane.f32.xlu0 %v190_v62  ;;  %177 = vmin.xlane.f32.xlu1 %v176_v63  ;;  %v195_v11 = vshll.u32 %v194_v5, 16  ;;  %v181_v12 = vshll.u32 %v180_v6, 16 }
 0x22a   :  { %v202_v0 = vpop.xlane.xlu1 %201 }
 0x22b   :  { %vm203_vm7 = vcmp.eq.f32.partialorder %v200_v50, %v202_v0  ;;  %v208_v15 = vcvt.f32.s32 %v202_v0 }
 0x22c   :  { %v204_v2 = vsel %vm203_vm7, %v199_v1, inf }
 0x22d   :  { %205 = vmin.xlane.f32.xlu1 %v204_v2  ;;  %v209_v22 = vshll.u32 %v208_v15, 16 }
 0x2ae   :  { %v164_v7 = vpop.xlane.xlu0 %163 }
 0x2af   :  { %v165_v9 = vcvt.f32.s32 %v164_v7 }
 0x2b1   :  { %v168_v10 = vadd.s32 %v167_v8, %v165_v9 }
 0x2b2   :  { %v192_v13 = vpop.xlane.xlu0 %191  ;;  %v178_v14 = vpop.xlane.xlu1 %177 }
 0x2b3   :  { %v193_v16 = vcvt.f32.s32 %v192_v13  ;;  %v179_v17 = vcvt.f32.s32 %v178_v14  ;;  %vm211_vm9 = vcmp.eq.s32.totalorder %v589_v34, %v168_v10  ;;  %313 = vst.msk [vmem:[%s637_s4] sm:$0xff] %vm312_vm8, %v168_v10 }
 0x2b4   :  { %486 = vmatprep.mubr.msk.f32.mxu1 %vm211_vm9, %v495_v18  ;;  %v368_v24 = vsel %vm211_vm9, 1.0, %v494_v3 }
 0x2b5   :  { %v196_v19 = vadd.s32 %v195_v11, %v193_v16  ;;  %v182_v20 = vadd.s32 %v181_v12, %v179_v17 }
 0x2b6   :  { %v206_v21 = vpop.xlane.xlu1 %205 }
 0x2b7   :  { %315 = vst.msk [vmem:[%s637_s4 + $0x10] sm:$0xff] %vm312_vm8, %v196_v19  ;;  %314 = vst.msk [vmem:[%s637_s4 + $0x8] sm:$0xff] %vm312_vm8, %v182_v20  ;;  %vm212_vm10 = vcmp.eq.s32.totalorder %v589_v34, %v182_v20  ;;  %v207_v23 = vcvt.f32.s32 %v206_v21  ;;  %vm213_vm11 = vcmp.eq.s32.totalorder %v589_v34, %v196_v19 }
 0x2b8   :  { %v369_v25 = vsel %vm212_vm10, 1.0, %v494_v3  ;;  %487 = vmatmul.mubr.msk.f32.vlgmr.msra.gmra.mxu1 %vm212_vm10, %v495_v18  ;;  %v370_v28 = vsel %vm213_vm11, 1.0, %v494_v3 }
 0x2b9   :  { %v344_v26 = vadd.f32 %v369_v25, %v368_v24  ;;  %v210_v27 = vadd.s32 %v209_v22, %v207_v23  ;;  %489 = vmatprep.mubr.msk.f32.mxu1 %vm213_vm11, %v495_v18 }
 0x2bb   :  { %316 = vst.msk [vmem:[%s637_s4 + $0x18] sm:$0xff] %vm312_vm8, %v210_v27  ;;  %v345_v29 = vadd.f32 %v370_v28, %v344_v26  ;;  %vm214_vm12 = vcmp.eq.s32.totalorder %v589_v34, %v210_v27 }
 0x2bc   :  { %v371_v30 = vsel %vm214_vm12, 1.0, %v494_v3  ;;  %490 = vmatmul.mubr.msk.f32.gmra.mxu1 %vm214_vm12, %v495_v18 }
 0x2bd   :  { %v346_v31 = vadd.f32 %v371_v30, %v345_v29 }
 0x2bf   :  { %v347_v32 = vrot.slane %v346_v31, 4 }
 0x2c1   :  { %v348_v33 = vadd.f32 %v347_v32, %v346_v31 }
 0x2c3   :  { %v349_v35 = vrot.slane %v348_v33, 2 }
 0x2c5   :  { %v350_v36 = vadd.f32 %v349_v35, %v348_v33 }
 0x2c7   :  { %v351_v37 = vrot.slane %v350_v36, 1 }
 0x2c9   :  { %v352_v38 = vadd.f32 %v351_v37, %v350_v36 }
 0x2cb   :  { %353 = vst [vmem:[%s636_s5] sm:$0x1] %v352_v38 }
 0x378   :  { %v488_v39 = vpop.f32.mrf.mxu1 }
 0x379   :  { %309 = vst [vmem:[%s638_s3 + $0x8] sm:$0xff] %v488_v39 }
 0x37a   :  { %v289_v40 = vpop.f32.mrf.mxu1 }
 0x37b   :  { %308 = vst [vmem:[%s638_s3] sm:$0xff] %v289_v40 }
 0x37c   :  { %v491_v34 = vpop.f32.mrf.mxu1 }
 0x37d   :  { %311 = vst [vmem:[%s638_s3 + $0x18] sm:$0xff] %v491_v34 }
 0x37e   :  { %v299_v41 = vpop.f32.mrf.mxu1 }
 0x37f   :  { %310 = vst [vmem:[%s638_s3 + $0x10] sm:$0xff] %v299_v41 }

// kernel: squeeze.1
= control target key start
LH: loop header
LB: loop body
LE: loop exit
PB: predicated region body
PF: predicated region fallthrough
CT: control target
= control target key end

     0   :  { %s77_s0 = inlined_call_operand.vmem [shape: s32[32], index: 0, kind: input, shape index: {}]   ;;  %s78_s1 = inlined_call_operand.hbm [shape: s32[2,16], index: 1, kind: output, shape index: {}]  }
   0x1   :  { %v6_v0 = vld [vmem:[%s77_s0] sm:$0x1] }
   0x2   :  { %2 = vsyncpa [#allocation1], 0  ;;  %7 = vst [vmem:[#allocation3] sm:$0x1] %v6_v0  ;;  %vm9_vm0 = vcmask 130048   ;;  %s59_s0 = smov 112  }
   0x3   :  { %s60_s8 = smov [#allocation0]  }
   0x4   :  { %s29_s9 = sshll.u32 %s60_s8, 4  ;;  %s30_s9 = int_to_ptr.vmem [resolvable:$true] %s29_s9 }
   0x5   :  { %s37_s10 = scalar_lea.vmem %s30_s9, 32  ;;  %p42_p1 = scmp.lt.s32.totalorder %s30_s9, %s30_s9 }
   0x6   :  { %p38_p0 = scmp.ne.s32.totalorder %s30_s9, %s37_s10  ;;  %p43_p2 = scmp.lt.s32.totalorder %s37_s10, %s37_s10 }
   0x8   :  { %p44_p3 = por %p43_p2, %p42_p1 }
   0x9   :  { %v11_v1 = vld [vmem:[#allocation3] sm:$0x1]  }
   0xa   :  { %v8_v2 = vld [vmem:[#allocation3] sm:$0x1]   ;;  %12 = vrot.lane.b32.xlu0 %v11_v1, %s59_s0  ;;  %p45_p4 = pnand %p44_p3, %p38_p0 }
   0xb   :  { %10 = vst.msk [vmem:[#allocation2] sm:$0x1] %vm9_vm0, %v8_v2  }
  0x7c   :  { %v13_v3 = vpop.permute.xlu0 %12  }
  0x7d   :  { %16 = vst.msk [vmem:[#allocation2 + $0x1] sm:$0x1] %vm9_vm0, %v13_v3  }
  0x84   :  { %v21_v4 = vld [vmem:[#allocation2] sm:$0x3] }
  0x85   :  { %24 = vst [vmem:[#allocation0] sm:$0x3] %v21_v4 }
  0x86   :  { %48 = shalt.err (!%p45_p4)
}
  0x87   :  { %32 = dma.vmem_to_hbm [thread:$0]  %s30_s9, 32, %s78_s1, [#allocation1]  }
  0x88   :  { %57 = dma.done.wait [#allocation1], 32  }
  0x89   :  { %58 = vsyncadd [#allocation1], 4294967264 }
  0x8a   :  { %34 = vsyncpa [#allocation1], 1 }

// kernel: vqvae_forward.8
= control target key start
LH: loop header
LB: loop body
LE: loop exit
PB: predicated region body
PF: predicated region fallthrough
CT: control target
= control target key end

     0   :  { %s2518_s17 = smov 0   ;;  %s2913_s0 = inlined_call_operand.vmem [shape: bf16[2,32,256], index: 0, kind: input, shape index: {}]   ;;  %s2914_s1 = inlined_call_operand.vmem [shape: bf16[512,128], index: 1, kind: input, shape index: {}]   ;;  %s2915_s2 = inlined_call_operand.vmem [shape: f32[1,128], index: 2, kind: input, shape index: {}]   ;;  %s2916_s3 = inlined_call_operand.vmem [shape: bf16[384,128], index: 3, kind: input, shape index: {}]   ;;  %s2917_s4 = inlined_call_operand.vmem [shape: f32[1,128], index: 4, kind: input, shape index: {}]   ;;  %s2918_s5 = inlined_call_operand.vmem [shape: bf16[128,128], index: 5, kind: input, shape index: {}]   ;;  %s2919_s6 = inlined_call_operand.vmem [shape: f32[1,128], index: 6, kind: input, shape index: {}]   ;;  %s2920_s7 = inlined_call_operand.vmem [shape: bf16[384,128], index: 7, kind: input, shape index: {}]   ;;  %s2921_s8 = inlined_call_operand.vmem [shape: f32[1,128], index: 8, kind: input, shape index: {}]   ;;  %s2922_s9 = inlined_call_operand.vmem [shape: bf16[128,128], index: 9, kind: input, shape index: {}]   ;;  %s2923_s10 = inlined_call_operand.vmem [shape: f32[1,128], index: 10, kind: input, shape index: {}]   ;;  %s2924_s11 = inlined_call_operand.vmem [shape: bf16[2,32,128], index: 11, kind: output, shape index: {}]  }
   0x1 LB: > { %s1979_s18 = sadd.s32 4294967295, %s2455_s17   ;;  %p1983_p0 = scmp.ge.s32.totalorder %s2455_s17, 1  ;;  %s2455_s17 = sphi %s2518_s17, %s21_s17  }
   0x2   : > { %p337_p1 = scmp.lt.s32.totalorder %s2455_s17, 3 }
   0x4   : > { %p338_p2 = pnand %p1983_p0, %p337_p1 }
   0x5   : > { %p377_p3 = scmp.lt.s32.totalorder (!%p338_p2), %s1979_s18, 1 }
   0x6   : > { %341 = sbr.rel (%p338_p2) target bundleno = 1135 (0x46f), region = 64 }
   0xb   : > { %v2353_v0 = vld [vmem:[%s2914_s1 + $0x78] sm:$0xff]   ;;  %v400_v2 = vlaneseq  ;;  %v2357_v5 = vld [vmem:[%s2914_s1 + $0x70] sm:$0xff]   ;;  %v2457_v9 = vmov 0.0   ;;  %v2361_v10 = vld [vmem:[%s2914_s1 + $0x68] sm:$0xff]   ;;  %s2926_s18 = smov (!%p377_p3, %s1979_s18), 1  ;;  %vm417_vm1 = vcmask 1040384  }
   0xc   : > { %v2354_v1 = vld [vmem:[%s2914_s1 + $0xf8] sm:$0xff]   ;;  %2112 = vmatprep.subr.bf16.mxu0 %v2353_v0  ;;  %v2358_v6 = vld [vmem:[%s2914_s1 + $0xf0] sm:$0xff]   ;;  %1400 = vst [vmem:[#allocation2 + $0x40] sm:$0x38] %v2457_v9  ;;  %v2362_v11 = vld [vmem:[%s2914_s1 + $0xe8] sm:$0xff]   ;;  %s2095_s22 = sshll.u32 %s2926_s18, 5 }
   0xd   : > { %v2355_v3 = vld [vmem:[%s2914_s1 + $0x38] sm:$0xff]   ;;  %2140 = vmatprep.subr.bf16.mxu1 %v2354_v1  ;;  %vm402_vm0 = vcmp.lt.s32.totalorder %v400_v2, 256  ;;  %v2359_v7 = vld [vmem:[%s2914_s1 + $0x30] sm:$0xff]   ;;  %v2363_v12 = vld [vmem:[%s2914_s1 + $0x28] sm:$0xff]   ;;  %s381_s12 = scalar_lea.vmem %s2913_s0, %s2095_s22  ;;  %vm526_vm2 = vcmask 1046528   ;;  %vm1405_vm4 = vcmask 1042432  }
   0xe   : > { %v2356_v4 = vld [vmem:[%s2914_s1 + $0xb8] sm:$0xff]   ;;  %2113 = vmatpush3.bf16.msra.mxu0 %v2355_v3  ;;  %v2360_v8 = vld [vmem:[%s2914_s1 + $0xb0] sm:$0xff]   ;;  %404 = vst.msk [vmem:[#allocation2] ss:$8 sm:$0x3] %vm402_vm0, %v2457_v9  ;;  %v2364_v13 = vld [vmem:[%s2914_s1 + $0xa8] sm:$0xff]  }
   0xf   : > { %2141 = vmatpush3.bf16.msra.mxu1 %v2356_v4  ;;  %2114 = vmatprep.subr.bf16.mxu0 %v2357_v5  ;;  %407 = vst.msk [vmem:[#allocation2 + $0x41] ss:$8 sm:$0x3] %vm402_vm0, %v2457_v9  ;;  %899 = vst [vmem:[#allocation2] sm:$0x1] %v2457_v9  ;;  %v2365_v14 = vld [vmem:[%s2914_s1 + $0x60] sm:$0xff]  }
  0x10   : > { %2142 = vmatprep.subr.bf16.mxu1 %v2358_v6  ;;  %v2366_v15 = vld [vmem:[%s2914_s1 + $0xe0] sm:$0xff]   ;;  %v2369_v18 = vld [vmem:[%s2914_s1 + $0x58] sm:$0xff]   ;;  %v2373_v22 = vld [vmem:[%s2914_s1 + $0x50] sm:$0xff]   ;;  %vm478_vm3 = vsmask.f32 7424  ;;  %vm1469_vm5 = vcmask 1044480  }
  0x11   : > { %v2367_v16 = vld [vmem:[%s2914_s1 + $0x20] sm:$0xff]   ;;  %v2370_v19 = vld [vmem:[%s2914_s1 + $0xd8] sm:$0xff]   ;;  %v2374_v23 = vld [vmem:[%s2914_s1 + $0xd0] sm:$0xff]   ;;  %vm1437_vm6 = vsmask.f32 6400  ;;  %s2096_s21 = sshll.u32 %s2926_s18, 4 }
  0x12   : > { %2115 = vmatpush3.bf16.msra.mxu0 %v2359_v7  ;;  %v2368_v17 = vld [vmem:[%s2914_s1 + $0xa0] sm:$0xff]   ;;  %v2371_v20 = vld [vmem:[%s2914_s1 + $0x18] sm:$0xff]   ;;  %v2375_v24 = vld [vmem:[%s2914_s1 + $0x10] sm:$0xff]   ;;  %s386_s24 = scalar_lea.vmem %s2924_s11, %s2096_s21 }
  0x13   : > { %2143 = vmatpush3.bf16.msra.mxu1 %v2360_v8  ;;  %2116 = vmatprep.subr.bf16.mxu0 %v2361_v10  ;;  %v2372_v21 = vld [vmem:[%s2914_s1 + $0x98] sm:$0xff]   ;;  %v2376_v25 = vld [vmem:[%s2914_s1 + $0x90] sm:$0xff]   ;;  %v2377_v26 = vld [vmem:[%s2914_s1 + $0x48] sm:$0xff]  }
  0x14   : > { %2144 = vmatprep.subr.bf16.mxu1 %v2362_v11  ;;  %v2378_v27 = vld [vmem:[%s2914_s1 + $0xc8] sm:$0xff]   ;;  %v2381_v30 = vld [vmem:[%s2914_s1 + $0x40] sm:$0xff]   ;;  %v390_v36 = vld [vmem:[%s381_s12 + $0x10] sm:$0xff] }
  0x15   : > { %v2379_v28 = vld [vmem:[%s2914_s1 + $0x8] sm:$0xff]   ;;  %v2382_v31 = vld [vmem:[%s2914_s1 + $0xc0] sm:$0xff]   ;;  %v391_v37 = vld [vmem:[%s381_s12 + $0x18] sm:$0xff]  ;;  %v396_v40 = vunpack.c.l.bf16 %v390_v36  ;;  %v397_v44 = vunpack.c.h.bf16 %v390_v36 }
  0x16   : > { %2117 = vmatpush3.bf16.msra.mxu0 %v2363_v12  ;;  %v2380_v29 = vld [vmem:[%s2914_s1 + $0x88] sm:$0xff]   ;;  %v2383_v32 = vld [vmem:[%s2914_s1] sm:$0xff]   ;;  %v398_v42 = vunpack.c.l.bf16 %v391_v37  ;;  %v399_v45 = vunpack.c.h.bf16 %v391_v37 }
  0x17   : > { %2145 = vmatpush3.bf16.msra.mxu1 %v2364_v13  ;;  %2118 = vmatprep.subr.bf16.mxu0 %v2365_v14  ;;  %v2384_v33 = vld [vmem:[%s2914_s1 + $0x80] sm:$0xff]   ;;  %v389_v35 = vld [vmem:[%s381_s12 + $0x8] sm:$0xff]  ;;  %v424_v48 = vrot.slane %v396_v40, 7  ;;  %v426_v52 = vrot.slane %v397_v44, 7  ;;  %v2385_v44 = vld [vmem:[%s2916_s3 + $0xb8] sm:$0xff]  }
  0x18   : > { %2146 = vmatprep.subr.bf16.mxu1 %v2366_v15  ;;  %v388_v34 = vld [vmem:[%s381_s12] sm:$0xff]  ;;  %v394_v39 = vunpack.c.l.bf16 %v389_v35  ;;  %v395_v43 = vunpack.c.h.bf16 %v389_v35  ;;  %v428_v50 = vrot.slane %v398_v42, 7  ;;  %v430_v53 = vrot.slane %v399_v45, 7  ;;  %v2386_v42 = vld [vmem:[%s2916_s3 + $0x78] sm:$0xff]   ;;  %v2389_v45 = vld [vmem:[%s2916_s3 + $0x70] sm:$0xff]  }
  0x19   : > { %v392_v38 = vunpack.c.l.bf16 %v388_v34  ;;  %v393_v41 = vunpack.c.h.bf16 %v388_v34 }
  0x1a   : > { %2119 = vmatpush3.bf16.msra.mxu0 %v2367_v16  ;;  %v420_v47 = vrot.slane %v394_v39, 7  ;;  %v422_v51 = vrot.slane %v395_v43, 7  ;;  %v429_v55 = vsel %vm417_vm1, %v424_v48, %v428_v50  ;;  %450 = vst [vmem:[#allocation2 + $0x40] sm:$0x1] %v428_v50  ;;  %v431_v58 = vsel %vm417_vm1, %v426_v52, %v430_v53  ;;  %451 = vst [vmem:[#allocation2 + $0x48] sm:$0x1] %v430_v53 }
  0x1b   : > { %2147 = vmatpush3.bf16.msra.mxu1 %v2368_v17  ;;  %2120 = vmatprep.subr.bf16.mxu0 %v2369_v18  ;;  %v418_v46 = vrot.slane %v392_v38, 7  ;;  %v419_v49 = vrot.slane %v393_v41, 7  ;;  %v2387_v43 = vld [vmem:[%s2916_s3 + $0x38] sm:$0xff]   ;;  %v2391_v50 = vld [vmem:[%s2916_s3 + $0xa8] sm:$0xff]   ;;  %v2394_v53 = vld [vmem:[%s2916_s3 + $0xa0] sm:$0xff]  }
  0x1c   : > { %2148 = vmatprep.subr.bf16.mxu1 %v2370_v19  ;;  %v425_v54 = vsel %vm417_vm1, %v420_v47, %v424_v48  ;;  %v427_v57 = vsel %vm417_vm1, %v422_v51, %v426_v52  ;;  %v2392_v48 = vld [vmem:[%s2916_s3 + $0x68] sm:$0xff]   ;;  %v2396_v52 = vld [vmem:[%s2916_s3 + $0x20] sm:$0xff]  }
  0x1d   : > { %442 = vst [vmem:[#allocation2] sm:$0xfe] %v418_v46  ;;  %443 = vst [vmem:[#allocation2 + $0x8] sm:$0xfe] %v419_v49  ;;  %v423_v56 = vsel %vm417_vm1, %v419_v49, %v422_v51  ;;  %v464_v59 = vpack.c.bf16 %v429_v55, %v425_v54  ;;  %v472_v60 = vpack.c.bf16 %v431_v58, %v427_v57  ;;  %v2393_v49 = vld [vmem:[%s2916_s3 + $0x28] sm:$0xff]   ;;  %v2395_v51 = vld [vmem:[%s2916_s3 + $0x60] sm:$0xff]  }
  0x1e   : > { %2121 = vmatpush3.bf16.msra.mxu0 %v2371_v20  ;;  %v421_v63 = vsel %vm417_vm1, %v418_v46, %v420_v47  ;;  %v2390_v46 = vld [vmem:[%s2916_s3 + $0x30] sm:$0xff]   ;;  %v2398_v54 = vld [vmem:[%s2916_s3 + $0x58] sm:$0xff]  }
  0x1f   : > { %2149 = vmatpush3.bf16.msra.mxu1 %v2372_v21  ;;  %2122 = vmatprep.subr.bf16.mxu0 %v2373_v22  ;;  %v487_v61 = vshll.u32 %v464_v59, 16  ;;  %v509_v62 = vshll.u32 %v472_v60, 16  ;;  %v528_v0 = vrot.slane %v464_v59, 1  ;;  %v491_v1 = vshrl.u32 %v464_v59, 16  ;;  %v2388_v47 = vld [vmem:[%s2916_s3 + $0xb0] sm:$0xff]   ;;  %v2399_v55 = vld [vmem:[%s2916_s3 + $0x18] sm:$0xff]  }
  0x20   : > { %2150 = vmatprep.subr.bf16.mxu1 %v2374_v23  ;;  %v2401_v57 = vld [vmem:[%s2916_s3 + $0x50] sm:$0xff]  }
  0x21   : > { %v489_v3 = vrot.slane %v487_v61, 1  ;;  %v511_v5 = vrot.slane %v509_v62, 1  ;;  %v462_v10 = vld [vmem:[#allocation2 + $0x40] sm:$0x1]  ;;  %v470_v15 = vld [vmem:[#allocation2 + $0x48] sm:$0x1] }
  0x22   : > { %2123 = vmatpush3.bf16.msra.mxu0 %v2375_v24  ;;  %v475_v11 = vld [vmem:[#allocation2 + $0x40] sm:$0x3]  ;;  %v465_v13 = vpack.c.bf16 %v462_v10, %v462_v10  ;;  %v473_v20 = vpack.c.bf16 %v470_v15, %v470_v15  ;;  %v2402_v58 = vld [vmem:[%s2916_s3 + $0x10] sm:$0xff]   ;;  %v2403_v61 = vld [vmem:[%s2916_s3 + $0x88] sm:$0xff]  }
  0x23   : > { %2151 = vmatpush3.bf16.msra.mxu1 %v2376_v25  ;;  %2124 = vmatprep.subr.bf16.mxu0 %v2377_v26  ;;  %v477_v14 = vpack.c.bf16 %v475_v11, %v475_v11  ;;  %900 = vst [vmem:[#allocation2 + $0x41] sm:$0x1] %v2457_v9  ;;  %v2400_v59 = vld [vmem:[%s2916_s3 + $0x90] sm:$0xff]   ;;  %v2405_v62 = vld [vmem:[%s2916_s3 + $0x8] sm:$0xff]  }
  0x24   : > { %2152 = vmatprep.subr.bf16.mxu1 %v2378_v27  ;;  %v458_v2 = vld [vmem:[#allocation2] sm:$0xfe]  ;;  %v466_v8 = vld [vmem:[#allocation2 + $0x8] sm:$0xfe]  ;;  %v495_v23 = vshll.u32 %v465_v13, 16  ;;  %v493_v27 = vor.u32 %v491_v1, %v489_v3 }
  0x25   : > { %v474_v4 = vld [vmem:[#allocation2] sm:$0xfc]  ;;  %v463_v6 = vpack.c.bf16 %v421_v63, %v458_v2  ;;  %v471_v12 = vpack.c.bf16 %v423_v56, %v466_v8  ;;  %v452_v19 = vld [vmem:[#allocation2 + $0x8] sm:$0xff]  ;;  %v530_v24 = vrot.slane %v477_v14, 1  ;;  %v2724_v2 = vld [vmem:[%s2918_s5 + $0x38] sm:$0xff]  }
  0x26   : > { %2125 = vmatpush3.bf16.msra.mxu0 %v2379_v28  ;;  %v476_v7 = vpack.c.bf16 %v421_v63, %v474_v4  ;;  %v517_v28 = vshll.u32 %v473_v20, 16  ;;  %v2407_v63 = vld [vmem:[%s2916_s3 + $0x40] sm:$0xff]  }
  0x27   : > { %2153 = vmatpush3.bf16.msra.mxu1 %v2380_v29  ;;  %2126 = vmatprep.subr.bf16.mxu0 %v2381_v30  ;;  %v480_v16 = vshrl.u32 %v463_v6, 16  ;;  %v482_v17 = vshll.u32 %v463_v6, 16  ;;  %v502_v21 = vshrl.u32 %v471_v12, 16  ;;  %v504_v22 = vshll.u32 %v471_v12, 16  ;;  %v2406_v1 = vld [vmem:[%s2916_s3 + $0x80] sm:$0xff]  }
  0x28   : > { %2154 = vmatprep.subr.bf16.mxu1 %v2382_v31  ;;  %v527_v18 = vrot.slane %v476_v7, 1  ;;  %v497_v30 = vrot.slane %v495_v23, 1  ;;  %v519_v34 = vrot.slane %v517_v28, 1  ;;  %v531_v38 = vsel %vm526_vm2, %v528_v0, %v530_v24 }
  0x29   : > { %v484_v25 = vrot.slane %v482_v17, 1  ;;  %v506_v29 = vrot.slane %v504_v22, 1 }
  0x2a   : > { %2127 = vmatpush3.bf16.msra.mxu0 %v2383_v32  ;;  %v529_v26 = vsel %vm526_vm2, %v527_v18, %v528_v0  ;;  %v456_v32 = vpack.c.bf16 %v423_v56, %v452_v19  ;;  %v498_v37 = vsel %vm478_vm3, %v493_v27, %v497_v30  ;;  %v2397_v56 = vld [vmem:[%s2916_s3 + $0x98] sm:$0xff]   ;;  %v2408_v0 = vld [vmem:[%s2916_s3] sm:$0xff]  }
  0x2b   : > { %2155 = vmatpush3.bf16.msra.mxu1 %v2384_v33  ;;  %878 = vmatprep.mubr.bf16.mxu1 %v529_v26  ;;  %v485_v31 = vor.u32 %v484_v25, %v480_v16  ;;  %v513_v33 = vshrl.u32 %v472_v60, 16  ;;  %v507_v35 = vor.u32 %v506_v29, %v502_v21 }
  0x2c   : > { %2168 = vmatprep.subr.bf16.mxu0 %v2386_v42  ;;  %2264 = vmatprep.subr.bf16.mxu1 %v2385_v44 }
  0x2d   : > { %v490_v36 = vsel %vm478_vm3, %v485_v31, %v489_v3  ;;  %v512_v39 = vsel %vm478_vm3, %v507_v35, %v511_v5  ;;  %v515_v40 = vor.u32 %v513_v33, %v511_v5  ;;  %v1988_v5 = vld [vmem:[%s2915_s2] ss:$0 sm:$0xff] }
  0x2e   : > { %829 = vmatprep.mubr.bf16.mxu0 %v490_v36  ;;  %879 = vmatmul.mubr.bf16.vlgmr.msra.gmra.mxu1 %v512_v39 }
  0x2f   : > { %830 = vmatmul.mubr.bf16.vlgmr.msra.gmra.mxu0 %v456_v32  ;;  %886 = vmatprep.mubr.bf16.mxu1 %v531_v38  ;;  %v520_v41 = vsel %vm478_vm3, %v515_v40, %v519_v34 }
  0x30   : > { %837 = vmatprep.mubr.bf16.mxu0 %v498_v37  ;;  %2169 = vmatpush3.bf16.msra.mxu0 %v2387_v43 }
  0x31   : > { %2170 = vmatprep.subr.bf16.mxu0 %v2389_v45  ;;  %2265 = vmatpush3.bf16.msra.mxu1 %v2385_v44 }
  0x32   : > { %2266 = vmatprep.subr.bf16.mxu1 %v2388_v47 }
  0x34   : > { %2171 = vmatpush3.bf16.msra.mxu0 %v2390_v46 }
  0x35   : > { %2172 = vmatprep.subr.bf16.mxu0 %v2392_v48  ;;  %2267 = vmatpush3.bf16.msra.mxu1 %v2388_v47 }
  0x36   : > { %887 = vmatmul.mubr.bf16.gmra.mxu1 %v520_v41  ;;  %2268 = vmatprep.subr.bf16.mxu1 %v2391_v50 }
  0x37   : > { %838 = vmatmul.mubr.bf16.gmra.mxu0 %v472_v60  ;;  %v2404_v60 = vld [vmem:[%s2916_s3 + $0x48] sm:$0xff]  }
  0x38   : > { %2173 = vmatpush3.bf16.msra.mxu0 %v2393_v49 }
  0x39   : > { %2174 = vmatprep.subr.bf16.mxu0 %v2395_v51  ;;  %2269 = vmatpush3.bf16.msra.mxu1 %v2391_v50 }
  0x3a   : > { %2270 = vmatprep.subr.bf16.mxu1 %v2394_v53 }
  0x3c   : > { %2175 = vmatpush3.bf16.msra.mxu0 %v2396_v52 }
  0x3d   : > { %2176 = vmatprep.subr.bf16.mxu0 %v2398_v54  ;;  %2271 = vmatpush3.bf16.msra.mxu1 %v2394_v53 }
  0x3e   : > { %2272 = vmatprep.subr.bf16.mxu1 %v2397_v56 }
  0x40   : > { %2177 = vmatpush3.bf16.msra.mxu0 %v2399_v55 }
  0x41   : > { %2178 = vmatprep.subr.bf16.mxu0 %v2401_v57  ;;  %2273 = vmatpush3.bf16.msra.mxu1 %v2397_v56 }
  0x42   : > { %2274 = vmatprep.subr.bf16.mxu1 %v2400_v59 }
  0x44   : > { %2179 = vmatpush3.bf16.msra.mxu0 %v2402_v58 }
  0x45   : > { %2180 = vmatprep.subr.bf16.mxu0 %v2404_v60  ;;  %2275 = vmatpush3.bf16.msra.mxu1 %v2400_v59 }
  0x46   : > { %2276 = vmatprep.subr.bf16.mxu1 %v2403_v61 }
  0x48   : > { %2181 = vmatpush3.bf16.msra.mxu0 %v2405_v62 }
  0x49   : > { %2182 = vmatprep.subr.bf16.mxu0 %v2407_v63  ;;  %2277 = vmatpush3.bf16.msra.mxu1 %v2403_v61 }
  0x4a   : > { %2278 = vmatprep.subr.bf16.mxu1 %v2406_v1 }
  0x4c   : > { %2183 = vmatpush3.bf16.msra.mxu0 %v2408_v0 }
  0x4d   : > { %2279 = vmatpush3.bf16.msra.mxu1 %v2406_v1  ;;  %2284 = vmatprep.subr.bf16.mxu0 %v2724_v2 }
  0xee   : > { %v2156_v4 = vpop.f32.mrf.mxu1 }
  0xef   : > { %v2128_v3 = vpop.f32.mrf.mxu0 }
  0xf0   : > { %v2157_v7 = vpop.f32.mrf.mxu1 }
  0xf1   : > { %v2129_v6 = vpop.f32.mrf.mxu0  ;;  %v2158_v13 = vadd.f32 %v2157_v7, %v2156_v4 }
  0xf2   : > { %v2130_v8 = vadd.f32 %v2129_v6, %v2128_v3  ;;  %v2159_v11 = vpop.f32.mrf.mxu1  ;;  %v2410_v3 = vld [vmem:[%s2918_s5 + $0x30] sm:$0xff]  }
  0xf3   : > { %v2131_v10 = vpop.f32.mrf.mxu0 }
  0xf4   : > { %v832_v12 = vadd.f32 %v2130_v8, %v1988_v5  ;;  %v2160_v15 = vpop.f32.mrf.mxu1 }
  0xf5   : > { %v2132_v14 = vpop.f32.mrf.mxu0  ;;  %v2161_v22 = vadd.f32 %v2160_v15, %v2159_v11  ;;  %v2413_v15 = vld [vmem:[%s2918_s5 + $0x18] sm:$0xff]  }
  0xf6   : > { %v2730_v16 = vadd.f32 %v2158_v13, %v832_v12  ;;  %v2133_v17 = vadd.f32 %v2132_v14, %v2131_v10  ;;  %v2162_v19 = vpop.f32.mrf.mxu1  ;;  %v2411_v14 = vld [vmem:[%s2918_s5 + $0x28] sm:$0xff]  }
  0xf7   : > { %v2134_v18 = vpop.f32.mrf.mxu0 }
  0xf8   : > { %v895_v20 = vmax.f32 %v2730_v16, 0.0  ;;  %v835_v21 = vadd.f32 %v2133_v17, %v1988_v5  ;;  %v2163_v24 = vpop.f32.mrf.mxu1  ;;  %v2414_v17 = vld [vmem:[%s2918_s5 + $0x10] sm:$0xff]  }
  0xf9   : > { %v2135_v23 = vpop.f32.mrf.mxu0  ;;  %v2164_v32 = vadd.f32 %v2163_v24, %v2162_v19  ;;  %v2416_v19 = vld [vmem:[%s2918_s5] sm:$0xff]  }
  0xfa   : > { %v905_v25 = vrot.slane %v895_v20, 7  ;;  %v2733_v26 = vadd.f32 %v2161_v22, %v835_v21  ;;  %v2136_v27 = vadd.f32 %v2135_v23, %v2134_v18  ;;  %v2165_v29 = vpop.f32.mrf.mxu1  ;;  %v2415_v18 = vld [vmem:[%s2918_s5 + $0x8] sm:$0xff]   ;;  %v2417_v20 = vld [vmem:[%s2920_s7 + $0xb8] sm:$0xff]   ;;  %v2021_v22 = vld [vmem:[%s2917_s4] ss:$0 sm:$0xff] }
  0xfb   : > { %v2137_v28 = vpop.f32.mrf.mxu0 }
  0xfc   : > { %917 = vst [vmem:[#allocation2] sm:$0xfe] %v905_v25  ;;  %v896_v30 = vmax.f32 %v2733_v26, 0.0  ;;  %v840_v31 = vadd.f32 %v2136_v27, %v1988_v5  ;;  %v2166_v34 = vpop.f32.mrf.mxu1 }
  0xfd   : > { %v2138_v33 = vpop.f32.mrf.mxu0  ;;  %v2167_v40 = vadd.f32 %v2166_v34, %v2165_v29 }
  0xfe   : > { %v2736_v35 = vadd.f32 %v2164_v32, %v840_v31  ;;  %v2139_v36 = vadd.f32 %v2138_v33, %v2137_v28  ;;  %v906_v37 = vrot.slane %v896_v30, 7 }
 0x100   : > { %v897_v38 = vmax.f32 %v2736_v35, 0.0  ;;  %v843_v39 = vadd.f32 %v2139_v36, %v1988_v5  ;;  %v907_v42 = vsel %vm417_vm1, %v905_v25, %v906_v37 }
 0x102   : > { %v2739_v41 = vadd.f32 %v2167_v40, %v843_v39  ;;  %v908_v46 = vrot.slane %v897_v38, 7 }
 0x103   : > { %v932_v43 = vld [vmem:[#allocation2] sm:$0xfc] }
 0x104   : > { %v928_v44 = vld [vmem:[#allocation2] sm:$0xfe]  ;;  %v898_v47 = vmax.f32 %v2739_v41, 0.0  ;;  %v934_v51 = vpack.c.bf16 %v907_v42, %v932_v43  ;;  %v909_v52 = vsel %vm417_vm1, %v906_v37, %v908_v46 }
 0x105   : > { %v922_v45 = vld [vmem:[#allocation2] sm:$0xff]  ;;  %v930_v48 = vpack.c.bf16 %v907_v42, %v928_v44 }
 0x106   : > { %1399 = vst [vmem:[#allocation2] sm:$0x7] %v2457_v9  ;;  %v910_v49 = vrot.slane %v898_v47, 7  ;;  %v961_v56 = vrot.slane %v934_v51, 1  ;;  %v926_v0 = vpack.c.bf16 %v907_v42, %v922_v45 }
 0x107   : > { %v939_v50 = vshll.u32 %v930_v48, 16  ;;  %v937_v58 = vshrl.u32 %v930_v48, 16 }
 0x108   : > { %v911_v53 = vsel %vm417_vm1, %v908_v46, %v910_v49  ;;  %921 = vst [vmem:[#allocation2 + $0x40] sm:$0x1] %v910_v49 }
 0x109   : > { %v927_v54 = vpack.c.bf16 %v911_v53, %v909_v52  ;;  %v941_v55 = vrot.slane %v939_v50, 1 }
 0x10b   : > { %v962_v57 = vrot.slane %v927_v54, 1  ;;  %v944_v59 = vshll.u32 %v927_v54, 16  ;;  %v942_v61 = vor.u32 %v941_v55, %v937_v58  ;;  %v948_v7 = vshrl.u32 %v927_v54, 16  ;;  %v2418_v55 = vld [vmem:[%s2920_s7 + $0x78] sm:$0xff]   ;;  %v2421_v58 = vld [vmem:[%s2920_s7 + $0x70] sm:$0xff]  }
 0x10c   : > { %2216 = vmatprep.subr.bf16.mxu1 %v2418_v55 }
 0x10d   : > { %v963_v60 = vsel %vm526_vm2, %v961_v56, %v962_v57  ;;  %v946_v62 = vrot.slane %v944_v59, 1  ;;  %v2419_v56 = vld [vmem:[%s2920_s7 + $0xb0] sm:$0xff]   ;;  %v2422_v59 = vld [vmem:[%s2920_s7 + $0xa8] sm:$0xff]  }
 0x10e   : > { %2280 = vmatprep.mubr.bf16.mxu1 %v963_v60  ;;  %v2423_v60 = vld [vmem:[%s2920_s7 + $0x30] sm:$0xff]  }
 0x10f   : > { %v933_v9 = vld [vmem:[#allocation2 + $0x40] sm:$0x3]  ;;  %v947_v63 = vsel %vm478_vm3, %v942_v61, %v946_v62  ;;  %v950_v11 = vor.u32 %v948_v7, %v946_v62  ;;  %v2424_v61 = vld [vmem:[%s2920_s7 + $0x68] sm:$0xff]  }
 0x110   : > { %v929_v1 = vld [vmem:[#allocation2 + $0x40] sm:$0x1]  ;;  %v935_v4 = vpack.c.bf16 %v933_v9, %v933_v9  ;;  %1199 = vmatprep.mubr.bf16.mxu0 %v947_v63  ;;  %v2426_v9 = vld [vmem:[%s2920_s7 + $0x28] sm:$0xff]  }
 0x111   : > { %v931_v5 = vpack.c.bf16 %v929_v1, %v929_v1  ;;  %1200 = vmatmul.mubr.bf16.vlgmr.msra.gmra.mxu0 %v926_v0  ;;  %v2425_v62 = vld [vmem:[%s2920_s7 + $0xa0] sm:$0xff]   ;;  %v2428_v0 = vld [vmem:[%s2920_s7 + $0x98] sm:$0xff]   ;;  %v2434_v7 = vld [vmem:[%s2920_s7 + $0x88] sm:$0xff]  }
 0x112   : > { %v964_v6 = vrot.slane %v935_v4, 1  ;;  %2285 = vmatpush3.bf16.msra.mxu0 %v2724_v2  ;;  %v2412_v2 = vld [vmem:[%s2918_s5 + $0x20] sm:$0xff]   ;;  %v2431_v4 = vld [vmem:[%s2920_s7 + $0x90] sm:$0xff]  }
 0x113   : > { %v952_v8 = vshll.u32 %v931_v5, 16  ;;  %2286 = vmatprep.subr.bf16.mxu0 %v2410_v3  ;;  %v2427_v63 = vld [vmem:[%s2920_s7 + $0x60] sm:$0xff]   ;;  %v2432_v5 = vld [vmem:[%s2920_s7 + $0x18] sm:$0xff]  }
 0x114   : > { %v965_v10 = vsel %vm526_vm2, %v962_v57, %v964_v6  ;;  %v2420_v57 = vld [vmem:[%s2920_s7 + $0x38] sm:$0xff]   ;;  %v2429_v1 = vld [vmem:[%s2920_s7 + $0x20] sm:$0xff]   ;;  %v2433_v6 = vld [vmem:[%s2920_s7 + $0x50] sm:$0xff]  }
 0x115   : > { %v954_v12 = vrot.slane %v952_v8, 1  ;;  %2281 = vmatmul.mubr.bf16.vlgmr.msra.gmra.mxu1 %v965_v10  ;;  %v2435_v8 = vld [vmem:[%s2920_s7 + $0x10] sm:$0xff]   ;;  %v2436_v10 = vld [vmem:[%s2920_s7 + $0x48] sm:$0xff]  }
 0x116   : > { %2287 = vmatpush3.bf16.msra.mxu0 %v2410_v3  ;;  %2217 = vmatpush3.bf16.msra.mxu1 %v2420_v57  ;;  %v2430_v3 = vld [vmem:[%s2920_s7 + $0x58] sm:$0xff]  }
 0x117   : > { %v955_v13 = vsel %vm478_vm3, %v950_v11, %v954_v12  ;;  %2288 = vmatprep.subr.bf16.mxu0 %v2411_v14  ;;  %2218 = vmatprep.subr.bf16.mxu1 %v2421_v58  ;;  %v2437_v11 = vld [vmem:[%s2920_s7 + $0x80] sm:$0xff]   ;;  %v2438_v12 = vld [vmem:[%s2920_s7 + $0x8] sm:$0xff]  }
 0x118   : > { %1207 = vmatprep.mubr.bf16.mxu0 %v955_v13  ;;  %v2439_v13 = vld [vmem:[%s2920_s7 + $0x40] sm:$0xff]  }
 0x119   : > { %1208 = vmatmul.mubr.bf16.gmra.mxu0 %v927_v54 }
 0x11a   : > { %2289 = vmatpush3.bf16.msra.mxu0 %v2411_v14  ;;  %2219 = vmatpush3.bf16.msra.mxu1 %v2423_v60  ;;  %v2440_v14 = vld [vmem:[%s2920_s7] sm:$0xff]  }
 0x11b   : > { %2290 = vmatprep.subr.bf16.mxu0 %v2412_v2  ;;  %2220 = vmatprep.subr.bf16.mxu1 %v2424_v61 }
 0x11e   : > { %2291 = vmatpush3.bf16.msra.mxu0 %v2412_v2  ;;  %2221 = vmatpush3.bf16.msra.mxu1 %v2426_v9  ;;  %v2850_v2 = vld [vmem:[%s2922_s9 + $0x38] sm:$0xff]  }
 0x11f   : > { %2292 = vmatprep.subr.bf16.mxu0 %v2413_v15  ;;  %2222 = vmatprep.subr.bf16.mxu1 %v2427_v63 }
 0x122   : > { %2293 = vmatpush3.bf16.msra.mxu0 %v2413_v15  ;;  %2223 = vmatpush3.bf16.msra.mxu1 %v2429_v1  ;;  %v2046_v15 = vld [vmem:[%s2919_s6] ss:$0 sm:$0xff] }
 0x123   : > { %2294 = vmatprep.subr.bf16.mxu0 %v2414_v17  ;;  %2224 = vmatprep.subr.bf16.mxu1 %v2430_v3 }
 0x126   : > { %2295 = vmatpush3.bf16.msra.mxu0 %v2414_v17  ;;  %2225 = vmatpush3.bf16.msra.mxu1 %v2432_v5 }
 0x127   : > { %2296 = vmatprep.subr.bf16.mxu0 %v2415_v18  ;;  %2226 = vmatprep.subr.bf16.mxu1 %v2433_v6 }
 0x12a   : > { %2297 = vmatpush3.bf16.msra.mxu0 %v2415_v18  ;;  %2227 = vmatpush3.bf16.msra.mxu1 %v2435_v8  ;;  %v2442_v8 = vld [vmem:[%s2922_s9 + $0x30] sm:$0xff]  }
 0x12b   : > { %2298 = vmatprep.subr.bf16.mxu0 %v2416_v19  ;;  %2228 = vmatprep.subr.bf16.mxu1 %v2436_v10  ;;  %v2443_v10 = vld [vmem:[%s2922_s9 + $0x28] sm:$0xff]  }
 0x12e   : > { %2299 = vmatpush3.bf16.msra.mxu0 %v2416_v19  ;;  %2229 = vmatpush3.bf16.msra.mxu1 %v2438_v12  ;;  %v2445_v12 = vld [vmem:[%s2922_s9 + $0x18] sm:$0xff]  }
 0x12f   : > { %2304 = vmatprep.subr.bf16.mxu0 %v2417_v20  ;;  %2230 = vmatprep.subr.bf16.mxu1 %v2439_v13  ;;  %v2446_v13 = vld [vmem:[%s2922_s9 + $0x10] sm:$0xff]  }
 0x132   : > { %2231 = vmatpush3.bf16.msra.mxu1 %v2440_v14  ;;  %v2447_v14 = vld [vmem:[%s2922_s9 + $0x8] sm:$0xff]  }
 0x133   : > { %2324 = vmatprep.subr.bf16.mxu1 %v2850_v2 }
 0x1d1   : > { %v2184_v21 = vpop.f32.mrf.mxu0 }
 0x1d3   : > { %v2185_v23 = vpop.f32.mrf.mxu0 }
 0x1d4   : > { %v2186_v24 = vadd.f32 %v2185_v23, %v2184_v21 }
 0x1d5   : > { %v2282_v25 = vpop.f32.mrf.mxu1  ;;  %v2187_v27 = vpop.f32.mrf.mxu0 }
 0x1d6   : > { %v1202_v28 = vadd.f32 %v2186_v24, %v2021_v22 }
 0x1d7   : > { %v1250_v29 = vpop.f32.mrf.mxu1  ;;  %v2188_v30 = vpop.f32.mrf.mxu0 }
 0x1d8   : > { %v2189_v31 = vadd.f32 %v2188_v30, %v2187_v27  ;;  %v1251_v34 = vadd.f32 %v1250_v29, %v1202_v28 }
 0x1d9   : > { %v2283_v32 = vpop.f32.mrf.mxu1  ;;  %v2190_v33 = vpop.f32.mrf.mxu0 }
 0x1da   : > { %v1205_v36 = vadd.f32 %v2189_v31, %v2021_v22  ;;  %v1265_v43 = vmax.f32 %v1251_v34, 0.0 }
 0x1db   : > { %v1253_v37 = vpop.f32.mrf.mxu1  ;;  %v2191_v38 = vpop.f32.mrf.mxu0 }
 0x1dc   : > { %v1254_v39 = vadd.f32 %v1253_v37, %v1205_v36  ;;  %v2192_v40 = vadd.f32 %v2191_v38, %v2190_v33 }
 0x1dd   : > { %v2193_v42 = vpop.f32.mrf.mxu0 }
 0x1de   : > { %v1266_v44 = vmax.f32 %v1254_v39, 0.0  ;;  %v1210_v45 = vadd.f32 %v2192_v40, %v2021_v22 }
 0x1df   : > { %v2194_v46 = vpop.f32.mrf.mxu0 }
 0x1e0   : > { %v2195_v47 = vadd.f32 %v2194_v46, %v2193_v42  ;;  %v1269_v48 = vpack.c.bf16 %v1266_v44, %v1265_v43  ;;  %v1259_v49 = vadd.f32 %v2282_v25, %v1210_v45 }
 0x1e2   : > { %v1213_v50 = vadd.f32 %v2195_v47, %v2021_v22  ;;  %2300 = vmatprep.mubr.bf16.mxu0 %v1269_v48  ;;  %v1267_v52 = vmax.f32 %v1259_v49, 0.0 }
 0x1e4   : > { %v1262_v51 = vadd.f32 %v2283_v32, %v1213_v50 }
 0x1e6   : > { %v1268_v53 = vmax.f32 %v1262_v51, 0.0 }
 0x1e8   : > { %v1270_v54 = vpack.c.bf16 %v1268_v53, %v1267_v52 }
 0x1ea   : > { %2301 = vmatmul.mubr.bf16.vlgmr.msra.gmra.mxu0 %v1270_v54 }
 0x1eb   : > { %2305 = vmatpush3.bf16.msra.mxu0 %v2417_v20 }
 0x1ec   : > { %2306 = vmatprep.subr.bf16.mxu0 %v2419_v56 }
 0x1ef   : > { %2307 = vmatpush3.bf16.msra.mxu0 %v2419_v56 }
 0x1f0   : > { %2308 = vmatprep.subr.bf16.mxu0 %v2422_v59 }
 0x1f3   : > { %2309 = vmatpush3.bf16.msra.mxu0 %v2422_v59 }
 0x1f4   : > { %2310 = vmatprep.subr.bf16.mxu0 %v2425_v62 }
 0x1f7   : > { %2311 = vmatpush3.bf16.msra.mxu0 %v2425_v62 }
 0x1f8   : > { %2312 = vmatprep.subr.bf16.mxu0 %v2428_v0 }
 0x1fb   : > { %2313 = vmatpush3.bf16.msra.mxu0 %v2428_v0 }
 0x1fc   : > { %2314 = vmatprep.subr.bf16.mxu0 %v2431_v4 }
 0x1ff   : > { %2315 = vmatpush3.bf16.msra.mxu0 %v2431_v4 }
 0x200   : > { %2316 = vmatprep.subr.bf16.mxu0 %v2434_v7 }
 0x203   : > { %2317 = vmatpush3.bf16.msra.mxu0 %v2434_v7 }
 0x204   : > { %2318 = vmatprep.subr.bf16.mxu0 %v2437_v11 }
 0x207   : > { %2319 = vmatpush3.bf16.msra.mxu0 %v2437_v11  ;;  %v2444_v11 = vld [vmem:[%s2922_s9 + $0x20] sm:$0xff]  }
 0x2aa   : > { %v2302_v17 = vpop.f32.mrf.mxu0 }
 0x2ab   : > { %v1385_v18 = vadd.f32 %v2302_v17, %v2046_v15 }
 0x2ac   : > { %v1376_v19 = vpop.f32.mrf.mxu0 }
 0x2ad   : > { %v2857_v20 = vadd.f32 %v1385_v18, %v2736_v35  ;;  %v1377_v21 = vadd.f32 %v2046_v15, %v1376_v19  ;;  %v2055_v19 = vld [vmem:[%s2921_s8] ss:$0 sm:$0xff] }
 0x2ae   : > { %v2303_v22 = vpop.f32.mrf.mxu0 }
 0x2af   : > { %v2860_v23 = vadd.f32 %v1377_v21, %v2730_v16  ;;  %v1388_v24 = vadd.f32 %v2303_v22, %v2046_v15  ;;  %v1397_v27 = vmax.f32 %v2857_v20, 0.0 }
 0x2b0   : > { %v1379_v25 = vpop.f32.mrf.mxu0 }
 0x2b1   : > { %v1395_v28 = vmax.f32 %v2860_v23, 0.0  ;;  %v2865_v29 = vadd.f32 %v1388_v24, %v2739_v41  ;;  %v1380_v30 = vadd.f32 %v2046_v15, %v1379_v25  ;;  %v1409_v33 = vrot.slane %v1397_v27, 5 }
 0x2b3   : > { %v1406_v31 = vrot.slane %v1395_v28, 5  ;;  %v1398_v32 = vmax.f32 %v2865_v29, 0.0  ;;  %v2869_v35 = vadd.f32 %v1380_v30, %v2733_v26 }
 0x2b5   : > { %1418 = vst [vmem:[#allocation2] sm:$0xf8] %v1406_v31  ;;  %v1411_v16 = vrot.slane %v1398_v32, 5  ;;  %v1396_v34 = vmax.f32 %v2869_v35, 0.0 }
 0x2b7   : > { %v1412_v36 = vsel %vm1405_vm4, %v1409_v33, %v1411_v16  ;;  %1422 = vst [vmem:[#allocation2 + $0x40] sm:$0x7] %v1411_v16  ;;  %v1407_v37 = vrot.slane %v1396_v34, 5 }
 0x2b9   : > { %v1408_v38 = vsel %vm1405_vm4, %v1406_v31, %v1407_v37  ;;  %v1410_v39 = vsel %vm1405_vm4, %v1407_v37, %v1409_v33 }
 0x2ba   : > { %v1428_v41 = vpack.c.bf16 %v1412_v36, %v1410_v39 }
 0x2bc   : > { %v1433_v40 = vld [vmem:[#allocation2] sm:$0xc0]  ;;  %v1447_v43 = vshrl.u32 %v1428_v41, 16  ;;  %v1450_v26 = vshll.u32 %v1428_v41, 16  ;;  %v1471_v46 = vrot.slane %v1428_v41, 3 }
 0x2bd   : > { %v1429_v42 = vld [vmem:[#allocation2] sm:$0xf8]  ;;  %v1435_v44 = vpack.c.bf16 %v1408_v38, %v1433_v40 }
 0x2be   : > { %v1431_v45 = vpack.c.bf16 %v1408_v38, %v1429_v42  ;;  %v1434_v47 = vld [vmem:[#allocation2 + $0x40] sm:$0x3f]  ;;  %v1449_v48 = vrot.slane %v1447_v43, 1  ;;  %v1452_v54 = vrot.slane %v1450_v26, 2 }
 0x2bf   : > { %v1430_v49 = vld [vmem:[#allocation2 + $0x40] sm:$0x7]  ;;  %v1470_v50 = vrot.slane %v1435_v44, 3  ;;  %v1436_v51 = vpack.c.bf16 %v1434_v47, %v1434_v47 }
 0x2c0   : > { %v1439_v52 = vshrl.u32 %v1431_v45, 16  ;;  %v1442_v53 = vshll.u32 %v1431_v45, 16  ;;  %v1432_v55 = vpack.c.bf16 %v1430_v49, %v1430_v49  ;;  %v1423_v60 = vld [vmem:[#allocation2] sm:$0xff]  ;;  %v1453_v0 = vor.u32 %v1452_v54, %v1449_v48 }
 0x2c1   : > { %v1472_v56 = vsel %vm1469_vm5, %v1470_v50, %v1471_v46  ;;  %v1473_v57 = vrot.slane %v1436_v51, 3  ;;  %v1427_v5 = vpack.c.bf16 %v1408_v38, %v1423_v60  ;;  %v2080_v51 = vld [vmem:[%s2923_s10] ss:$0 sm:$0xff] }
 0x2c2   : > { %v1441_v58 = vrot.slane %v1439_v52, 1  ;;  %v1444_v59 = vrot.slane %v1442_v53, 2  ;;  %2320 = vmatprep.mubr.bf16.mxu0 %v1472_v56  ;;  %v1456_v61 = vshrl.u32 %v1432_v55, 16  ;;  %v1459_v62 = vshll.u32 %v1432_v55, 16 }
 0x2c3   : > { %v1474_v9 = vsel %vm1469_vm5, %v1471_v46, %v1473_v57 }
 0x2c4   : > { %v1445_v63 = vor.u32 %v1444_v59, %v1441_v58  ;;  %2321 = vmatmul.mubr.bf16.vlgmr.msra.gmra.mxu0 %v1474_v9  ;;  %v1458_v1 = vrot.slane %v1456_v61, 1  ;;  %v1461_v3 = vrot.slane %v1459_v62, 2 }
 0x2c6   : > { %v1454_v4 = vsel %vm1437_vm6, %v1445_v63, %v1453_v0  ;;  %v1462_v6 = vor.u32 %v1461_v3, %v1458_v1 }
 0x2c7   : > { %1708 = vmatprep.mubr.bf16.mxu1 %v1454_v4 }
 0x2c8   : > { %1709 = vmatmul.mubr.bf16.vlgmr.msra.gmra.mxu1 %v1427_v5  ;;  %v1463_v7 = vsel %vm1437_vm6, %v1453_v0, %v1462_v6 }
 0x2c9   : > { %2325 = vmatpush3.bf16.msra.mxu1 %v2850_v2  ;;  %1716 = vmatprep.mubr.bf16.mxu1 %v1463_v7  ;;  %v2448_v2 = vld [vmem:[%s2922_s9] sm:$0xff]  }
 0x2ca   : > { %2326 = vmatprep.subr.bf16.mxu1 %v2442_v8 }
 0x2cd   : > { %2327 = vmatpush3.bf16.msra.mxu1 %v2442_v8 }
 0x2ce   : > { %2328 = vmatprep.subr.bf16.mxu1 %v2443_v10 }
 0x2d0   : > { %1717 = vmatmul.mubr.bf16.gmra.mxu1 %v1428_v41 }
 0x2d1   : > { %2329 = vmatpush3.bf16.msra.mxu1 %v2443_v10 }
 0x2d2   : > { %2330 = vmatprep.subr.bf16.mxu1 %v2444_v11 }
 0x2d5   : > { %2331 = vmatpush3.bf16.msra.mxu1 %v2444_v11 }
 0x2d6   : > { %2332 = vmatprep.subr.bf16.mxu1 %v2445_v12 }
 0x2d9   : > { %2333 = vmatpush3.bf16.msra.mxu1 %v2445_v12 }
 0x2da   : > { %2334 = vmatprep.subr.bf16.mxu1 %v2446_v13 }
 0x2dd   : > { %2335 = vmatpush3.bf16.msra.mxu1 %v2446_v13 }
 0x2de   : > { %2336 = vmatprep.subr.bf16.mxu1 %v2447_v14 }
 0x2e1   : > { %2337 = vmatpush3.bf16.msra.mxu1 %v2447_v14 }
 0x2e2   : > { %2338 = vmatprep.subr.bf16.mxu1 %v2448_v2 }
 0x2e5   : > { %2339 = vmatpush3.bf16.msra.mxu1 %v2448_v2 }
 0x384   : > { %v2322_v15 = vpop.f32.mrf.mxu0 }
 0x386   : > { %v1759_v18 = vpop.f32.mrf.mxu0 }
 0x388   : > { %v2232_v17 = vpop.f32.mrf.mxu1  ;;  %v2323_v27 = vpop.f32.mrf.mxu0 }
 0x38a   : > { %v2233_v21 = vpop.f32.mrf.mxu1  ;;  %v1762_v16 = vpop.f32.mrf.mxu0 }
 0x38b   : > { %v2234_v22 = vadd.f32 %v2233_v21, %v2232_v17 }
 0x38c   : > { %v2235_v24 = vpop.f32.mrf.mxu1 }
 0x38d   : > { %v1711_v25 = vadd.f32 %v2234_v22, %v2055_v19 }
 0x38e   : > { %v2236_v28 = vpop.f32.mrf.mxu1 }
 0x38f   : > { %v2237_v30 = vadd.f32 %v2236_v28, %v2235_v24  ;;  %v1760_v32 = vadd.f32 %v1759_v18, %v1711_v25 }
 0x390   : > { %v2238_v31 = vpop.f32.mrf.mxu1 }
 0x391   : > { %v1714_v33 = vadd.f32 %v2237_v30, %v2055_v19  ;;  %v1774_v39 = vmax.f32 %v1760_v32, 0.0 }
 0x392   : > { %v2239_v34 = vpop.f32.mrf.mxu1 }
 0x393   : > { %v1763_v36 = vadd.f32 %v1762_v16, %v1714_v33  ;;  %v2240_v37 = vadd.f32 %v2239_v34, %v2238_v31 }
 0x394   : > { %v2241_v38 = vpop.f32.mrf.mxu1 }
 0x395   : > { %v1775_v41 = vmax.f32 %v1763_v36, 0.0  ;;  %v1719_v40 = vadd.f32 %v2240_v37, %v2055_v19 }
 0x396   : > { %v2242_v42 = vpop.f32.mrf.mxu1 }
 0x397   : > { %v2243_v43 = vadd.f32 %v2242_v42, %v2241_v38  ;;  %v1778_v44 = vpack.c.bf16 %v1775_v41, %v1774_v39  ;;  %v1768_v45 = vadd.f32 %v2322_v15, %v1719_v40 }
 0x399   : > { %v1722_v26 = vadd.f32 %v2243_v43, %v2055_v19  ;;  %2340 = vmatprep.mubr.bf16.mxu1 %v1778_v44  ;;  %v1776_v47 = vmax.f32 %v1768_v45, 0.0 }
 0x39b   : > { %v1771_v46 = vadd.f32 %v2323_v27, %v1722_v26 }
 0x39d   : > { %v1777_v48 = vmax.f32 %v1771_v46, 0.0 }
 0x39f   : > { %v1779_v49 = vpack.c.bf16 %v1777_v48, %v1776_v47 }
 0x3a1   : > { %2341 = vmatmul.mubr.bf16.vlgmr.msra.gmra.mxu1 %v1779_v49 }
 0x461   : > { %v2342_v50 = vpop.f32.mrf.mxu1 }
 0x462   : > { %v1894_v53 = vadd.f32 %v2342_v50, %v2080_v51 }
 0x463   : > { %v1885_v52 = vpop.f32.mrf.mxu1 }
 0x464   : > { %v1886_v55 = vadd.f32 %v2080_v51, %v1885_v52  ;;  %v1902_v58 = vadd.f32 %v1894_v53, %v2857_v20 }
 0x465   : > { %v2343_v54 = vpop.f32.mrf.mxu1 }
 0x466   : > { %v1897_v56 = vadd.f32 %v2343_v54, %v2080_v51  ;;  %v1900_v61 = vadd.f32 %v1886_v55, %v2860_v23 }
 0x467   : > { %v1888_v57 = vpop.f32.mrf.mxu1 }
 0x468   : > { %v1903_v59 = vadd.f32 %v1897_v56, %v2865_v29  ;;  %v1889_v60 = vadd.f32 %v2080_v51, %v1888_v57 }
 0x46a   : > { %v2109_v62 = vpack.c.bf16 %v1903_v59, %v1902_v58  ;;  %v1901_v9 = vadd.f32 %v1889_v60, %v2869_v35 }
 0x46c   : > { %2111 = vst [vmem:[%s386_s24 + $0x8] sm:$0xff] %v2109_v62   ;;  %v2104_v63 = vpack.c.bf16 %v1901_v9, %v1900_v61 }
 0x46e   : > { %2105 = vst [vmem:[%s386_s24] sm:$0xff] %v2104_v63  }
 0x46f PF: > { %s21_s17 = sadd.s32 1, %s2455_s17  }
 0x470   : > { %p18_p4 = scmp.ge.s32.totalorder %s21_s17, 4  }
 0x472   :  { %20 = sbr.rel (!%p18_p4) target bundleno = 1 (0x1), region = 95 }

// kernel: vqvae_forward.9
= control target key start
LH: loop header
LB: loop body
LE: loop exit
PB: predicated region body
PF: predicated region fallthrough
CT: control target
= control target key end

     0   :  { %s2755_s25 = smov 0   ;;  %s3246_s0 = inlined_call_operand.vmem [shape: bf16[2,16,256], index: 0, kind: input, shape index: {}]   ;;  %s3247_s1 = inlined_call_operand.vmem [shape: bf16[512,128], index: 1, kind: input, shape index: {}]   ;;  %s3248_s2 = inlined_call_operand.vmem [shape: f32[1,128], index: 2, kind: input, shape index: {}]   ;;  %s3249_s3 = inlined_call_operand.vmem [shape: bf16[384,128], index: 3, kind: input, shape index: {}]   ;;  %s3250_s4 = inlined_call_operand.vmem [shape: f32[1,128], index: 4, kind: input, shape index: {}]   ;;  %s3251_s5 = inlined_call_operand.vmem [shape: bf16[128,128], index: 5, kind: input, shape index: {}]   ;;  %s3252_s6 = inlined_call_operand.vmem [shape: f32[1,128], index: 6, kind: input, shape index: {}]   ;;  %s3253_s7 = inlined_call_operand.vmem [shape: bf16[384,128], index: 7, kind: input, shape index: {}]   ;;  %s3254_s8 = inlined_call_operand.vmem [shape: f32[1,128], index: 8, kind: input, shape index: {}]   ;;  %s3255_s9 = inlined_call_operand.vmem [shape: bf16[128,128], index: 9, kind: input, shape index: {}]   ;;  %s3256_s10 = inlined_call_operand.vmem [shape: f32[1,128], index: 10, kind: input, shape index: {}]   ;;  %s3257_s11 = inlined_call_operand.vmem [shape: bf16[384,128], index: 11, kind: input, shape index: {}]   ;;  %s3258_s12 = inlined_call_operand.vmem [shape: f32[1,128], index: 12, kind: input, shape index: {}]   ;;  %s3259_s13 = inlined_call_operand.vmem [shape: f32[2,16,128], index: 13, kind: output, shape index: {}]  }
   0x1 LB: > { %s2151_s26 = sadd.s32 4294967295, %s2681_s25   ;;  %p2155_p0 = scmp.ge.s32.totalorder %s2681_s25, 1  ;;  %s2681_s25 = sphi %s2755_s25, %s23_s25  }
   0x2   : > { %p387_p1 = scmp.lt.s32.totalorder %s2681_s25, 3 }
   0x4   : > { %p388_p2 = pnand %p2155_p0, %p387_p1 }
   0x5   : > { %p431_p3 = scmp.lt.s32.totalorder (!%p388_p2), %s2151_s26, 1 }
   0x6   : > { %391 = sbr.rel (%p388_p2) target bundleno = 1341 (0x53d), region = 72 }
   0xb   : > { %v2555_v0 = vld [vmem:[%s3247_s1 + $0x78] sm:$0xff]   ;;  %v448_v1 = vlaneseq  ;;  %v2559_v5 = vld [vmem:[%s3247_s1 + $0x70] sm:$0xff]   ;;  %v2683_v8 = vmov 0.0   ;;  %v2563_v10 = vld [vmem:[%s3247_s1 + $0x68] sm:$0xff]   ;;  %s3261_s26 = smov (!%p431_p3, %s2151_s26), 1  ;;  %vm461_vm1 = vcmask 1040384  }
   0xc   : > { %v2556_v2 = vld [vmem:[%s3247_s1 + $0xf8] sm:$0xff]   ;;  %2290 = vmatprep.subr.bf16.mxu0 %v2555_v0  ;;  %v2560_v6 = vld [vmem:[%s3247_s1 + $0xf0] sm:$0xff]   ;;  %1322 = vst [vmem:[#allocation2 + $0x20] sm:$0x38] %v2683_v8  ;;  %v2564_v11 = vld [vmem:[%s3247_s1 + $0xe8] sm:$0xff]   ;;  %s2288_s19 = sshll.u32 %s3261_s26, 4 }
   0xd   : > { %v2557_v3 = vld [vmem:[%s3247_s1 + $0x38] sm:$0xff]   ;;  %2312 = vmatprep.subr.bf16.mxu1 %v2556_v2  ;;  %vm450_vm0 = vcmp.lt.s32.totalorder %v448_v1, 256  ;;  %v2561_v7 = vld [vmem:[%s3247_s1 + $0x30] sm:$0xff]   ;;  %v2565_v12 = vld [vmem:[%s3247_s1 + $0x28] sm:$0xff]   ;;  %s435_s30 = scalar_lea.vmem %s3246_s0, %s2288_s19  ;;  %vm526_vm2 = vcmask 1046528   ;;  %vm2684_vm4 = vmmov 0   ;;  %s440_s29 = scalar_lea.vmem %s3259_s13, %s2288_s19 }
   0xe   : > { %v2558_v4 = vld [vmem:[%s3247_s1 + $0xb8] sm:$0xff]   ;;  %2291 = vmatpush3.bf16.msra.mxu0 %v2557_v3  ;;  %452 = vst.msk [vmem:[#allocation2] ss:$8 sm:$0x3] %vm450_vm0, %v2683_v8  ;;  %v2562_v9 = vld [vmem:[%s3247_s1 + $0xb0] sm:$0xff]   ;;  %v2566_v13 = vld [vmem:[%s3247_s1 + $0xa8] sm:$0xff]  }
   0xf   : > { %2313 = vmatpush3.bf16.msra.mxu1 %v2558_v4  ;;  %2292 = vmatprep.subr.bf16.mxu0 %v2559_v5  ;;  %455 = vst.msk [vmem:[#allocation2 + $0x21] ss:$8 sm:$0x3] %vm450_vm0, %v2683_v8  ;;  %878 = vst [vmem:[#allocation2] sm:$0x1] %v2683_v8  ;;  %v2567_v14 = vld [vmem:[%s3247_s1 + $0x60] sm:$0xff]  }
  0x10   : > { %2314 = vmatprep.subr.bf16.mxu1 %v2560_v6  ;;  %v2568_v15 = vld [vmem:[%s3247_s1 + $0xe0] sm:$0xff]   ;;  %v2571_v18 = vld [vmem:[%s3247_s1 + $0x58] sm:$0xff]   ;;  %v2575_v22 = vld [vmem:[%s3247_s1 + $0x50] sm:$0xff]   ;;  %vm497_vm3 = vsmask.f32 7424  ;;  %vm1325_vm5 = vcmask 1042432  }
  0x11   : > { %v2569_v16 = vld [vmem:[%s3247_s1 + $0x20] sm:$0xff]   ;;  %v2572_v19 = vld [vmem:[%s3247_s1 + $0xd8] sm:$0xff]   ;;  %v2576_v23 = vld [vmem:[%s3247_s1 + $0xd0] sm:$0xff]   ;;  %vm1367_vm6 = vcmask 1044480   ;;  %vm1346_vm7 = vsmask.f32 6400 }
  0x12   : > { %2293 = vmatpush3.bf16.msra.mxu0 %v2561_v7  ;;  %v2570_v17 = vld [vmem:[%s3247_s1 + $0xa0] sm:$0xff]   ;;  %v2573_v20 = vld [vmem:[%s3247_s1 + $0x18] sm:$0xff]   ;;  %v2577_v24 = vld [vmem:[%s3247_s1 + $0x10] sm:$0xff]  }
  0x13   : > { %2315 = vmatpush3.bf16.msra.mxu1 %v2562_v9  ;;  %2294 = vmatprep.subr.bf16.mxu0 %v2563_v10  ;;  %v2574_v21 = vld [vmem:[%s3247_s1 + $0x98] sm:$0xff]   ;;  %v2578_v25 = vld [vmem:[%s3247_s1 + $0x90] sm:$0xff]   ;;  %v2579_v26 = vld [vmem:[%s3247_s1 + $0x48] sm:$0xff]  }
  0x14   : > { %2316 = vmatprep.subr.bf16.mxu1 %v2564_v11  ;;  %v2580_v27 = vld [vmem:[%s3247_s1 + $0xc8] sm:$0xff]   ;;  %v2583_v30 = vld [vmem:[%s3247_s1 + $0x40] sm:$0xff]  }
  0x15   : > { %v2581_v28 = vld [vmem:[%s3247_s1 + $0x8] sm:$0xff]   ;;  %v2584_v31 = vld [vmem:[%s3247_s1 + $0xc0] sm:$0xff]  }
  0x16   : > { %2295 = vmatpush3.bf16.msra.mxu0 %v2565_v12  ;;  %v2582_v29 = vld [vmem:[%s3247_s1 + $0x88] sm:$0xff]   ;;  %v2585_v32 = vld [vmem:[%s3247_s1] sm:$0xff]  }
  0x17   : > { %2317 = vmatpush3.bf16.msra.mxu1 %v2566_v13  ;;  %2296 = vmatprep.subr.bf16.mxu0 %v2567_v14  ;;  %v2586_v33 = vld [vmem:[%s3247_s1 + $0x80] sm:$0xff]   ;;  %v443_v35 = vld [vmem:[%s435_s30 + $0x8] sm:$0xff]  ;;  %v2587_v14 = vld [vmem:[%s3249_s3 + $0xb8] sm:$0xff]  }
  0x18   : > { %2318 = vmatprep.subr.bf16.mxu1 %v2568_v15  ;;  %v442_v34 = vld [vmem:[%s435_s30] sm:$0xff]  ;;  %v446_v37 = vunpack.c.l.bf16 %v443_v35  ;;  %v447_v39 = vunpack.c.h.bf16 %v443_v35  ;;  %v2588_v15 = vld [vmem:[%s3249_s3 + $0x78] sm:$0xff]  }
  0x19   : > { %v444_v36 = vunpack.c.l.bf16 %v442_v34  ;;  %v445_v38 = vunpack.c.h.bf16 %v442_v34  ;;  %v2608_v34 = vld [vmem:[%s3249_s3 + $0x8] sm:$0xff]   ;;  %v2607_v35 = vld [vmem:[%s3249_s3 + $0x80] sm:$0xff]  }
  0x1a   : > { %2297 = vmatpush3.bf16.msra.mxu0 %v2569_v16  ;;  %v464_v41 = vrot.slane %v446_v37, 7  ;;  %v466_v43 = vrot.slane %v447_v39, 7  ;;  %v2590_v16 = vld [vmem:[%s3249_s3 + $0x38] sm:$0xff]   ;;  %v2610_v37 = vld [vmem:[%s3249_s3] sm:$0xff]  }
  0x1b   : > { %2319 = vmatpush3.bf16.msra.mxu1 %v2570_v17  ;;  %2298 = vmatprep.subr.bf16.mxu0 %v2571_v18  ;;  %v462_v40 = vrot.slane %v444_v36, 7  ;;  %v463_v42 = vrot.slane %v445_v38, 7  ;;  %v2589_v17 = vld [vmem:[%s3249_s3 + $0xb0] sm:$0xff]   ;;  %v2609_v36 = vld [vmem:[%s3249_s3 + $0x40] sm:$0xff]  }
  0x1c   : > { %2320 = vmatprep.subr.bf16.mxu1 %v2572_v19  ;;  %478 = vst [vmem:[#allocation2 + $0x20] sm:$0x1] %v464_v41  ;;  %479 = vst [vmem:[#allocation2 + $0x28] sm:$0x1] %v466_v43  ;;  %v2591_v18 = vld [vmem:[%s3249_s3 + $0x70] sm:$0xff]  }
  0x1d   : > { %474 = vst [vmem:[#allocation2] sm:$0xfe] %v462_v40  ;;  %v467_v44 = vsel %vm461_vm1, %v463_v42, %v466_v43  ;;  %475 = vst [vmem:[#allocation2 + $0x8] sm:$0xfe] %v463_v42  ;;  %v465_v45 = vsel %vm461_vm1, %v462_v40, %v464_v41  ;;  %v2593_v19 = vld [vmem:[%s3249_s3 + $0x30] sm:$0xff]  }
  0x1e   : > { %2299 = vmatpush3.bf16.msra.mxu0 %v2573_v20  ;;  %v2592_v20 = vld [vmem:[%s3249_s3 + $0xa8] sm:$0xff]   ;;  %v2160_v40 = vld [vmem:[%s3248_s2] ss:$0 sm:$0xff] }
  0x1f   : > { %2321 = vmatpush3.bf16.msra.mxu1 %v2574_v21  ;;  %2300 = vmatprep.subr.bf16.mxu0 %v2575_v22  ;;  %v2594_v21 = vld [vmem:[%s3249_s3 + $0x68] sm:$0xff]  }
  0x20   : > { %2322 = vmatprep.subr.bf16.mxu1 %v2576_v23  ;;  %v2596_v22 = vld [vmem:[%s3249_s3 + $0x28] sm:$0xff]   ;;  %v2595_v23 = vld [vmem:[%s3249_s3 + $0xa0] sm:$0xff]  }
  0x22   : > { %2301 = vmatpush3.bf16.msra.mxu0 %v2577_v24  ;;  %v2597_v24 = vld [vmem:[%s3249_s3 + $0x60] sm:$0xff]  }
  0x23   : > { %2323 = vmatpush3.bf16.msra.mxu1 %v2578_v25  ;;  %2302 = vmatprep.subr.bf16.mxu0 %v2579_v26  ;;  %v485_v47 = vld [vmem:[#allocation2 + $0x20] sm:$0x1]  ;;  %v490_v55 = vld [vmem:[#allocation2 + $0x28] sm:$0x1]  ;;  %v2598_v26 = vld [vmem:[%s3249_s3 + $0x98] sm:$0xff]  }
  0x24   : > { %2324 = vmatprep.subr.bf16.mxu1 %v2580_v27  ;;  %v483_v46 = vld [vmem:[#allocation2] sm:$0xfe]  ;;  %v487_v50 = vpack.c.bf16 %v485_v47, %v485_v47  ;;  %v488_v53 = vld [vmem:[#allocation2 + $0x8] sm:$0xfe]  ;;  %v492_v63 = vpack.c.bf16 %v490_v55, %v490_v55  ;;  %v2600_v27 = vld [vmem:[%s3249_s3 + $0x58] sm:$0xff]  }
  0x25   : > { %v493_v48 = vld [vmem:[#allocation2] sm:$0xfc]  ;;  %v486_v49 = vpack.c.bf16 %v465_v45, %v483_v46  ;;  %v494_v51 = vld [vmem:[#allocation2 + $0x20] sm:$0x3]  ;;  %v491_v56 = vpack.c.bf16 %v467_v44, %v488_v53  ;;  %v480_v62 = vld [vmem:[#allocation2 + $0x8] sm:$0xff] }
  0x26   : > { %2303 = vmatpush3.bf16.msra.mxu0 %v2581_v28  ;;  %v495_v52 = vpack.c.bf16 %v465_v45, %v493_v48  ;;  %v496_v54 = vpack.c.bf16 %v494_v51, %v494_v51  ;;  %879 = vst [vmem:[#allocation2 + $0x21] sm:$0x1] %v2683_v8  ;;  %v506_v59 = vshll.u32 %v487_v50, 16  ;;  %v519_v6 = vshll.u32 %v492_v63, 16  ;;  %v2599_v25 = vld [vmem:[%s3249_s3 + $0x20] sm:$0xff]   ;;  %v2602_v28 = vld [vmem:[%s3249_s3 + $0x18] sm:$0xff]  }
  0x27   : > { %2325 = vmatpush3.bf16.msra.mxu1 %v2582_v29  ;;  %2304 = vmatprep.subr.bf16.mxu0 %v2583_v30  ;;  %v499_v57 = vshrl.u32 %v486_v49, 16  ;;  %v501_v58 = vshll.u32 %v486_v49, 16  ;;  %v512_v0 = vshrl.u32 %v491_v56, 16  ;;  %v514_v1 = vshll.u32 %v491_v56, 16  ;;  %v2601_v29 = vld [vmem:[%s3249_s3 + $0x90] sm:$0xff]  }
  0x28   : > { %2326 = vmatprep.subr.bf16.mxu1 %v2584_v31  ;;  %v527_v60 = vrot.slane %v495_v52, 1  ;;  %v528_v61 = vrot.slane %v496_v54, 1  ;;  %v508_v3 = vrot.slane %v506_v59, 1  ;;  %v482_v9 = vpack.c.bf16 %v467_v44, %v480_v62  ;;  %v2603_v30 = vld [vmem:[%s3249_s3 + $0x50] sm:$0xff]  }
  0x29   : > { %v503_v2 = vrot.slane %v501_v58, 1  ;;  %v516_v5 = vrot.slane %v514_v1, 1  ;;  %v521_v11 = vrot.slane %v519_v6, 1  ;;  %v2605_v31 = vld [vmem:[%s3249_s3 + $0x10] sm:$0xff]  }
  0x2a   : > { %2305 = vmatpush3.bf16.msra.mxu0 %v2585_v32  ;;  %v529_v4 = vsel %vm526_vm2, %v527_v60, %v528_v61  ;;  %v2604_v32 = vld [vmem:[%s3249_s3 + $0x88] sm:$0xff]  }
  0x2b   : > { %2327 = vmatpush3.bf16.msra.mxu1 %v2586_v33  ;;  %v504_v7 = vor.u32 %v503_v2, %v499_v57  ;;  %867 = vmatprep.mubr.bf16.mxu1 %v529_v4  ;;  %v517_v10 = vor.u32 %v516_v5, %v512_v0  ;;  %v2606_v33 = vld [vmem:[%s3249_s3 + $0x48] sm:$0xff]  }
  0x2c   : > { %2445 = vmatprep.subr.bf16.mxu1 %v2683_v8  ;;  %2334 = vmatprep.subr.bf16.mxu0 %v2588_v15  ;;  %v2611_v15 = vld [vmem:[%s3251_s5 + $0x38] sm:$0xff]  }
  0x2d   : > { %v509_v12 = vsel %vm497_vm3, %v504_v7, %v508_v3  ;;  %v522_v13 = vsel %vm497_vm3, %v517_v10, %v521_v11 }
  0x2e   : > { %826 = vmatprep.mubr.bf16.mxu0 %v509_v12  ;;  %868 = vmatmul.mubr.bf16.vlgmr.msra.gmra.mxu1 %v522_v13 }
  0x2f   : > { %827 = vmatmul.mubr.bf16.vlgmr.msra.gmra.mxu0 %v482_v9  ;;  %2446 = vmatpush3.bf16.msra.mxu1 %v2587_v14 }
  0x30   : > { %2447 = vmatprep.subr.bf16.mxu1 %v2683_v8  ;;  %2335 = vmatpush3.bf16.msra.mxu0 %v2590_v16 }
  0x31   : > { %2336 = vmatprep.subr.bf16.mxu0 %v2591_v18  ;;  %2461 = vmatprep.mubr.msk.bf16.mxu1 %vm2684_vm4, %v2683_v8  ;;  %v2612_v18 = vld [vmem:[%s3251_s5 + $0x30] sm:$0xff]  }
  0x33   : > { %2448 = vmatpush3.bf16.msra.mxu1 %v2589_v17 }
  0x34   : > { %2449 = vmatprep.subr.bf16.mxu1 %v2683_v8  ;;  %2337 = vmatpush3.bf16.msra.mxu0 %v2593_v19  ;;  %v2613_v19 = vld [vmem:[%s3251_s5 + $0x28] sm:$0xff]  }
  0x35   : > { %2338 = vmatprep.subr.bf16.mxu0 %v2594_v21  ;;  %v2615_v21 = vld [vmem:[%s3251_s5 + $0x18] sm:$0xff]  }
  0x37   : > { %2450 = vmatpush3.bf16.msra.mxu1 %v2592_v20  ;;  %v2614_v20 = vld [vmem:[%s3251_s5 + $0x20] sm:$0xff]  }
  0x38   : > { %2451 = vmatprep.subr.bf16.mxu1 %v2683_v8  ;;  %2339 = vmatpush3.bf16.msra.mxu0 %v2596_v22  ;;  %v2616_v22 = vld [vmem:[%s3251_s5 + $0x10] sm:$0xff]  }
  0x39   : > { %2340 = vmatprep.subr.bf16.mxu0 %v2597_v24  ;;  %v2618_v24 = vld [vmem:[%s3251_s5] sm:$0xff]  }
  0x3b   : > { %2452 = vmatpush3.bf16.msra.mxu1 %v2595_v23  ;;  %v2617_v23 = vld [vmem:[%s3251_s5 + $0x8] sm:$0xff]  }
  0x3c   : > { %2453 = vmatprep.subr.bf16.mxu1 %v2683_v8  ;;  %2341 = vmatpush3.bf16.msra.mxu0 %v2599_v25 }
  0x3d   : > { %2342 = vmatprep.subr.bf16.mxu0 %v2600_v27 }
  0x3f   : > { %2454 = vmatpush3.bf16.msra.mxu1 %v2598_v26 }
  0x40   : > { %2455 = vmatprep.subr.bf16.mxu1 %v2683_v8  ;;  %2343 = vmatpush3.bf16.msra.mxu0 %v2602_v28 }
  0x41   : > { %2344 = vmatprep.subr.bf16.mxu0 %v2603_v30 }
  0x43   : > { %2456 = vmatpush3.bf16.msra.mxu1 %v2601_v29  ;;  %v2193_v29 = vld [vmem:[%s3250_s4] ss:$0 sm:$0xff] }
  0x44   : > { %2457 = vmatprep.subr.bf16.mxu1 %v2683_v8  ;;  %2345 = vmatpush3.bf16.msra.mxu0 %v2605_v31 }
  0x45   : > { %2346 = vmatprep.subr.bf16.mxu0 %v2606_v33 }
  0x47   : > { %2458 = vmatpush3.bf16.msra.mxu1 %v2604_v32 }
  0x48   : > { %2459 = vmatprep.subr.bf16.mxu1 %v2683_v8  ;;  %2347 = vmatpush3.bf16.msra.mxu0 %v2608_v34 }
  0x49   : > { %2348 = vmatprep.subr.bf16.mxu0 %v2609_v36 }
  0x4b   : > { %2460 = vmatpush3.bf16.msra.mxu1 %v2607_v35 }
  0x4c   : > { %2349 = vmatpush3.bf16.msra.mxu0 %v2610_v37 }
  0x4d   : > { %2465 = vmatprep.subr.bf16.mxu0 %v2683_v8 }
  0xee   : > { %v2328_v39 = vpop.f32.mrf.mxu1 }
  0xef   : > { %v2306_v38 = vpop.f32.mrf.mxu0 }
  0xf0   : > { %v2329_v42 = vpop.f32.mrf.mxu1 }
  0xf1   : > { %v2307_v41 = vpop.f32.mrf.mxu0  ;;  %v2330_v47 = vadd.f32 %v2329_v42, %v2328_v39  ;;  %v2619_v42 = vld [vmem:[%s3253_s7 + $0xb8] sm:$0xff]  }
  0xf2   : > { %v2308_v43 = vadd.f32 %v2307_v41, %v2306_v38  ;;  %v2331_v45 = vpop.f32.mrf.mxu1 }
  0xf3   : > { %v2309_v44 = vpop.f32.mrf.mxu0 }
  0xf4   : > { %v829_v46 = vadd.f32 %v2308_v43, %v2160_v40  ;;  %v2332_v49 = vpop.f32.mrf.mxu1 }
  0xf5   : > { %v2310_v48 = vpop.f32.mrf.mxu0  ;;  %v2333_v54 = vadd.f32 %v2332_v49, %v2331_v45  ;;  %v2621_v45 = vld [vmem:[%s3253_s7 + $0xb0] sm:$0xff]  }
  0xf6   : > { %v2967_v50 = vadd.f32 %v2330_v47, %v829_v46  ;;  %v2311_v51 = vadd.f32 %v2310_v48, %v2309_v44  ;;  %v2620_v44 = vld [vmem:[%s3253_s7 + $0x78] sm:$0xff]   ;;  %v2623_v47 = vld [vmem:[%s3253_s7 + $0x70] sm:$0xff]   ;;  %v2624_v48 = vld [vmem:[%s3253_s7 + $0xa8] sm:$0xff]  }
  0xf7   : > { %v2622_v46 = vld [vmem:[%s3253_s7 + $0x38] sm:$0xff]   ;;  %2374 = vmatprep.subr.bf16.mxu1 %v2620_v44  ;;  %v2625_v49 = vld [vmem:[%s3253_s7 + $0x30] sm:$0xff]   ;;  %v2645_v44 = vld [vmem:[%s3255_s9 + $0x28] sm:$0xff]  }
  0xf8   : > { %v876_v52 = vmax.f32 %v2967_v50, 0.0  ;;  %v832_v53 = vadd.f32 %v2311_v51, %v2160_v40  ;;  %v2626_v51 = vld [vmem:[%s3253_s7 + $0x68] sm:$0xff]  }
  0xfa   : > { %v882_v55 = vrot.slane %v876_v52, 7  ;;  %v2970_v56 = vadd.f32 %v2333_v54, %v832_v53  ;;  %v2627_v52 = vld [vmem:[%s3253_s7 + $0xa0] sm:$0xff]   ;;  %v2628_v53 = vld [vmem:[%s3253_s7 + $0x28] sm:$0xff]  }
  0xfb   : > { %v2629_v54 = vld [vmem:[%s3253_s7 + $0x60] sm:$0xff]  }
  0xfc   : > { %888 = vst [vmem:[#allocation2] sm:$0xfe] %v882_v55  ;;  %v877_v57 = vmax.f32 %v2970_v56, 0.0 }
  0xfe   : > { %v883_v58 = vrot.slane %v877_v57, 7  ;;  %v2631_v57 = vld [vmem:[%s3253_s7 + $0x20] sm:$0xff]  }
 0x100   : > { %890 = vst [vmem:[#allocation2 + $0x20] sm:$0x1] %v883_v58  ;;  %v884_v59 = vsel %vm461_vm1, %v882_v55, %v883_v58  ;;  %v2630_v55 = vld [vmem:[%s3253_s7 + $0x98] sm:$0xff]  }
 0x101   : > { %v2632_v58 = vld [vmem:[%s3253_s7 + $0x58] sm:$0xff]  }
 0x103   : > { %v898_v60 = vld [vmem:[#allocation2] sm:$0xfc] }
 0x104   : > { %v894_v61 = vld [vmem:[#allocation2] sm:$0xfe]  ;;  %v900_v0 = vpack.c.bf16 %v884_v59, %v898_v60  ;;  %v2634_v60 = vld [vmem:[%s3253_s7 + $0x18] sm:$0xff]  }
 0x105   : > { %v891_v62 = vld [vmem:[#allocation2] sm:$0xff]  ;;  %v896_v63 = vpack.c.bf16 %v884_v59, %v894_v61  ;;  %v2635_v61 = vld [vmem:[%s3253_s7 + $0x50] sm:$0xff]  }
 0x106   : > { %1321 = vst [vmem:[#allocation2] sm:$0x7] %v2683_v8  ;;  %v917_v7 = vrot.slane %v900_v0, 1  ;;  %v893_v17 = vpack.c.bf16 %v884_v59, %v891_v62  ;;  %v2633_v59 = vld [vmem:[%s3253_s7 + $0x90] sm:$0xff]   ;;  %v2636_v62 = vld [vmem:[%s3253_s7 + $0x88] sm:$0xff]  }
 0x107   : > { %v905_v1 = vshll.u32 %v896_v63, 16  ;;  %v899_v2 = vld [vmem:[#allocation2 + $0x20] sm:$0x3]  ;;  %v903_v10 = vshrl.u32 %v896_v63, 16  ;;  %v2637_v63 = vld [vmem:[%s3253_s7 + $0x10] sm:$0xff]   ;;  %v2638_v0 = vld [vmem:[%s3253_s7 + $0x48] sm:$0xff]  }
 0x108   : > { %v895_v3 = vld [vmem:[#allocation2 + $0x20] sm:$0x1]  ;;  %v901_v4 = vpack.c.bf16 %v899_v2, %v899_v2  ;;  %v2640_v2 = vld [vmem:[%s3253_s7 + $0x8] sm:$0xff]  }
 0x109   : > { %v897_v5 = vpack.c.bf16 %v895_v3, %v895_v3  ;;  %v907_v6 = vrot.slane %v905_v1, 1  ;;  %v2639_v1 = vld [vmem:[%s3253_s7 + $0x80] sm:$0xff]  }
 0x10a   : > { %v918_v9 = vrot.slane %v901_v4, 1  ;;  %v2641_v3 = vld [vmem:[%s3253_s7 + $0x40] sm:$0xff]  }
 0x10b   : > { %v910_v11 = vshll.u32 %v897_v5, 16  ;;  %v908_v13 = vor.u32 %v907_v6, %v903_v10  ;;  %v2642_v4 = vld [vmem:[%s3253_s7] sm:$0xff]  }
 0x10c   : > { %v919_v12 = vsel %vm526_vm2, %v917_v7, %v918_v9  ;;  %v2218_v5 = vld [vmem:[%s3252_s6] ss:$0 sm:$0xff] }
 0x10d   : > { %v912_v14 = vrot.slane %v910_v11, 1  ;;  %2462 = vmatmul.mubr.bf16.vlgmr.msra.gmra.mxu1 %v919_v12 }
 0x10e   : > { %2375 = vmatpush3.bf16.msra.mxu1 %v2622_v46  ;;  %v2647_v46 = vld [vmem:[%s3255_s9 + $0x18] sm:$0xff]  }
 0x10f   : > { %v913_v16 = vsel %vm497_vm3, %v908_v13, %v912_v14  ;;  %2376 = vmatprep.subr.bf16.mxu1 %v2623_v47  ;;  %v2648_v47 = vld [vmem:[%s3255_s9 + $0x10] sm:$0xff]  }
 0x110   : > { %1152 = vmatprep.mubr.bf16.mxu0 %v913_v16 }
 0x111   : > { %1153 = vmatmul.mubr.bf16.vlgmr.msra.gmra.mxu0 %v893_v17 }
 0x112   : > { %2466 = vmatpush3.bf16.msra.mxu0 %v2611_v15  ;;  %2481 = vmatprep.mubr.msk.bf16.mxu0 %vm2684_vm4, %v2683_v8 }
 0x113   : > { %2467 = vmatprep.subr.bf16.mxu0 %v2683_v8  ;;  %2377 = vmatpush3.bf16.msra.mxu1 %v2625_v49  ;;  %v2650_v49 = vld [vmem:[%s3255_s9] sm:$0xff]  }
 0x114   : > { %2378 = vmatprep.subr.bf16.mxu1 %v2626_v51  ;;  %v2652_v51 = vld [vmem:[%s3257_s11 + $0x78] sm:$0xff]  }
 0x116   : > { %2468 = vmatpush3.bf16.msra.mxu0 %v2612_v18 }
 0x117   : > { %2469 = vmatprep.subr.bf16.mxu0 %v2683_v8  ;;  %2379 = vmatpush3.bf16.msra.mxu1 %v2628_v53 }
 0x118   : > { %2380 = vmatprep.subr.bf16.mxu1 %v2629_v54 }
 0x11a   : > { %2470 = vmatpush3.bf16.msra.mxu0 %v2613_v19 }
 0x11b   : > { %2471 = vmatprep.subr.bf16.mxu0 %v2683_v8  ;;  %2381 = vmatpush3.bf16.msra.mxu1 %v2631_v57 }
 0x11c   : > { %2382 = vmatprep.subr.bf16.mxu1 %v2632_v58 }
 0x11e   : > { %2472 = vmatpush3.bf16.msra.mxu0 %v2614_v20 }
 0x11f   : > { %2473 = vmatprep.subr.bf16.mxu0 %v2683_v8  ;;  %2383 = vmatpush3.bf16.msra.mxu1 %v2634_v60 }
 0x120   : > { %2384 = vmatprep.subr.bf16.mxu1 %v2635_v61 }
 0x122   : > { %2474 = vmatpush3.bf16.msra.mxu0 %v2615_v21 }
 0x123   : > { %2475 = vmatprep.subr.bf16.mxu0 %v2683_v8  ;;  %2385 = vmatpush3.bf16.msra.mxu1 %v2637_v63 }
 0x124   : > { %2386 = vmatprep.subr.bf16.mxu1 %v2638_v0 }
 0x126   : > { %2476 = vmatpush3.bf16.msra.mxu0 %v2616_v22 }
 0x127   : > { %2477 = vmatprep.subr.bf16.mxu0 %v2683_v8  ;;  %2387 = vmatpush3.bf16.msra.mxu1 %v2640_v2 }
 0x128   : > { %2388 = vmatprep.subr.bf16.mxu1 %v2641_v3 }
 0x12a   : > { %2478 = vmatpush3.bf16.msra.mxu0 %v2617_v23 }
 0x12b   : > { %2479 = vmatprep.subr.bf16.mxu0 %v2683_v8  ;;  %2389 = vmatpush3.bf16.msra.mxu1 %v2642_v4 }
 0x12c   : > { %2505 = vmatprep.subr.bf16.mxu1 %v2683_v8 }
 0x12e   : > { %2480 = vmatpush3.bf16.msra.mxu0 %v2618_v24 }
 0x12f   : > { %2485 = vmatprep.subr.bf16.mxu0 %v2683_v8 }
 0x1cd   : > { %v1195_v25 = vpop.f32.mrf.mxu1 }
 0x1cf   : > { %v2463_v26 = vpop.f32.mrf.mxu1 }
 0x1d1   : > { %v2350_v27 = vpop.f32.mrf.mxu0  ;;  %v1198_v28 = vpop.f32.mrf.mxu1 }
 0x1d3   : > { %v2351_v30 = vpop.f32.mrf.mxu0  ;;  %v2464_v31 = vpop.f32.mrf.mxu1 }
 0x1d4   : > { %v2352_v32 = vadd.f32 %v2351_v30, %v2350_v27 }
 0x1d5   : > { %v2353_v33 = vpop.f32.mrf.mxu0 }
 0x1d6   : > { %v1155_v34 = vadd.f32 %v2352_v32, %v2193_v29 }
 0x1d7   : > { %v2354_v35 = vpop.f32.mrf.mxu0 }
 0x1d8   : > { %v2355_v36 = vadd.f32 %v2354_v35, %v2353_v33  ;;  %v1196_v37 = vadd.f32 %v1195_v25, %v1155_v34 }
 0x1da   : > { %v1158_v38 = vadd.f32 %v2355_v36, %v2193_v29  ;;  %v1202_v40 = vmax.f32 %v1196_v37, 0.0 }
 0x1dc   : > { %v1199_v39 = vadd.f32 %v1198_v28, %v1158_v38 }
 0x1de   : > { %v1203_v41 = vmax.f32 %v1199_v39, 0.0 }
 0x1e0   : > { %v1204_v43 = vpack.c.bf16 %v1203_v41, %v1202_v40  ;;  %v2643_v40 = vld [vmem:[%s3255_s9 + $0x38] sm:$0xff]  }
 0x1e2   : > { %2482 = vmatmul.mubr.bf16.vlgmr.msra.gmra.mxu0 %v1204_v43  ;;  %v2644_v43 = vld [vmem:[%s3255_s9 + $0x30] sm:$0xff]  }
 0x1e3   : > { %2486 = vmatpush3.bf16.msra.mxu0 %v2619_v42  ;;  %2501 = vmatprep.mubr.msk.bf16.mxu0 %vm2684_vm4, %v2683_v8 }
 0x1e4   : > { %2487 = vmatprep.subr.bf16.mxu0 %v2683_v8 }
 0x1e7   : > { %2488 = vmatpush3.bf16.msra.mxu0 %v2621_v45  ;;  %v2646_v45 = vld [vmem:[%s3255_s9 + $0x20] sm:$0xff]  }
 0x1e8   : > { %2489 = vmatprep.subr.bf16.mxu0 %v2683_v8 }
 0x1eb   : > { %2490 = vmatpush3.bf16.msra.mxu0 %v2624_v48  ;;  %v2649_v48 = vld [vmem:[%s3255_s9 + $0x8] sm:$0xff]  }
 0x1ec   : > { %2491 = vmatprep.subr.bf16.mxu0 %v2683_v8 }
 0x1ef   : > { %2492 = vmatpush3.bf16.msra.mxu0 %v2627_v52  ;;  %v2654_v52 = vld [vmem:[%s3257_s11 + $0x38] sm:$0xff]  }
 0x1f0   : > { %2493 = vmatprep.subr.bf16.mxu0 %v2683_v8 }
 0x1f3   : > { %2494 = vmatpush3.bf16.msra.mxu0 %v2630_v55 }
 0x1f4   : > { %2495 = vmatprep.subr.bf16.mxu0 %v2683_v8 }
 0x1f7   : > { %2496 = vmatpush3.bf16.msra.mxu0 %v2633_v59  ;;  %v2227_v59 = vld [vmem:[%s3254_s8] ss:$0 sm:$0xff] }
 0x1f8   : > { %2497 = vmatprep.subr.bf16.mxu0 %v2683_v8 }
 0x1fb   : > { %2498 = vmatpush3.bf16.msra.mxu0 %v2636_v62 }
 0x1fc   : > { %2499 = vmatprep.subr.bf16.mxu0 %v2683_v8 }
 0x1ff   : > { %2500 = vmatpush3.bf16.msra.mxu0 %v2639_v1 }
 0x200   : > { %2414 = vmatprep.subr.bf16.mxu0 %v2652_v51 }
 0x2a2   : > { %v1310_v6 = vpop.f32.mrf.mxu0 }
 0x2a3   : > { %v1311_v7 = vadd.f32 %v2218_v5, %v1310_v6 }
 0x2a4   : > { %v2483_v9 = vpop.f32.mrf.mxu0 }
 0x2a5   : > { %v3100_v10 = vadd.f32 %v1311_v7, %v2967_v50  ;;  %v2651_v7 = vld [vmem:[%s3257_s11 + $0xb8] sm:$0xff]  }
 0x2a6   : > { %v1313_v11 = vpop.f32.mrf.mxu0 }
 0x2a7   : > { %v1319_v12 = vmax.f32 %v3100_v10, 0.0  ;;  %v1314_v13 = vadd.f32 %v2218_v5, %v1313_v11  ;;  %v2653_v11 = vld [vmem:[%s3257_s11 + $0xb0] sm:$0xff]  }
 0x2a8   : > { %v2484_v14 = vpop.f32.mrf.mxu0 }
 0x2a9   : > { %v1326_v15 = vrot.slane %v1319_v12, 5  ;;  %v3104_v16 = vadd.f32 %v1314_v13, %v2970_v56  ;;  %v2655_v12 = vld [vmem:[%s3257_s11 + $0x70] sm:$0xff]   ;;  %v2656_v14 = vld [vmem:[%s3257_s11 + $0xa8] sm:$0xff]  }
 0x2aa   : > { %v2657_v13 = vld [vmem:[%s3257_s11 + $0x30] sm:$0xff]  }
 0x2ab   : > { %1332 = vst [vmem:[#allocation2] sm:$0xf8] %v1326_v15  ;;  %v1320_v17 = vmax.f32 %v3104_v16, 0.0 }
 0x2ad   : > { %v1327_v18 = vrot.slane %v1320_v17, 5  ;;  %v2660_v17 = vld [vmem:[%s3257_s11 + $0x28] sm:$0xff]  }
 0x2af   : > { %1334 = vst [vmem:[#allocation2 + $0x20] sm:$0x7] %v1327_v18  ;;  %v1328_v19 = vsel %vm1325_vm5, %v1326_v15, %v1327_v18  ;;  %v2658_v15 = vld [vmem:[%s3257_s11 + $0x68] sm:$0xff]   ;;  %v2659_v18 = vld [vmem:[%s3257_s11 + $0xa0] sm:$0xff]  }
 0x2b2   : > { %v1342_v20 = vld [vmem:[#allocation2] sm:$0xc0] }
 0x2b3   : > { %v1338_v21 = vld [vmem:[#allocation2] sm:$0xf8]  ;;  %v1344_v23 = vpack.c.bf16 %v1328_v19, %v1342_v20 }
 0x2b4   : > { %v1335_v50 = vld [vmem:[#allocation2] sm:$0xff]  ;;  %v1340_v22 = vpack.c.bf16 %v1328_v19, %v1338_v21  ;;  %v2662_v21 = vld [vmem:[%s3257_s11 + $0x98] sm:$0xff]  }
 0x2b5   : > { %1770 = vst [vmem:[#allocation2] sm:$0x1] %v2683_v8  ;;  %v1368_v29 = vrot.slane %v1344_v23, 3  ;;  %v1337_v42 = vpack.c.bf16 %v1328_v19, %v1335_v50  ;;  %v2661_v19 = vld [vmem:[%s3257_s11 + $0x60] sm:$0xff]   ;;  %v2664_v50 = vld [vmem:[%s3257_s11 + $0x58] sm:$0xff]   ;;  %v2665_v23 = vld [vmem:[%s3257_s11 + $0x90] sm:$0xff]  }
 0x2b6   : > { %v1348_v24 = vshrl.u32 %v1340_v22, 16  ;;  %v1351_v25 = vshll.u32 %v1340_v22, 16  ;;  %v1343_v26 = vld [vmem:[#allocation2 + $0x20] sm:$0x3f]  ;;  %v2666_v22 = vld [vmem:[%s3257_s11 + $0x18] sm:$0xff]  }
 0x2b7   : > { %v1339_v27 = vld [vmem:[#allocation2 + $0x20] sm:$0x7]  ;;  %v1345_v56 = vpack.c.bf16 %v1343_v26, %v1343_v26  ;;  %v2668_v26 = vld [vmem:[%s3257_s11 + $0x88] sm:$0xff]  }
 0x2b8   : > { %v1341_v28 = vpack.c.bf16 %v1339_v27, %v1339_v27  ;;  %1771 = vst [vmem:[#allocation2 + $0x21] sm:$0x1] %v2683_v8  ;;  %v1350_v30 = vrot.slane %v1348_v24, 1  ;;  %v1353_v32 = vrot.slane %v1351_v25, 2  ;;  %v2663_v20 = vld [vmem:[%s3257_s11 + $0x20] sm:$0xff]   ;;  %v2667_v24 = vld [vmem:[%s3257_s11 + $0x50] sm:$0xff]  }
 0x2b9   : > { %v1369_v31 = vrot.slane %v1345_v56, 3  ;;  %v2669_v25 = vld [vmem:[%s3257_s11 + $0x10] sm:$0xff]   ;;  %v2670_v27 = vld [vmem:[%s3257_s11 + $0x48] sm:$0xff]  }
 0x2ba   : > { %v1356_v33 = vshrl.u32 %v1341_v28, 16  ;;  %v1359_v34 = vshll.u32 %v1341_v28, 16  ;;  %v1354_v38 = vor.u32 %v1353_v32, %v1350_v30  ;;  %v2672_v56 = vld [vmem:[%s3257_s11 + $0x8] sm:$0xff]   ;;  %v2671_v28 = vld [vmem:[%s3257_s11 + $0x80] sm:$0xff]  }
 0x2bb   : > { %v1370_v35 = vsel %vm1367_vm6, %v1368_v29, %v1369_v31  ;;  %v2673_v29 = vld [vmem:[%s3257_s11 + $0x40] sm:$0xff]  }
 0x2bc   : > { %v1358_v36 = vrot.slane %v1356_v33, 1  ;;  %v1361_v37 = vrot.slane %v1359_v34, 2  ;;  %2502 = vmatmul.mubr.bf16.vlgmr.msra.gmra.mxu0 %v1370_v35  ;;  %v2674_v30 = vld [vmem:[%s3257_s11] sm:$0xff]  }
 0x2bd   : > { %2415 = vmatpush3.bf16.msra.mxu0 %v2654_v52  ;;  %v2252_v31 = vld [vmem:[%s3256_s10] ss:$0 sm:$0xff] }
 0x2be   : > { %v1362_v39 = vor.u32 %v1361_v37, %v1358_v36  ;;  %2416 = vmatprep.subr.bf16.mxu0 %v2655_v12 }
 0x2c0   : > { %v1363_v41 = vsel %vm1346_vm7, %v1354_v38, %v1362_v39 }
 0x2c1   : > { %1603 = vmatprep.mubr.bf16.mxu1 %v1363_v41  ;;  %2417 = vmatpush3.bf16.msra.mxu0 %v2657_v13 }
 0x2c2   : > { %1604 = vmatmul.mubr.bf16.vlgmr.msra.gmra.mxu1 %v1337_v42  ;;  %2418 = vmatprep.subr.bf16.mxu0 %v2658_v15 }
 0x2c3   : > { %2506 = vmatpush3.bf16.msra.mxu1 %v2643_v40  ;;  %2521 = vmatprep.mubr.msk.bf16.mxu1 %vm2684_vm4, %v2683_v8 }
 0x2c4   : > { %2507 = vmatprep.subr.bf16.mxu1 %v2683_v8 }
 0x2c5   : > { %2419 = vmatpush3.bf16.msra.mxu0 %v2660_v17 }
 0x2c6   : > { %2420 = vmatprep.subr.bf16.mxu0 %v2661_v19 }
 0x2c7   : > { %2508 = vmatpush3.bf16.msra.mxu1 %v2644_v43 }
 0x2c8   : > { %2509 = vmatprep.subr.bf16.mxu1 %v2683_v8 }
 0x2c9   : > { %2421 = vmatpush3.bf16.msra.mxu0 %v2663_v20 }
 0x2ca   : > { %2422 = vmatprep.subr.bf16.mxu0 %v2664_v50 }
 0x2cb   : > { %2510 = vmatpush3.bf16.msra.mxu1 %v2645_v44 }
 0x2cc   : > { %2511 = vmatprep.subr.bf16.mxu1 %v2683_v8 }
 0x2cd   : > { %2423 = vmatpush3.bf16.msra.mxu0 %v2666_v22 }
 0x2ce   : > { %2424 = vmatprep.subr.bf16.mxu0 %v2667_v24 }
 0x2cf   : > { %2512 = vmatpush3.bf16.msra.mxu1 %v2646_v45 }
 0x2d0   : > { %2513 = vmatprep.subr.bf16.mxu1 %v2683_v8 }
 0x2d1   : > { %2425 = vmatpush3.bf16.msra.mxu0 %v2669_v25 }
 0x2d2   : > { %2426 = vmatprep.subr.bf16.mxu0 %v2670_v27 }
 0x2d3   : > { %2514 = vmatpush3.bf16.msra.mxu1 %v2647_v46 }
 0x2d4   : > { %2515 = vmatprep.subr.bf16.mxu1 %v2683_v8 }
 0x2d5   : > { %2427 = vmatpush3.bf16.msra.mxu0 %v2672_v56 }
 0x2d6   : > { %2428 = vmatprep.subr.bf16.mxu0 %v2673_v29 }
 0x2d7   : > { %2516 = vmatpush3.bf16.msra.mxu1 %v2648_v47 }
 0x2d8   : > { %2517 = vmatprep.subr.bf16.mxu1 %v2683_v8 }
 0x2d9   : > { %2429 = vmatpush3.bf16.msra.mxu0 %v2674_v30 }
 0x2db   : > { %2518 = vmatpush3.bf16.msra.mxu1 %v2649_v48 }
 0x2dc   : > { %2519 = vmatprep.subr.bf16.mxu1 %v2683_v8 }
 0x2df   : > { %2520 = vmatpush3.bf16.msra.mxu1 %v2650_v49 }
 0x2e0   : > { %2525 = vmatprep.subr.bf16.mxu1 %v2683_v8 }
 0x37c   : > { %v1646_v53 = vpop.f32.mrf.mxu0 }
 0x37e   : > { %v2503_v54 = vpop.f32.mrf.mxu0 }
 0x380   : > { %v1649_v55 = vpop.f32.mrf.mxu0 }
 0x382   : > { %v2390_v57 = vpop.f32.mrf.mxu1  ;;  %v2504_v58 = vpop.f32.mrf.mxu0 }
 0x384   : > { %v2391_v60 = vpop.f32.mrf.mxu1 }
 0x385   : > { %v2392_v61 = vadd.f32 %v2391_v60, %v2390_v57 }
 0x386   : > { %v2393_v62 = vpop.f32.mrf.mxu1 }
 0x387   : > { %v1606_v63 = vadd.f32 %v2392_v61, %v2227_v59 }
 0x388   : > { %v2394_v0 = vpop.f32.mrf.mxu1 }
 0x389   : > { %v2395_v1 = vadd.f32 %v2394_v0, %v2393_v62  ;;  %v1647_v2 = vadd.f32 %v1646_v53, %v1606_v63 }
 0x38b   : > { %v1609_v3 = vadd.f32 %v2395_v1, %v2227_v59  ;;  %v1653_v5 = vmax.f32 %v1647_v2, 0.0  ;;  %v2261_v2 = vld [vmem:[%s3258_s12] ss:$0 sm:$0xff] }
 0x38d   : > { %v1650_v4 = vadd.f32 %v1649_v55, %v1609_v3 }
 0x38f   : > { %v1654_v6 = vmax.f32 %v1650_v4, 0.0 }
 0x391   : > { %v1655_v9 = vpack.c.bf16 %v1654_v6, %v1653_v5 }
 0x393   : > { %2522 = vmatmul.mubr.bf16.vlgmr.msra.gmra.mxu1 %v1655_v9 }
 0x394   : > { %2526 = vmatpush3.bf16.msra.mxu1 %v2651_v7  ;;  %2541 = vmatprep.mubr.msk.bf16.mxu1 %vm2684_vm4, %v2683_v8 }
 0x395   : > { %2527 = vmatprep.subr.bf16.mxu1 %v2683_v8 }
 0x398   : > { %2528 = vmatpush3.bf16.msra.mxu1 %v2653_v11 }
 0x399   : > { %2529 = vmatprep.subr.bf16.mxu1 %v2683_v8 }
 0x39c   : > { %2530 = vmatpush3.bf16.msra.mxu1 %v2656_v14 }
 0x39d   : > { %2531 = vmatprep.subr.bf16.mxu1 %v2683_v8 }
 0x3a0   : > { %2532 = vmatpush3.bf16.msra.mxu1 %v2659_v18 }
 0x3a1   : > { %2533 = vmatprep.subr.bf16.mxu1 %v2683_v8 }
 0x3a4   : > { %2534 = vmatpush3.bf16.msra.mxu1 %v2662_v21 }
 0x3a5   : > { %2535 = vmatprep.subr.bf16.mxu1 %v2683_v8 }
 0x3a8   : > { %2536 = vmatpush3.bf16.msra.mxu1 %v2665_v23 }
 0x3a9   : > { %2537 = vmatprep.subr.bf16.mxu1 %v2683_v8 }
 0x3ac   : > { %2538 = vmatpush3.bf16.msra.mxu1 %v2668_v26 }
 0x3ad   : > { %2539 = vmatprep.subr.bf16.mxu1 %v2683_v8 }
 0x3b0   : > { %2540 = vmatpush3.bf16.msra.mxu1 %v2671_v28 }
 0x453   : > { %v1761_v32 = vpop.f32.mrf.mxu1 }
 0x454   : > { %v1762_v33 = vadd.f32 %v2252_v31, %v1761_v32 }
 0x455   : > { %v2523_v34 = vpop.f32.mrf.mxu1 }
 0x456   : > { %v1768_v8 = vadd.f32 %v1762_v33, %v3100_v10 }
 0x457   : > { %v1764_v35 = vpop.f32.mrf.mxu1 }
 0x458   : > { %v1774_v36 = vrot.slane %v1768_v8, 7  ;;  %v1765_v37 = vadd.f32 %v2252_v31, %v1764_v35 }
 0x459   : > { %v2524_v38 = vpop.f32.mrf.mxu1 }
 0x45a   : > { %1780 = vst [vmem:[#allocation2] sm:$0xfe] %v1774_v36  ;;  %v1769_v39 = vadd.f32 %v1765_v37, %v3104_v16 }
 0x45c   : > { %v1775_v40 = vrot.slane %v1769_v39, 7 }
 0x45e   : > { %v1776_v41 = vsel %vm461_vm1, %v1774_v36, %v1775_v40  ;;  %1782 = vst [vmem:[#allocation2 + $0x20] sm:$0x1] %v1775_v40 }
 0x461   : > { %v1790_v42 = vld [vmem:[#allocation2] sm:$0xfc] }
 0x462   : > { %v1786_v43 = vld [vmem:[#allocation2] sm:$0xfe]  ;;  %v1792_v45 = vpack.c.bf16 %v1776_v41, %v1790_v42 }
 0x463   : > { %v1788_v44 = vpack.c.bf16 %v1776_v41, %v1786_v43  ;;  %v1783_v57 = vld [vmem:[#allocation2] sm:$0xff] }
 0x464   : > { %v1809_v52 = vrot.slane %v1792_v45, 1  ;;  %v1785_v61 = vpack.c.bf16 %v1776_v41, %v1783_v57 }
 0x465   : > { %v1797_v46 = vshll.u32 %v1788_v44, 16  ;;  %v1791_v47 = vld [vmem:[#allocation2 + $0x20] sm:$0x3]  ;;  %v1795_v54 = vshrl.u32 %v1788_v44, 16 }
 0x466   : > { %v1787_v48 = vld [vmem:[#allocation2 + $0x20] sm:$0x1]  ;;  %v1793_v49 = vpack.c.bf16 %v1791_v47, %v1791_v47 }
 0x467   : > { %v1789_v10 = vpack.c.bf16 %v1787_v48, %v1787_v48  ;;  %v1799_v51 = vrot.slane %v1797_v46, 1 }
 0x468   : > { %v1810_v53 = vrot.slane %v1793_v49, 1 }
 0x469   : > { %v1802_v55 = vshll.u32 %v1789_v10, 16  ;;  %v1800_v58 = vor.u32 %v1799_v51, %v1795_v54 }
 0x46a   : > { %v1811_v16 = vsel %vm526_vm2, %v1809_v52, %v1810_v53 }
 0x46b   : > { %v1804_v59 = vrot.slane %v1802_v55, 1  ;;  %2542 = vmatmul.mubr.bf16.vlgmr.msra.gmra.mxu1 %v1811_v16 }
 0x46d   : > { %v1805_v60 = vsel %vm497_vm3, %v1800_v58, %v1804_v59 }
 0x46e   : > { %2044 = vmatprep.mubr.bf16.mxu0 %v1805_v60 }
 0x46f   : > { %2045 = vmatmul.mubr.bf16.vlgmr.msra.gmra.mxu0 %v1785_v61 }
 0x52b   : > { %v2087_v62 = vpop.f32.mrf.mxu1 }
 0x52d   : > { %v2543_v63 = vpop.f32.mrf.mxu1 }
 0x52f   : > { %v2430_v0 = vpop.f32.mrf.mxu0  ;;  %v2090_v1 = vpop.f32.mrf.mxu1 }
 0x531   : > { %v2431_v3 = vpop.f32.mrf.mxu0  ;;  %v2544_v4 = vpop.f32.mrf.mxu1 }
 0x532   : > { %v2432_v5 = vadd.f32 %v2431_v3, %v2430_v0 }
 0x533   : > { %v2433_v6 = vpop.f32.mrf.mxu0 }
 0x534   : > { %v2047_v7 = vadd.f32 %v2432_v5, %v2261_v2 }
 0x535   : > { %v2434_v9 = vpop.f32.mrf.mxu0 }
 0x536   : > { %v2088_v11 = vadd.f32 %v2087_v62, %v2047_v7  ;;  %v2435_v12 = vadd.f32 %v2434_v9, %v2433_v6 }
 0x538   : > { %2094 = vst [vmem:[%s440_s29] sm:$0xff] %v2088_v11  ;;  %v2050_v13 = vadd.f32 %v2435_v12, %v2261_v2 }
 0x53a   : > { %v2091_v14 = vadd.f32 %v2090_v1, %v2050_v13 }
 0x53c   : > { %2095 = vst [vmem:[%s440_s29 + $0x8] sm:$0xff] %v2091_v14 }
 0x53d PF: > { %s23_s25 = sadd.s32 1, %s2681_s25  }
 0x53e   : > { %p20_p4 = scmp.ge.s32.totalorder %s23_s25, 4  }
 0x540   :  { %22 = sbr.rel (!%p20_p4) target bundleno = 1 (0x1), region = 103 }

// kernel: vqvae_forward.12
= control target key start
LH: loop header
LB: loop body
LE: loop exit
PB: predicated region body
PF: predicated region fallthrough
CT: control target
= control target key end

     0   :  { %s2354_s17 = smov 0   ;;  %s2774_s0 = inlined_call_operand.vmem [shape: bf16[2,32,128], index: 0, kind: input, shape index: {}]   ;;  %s2775_s1 = inlined_call_operand.vmem [shape: bf16[384,128], index: 1, kind: input, shape index: {}]   ;;  %s2776_s2 = inlined_call_operand.vmem [shape: f32[1,128], index: 2, kind: input, shape index: {}]   ;;  %s2777_s3 = inlined_call_operand.vmem [shape: bf16[128,128], index: 3, kind: input, shape index: {}]   ;;  %s2778_s4 = inlined_call_operand.vmem [shape: f32[1,128], index: 4, kind: input, shape index: {}]   ;;  %s2779_s5 = inlined_call_operand.vmem [shape: bf16[384,128], index: 5, kind: input, shape index: {}]   ;;  %s2780_s6 = inlined_call_operand.vmem [shape: f32[1,128], index: 6, kind: input, shape index: {}]   ;;  %s2781_s7 = inlined_call_operand.vmem [shape: bf16[128,128], index: 7, kind: input, shape index: {}]   ;;  %s2782_s8 = inlined_call_operand.vmem [shape: f32[1,128], index: 8, kind: input, shape index: {}]   ;;  %s2783_s9 = inlined_call_operand.vmem [shape: bf16[384,256], index: 9, kind: input, shape index: {}]   ;;  %s2784_s10 = inlined_call_operand.vmem [shape: f32[1,256], index: 10, kind: input, shape index: {}]   ;;  %s2785_s11 = inlined_call_operand.vmem [shape: bf16[2,32,256], index: 11, kind: output, shape index: {}]  }
   0x1 LB: > { %s1823_s18 = sadd.s32 4294967295, %s2290_s17   ;;  %p1827_p0 = scmp.ge.s32.totalorder %s2290_s17, 1  ;;  %s2290_s17 = sphi %s2354_s17, %s21_s17  }
   0x2   : > { %p337_p1 = scmp.lt.s32.totalorder %s2290_s17, 3 }
   0x4   : > { %p338_p2 = pnand %p1827_p0, %p337_p1 }
   0x5   : > { %p377_p3 = scmp.lt.s32.totalorder (!%p338_p2), %s1823_s18, 1 }
   0x6   : > { %341 = sbr.rel (%p338_p2) target bundleno = 1122 (0x462), region = 64 }
   0xb   : > { %v2146_v0 = vld [vmem:[%s2775_s1 + $0x78] sm:$0xff]   ;;  %v2148_v2 = vld [vmem:[%s2775_s1 + $0x70] sm:$0xff]   ;;  %v2292_v5 = vmov 0.0   ;;  %v2151_v6 = vld [vmem:[%s2775_s1 + $0x68] sm:$0xff]   ;;  %s2787_s18 = smov (!%p377_p3, %s1823_s18), 1  ;;  %v2293_v25 = vmov 0  }
   0xc   : > { %v2147_v1 = vld [vmem:[%s2775_s1 + $0x38] sm:$0xff]   ;;  %1960 = vmatprep.subr.bf16.mxu0 %v2146_v0  ;;  %v2150_v4 = vld [vmem:[%s2775_s1 + $0x30] sm:$0xff]   ;;  %400 = vst [vmem:[#allocation2] sm:$0x7] %v2292_v5  ;;  %401 = vst [vmem:[#allocation2 + $0x23] sm:$0x7] %v2292_v5 }
   0xd   : > { %1961 = vmatpush3.bf16.msra.mxu0 %v2147_v1  ;;  %v2149_v3 = vld [vmem:[%s2775_s1 + $0xb8] sm:$0xff]   ;;  %v2152_v7 = vld [vmem:[%s2775_s1 + $0xb0] sm:$0xff]   ;;  %v2153_v8 = vld [vmem:[%s2775_s1 + $0x28] sm:$0xff]   ;;  %s1954_s15 = sshll.u32 %s2787_s18, 4  ;;  %s1955_s19 = sshll.u32 %s2787_s18, 5 }
   0xe   : > { %1962 = vmatprep.subr.bf16.mxu0 %v2148_v2  ;;  %2056 = vmatprep.subr.bf16.mxu1 %v2149_v3  ;;  %v2154_v9 = vld [vmem:[%s2775_s1 + $0x60] sm:$0xff]   ;;  %v2155_v10 = vld [vmem:[%s2775_s1 + $0xa8] sm:$0xff]   ;;  %v2157_v12 = vld [vmem:[%s2775_s1 + $0x58] sm:$0xff]   ;;  %s381_s26 = scalar_lea.vmem %s2774_s0, %s1954_s15  ;;  %s386_s22 = scalar_lea.vmem %s2785_s11, %s1955_s19 }
   0xf   : > { %2057 = vmatpush3.bf16.msra.mxu1 %v2149_v3  ;;  %v2156_v11 = vld [vmem:[%s2775_s1 + $0x20] sm:$0xff]   ;;  %v2159_v14 = vld [vmem:[%s2775_s1 + $0x18] sm:$0xff]   ;;  %v2160_v16 = vld [vmem:[%s2775_s1 + $0x50] sm:$0xff]  }
  0x10   : > { %2058 = vmatprep.subr.bf16.mxu1 %v2152_v7  ;;  %v2158_v13 = vld [vmem:[%s2775_s1 + $0xa0] sm:$0xff]   ;;  %v2161_v15 = vld [vmem:[%s2775_s1 + $0x98] sm:$0xff]   ;;  %v2162_v17 = vld [vmem:[%s2775_s1 + $0x10] sm:$0xff]  }
  0x11   : > { %1963 = vmatpush3.bf16.msra.mxu0 %v2150_v4  ;;  %v2164_v18 = vld [vmem:[%s2775_s1 + $0x90] sm:$0xff]   ;;  %v2163_v19 = vld [vmem:[%s2775_s1 + $0x48] sm:$0xff]   ;;  %v2437_v22 = vld [vmem:[%s381_s26] sm:$0xf] }
  0x12   : > { %1964 = vmatprep.subr.bf16.mxu0 %v2151_v6  ;;  %v2165_v20 = vld [vmem:[%s2775_s1 + $0x8] sm:$0xff]   ;;  %v2439_v23 = vld [vmem:[%s381_s26 + $0x4] sm:$0xf]  ;;  %v392_v26 = vmax.bf16 %v2293_v25, %v2437_v22  ;;  %v2170_v37 = vld [vmem:[%s2777_s3 + $0x38] sm:$0xff]  }
  0x13   : > { %2059 = vmatpush3.bf16.msra.mxu1 %v2152_v7  ;;  %v2167_v21 = vld [vmem:[%s2775_s1 + $0x88] sm:$0xff]   ;;  %v2166_v24 = vld [vmem:[%s2775_s1 + $0x40] sm:$0xff]   ;;  %v393_v27 = vmax.bf16 %v2293_v25, %v2439_v23  ;;  %v2171_v46 = vld [vmem:[%s2777_s3 + $0x30] sm:$0xff]  }
  0x14   : > { %2060 = vmatprep.subr.bf16.mxu1 %v2155_v10  ;;  %v2448_v28 = vld [vmem:[%s381_s26 + $0x8] sm:$0xf]  ;;  %v2168_v29 = vld [vmem:[%s2775_s1] sm:$0xff]   ;;  %v2455_v31 = vld [vmem:[%s381_s26 + $0xc] sm:$0xf]  ;;  %v396_v32 = vunpack.c.l.bf16 %v392_v26 }
  0x15   : > { %1965 = vmatpush3.bf16.msra.mxu0 %v2153_v8  ;;  %v394_v30 = vmax.bf16 %v2293_v25, %v2448_v28  ;;  %v397_v33 = vunpack.c.l.bf16 %v393_v27  ;;  %v2169_v34 = vld [vmem:[%s2775_s1 + $0x80] sm:$0xff]   ;;  %v395_v35 = vmax.bf16 %v2293_v25, %v2455_v31  ;;  %v2282_v38 = vcombine.low %v392_v26, %v393_v27  ;;  %v2172_v54 = vld [vmem:[%s2777_s3 + $0x28] sm:$0xff]   ;;  %v2174_v56 = vld [vmem:[%s2777_s3 + $0x18] sm:$0xff]  }
  0x16   : > { %1966 = vmatprep.subr.bf16.mxu0 %v2154_v9  ;;  %402 = vst [vmem:[#allocation2 + $0x3] sm:$0xff] %v396_v32  ;;  %v2173_v55 = vld [vmem:[%s2777_s3 + $0x20] sm:$0xff]   ;;  %v2175_v57 = vld [vmem:[%s2777_s3 + $0x10] sm:$0xff]   ;;  %v2176_v58 = vld [vmem:[%s2777_s3 + $0x8] sm:$0xff]  }
  0x17   : > { %2061 = vmatpush3.bf16.msra.mxu1 %v2155_v10  ;;  %v398_v36 = vunpack.c.l.bf16 %v394_v30  ;;  %403 = vst [vmem:[#allocation2 + $0xb] sm:$0xff] %v397_v33  ;;  %v399_v39 = vunpack.c.l.bf16 %v395_v35  ;;  %655 = vmatprep.mubr.bf16.mxu0 %v2282_v38  ;;  %v2283_v43 = vcombine.low %v394_v30, %v395_v35  ;;  %v2177_v59 = vld [vmem:[%s2777_s3] sm:$0xff]   ;;  %v2178_v60 = vld [vmem:[%s2779_s5 + $0x78] sm:$0xff]   ;;  %v2181_v63 = vld [vmem:[%s2779_s5 + $0x70] sm:$0xff]  }
  0x18   : > { %2062 = vmatprep.subr.bf16.mxu1 %v2158_v13  ;;  %v2179_v61 = vld [vmem:[%s2779_s5 + $0xb8] sm:$0xff]   ;;  %v2183_v0 = vld [vmem:[%s2779_s5 + $0x30] sm:$0xff]   ;;  %v1832_v4 = vld [vmem:[%s2776_s2] ss:$0 sm:$0xff] }
  0x19   : > { %1967 = vmatpush3.bf16.msra.mxu0 %v2156_v11  ;;  %404 = vst [vmem:[#allocation2 + $0x13] sm:$0xff] %v398_v36  ;;  %405 = vst [vmem:[#allocation2 + $0x1b] sm:$0xff] %v399_v39  ;;  %v2180_v62 = vld [vmem:[%s2779_s5 + $0x38] sm:$0xff]   ;;  %v2182_v38 = vld [vmem:[%s2779_s5 + $0xb0] sm:$0xff]  }
  0x1a   : > { %1968 = vmatprep.subr.bf16.mxu0 %v2157_v12  ;;  %v2184_v39 = vld [vmem:[%s2779_s5 + $0x68] sm:$0xff]  }
  0x1b   : > { %2063 = vmatpush3.bf16.msra.mxu1 %v2158_v13 }
  0x1c   : > { %2064 = vmatprep.subr.bf16.mxu1 %v2161_v15 }
  0x1d   : > { %1969 = vmatpush3.bf16.msra.mxu0 %v2159_v14  ;;  %v406_v40 = vld [vmem:[#allocation2] sm:$0xff] }
  0x1e   : > { %1970 = vmatprep.subr.bf16.mxu0 %v2160_v16  ;;  %v407_v41 = vld [vmem:[#allocation2 + $0x8] sm:$0xff]  ;;  %859 = vst [vmem:[#allocation2] sm:$0x1] %v2292_v5 }
  0x1f   : > { %2065 = vmatpush3.bf16.msra.mxu1 %v2161_v15  ;;  %v418_v42 = vld [vmem:[#allocation2 + $0x6] sm:$0xff]  ;;  %v410_v44 = vpack.c.bf16 %v407_v41, %v406_v40 }
  0x20   : > { %2066 = vmatprep.subr.bf16.mxu1 %v2164_v18  ;;  %v419_v45 = vld [vmem:[#allocation2 + $0xe] sm:$0xff]  ;;  %v420_v48 = vld [vmem:[#allocation2 + $0x16] sm:$0xff]  ;;  %v421_v49 = vld [vmem:[#allocation2 + $0x1e] sm:$0xff] }
  0x21   : > { %1971 = vmatpush3.bf16.msra.mxu0 %v2162_v17  ;;  %v422_v47 = vpack.c.bf16 %v419_v45, %v418_v42  ;;  %v408_v50 = vld [vmem:[#allocation2 + $0x10] sm:$0xff]  ;;  %v409_v51 = vld [vmem:[#allocation2 + $0x18] sm:$0xff]  ;;  %v423_v52 = vpack.c.bf16 %v421_v49, %v420_v48  ;;  %860 = vst [vmem:[#allocation2 + $0x21] sm:$0x1] %v2292_v5  ;;  %v2185_v40 = vld [vmem:[%s2779_s5 + $0xa8] sm:$0xff]  }
  0x22   : > { %1972 = vmatprep.subr.bf16.mxu0 %v2163_v19  ;;  %v411_v53 = vpack.c.bf16 %v409_v51, %v408_v50  ;;  %v2186_v41 = vld [vmem:[%s2779_s5 + $0x28] sm:$0xff]   ;;  %v2187_v42 = vld [vmem:[%s2779_s5 + $0x60] sm:$0xff]   ;;  %v2190_v45 = vld [vmem:[%s2779_s5 + $0x58] sm:$0xff]  }
  0x23   : > { %2067 = vmatpush3.bf16.msra.mxu1 %v2164_v18  ;;  %2072 = vmatprep.mubr.bf16.mxu1 %v422_v47  ;;  %v2192_v47 = vld [vmem:[%s2779_s5 + $0x18] sm:$0xff]   ;;  %v2193_v48 = vld [vmem:[%s2779_s5 + $0x50] sm:$0xff]   ;;  %v2196_v51 = vld [vmem:[%s2779_s5 + $0x48] sm:$0xff]  }
  0x24   : > { %2068 = vmatprep.subr.bf16.mxu1 %v2167_v21  ;;  %v2194_v49 = vld [vmem:[%s2779_s5 + $0x90] sm:$0xff]  }
  0x25   : > { %1973 = vmatpush3.bf16.msra.mxu0 %v2165_v20  ;;  %v2195_v50 = vld [vmem:[%s2779_s5 + $0x10] sm:$0xff]  }
  0x26   : > { %1974 = vmatprep.subr.bf16.mxu0 %v2166_v24 }
  0x27   : > { %2069 = vmatpush3.bf16.msra.mxu1 %v2167_v21 }
  0x28   : > { %2070 = vmatprep.subr.bf16.mxu1 %v2169_v34 }
  0x29   : > { %1975 = vmatpush3.bf16.msra.mxu0 %v2168_v29 }
  0x2a   : > { %2076 = vmatprep.subr.bf16.mxu0 %v2170_v37 }
  0x2b   : > { %2071 = vmatpush3.bf16.msra.mxu1 %v2169_v34 }
  0x2c   : > { %656 = vmatmul.mubr.bf16.vlgmr.msra.gmra.mxu0 %v410_v44  ;;  %2008 = vmatprep.subr.bf16.mxu1 %v2178_v60  ;;  %v2189_v44 = vld [vmem:[%s2779_s5 + $0x20] sm:$0xff]  }
  0x2d   : > { %663 = vmatprep.mubr.bf16.mxu0 %v2283_v43  ;;  %2077 = vmatpush3.bf16.msra.mxu0 %v2170_v37  ;;  %v2188_v43 = vld [vmem:[%s2779_s5 + $0xa0] sm:$0xff]  }
  0x2e   : > { %2073 = vmatmul.mubr.bf16.vlgmr.msra.gmra.mxu1 %v423_v52  ;;  %2078 = vmatprep.subr.bf16.mxu0 %v2171_v46  ;;  %v2197_v52 = vld [vmem:[%s2779_s5 + $0x88] sm:$0xff]  }
  0x2f   : > { %2009 = vmatpush3.bf16.msra.mxu1 %v2180_v62  ;;  %v847_v62 = vunpack.c.l.bf16 %v2437_v22 }
  0x30   : > { %2010 = vmatprep.subr.bf16.mxu1 %v2181_v63 }
  0x31   : > { %2079 = vmatpush3.bf16.msra.mxu0 %v2171_v46  ;;  %v2191_v46 = vld [vmem:[%s2779_s5 + $0x98] sm:$0xff]  }
  0x32   : > { %2080 = vmatprep.subr.bf16.mxu0 %v2172_v54 }
  0x33   : > { %2011 = vmatpush3.bf16.msra.mxu1 %v2183_v0 }
  0x34   : > { %664 = vmatmul.mubr.bf16.gmra.mxu0 %v411_v53  ;;  %2012 = vmatprep.subr.bf16.mxu1 %v2184_v39  ;;  %v2198_v53 = vld [vmem:[%s2779_s5 + $0x8] sm:$0xff]  }
  0x35   : > { %2081 = vmatpush3.bf16.msra.mxu0 %v2172_v54  ;;  %v2199_v54 = vld [vmem:[%s2779_s5 + $0x40] sm:$0xff]  }
  0x36   : > { %2082 = vmatprep.subr.bf16.mxu0 %v2173_v55  ;;  %v2215_v39 = vld [vmem:[%s2783_s9 + $0x64] ss:$8 sps:$4 sm:$0xff]  }
  0x37   : > { %2013 = vmatpush3.bf16.msra.mxu1 %v2186_v41  ;;  %v2218_v41 = vld [vmem:[%s2783_s9 + $0x54] ss:$8 sps:$4 sm:$0xff]  }
  0x38   : > { %2014 = vmatprep.subr.bf16.mxu1 %v2187_v42  ;;  %v2236_v42 = vld [vmem:[%s2783_s9 + $0x174] ss:$8 sps:$4 sm:$0xff]  }
  0x39   : > { %2083 = vmatpush3.bf16.msra.mxu0 %v2173_v55  ;;  %v2200_v55 = vld [vmem:[%s2779_s5 + $0x80] sm:$0xff]  }
  0x3a   : > { %2084 = vmatprep.subr.bf16.mxu0 %v2174_v56 }
  0x3b   : > { %2015 = vmatpush3.bf16.msra.mxu1 %v2189_v44  ;;  %v2221_v44 = vld [vmem:[%s2783_s9 + $0x44] ss:$8 sps:$4 sm:$0xff]  }
  0x3c   : > { %2016 = vmatprep.subr.bf16.mxu1 %v2190_v45  ;;  %v2219_v45 = vld [vmem:[%s2783_s9 + $0x40] ss:$8 sps:$4 sm:$0xff]  }
  0x3d   : > { %2085 = vmatpush3.bf16.msra.mxu0 %v2174_v56  ;;  %v2201_v56 = vld [vmem:[%s2779_s5] sm:$0xff]  }
  0x3e   : > { %2086 = vmatprep.subr.bf16.mxu0 %v2175_v57 }
  0x3f   : > { %2017 = vmatpush3.bf16.msra.mxu1 %v2192_v47  ;;  %v2222_v47 = vld [vmem:[%s2783_s9 + $0x30] ss:$8 sps:$4 sm:$0xff]  }
  0x40   : > { %2018 = vmatprep.subr.bf16.mxu1 %v2193_v48  ;;  %v2227_v48 = vld [vmem:[%s2783_s9 + $0x24] ss:$8 sps:$4 sm:$0xff]  }
  0x41   : > { %2087 = vmatpush3.bf16.msra.mxu0 %v2175_v57  ;;  %v2202_v57 = vld [vmem:[%s2781_s7 + $0x38] sm:$0xff]  }
  0x42   : > { %2088 = vmatprep.subr.bf16.mxu0 %v2176_v58 }
  0x43   : > { %2019 = vmatpush3.bf16.msra.mxu1 %v2195_v50  ;;  %v2230_v50 = vld [vmem:[%s2783_s9 + $0x14] ss:$8 sps:$4 sm:$0xff]  }
  0x44   : > { %2020 = vmatprep.subr.bf16.mxu1 %v2196_v51  ;;  %v2228_v51 = vld [vmem:[%s2783_s9 + $0x10] ss:$8 sps:$4 sm:$0xff]  }
  0x45   : > { %2089 = vmatpush3.bf16.msra.mxu0 %v2176_v58  ;;  %v1857_v58 = vld [vmem:[%s2778_s4] ss:$0 sm:$0xff] }
  0x46   : > { %2090 = vmatprep.subr.bf16.mxu0 %v2177_v59 }
  0x47   : > { %2021 = vmatpush3.bf16.msra.mxu1 %v2198_v53  ;;  %v2231_v53 = vld [vmem:[%s2783_s9] ss:$8 sps:$4 sm:$0xff]  }
  0x48   : > { %2022 = vmatprep.subr.bf16.mxu1 %v2199_v54  ;;  %v2239_v54 = vld [vmem:[%s2783_s9 + $0xf4] ss:$8 sps:$4 sm:$0xff]  }
  0x49   : > { %2091 = vmatpush3.bf16.msra.mxu0 %v2177_v59  ;;  %v849_v59 = vunpack.c.l.bf16 %v2448_v28 }
  0x4a   : > { %2096 = vmatprep.subr.bf16.mxu0 %v2179_v61 }
  0x4b   : > { %2023 = vmatpush3.bf16.msra.mxu1 %v2201_v56  ;;  %v2245_v56 = vld [vmem:[%s2783_s9 + $0xe4] ss:$8 sps:$4 sm:$0xff]  }
  0x4c   : > { %2116 = vmatprep.subr.bf16.mxu1 %v2202_v57 }
  0xec   : > { %v1976_v1 = vpop.f32.mrf.mxu0 }
  0xee   : > { %v1977_v2 = vpop.f32.mrf.mxu0  ;;  %v2074_v3 = vpop.f32.mrf.mxu1 }
  0xef   : > { %v1978_v6 = vadd.f32 %v1977_v2, %v1976_v1  ;;  %v850_v2 = vunpack.c.l.bf16 %v2455_v31 }
  0xf0   : > { %v1979_v7 = vpop.f32.mrf.mxu0  ;;  %v706_v8 = vpop.f32.mrf.mxu1 }
  0xf1   : > { %v658_v9 = vadd.f32 %v1978_v6, %v1832_v4 }
  0xf2   : > { %v1980_v10 = vpop.f32.mrf.mxu0  ;;  %v2075_v11 = vpop.f32.mrf.mxu1 }
  0xf3   : > { %v1981_v12 = vadd.f32 %v1980_v10, %v1979_v7  ;;  %v707_v15 = vadd.f32 %v706_v8, %v658_v9  ;;  %v848_v8 = vunpack.c.l.bf16 %v2439_v23 }
  0xf4   : > { %v1982_v13 = vpop.f32.mrf.mxu0  ;;  %v709_v14 = vpop.f32.mrf.mxu1 }
  0xf5   : > { %v661_v16 = vadd.f32 %v1981_v12, %v1832_v4  ;;  %v721_v21 = vmax.f32 %v707_v15, 0.0 }
  0xf6   : > { %v1983_v17 = vpop.f32.mrf.mxu0 }
  0xf7   : > { %v1984_v18 = vadd.f32 %v1983_v17, %v1982_v13  ;;  %v710_v19 = vadd.f32 %v709_v14, %v661_v16 }
  0xf8   : > { %v1985_v20 = vpop.f32.mrf.mxu0 }
  0xf9   : > { %v666_v24 = vadd.f32 %v1984_v18, %v1832_v4  ;;  %v722_v26 = vmax.f32 %v710_v19, 0.0 }
  0xfa   : > { %v1986_v27 = vpop.f32.mrf.mxu0 }
  0xfb   : > { %v725_v29 = vpack.c.bf16 %v722_v26, %v721_v21  ;;  %v1987_v30 = vadd.f32 %v1986_v27, %v1985_v20  ;;  %v715_v32 = vadd.f32 %v2074_v3, %v666_v24  ;;  %v2203_v26 = vld [vmem:[%s2781_s7 + $0x30] sm:$0xff]  }
  0xfd   : > { %v669_v33 = vadd.f32 %v1987_v30, %v1832_v4  ;;  %2092 = vmatprep.mubr.bf16.mxu0 %v725_v29  ;;  %v723_v35 = vmax.f32 %v715_v32, 0.0  ;;  %v2204_v30 = vld [vmem:[%s2781_s7 + $0x28] sm:$0xff]   ;;  %v2205_v32 = vld [vmem:[%s2781_s7 + $0x20] sm:$0xff]  }
  0xff   : > { %v718_v34 = vadd.f32 %v2075_v11, %v669_v33  ;;  %v2206_v33 = vld [vmem:[%s2781_s7 + $0x18] sm:$0xff]  }
 0x101   : > { %v724_v36 = vmax.f32 %v718_v34, 0.0  ;;  %v2207_v34 = vld [vmem:[%s2781_s7 + $0x10] sm:$0xff]  }
 0x103   : > { %v726_v37 = vpack.c.bf16 %v724_v36, %v723_v35  ;;  %v2208_v35 = vld [vmem:[%s2781_s7 + $0x8] sm:$0xff]   ;;  %v2209_v36 = vld [vmem:[%s2781_s7] sm:$0xff]  }
 0x105   : > { %2093 = vmatmul.mubr.bf16.vlgmr.msra.gmra.mxu0 %v726_v37  ;;  %v2210_v37 = vld [vmem:[%s2783_s9 + $0x70] ss:$8 sps:$4 sm:$0xff]  }
 0x106   : > { %2097 = vmatpush3.bf16.msra.mxu0 %v2179_v61 }
 0x107   : > { %2098 = vmatprep.subr.bf16.mxu0 %v2182_v38 }
 0x10a   : > { %2099 = vmatpush3.bf16.msra.mxu0 %v2182_v38  ;;  %v2212_v38 = vld [vmem:[%s2783_s9 + $0x74] ss:$8 sps:$4 sm:$0xff]  }
 0x10b   : > { %2100 = vmatprep.subr.bf16.mxu0 %v2185_v40 }
 0x10e   : > { %2101 = vmatpush3.bf16.msra.mxu0 %v2185_v40  ;;  %v2213_v40 = vld [vmem:[%s2783_s9 + $0x60] ss:$8 sps:$4 sm:$0xff]  }
 0x10f   : > { %2102 = vmatprep.subr.bf16.mxu0 %v2188_v43 }
 0x112   : > { %2103 = vmatpush3.bf16.msra.mxu0 %v2188_v43  ;;  %v2216_v43 = vld [vmem:[%s2783_s9 + $0x50] ss:$8 sps:$4 sm:$0xff]  }
 0x113   : > { %2104 = vmatprep.subr.bf16.mxu0 %v2191_v46 }
 0x116   : > { %2105 = vmatpush3.bf16.msra.mxu0 %v2191_v46  ;;  %v2224_v46 = vld [vmem:[%s2783_s9 + $0x34] ss:$8 sps:$4 sm:$0xff]  }
 0x117   : > { %2106 = vmatprep.subr.bf16.mxu0 %v2194_v49 }
 0x11a   : > { %2107 = vmatpush3.bf16.msra.mxu0 %v2194_v49  ;;  %v2225_v49 = vld [vmem:[%s2783_s9 + $0x20] ss:$8 sps:$4 sm:$0xff]  }
 0x11b   : > { %2108 = vmatprep.subr.bf16.mxu0 %v2197_v52 }
 0x11e   : > { %2109 = vmatpush3.bf16.msra.mxu0 %v2197_v52  ;;  %v2233_v52 = vld [vmem:[%s2783_s9 + $0x4] ss:$8 sps:$4 sm:$0xff]  }
 0x11f   : > { %2110 = vmatprep.subr.bf16.mxu0 %v2200_v55 }
 0x122   : > { %2111 = vmatpush3.bf16.msra.mxu0 %v2200_v55  ;;  %v2237_v55 = vld [vmem:[%s2783_s9 + $0xf0] ss:$8 sps:$4 sm:$0xff]  }
 0x123   : > { %1634 = vmatprep.subr.bf16.mxu0 %v2212_v38  ;;  %v2257_v38 = vld [vmem:[%s2783_s9 + $0xc4] ss:$8 sps:$4 sm:$0xff]  }
 0x1c5   : > { %v2094_v60 = vpop.f32.mrf.mxu0 }
 0x1c6   : > { %v841_v61 = vadd.f32 %v2094_v60, %v1857_v58 }
 0x1c7   : > { %v832_v63 = vpop.f32.mrf.mxu0 }
 0x1c8   : > { %v2571_v0 = vadd.f32 %v849_v59, %v841_v61  ;;  %v833_v1 = vadd.f32 %v1857_v58, %v832_v63  ;;  %v2249_v59 = vld [vmem:[%s2783_s9 + $0xd0] ss:$8 sps:$4 sm:$0xff]   ;;  %v1866_v63 = vld [vmem:[%s2780_s6] ss:$0 sm:$0xff] }
 0x1c9   : > { %v2095_v3 = vpop.f32.mrf.mxu0 }
 0x1ca   : > { %v857_v4 = vmax.f32 %v2571_v0, 0.0  ;;  %v2575_v6 = vadd.f32 %v847_v62, %v833_v1  ;;  %v844_v7 = vadd.f32 %v2095_v3, %v1857_v58 }
 0x1cb   : > { %v835_v9 = vpop.f32.mrf.mxu0 }
 0x1cc   : > { %863 = vst [vmem:[#allocation2 + $0x11] sm:$0xff] %v857_v4  ;;  %v855_v28 = vmax.f32 %v2575_v6, 0.0  ;;  %v2579_v10 = vadd.f32 %v850_v2, %v844_v7  ;;  %v836_v22 = vadd.f32 %v1857_v58, %v835_v9  ;;  %v2251_v58 = vld [vmem:[%s2783_s9 + $0xd4] ss:$8 sps:$4 sm:$0xff]  }
 0x1ce   : > { %861 = vst [vmem:[#allocation2 + $0x1] sm:$0xff] %v855_v28  ;;  %v858_v11 = vmax.f32 %v2579_v10, 0.0  ;;  %v2582_v12 = vadd.f32 %v848_v8, %v836_v22 }
 0x1d0   : > { %864 = vst [vmem:[#allocation2 + $0x19] sm:$0xff] %v858_v11  ;;  %v856_v31 = vmax.f32 %v2582_v12, 0.0  ;;  %v876_v24 = vpack.c.bf16 %v858_v11, %v857_v4 }
 0x1d2   : > { %862 = vst [vmem:[#allocation2 + $0x9] sm:$0xff] %v856_v31  ;;  %v875_v13 = vpack.c.bf16 %v856_v31, %v855_v28 }
 0x1d4   : > { %1114 = vmatprep.mubr.bf16.mxu1 %v875_v13 }
 0x1d5   : > { %v865_v14 = vld [vmem:[#allocation2] sm:$0xff] }
 0x1d6   : > { %1310 = vst [vmem:[#allocation2] sm:$0x1] %v2292_v5 }
 0x1d7   : > { %v880_v23 = vld [vmem:[#allocation2 + $0x1a] sm:$0xff]  ;;  %v879_v15 = vld [vmem:[#allocation2 + $0x12] sm:$0xff] }
 0x1d8   : > { %1311 = vst [vmem:[#allocation2 + $0x21] sm:$0x1] %v2292_v5  ;;  %v882_v21 = vpack.c.bf16 %v880_v23, %v879_v15  ;;  %v868_v29 = vld [vmem:[#allocation2 + $0x18] sm:$0xff] }
 0x1d9   : > { %v877_v16 = vld [vmem:[#allocation2 + $0x2] sm:$0xff]  ;;  %v878_v17 = vld [vmem:[#allocation2 + $0xa] sm:$0xff] }
 0x1da   : > { %v866_v18 = vld [vmem:[#allocation2 + $0x8] sm:$0xff]  ;;  %v881_v19 = vpack.c.bf16 %v878_v17, %v877_v16  ;;  %v867_v27 = vld [vmem:[#allocation2 + $0x10] sm:$0xff] }
 0x1db   : > { %v869_v20 = vpack.c.bf16 %v866_v18, %v865_v14  ;;  %v870_v5 = vpack.c.bf16 %v868_v29, %v867_v27 }
 0x1dc   : > { %2112 = vmatprep.mubr.bf16.mxu0 %v881_v19 }
 0x1dd   : > { %1115 = vmatmul.mubr.bf16.vlgmr.msra.gmra.mxu1 %v869_v20  ;;  %2113 = vmatmul.mubr.bf16.vlgmr.msra.gmra.mxu0 %v882_v21 }
 0x1de   : > { %1122 = vmatprep.mubr.bf16.mxu1 %v876_v24  ;;  %2117 = vmatpush3.bf16.msra.mxu1 %v2202_v57  ;;  %v2243_v57 = vld [vmem:[%s2783_s9 + $0xe0] ss:$8 sps:$4 sm:$0xff]  }
 0x1df   : > { %2118 = vmatprep.subr.bf16.mxu1 %v2203_v26  ;;  %1635 = vmatpush1.bf16.msra.mxu0 %v2210_v37  ;;  %v2254_v37 = vld [vmem:[%s2783_s9 + $0x144] ss:$8 sps:$4 sm:$0xff]  }
 0x1e0   : > { %1636 = vmatprep.subr.bf16.mxu0 %v2215_v39  ;;  %v2252_v39 = vld [vmem:[%s2783_s9 + $0x140] ss:$8 sps:$4 sm:$0xff]  }
 0x1e2   : > { %2119 = vmatpush3.bf16.msra.mxu1 %v2203_v26 }
 0x1e3   : > { %2120 = vmatprep.subr.bf16.mxu1 %v2204_v30  ;;  %1637 = vmatpush1.bf16.msra.mxu0 %v2213_v40  ;;  %v2255_v40 = vld [vmem:[%s2783_s9 + $0xc0] ss:$8 sps:$4 sm:$0xff]  }
 0x1e4   : > { %1638 = vmatprep.subr.bf16.mxu0 %v2218_v41  ;;  %v2260_v41 = vld [vmem:[%s2783_s9 + $0x134] ss:$8 sps:$4 sm:$0xff]  }
 0x1e5   : > { %1123 = vmatmul.mubr.bf16.gmra.mxu1 %v870_v5 }
 0x1e6   : > { %2121 = vmatpush3.bf16.msra.mxu1 %v2204_v30  ;;  %v2234_v30 = vld [vmem:[%s2783_s9 + $0x170] ss:$8 sps:$4 sm:$0xff]  }
 0x1e7   : > { %2122 = vmatprep.subr.bf16.mxu1 %v2205_v32  ;;  %1639 = vmatpush1.bf16.msra.mxu0 %v2216_v43  ;;  %v2258_v43 = vld [vmem:[%s2783_s9 + $0x130] ss:$8 sps:$4 sm:$0xff]  }
 0x1e8   : > { %1640 = vmatprep.subr.bf16.mxu0 %v2221_v44  ;;  %v2261_v44 = vld [vmem:[%s2783_s9 + $0xb0] ss:$8 sps:$4 sm:$0xff]  }
 0x1ea   : > { %2123 = vmatpush3.bf16.msra.mxu1 %v2205_v32 }
 0x1eb   : > { %2124 = vmatprep.subr.bf16.mxu1 %v2206_v33  ;;  %1641 = vmatpush1.bf16.msra.mxu0 %v2219_v45  ;;  %v2266_v45 = vld [vmem:[%s2783_s9 + $0x124] ss:$8 sps:$4 sm:$0xff]  }
 0x1ec   : > { %1642 = vmatprep.subr.bf16.mxu0 %v2224_v46  ;;  %v2269_v46 = vld [vmem:[%s2783_s9 + $0xa4] ss:$8 sps:$4 sm:$0xff]  }
 0x1ee   : > { %2125 = vmatpush3.bf16.msra.mxu1 %v2206_v33  ;;  %v2242_v33 = vld [vmem:[%s2783_s9 + $0x164] ss:$8 sps:$4 sm:$0xff]  }
 0x1ef   : > { %2126 = vmatprep.subr.bf16.mxu1 %v2207_v34  ;;  %1643 = vmatpush1.bf16.msra.mxu0 %v2222_v47  ;;  %v2264_v47 = vld [vmem:[%s2783_s9 + $0x120] ss:$8 sps:$4 sm:$0xff]  }
 0x1f0   : > { %1644 = vmatprep.subr.bf16.mxu0 %v2227_v48  ;;  %v2267_v48 = vld [vmem:[%s2783_s9 + $0xa0] ss:$8 sps:$4 sm:$0xff]  }
 0x1f2   : > { %2127 = vmatpush3.bf16.msra.mxu1 %v2207_v34  ;;  %v2240_v34 = vld [vmem:[%s2783_s9 + $0x160] ss:$8 sps:$4 sm:$0xff]  }
 0x1f3   : > { %2128 = vmatprep.subr.bf16.mxu1 %v2208_v35  ;;  %1645 = vmatpush1.bf16.msra.mxu0 %v2225_v49  ;;  %v2270_v49 = vld [vmem:[%s2783_s9 + $0x110] ss:$8 sps:$4 sm:$0xff]  }
 0x1f4   : > { %1646 = vmatprep.subr.bf16.mxu0 %v2230_v50  ;;  %v2272_v50 = vld [vmem:[%s2783_s9 + $0x114] ss:$8 sps:$4 sm:$0xff]  }
 0x1f6   : > { %2129 = vmatpush3.bf16.msra.mxu1 %v2208_v35  ;;  %v2248_v35 = vld [vmem:[%s2783_s9 + $0x154] ss:$8 sps:$4 sm:$0xff]  }
 0x1f7   : > { %2130 = vmatprep.subr.bf16.mxu1 %v2209_v36  ;;  %1647 = vmatpush1.bf16.msra.mxu0 %v2228_v51  ;;  %v2273_v51 = vld [vmem:[%s2783_s9 + $0x90] ss:$8 sps:$4 sm:$0xff]  }
 0x1f8   : > { %1648 = vmatprep.subr.bf16.mxu0 %v2233_v52  ;;  %v2275_v52 = vld [vmem:[%s2783_s9 + $0x94] ss:$8 sps:$4 sm:$0xff]  }
 0x1fa   : > { %2131 = vmatpush3.bf16.msra.mxu1 %v2209_v36  ;;  %v2246_v36 = vld [vmem:[%s2783_s9 + $0x150] ss:$8 sps:$4 sm:$0xff]  }
 0x1fb   : > { %1687 = vmatprep.subr.bf16.mxu1 %v2236_v42  ;;  %1649 = vmatpush1.bf16.msra.mxu0 %v2231_v53  ;;  %v2263_v42 = vld [vmem:[%s2783_s9 + $0xb4] ss:$8 sps:$4 sm:$0xff]   ;;  %v2278_v53 = vld [vmem:[%s2783_s9 + $0x104] ss:$8 sps:$4 sm:$0xff]  }
 0x1fc   : > { %1650 = vmatprep.subr.bf16.mxu0 %v2239_v54  ;;  %v2281_v54 = vld [vmem:[%s2783_s9 + $0x84] ss:$8 sps:$4 sm:$0xff]  }
 0x1ff   : > { %1651 = vmatpush2.bf16.msra.mxu0 %v2237_v55  ;;  %v2276_v55 = vld [vmem:[%s2783_s9 + $0x100] ss:$8 sps:$4 sm:$0xff]  }
 0x200   : > { %1652 = vmatprep.subr.bf16.mxu0 %v2245_v56  ;;  %v2279_v56 = vld [vmem:[%s2783_s9 + $0x80] ss:$8 sps:$4 sm:$0xff]  }
 0x203   : > { %1653 = vmatpush2.bf16.msra.mxu0 %v2243_v57  ;;  %v1891_v57 = vld [vmem:[%s2782_s8] ss:$0 sm:$0xff] }
 0x204   : > { %1654 = vmatprep.subr.bf16.mxu0 %v2251_v58 }
 0x207   : > { %1655 = vmatpush2.bf16.msra.mxu0 %v2249_v59 }
 0x208   : > { %1656 = vmatprep.subr.bf16.mxu0 %v2257_v38 }
 0x20b   : > { %1657 = vmatpush2.bf16.msra.mxu0 %v2255_v40 }
 0x20c   : > { %1658 = vmatprep.subr.bf16.mxu0 %v2263_v42 }
 0x20f   : > { %1659 = vmatpush2.bf16.msra.mxu0 %v2261_v44 }
 0x210   : > { %1660 = vmatprep.subr.bf16.mxu0 %v2269_v46 }
 0x213   : > { %1661 = vmatpush2.bf16.msra.mxu0 %v2267_v48 }
 0x214   : > { %1662 = vmatprep.subr.bf16.mxu0 %v2275_v52 }
 0x217   : > { %1663 = vmatpush2.bf16.msra.mxu0 %v2273_v51 }
 0x218   : > { %1664 = vmatprep.subr.bf16.mxu0 %v2281_v54 }
 0x21b   : > { %1665 = vmatpush2.bf16.msra.mxu0 %v2279_v56 }
 0x29d   : > { %v2024_v60 = vpop.f32.mrf.mxu1  ;;  %v2114_v61 = vpop.f32.mrf.mxu0 }
 0x29f   : > { %v2025_v62 = vpop.f32.mrf.mxu1  ;;  %v1165_v2 = vpop.f32.mrf.mxu0 }
 0x2a0   : > { %v2026_v1 = vadd.f32 %v2025_v62, %v2024_v60 }
 0x2a1   : > { %v2027_v3 = vpop.f32.mrf.mxu1  ;;  %v2115_v7 = vpop.f32.mrf.mxu0 }
 0x2a2   : > { %v1117_v4 = vadd.f32 %v2026_v1, %v1866_v63 }
 0x2a3   : > { %v2028_v8 = vpop.f32.mrf.mxu1  ;;  %v1168_v31 = vpop.f32.mrf.mxu0 }
 0x2a4   : > { %v2029_v9 = vadd.f32 %v2028_v8, %v2027_v3  ;;  %v1166_v22 = vadd.f32 %v1165_v2, %v1117_v4 }
 0x2a5   : > { %v2030_v28 = vpop.f32.mrf.mxu1 }
 0x2a6   : > { %v1120_v11 = vadd.f32 %v2029_v9, %v1866_v63  ;;  %v1180_v16 = vmax.f32 %v1166_v22, 0.0 }
 0x2a7   : > { %v2031_v13 = vpop.f32.mrf.mxu1 }
 0x2a8   : > { %v1169_v14 = vadd.f32 %v1168_v31, %v1120_v11  ;;  %v2032_v23 = vadd.f32 %v2031_v13, %v2030_v28 }
 0x2a9   : > { %v2033_v15 = vpop.f32.mrf.mxu1 }
 0x2aa   : > { %v1181_v17 = vmax.f32 %v1169_v14, 0.0  ;;  %v1125_v18 = vadd.f32 %v2032_v23, %v1866_v63 }
 0x2ab   : > { %v2034_v19 = vpop.f32.mrf.mxu1 }
 0x2ac   : > { %v1184_v20 = vpack.c.bf16 %v1181_v17, %v1180_v16  ;;  %v2035_v21 = vadd.f32 %v2034_v19, %v2033_v15  ;;  %v1174_v24 = vadd.f32 %v2114_v61, %v1125_v18  ;;  %v1384_v17 = vlaneseq }
 0x2ae   : > { %v1128_v26 = vadd.f32 %v2035_v21, %v1866_v63  ;;  %2132 = vmatprep.mubr.bf16.mxu1 %v1184_v20  ;;  %v1182_v29 = vmax.f32 %v1174_v24, 0.0  ;;  %v1385_v18 = vshrl.u32 %v1384_v17, 7  ;;  %v1382_v20 = vld [vmem:[%s2784_s10] sm:$0x3] }
 0x2b0   : > { %v1177_v27 = vadd.f32 %v2115_v7, %v1128_v26  ;;  %v1386_v19 = vsub.s32 0, %v1385_v18  ;;  %v1390_v21 = vsub.s32 1, %v1385_v18 }
 0x2b2   : > { %v1183_v5 = vmax.f32 %v1177_v27, 0.0  ;;  %v1387_v24 = vrot.slane %v1382_v20, %v1386_v19  ;;  %v1391_v26 = vrot.slane %v1382_v20, %v1390_v21 }
 0x2b4   : > { %v1185_v32 = vpack.c.bf16 %v1183_v5, %v1182_v29 }
 0x2b6   : > { %2133 = vmatmul.mubr.bf16.vlgmr.msra.gmra.mxu1 %v1185_v32 }
 0x2b7   : > { %1688 = vmatpush1.bf16.msra.mxu1 %v2234_v30  ;;  %1719 = vmatprep.mubr.bf16.mxu1 %v2293_v25 }
 0x2b8   : > { %1689 = vmatprep.subr.bf16.mxu1 %v2242_v33 }
 0x2bb   : > { %1690 = vmatpush1.bf16.msra.mxu1 %v2240_v34 }
 0x2bc   : > { %1691 = vmatprep.subr.bf16.mxu1 %v2248_v35 }
 0x2bf   : > { %1692 = vmatpush1.bf16.msra.mxu1 %v2246_v36 }
 0x2c0   : > { %1693 = vmatprep.subr.bf16.mxu1 %v2254_v37 }
 0x2c3   : > { %1694 = vmatpush1.bf16.msra.mxu1 %v2252_v39 }
 0x2c4   : > { %1695 = vmatprep.subr.bf16.mxu1 %v2260_v41 }
 0x2c7   : > { %1696 = vmatpush1.bf16.msra.mxu1 %v2258_v43 }
 0x2c8   : > { %1697 = vmatprep.subr.bf16.mxu1 %v2266_v45 }
 0x2cb   : > { %1698 = vmatpush1.bf16.msra.mxu1 %v2264_v47 }
 0x2cc   : > { %1699 = vmatprep.subr.bf16.mxu1 %v2272_v50 }
 0x2cf   : > { %1700 = vmatpush1.bf16.msra.mxu1 %v2270_v49 }
 0x2d0   : > { %1701 = vmatprep.subr.bf16.mxu1 %v2278_v53 }
 0x2d3   : > { %1702 = vmatpush1.bf16.msra.mxu1 %v2276_v55 }
 0x376   : > { %v2134_v58 = vpop.f32.mrf.mxu1 }
 0x377   : > { %v1300_v59 = vadd.f32 %v2134_v58, %v1891_v57 }
 0x378   : > { %v1291_v60 = vpop.f32.mrf.mxu1 }
 0x379   : > { %v1308_v61 = vadd.f32 %v1300_v59, %v2571_v0  ;;  %v1292_v62 = vadd.f32 %v1891_v57, %v1291_v60 }
 0x37a   : > { %v2135_v63 = vpop.f32.mrf.mxu1 }
 0x37b   : > { %1314 = vst [vmem:[#allocation2 + $0x11] sm:$0xff] %v1308_v61  ;;  %v1306_v1 = vadd.f32 %v1292_v62, %v2575_v6  ;;  %v1303_v2 = vadd.f32 %v2135_v63, %v1891_v57 }
 0x37c   : > { %v1294_v3 = vpop.f32.mrf.mxu1 }
 0x37d   : > { %1312 = vst [vmem:[#allocation2 + $0x1] sm:$0xff] %v1306_v1  ;;  %v1309_v4 = vadd.f32 %v1303_v2, %v2579_v10  ;;  %v1295_v7 = vadd.f32 %v1891_v57, %v1294_v3 }
 0x37f   : > { %1315 = vst [vmem:[#allocation2 + $0x19] sm:$0xff] %v1309_v4  ;;  %v1307_v8 = vadd.f32 %v1295_v7, %v2582_v12  ;;  %v1327_v14 = vpack.c.bf16 %v1309_v4, %v1308_v61 }
 0x381   : > { %1313 = vst [vmem:[#allocation2 + $0x9] sm:$0xff] %v1307_v8  ;;  %v1326_v9 = vpack.c.bf16 %v1307_v8, %v1306_v1 }
 0x383   : > { %1666 = vmatprep.mubr.bf16.mxu0 %v1326_v9 }
 0x384   : > { %v1316_v28 = vld [vmem:[#allocation2] sm:$0xff] }
 0x386   : > { %v1330_v6 = vld [vmem:[#allocation2 + $0x12] sm:$0xff]  ;;  %v1331_v10 = vld [vmem:[#allocation2 + $0x1a] sm:$0xff] }
 0x387   : > { %v1319_v15 = vld [vmem:[#allocation2 + $0x18] sm:$0xff]  ;;  %v1333_v12 = vpack.c.bf16 %v1331_v10, %v1330_v6 }
 0x388   : > { %v1328_v22 = vld [vmem:[#allocation2 + $0x2] sm:$0xff]  ;;  %v1329_v0 = vld [vmem:[#allocation2 + $0xa] sm:$0xff] }
 0x389   : > { %v1317_v11 = vld [vmem:[#allocation2 + $0x8] sm:$0xff]  ;;  %v1332_v31 = vpack.c.bf16 %v1329_v0, %v1328_v22  ;;  %v1318_v23 = vld [vmem:[#allocation2 + $0x10] sm:$0xff] }
 0x38a   : > { %v1320_v13 = vpack.c.bf16 %v1317_v11, %v1316_v28  ;;  %v1321_v16 = vpack.c.bf16 %v1319_v15, %v1318_v23 }
 0x38b   : > { %1720 = vmatmul.mubr.bf16.vlgmr.msra.gmra.mxu1 %v1332_v31 }
 0x38c   : > { %1667 = vmatmul.mubr.bf16.vlgmr.msra.gmra.mxu0 %v1320_v13  ;;  %1729 = vmatprep.mubr.bf16.mxu1 %v2293_v25 }
 0x38d   : > { %1676 = vmatprep.mubr.bf16.mxu0 %v1327_v14 }
 0x393   : > { %1730 = vmatmul.mubr.bf16.gmra.mxu1 %v1333_v12 }
 0x394   : > { %1677 = vmatmul.mubr.bf16.gmra.mxu0 %v1321_v16 }
 0x44b   : > { %v1721_v25 = vpop.f32.mrf.mxu1 }
 0x44c   : > { %v1668_v27 = vpop.f32.mrf.mxu0 }
 0x44d   : > { %v1669_v29 = vadd.f32 %v1668_v27, %v1387_v24  ;;  %v1723_v5 = vpop.f32.mrf.mxu1 }
 0x44e   : > { %v1670_v30 = vpop.f32.mrf.mxu0 }
 0x44f   : > { %v1671_v32 = vadd.f32 %v1670_v30, %v1391_v26  ;;  %v1725_v33 = vpop.f32.mrf.mxu1  ;;  %v1722_v35 = vadd.f32 %v1721_v25, %v1669_v29 }
 0x450   : > { %v1672_v34 = vpop.f32.mrf.mxu0 }
 0x451   : > { %v1724_v36 = vadd.f32 %v1723_v5, %v1671_v32  ;;  %v1673_v37 = vadd.f32 %v1672_v34, %v1387_v24  ;;  %v1727_v38 = vpop.f32.mrf.mxu1 }
 0x452   : > { %v1674_v39 = vpop.f32.mrf.mxu0 }
 0x453   : > { %v1956_v40 = vpack.c.bf16 %v1724_v36, %v1722_v35  ;;  %v1675_v41 = vadd.f32 %v1674_v39, %v1391_v26  ;;  %v1731_v42 = vpop.f32.mrf.mxu1  ;;  %v1726_v44 = vadd.f32 %v1725_v33, %v1673_v37 }
 0x454   : > { %v1678_v43 = vpop.f32.mrf.mxu0 }
 0x455   : > { %1764 = vst [vmem:[%s386_s22] sm:$0xff] %v1956_v40  ;;  %v1728_v45 = vadd.f32 %v1727_v38, %v1675_v41  ;;  %v1679_v46 = vadd.f32 %v1678_v43, %v1387_v24  ;;  %v1733_v47 = vpop.f32.mrf.mxu1 }
 0x456   : > { %v1680_v48 = vpop.f32.mrf.mxu0 }
 0x457   : > { %v1957_v49 = vpack.c.bf16 %v1728_v45, %v1726_v44  ;;  %v1681_v50 = vadd.f32 %v1680_v48, %v1391_v26  ;;  %v1735_v51 = vpop.f32.mrf.mxu1  ;;  %v1732_v53 = vadd.f32 %v1731_v42, %v1679_v46 }
 0x458   : > { %v1682_v52 = vpop.f32.mrf.mxu0 }
 0x459   : > { %1765 = vst [vmem:[%s386_s22 + $0x8] sm:$0xff] %v1957_v49  ;;  %v1734_v54 = vadd.f32 %v1733_v47, %v1681_v50  ;;  %v1683_v55 = vadd.f32 %v1682_v52, %v1387_v24  ;;  %v1737_v59 = vpop.f32.mrf.mxu1 }
 0x45a   : > { %v1684_v56 = vpop.f32.mrf.mxu0 }
 0x45b   : > { %v1958_v57 = vpack.c.bf16 %v1734_v54, %v1732_v53  ;;  %v1685_v58 = vadd.f32 %v1684_v56, %v1391_v26  ;;  %v1736_v60 = vadd.f32 %v1735_v51, %v1683_v55 }
 0x45d   : > { %1766 = vst [vmem:[%s386_s22 + $0x10] sm:$0xff] %v1958_v57  ;;  %v1738_v61 = vadd.f32 %v1737_v59, %v1685_v58 }
 0x45f   : > { %v1959_v62 = vpack.c.bf16 %v1738_v61, %v1736_v60 }
 0x461   : > { %1767 = vst [vmem:[%s386_s22 + $0x18] sm:$0xff] %v1959_v62 }
 0x462 PF: > { %s21_s17 = sadd.s32 1, %s2290_s17  }
 0x463   : > { %p18_p4 = scmp.ge.s32.totalorder %s21_s17, 4  }
 0x465   :  { %20 = sbr.rel (!%p18_p4) target bundleno = 1 (0x1), region = 94 }

// kernel: vqvae_forward.11
= control target key start
LH: loop header
LB: loop body
LE: loop exit
PB: predicated region body
PF: predicated region fallthrough
CT: control target
= control target key end

     0   :  { %s2655_s25 = smov 0   ;;  %s3189_s0 = inlined_call_operand.vmem [shape: f32[2,16,128], index: 0, kind: input, shape index: {}]   ;;  %s3190_s1 = inlined_call_operand.vmem [shape: bf16[384,128], index: 1, kind: input, shape index: {}]   ;;  %s3191_s2 = inlined_call_operand.vmem [shape: f32[1,128], index: 2, kind: input, shape index: {}]   ;;  %s3192_s3 = inlined_call_operand.vmem [shape: bf16[384,128], index: 3, kind: input, shape index: {}]   ;;  %s3193_s4 = inlined_call_operand.vmem [shape: f32[1,128], index: 4, kind: input, shape index: {}]   ;;  %s3194_s5 = inlined_call_operand.vmem [shape: bf16[128,128], index: 5, kind: input, shape index: {}]   ;;  %s3195_s6 = inlined_call_operand.vmem [shape: f32[1,128], index: 6, kind: input, shape index: {}]   ;;  %s3196_s7 = inlined_call_operand.vmem [shape: bf16[384,128], index: 7, kind: input, shape index: {}]   ;;  %s3197_s8 = inlined_call_operand.vmem [shape: f32[1,128], index: 8, kind: input, shape index: {}]   ;;  %s3198_s9 = inlined_call_operand.vmem [shape: bf16[128,128], index: 9, kind: input, shape index: {}]   ;;  %s3199_s10 = inlined_call_operand.vmem [shape: f32[1,128], index: 10, kind: input, shape index: {}]   ;;  %s3200_s11 = inlined_call_operand.vmem [shape: bf16[384,256], index: 11, kind: input, shape index: {}]   ;;  %s3201_s12 = inlined_call_operand.vmem [shape: f32[1,256], index: 12, kind: input, shape index: {}]   ;;  %s3202_s13 = inlined_call_operand.vmem [shape: bf16[2,16,256], index: 13, kind: output, shape index: {}]  }
   0x1 LB: > { %s2034_s26 = sadd.s32 4294967295, %s2580_s25   ;;  %p2038_p0 = scmp.ge.s32.totalorder %s2580_s25, 1  ;;  %s2580_s25 = sphi %s2655_s25, %s23_s25  }
   0x2   : > { %p387_p1 = scmp.lt.s32.totalorder %s2580_s25, 3 }
   0x4   : > { %p388_p2 = pnand %p2038_p0, %p387_p1 }
   0x5   : > { %p431_p3 = scmp.lt.s32.totalorder (!%p388_p2), %s2034_s26, 1 }
   0x6   : > { %391 = sbr.rel (%p388_p2) target bundleno = 1314 (0x522), region = 72 }
   0xb   : > { %v2414_v0 = vld [vmem:[%s3190_s1 + $0x78] sm:$0xff]   ;;  %v2582_v1 = vmov 0.0   ;;  %v2417_v4 = vld [vmem:[%s3190_s1 + $0x70] sm:$0xff]   ;;  %vm2583_vm0 = vmmov 0   ;;  %v2420_v7 = vld [vmem:[%s3190_s1 + $0x68] sm:$0xff]   ;;  %s3204_s26 = smov (!%p431_p3, %s2034_s26), 1 }
   0xc   : > { %2303 = vmatprep.subr.bf16.mxu1 %v2582_v1  ;;  %444 = vst [vmem:[#allocation2] sm:$0x1] %v2582_v1  ;;  %445 = vst [vmem:[#allocation2 + $0x11] sm:$0x1] %v2582_v1  ;;  %v2415_v2 = vld [vmem:[%s3190_s1 + $0x38] sm:$0xff]   ;;  %2192 = vmatprep.subr.bf16.mxu0 %v2414_v0  ;;  %v2418_v5 = vld [vmem:[%s3190_s1 + $0x30] sm:$0xff]  }
   0xd   : > { %743 = vst [vmem:[#allocation2 + $0x13] sm:$0x7] %v2582_v1  ;;  %v2416_v3 = vld [vmem:[%s3190_s1 + $0xb8] sm:$0xff]   ;;  %2193 = vmatpush3.bf16.msra.mxu0 %v2415_v2  ;;  %2319 = vmatprep.mubr.msk.bf16.mxu1 %vm2583_vm0, %v2582_v1  ;;  %v2419_v6 = vld [vmem:[%s3190_s1 + $0xb0] sm:$0xff]   ;;  %v2421_v8 = vld [vmem:[%s3190_s1 + $0x28] sm:$0xff]   ;;  %s2188_s14 = sshll.u32 %s3204_s26, 4 }
   0xe   : > { %2304 = vmatpush3.bf16.msra.mxu1 %v2416_v3  ;;  %2194 = vmatprep.subr.bf16.mxu0 %v2417_v4  ;;  %v2422_v9 = vld [vmem:[%s3190_s1 + $0xa8] sm:$0xff]   ;;  %v2423_v10 = vld [vmem:[%s3190_s1 + $0x60] sm:$0xff]   ;;  %v2426_v13 = vld [vmem:[%s3190_s1 + $0x58] sm:$0xff]   ;;  %s435_s23 = scalar_lea.vmem %s3189_s0, %s2188_s14  ;;  %s440_s18 = scalar_lea.vmem %s3202_s13, %s2188_s14 }
   0xf   : > { %2305 = vmatprep.subr.bf16.mxu1 %v2582_v1  ;;  %v2424_v11 = vld [vmem:[%s3190_s1 + $0x20] sm:$0xff]   ;;  %v2427_v14 = vld [vmem:[%s3190_s1 + $0x18] sm:$0xff]   ;;  %v2429_v16 = vld [vmem:[%s3190_s1 + $0x50] sm:$0xff]  }
  0x10   : > { %v2425_v12 = vld [vmem:[%s3190_s1 + $0xa0] sm:$0xff]   ;;  %v2428_v15 = vld [vmem:[%s3190_s1 + $0x98] sm:$0xff]   ;;  %v2430_v17 = vld [vmem:[%s3190_s1 + $0x10] sm:$0xff]  }
  0x11   : > { %2195 = vmatpush3.bf16.msra.mxu0 %v2418_v5  ;;  %v2431_v18 = vld [vmem:[%s3190_s1 + $0x90] sm:$0xff]   ;;  %v2432_v19 = vld [vmem:[%s3190_s1 + $0x48] sm:$0xff]   ;;  %v2435_v22 = vld [vmem:[%s3190_s1 + $0x40] sm:$0xff]  }
  0x12   : > { %2306 = vmatpush3.bf16.msra.mxu1 %v2419_v6  ;;  %2196 = vmatprep.subr.bf16.mxu0 %v2420_v7  ;;  %v2433_v20 = vld [vmem:[%s3190_s1 + $0x8] sm:$0xff]   ;;  %v442_v23 = vld [vmem:[%s435_s23] sm:$0xff]  ;;  %v2438_v28 = vld [vmem:[%s3192_s3 + $0x78] sm:$0xff]  }
  0x13   : > { %2307 = vmatprep.subr.bf16.mxu1 %v2582_v1  ;;  %v2434_v21 = vld [vmem:[%s3190_s1 + $0x88] sm:$0xff]   ;;  %v2436_v25 = vld [vmem:[%s3190_s1] sm:$0xff]   ;;  %446 = vst [vmem:[#allocation2 + $0x1] sm:$0xff] %v442_v23  ;;  %v2440_v29 = vld [vmem:[%s3192_s3 + $0x38] sm:$0xff]  }
  0x14   : > { %v443_v24 = vld [vmem:[%s435_s23 + $0x8] sm:$0xff]  ;;  %v2437_v27 = vld [vmem:[%s3190_s1 + $0x80] sm:$0xff]   ;;  %v2439_v30 = vld [vmem:[%s3192_s3 + $0xb8] sm:$0xff]  }
  0x15   : > { %2197 = vmatpush3.bf16.msra.mxu0 %v2421_v8  ;;  %447 = vst [vmem:[#allocation2 + $0x9] sm:$0xff] %v443_v24  ;;  %v453_v26 = vpack.c.bf16 %v443_v24, %v442_v23  ;;  %v2441_v37 = vld [vmem:[%s3192_s3 + $0x70] sm:$0xff]   ;;  %v2444_v40 = vld [vmem:[%s3192_s3 + $0x68] sm:$0xff]   ;;  %v2447_v43 = vld [vmem:[%s3192_s3 + $0x60] sm:$0xff]  }
  0x16   : > { %2308 = vmatpush3.bf16.msra.mxu1 %v2422_v9  ;;  %2198 = vmatprep.subr.bf16.mxu0 %v2423_v10  ;;  %v2442_v38 = vld [vmem:[%s3192_s3 + $0xb0] sm:$0xff]   ;;  %v2445_v41 = vld [vmem:[%s3192_s3 + $0xa8] sm:$0xff]   ;;  %v2448_v44 = vld [vmem:[%s3192_s3 + $0xa0] sm:$0xff]  }
  0x17   : > { %2309 = vmatprep.subr.bf16.mxu1 %v2582_v1  ;;  %688 = vmatprep.mubr.bf16.mxu0 %v453_v26  ;;  %v2443_v39 = vld [vmem:[%s3192_s3 + $0x30] sm:$0xff]   ;;  %v2446_v42 = vld [vmem:[%s3192_s3 + $0x28] sm:$0xff]   ;;  %v2449_v45 = vld [vmem:[%s3192_s3 + $0x20] sm:$0xff]  }
  0x18   : > { %v2450_v46 = vld [vmem:[%s3192_s3 + $0x58] sm:$0xff]   ;;  %v2453_v49 = vld [vmem:[%s3192_s3 + $0x50] sm:$0xff]   ;;  %v2456_v52 = vld [vmem:[%s3192_s3 + $0x48] sm:$0xff]  }
  0x19   : > { %2199 = vmatpush3.bf16.msra.mxu0 %v2424_v11  ;;  %v2451_v47 = vld [vmem:[%s3192_s3 + $0x98] sm:$0xff]   ;;  %v2454_v50 = vld [vmem:[%s3192_s3 + $0x90] sm:$0xff]   ;;  %v2457_v53 = vld [vmem:[%s3192_s3 + $0x88] sm:$0xff]  }
  0x1a   : > { %2310 = vmatpush3.bf16.msra.mxu1 %v2425_v12  ;;  %2200 = vmatprep.subr.bf16.mxu0 %v2426_v13  ;;  %v448_v31 = vld [vmem:[#allocation2] sm:$0xff]  ;;  %v2452_v48 = vld [vmem:[%s3192_s3 + $0x18] sm:$0xff]   ;;  %v2455_v51 = vld [vmem:[%s3192_s3 + $0x10] sm:$0xff]  }
  0x1b   : > { %2311 = vmatprep.subr.bf16.mxu1 %v2582_v1  ;;  %v2458_v54 = vld [vmem:[%s3192_s3 + $0x8] sm:$0xff]   ;;  %v2459_v55 = vld [vmem:[%s3192_s3 + $0x40] sm:$0xff]   ;;  %v2467_v26 = vld [vmem:[%s3194_s5 + $0x10] sm:$0xff]  }
  0x1c   : > { %v454_v32 = vld [vmem:[#allocation2 + $0x2] sm:$0xff]  ;;  %v455_v35 = vld [vmem:[#allocation2 + $0xa] sm:$0xff]  ;;  %v2043_v60 = vld [vmem:[%s3191_s2] ss:$0 sm:$0xff] }
  0x1d   : > { %2201 = vmatpush3.bf16.msra.mxu0 %v2427_v14  ;;  %v449_v33 = vld [vmem:[#allocation2 + $0x8] sm:$0xff]  ;;  %742 = vst [vmem:[#allocation2] sm:$0x7] %v2582_v1  ;;  %v456_v36 = vpack.c.bf16 %v455_v35, %v454_v32  ;;  %v2460_v56 = vld [vmem:[%s3192_s3 + $0x80] sm:$0xff]   ;;  %v2475_v32 = vld [vmem:[%s3196_s7 + $0x30] sm:$0xff]  }
  0x1e   : > { %2312 = vmatpush3.bf16.msra.mxu1 %v2428_v15  ;;  %2202 = vmatprep.subr.bf16.mxu0 %v2429_v16  ;;  %v450_v34 = vpack.c.bf16 %v449_v33, %v448_v31  ;;  %v2461_v57 = vld [vmem:[%s3192_s3] sm:$0xff]   ;;  %v2462_v16 = vld [vmem:[%s3194_s5 + $0x38] sm:$0xff]   ;;  %v2464_v23 = vld [vmem:[%s3194_s5 + $0x28] sm:$0xff]  }
  0x1f   : > { %2313 = vmatprep.subr.bf16.mxu1 %v2582_v1  ;;  %v2465_v24 = vld [vmem:[%s3194_s5 + $0x20] sm:$0xff]   ;;  %v2473_v31 = vld [vmem:[%s3196_s7 + $0x70] sm:$0xff]   ;;  %v2476_v33 = vld [vmem:[%s3196_s7 + $0x68] sm:$0xff]  }
  0x21   : > { %2203 = vmatpush3.bf16.msra.mxu0 %v2430_v17 }
  0x22   : > { %2314 = vmatpush3.bf16.msra.mxu1 %v2431_v18  ;;  %2204 = vmatprep.subr.bf16.mxu0 %v2432_v19 }
  0x23   : > { %2315 = vmatprep.subr.bf16.mxu1 %v2582_v1 }
  0x25   : > { %2205 = vmatpush3.bf16.msra.mxu0 %v2433_v20 }
  0x26   : > { %2316 = vmatpush3.bf16.msra.mxu1 %v2434_v21  ;;  %2206 = vmatprep.subr.bf16.mxu0 %v2435_v22  ;;  %v2463_v22 = vld [vmem:[%s3194_s5 + $0x30] sm:$0xff]  }
  0x27   : > { %2317 = vmatprep.subr.bf16.mxu1 %v2582_v1 }
  0x29   : > { %2207 = vmatpush3.bf16.msra.mxu0 %v2436_v25  ;;  %v2466_v25 = vld [vmem:[%s3194_s5 + $0x18] sm:$0xff]  }
  0x2a   : > { %2318 = vmatpush3.bf16.msra.mxu1 %v2437_v27  ;;  %2223 = vmatprep.subr.bf16.mxu0 %v2438_v28  ;;  %v2468_v27 = vld [vmem:[%s3194_s5 + $0x8] sm:$0xff]   ;;  %v2469_v28 = vld [vmem:[%s3194_s5] sm:$0xff]  }
  0x2b   : > { %2323 = vmatprep.subr.bf16.mxu1 %v2582_v1 }
  0x2c   : > { %689 = vmatmul.mubr.bf16.vlgmr.msra.gmra.mxu0 %v450_v34  ;;  %v2478_v34 = vld [vmem:[%s3196_s7 + $0x28] sm:$0xff]  }
  0x2d   : > { %2320 = vmatmul.mubr.bf16.vlgmr.msra.gmra.mxu1 %v456_v36  ;;  %2224 = vmatpush3.bf16.msra.mxu0 %v2440_v29  ;;  %v2470_v29 = vld [vmem:[%s3196_s7 + $0x78] sm:$0xff]  }
  0x2e   : > { %2324 = vmatpush3.bf16.msra.mxu1 %v2439_v30  ;;  %2339 = vmatprep.mubr.msk.bf16.mxu1 %vm2583_vm0, %v2582_v1  ;;  %v2472_v30 = vld [vmem:[%s3196_s7 + $0x38] sm:$0xff]  }
  0x2f   : > { %2325 = vmatprep.subr.bf16.mxu1 %v2582_v1  ;;  %2225 = vmatprep.subr.bf16.mxu0 %v2441_v37 }
  0x31   : > { %2226 = vmatpush3.bf16.msra.mxu0 %v2443_v39 }
  0x32   : > { %2326 = vmatpush3.bf16.msra.mxu1 %v2442_v38  ;;  %2227 = vmatprep.subr.bf16.mxu0 %v2444_v40  ;;  %v2068_v38 = vld [vmem:[%s3193_s4] ss:$0 sm:$0xff] }
  0x33   : > { %2327 = vmatprep.subr.bf16.mxu1 %v2582_v1 }
  0x35   : > { %2228 = vmatpush3.bf16.msra.mxu0 %v2446_v42 }
  0x36   : > { %2328 = vmatpush3.bf16.msra.mxu1 %v2445_v41  ;;  %2229 = vmatprep.subr.bf16.mxu0 %v2447_v43 }
  0x37   : > { %2329 = vmatprep.subr.bf16.mxu1 %v2582_v1 }
  0x39   : > { %2230 = vmatpush3.bf16.msra.mxu0 %v2449_v45 }
  0x3a   : > { %2330 = vmatpush3.bf16.msra.mxu1 %v2448_v44  ;;  %2231 = vmatprep.subr.bf16.mxu0 %v2450_v46 }
  0x3b   : > { %2331 = vmatprep.subr.bf16.mxu1 %v2582_v1 }
  0x3d   : > { %2232 = vmatpush3.bf16.msra.mxu0 %v2452_v48 }
  0x3e   : > { %2332 = vmatpush3.bf16.msra.mxu1 %v2451_v47  ;;  %2233 = vmatprep.subr.bf16.mxu0 %v2453_v49 }
  0x3f   : > { %2333 = vmatprep.subr.bf16.mxu1 %v2582_v1 }
  0x41   : > { %2234 = vmatpush3.bf16.msra.mxu0 %v2455_v51 }
  0x42   : > { %2334 = vmatpush3.bf16.msra.mxu1 %v2454_v50  ;;  %2235 = vmatprep.subr.bf16.mxu0 %v2456_v52  ;;  %v2471_v52 = vld [vmem:[%s3196_s7 + $0xb8] sm:$0xff]  }
  0x43   : > { %2335 = vmatprep.subr.bf16.mxu1 %v2582_v1 }
  0x45   : > { %2236 = vmatpush3.bf16.msra.mxu0 %v2458_v54  ;;  %v2474_v54 = vld [vmem:[%s3196_s7 + $0xb0] sm:$0xff]  }
  0x46   : > { %2336 = vmatpush3.bf16.msra.mxu1 %v2457_v53  ;;  %2237 = vmatprep.subr.bf16.mxu0 %v2459_v55  ;;  %v2477_v55 = vld [vmem:[%s3196_s7 + $0xa8] sm:$0xff]  }
  0x47   : > { %2337 = vmatprep.subr.bf16.mxu1 %v2582_v1 }
  0x49   : > { %2238 = vmatpush3.bf16.msra.mxu0 %v2461_v57  ;;  %v2480_v57 = vld [vmem:[%s3196_s7 + $0xa0] sm:$0xff]  }
  0x4a   : > { %2338 = vmatpush3.bf16.msra.mxu1 %v2460_v56  ;;  %2343 = vmatprep.subr.bf16.mxu0 %v2582_v1  ;;  %v2479_v56 = vld [vmem:[%s3196_s7 + $0x60] sm:$0xff]  }
  0x4b   : > { %2263 = vmatprep.subr.bf16.mxu1 %v2470_v29  ;;  %v2497_v29 = vld [vmem:[%s3198_s9 + $0x20] sm:$0xff]  }
  0xec   : > { %v2208_v58 = vpop.f32.mrf.mxu0 }
  0xed   : > { %v731_v59 = vpop.f32.mrf.mxu1 }
  0xee   : > { %v2209_v61 = vpop.f32.mrf.mxu0 }
  0xef   : > { %v2210_v62 = vadd.f32 %v2209_v61, %v2208_v58  ;;  %v2321_v63 = vpop.f32.mrf.mxu1  ;;  %v2481_v58 = vld [vmem:[%s3196_s7 + $0x20] sm:$0xff]   ;;  %v2484_v61 = vld [vmem:[%s3196_s7 + $0x18] sm:$0xff]  }
  0xf0   : > { %v2211_v0 = vpop.f32.mrf.mxu0  ;;  %v2486_v63 = vld [vmem:[%s3196_s7 + $0x90] sm:$0xff]  }
  0xf1   : > { %v691_v2 = vadd.f32 %v2210_v62, %v2043_v60  ;;  %v734_v3 = vpop.f32.mrf.mxu1  ;;  %v2485_v62 = vld [vmem:[%s3196_s7 + $0x50] sm:$0xff]  }
  0xf2   : > { %v2212_v4 = vpop.f32.mrf.mxu0 }
  0xf3   : > { %v2847_v5 = vadd.f32 %v731_v59, %v691_v2  ;;  %v2213_v6 = vadd.f32 %v2212_v4, %v2211_v0  ;;  %v2322_v7 = vpop.f32.mrf.mxu1  ;;  %v2482_v59 = vld [vmem:[%s3196_s7 + $0x58] sm:$0xff]   ;;  %v2487_v0 = vld [vmem:[%s3196_s7 + $0x10] sm:$0xff]   ;;  %v2488_v2 = vld [vmem:[%s3196_s7 + $0x48] sm:$0xff]  }
  0xf4   : > { %v2490_v4 = vld [vmem:[%s3196_s7 + $0x8] sm:$0xff]   ;;  %v2492_v7 = vld [vmem:[%s3196_s7 + $0x80] sm:$0xff]  }
  0xf5   : > { %v738_v8 = vmax.f32 %v2847_v5, 0.0  ;;  %v694_v9 = vadd.f32 %v2213_v6, %v2043_v60  ;;  %v2483_v60 = vld [vmem:[%s3196_s7 + $0x98] sm:$0xff]   ;;  %v2491_v6 = vld [vmem:[%s3196_s7 + $0x40] sm:$0xff]  }
  0xf6   : > { %v2494_v5 = vld [vmem:[%s3198_s9 + $0x38] sm:$0xff]  }
  0xf7   : > { %v740_v10 = vmax.f32 %v738_v8, 0.0  ;;  %v2852_v11 = vadd.f32 %v734_v3, %v694_v9  ;;  %v2489_v3 = vld [vmem:[%s3196_s7 + $0x88] sm:$0xff]   ;;  %v2493_v9 = vld [vmem:[%s3196_s7] sm:$0xff]  }
  0xf9   : > { %744 = vst [vmem:[#allocation2 + $0x3] sm:$0xff] %v740_v10  ;;  %v739_v12 = vmax.f32 %v2852_v11, 0.0 }
  0xfb   : > { %v741_v13 = vmax.f32 %v739_v12, 0.0 }
  0xfd   : > { %745 = vst [vmem:[#allocation2 + $0xb] sm:$0xff] %v741_v13  ;;  %v751_v14 = vpack.c.bf16 %v741_v13, %v740_v10  ;;  %v2093_v10 = vld [vmem:[%s3195_s6] ss:$0 sm:$0xff] }
  0xff   : > { %986 = vmatprep.mubr.bf16.mxu0 %v751_v14 }
 0x100   : > { %v746_v15 = vld [vmem:[#allocation2] sm:$0xff] }
 0x101   : > { %1155 = vst [vmem:[#allocation2] sm:$0x1] %v2582_v1 }
 0x104   : > { %v752_v17 = vld [vmem:[#allocation2 + $0x6] sm:$0xff]  ;;  %v753_v18 = vld [vmem:[#allocation2 + $0xe] sm:$0xff] }
 0x105   : > { %v747_v19 = vld [vmem:[#allocation2 + $0x8] sm:$0xff]  ;;  %v754_v20 = vpack.c.bf16 %v753_v18, %v752_v17  ;;  %1156 = vst [vmem:[#allocation2 + $0x11] sm:$0x1] %v2582_v1 }
 0x106   : > { %v748_v21 = vpack.c.bf16 %v747_v19, %v746_v15 }
 0x107   : > { %2340 = vmatmul.mubr.bf16.vlgmr.msra.gmra.mxu1 %v754_v20 }
 0x108   : > { %987 = vmatmul.mubr.bf16.vlgmr.msra.gmra.mxu0 %v748_v21  ;;  %2264 = vmatpush3.bf16.msra.mxu1 %v2472_v30  ;;  %v2498_v30 = vld [vmem:[%s3198_s9 + $0x18] sm:$0xff]  }
 0x109   : > { %2344 = vmatpush3.bf16.msra.mxu0 %v2462_v16  ;;  %2359 = vmatprep.mubr.msk.bf16.mxu0 %vm2583_vm0, %v2582_v1 }
 0x10a   : > { %2345 = vmatprep.subr.bf16.mxu0 %v2582_v1  ;;  %2265 = vmatprep.subr.bf16.mxu1 %v2473_v31  ;;  %v2499_v31 = vld [vmem:[%s3198_s9 + $0x10] sm:$0xff]  }
 0x10c   : > { %2266 = vmatpush3.bf16.msra.mxu1 %v2475_v32  ;;  %v2500_v32 = vld [vmem:[%s3198_s9 + $0x8] sm:$0xff]  }
 0x10d   : > { %2346 = vmatpush3.bf16.msra.mxu0 %v2463_v22  ;;  %2267 = vmatprep.subr.bf16.mxu1 %v2476_v33  ;;  %v2501_v33 = vld [vmem:[%s3198_s9] sm:$0xff]  }
 0x10e   : > { %2347 = vmatprep.subr.bf16.mxu0 %v2582_v1 }
 0x110   : > { %2268 = vmatpush3.bf16.msra.mxu1 %v2478_v34  ;;  %v2502_v34 = vld [vmem:[%s3200_s11 + $0x70] ss:$8 sps:$4 sm:$0xff]  }
 0x111   : > { %2348 = vmatpush3.bf16.msra.mxu0 %v2464_v23  ;;  %2269 = vmatprep.subr.bf16.mxu1 %v2479_v56 }
 0x112   : > { %2349 = vmatprep.subr.bf16.mxu0 %v2582_v1 }
 0x114   : > { %2270 = vmatpush3.bf16.msra.mxu1 %v2481_v58 }
 0x115   : > { %2350 = vmatpush3.bf16.msra.mxu0 %v2465_v24  ;;  %2271 = vmatprep.subr.bf16.mxu1 %v2482_v59  ;;  %v2102_v59 = vld [vmem:[%s3197_s8] ss:$0 sm:$0xff] }
 0x116   : > { %2351 = vmatprep.subr.bf16.mxu0 %v2582_v1 }
 0x118   : > { %2272 = vmatpush3.bf16.msra.mxu1 %v2484_v61 }
 0x119   : > { %2352 = vmatpush3.bf16.msra.mxu0 %v2466_v25  ;;  %2273 = vmatprep.subr.bf16.mxu1 %v2485_v62 }
 0x11a   : > { %2353 = vmatprep.subr.bf16.mxu0 %v2582_v1 }
 0x11c   : > { %2274 = vmatpush3.bf16.msra.mxu1 %v2487_v0 }
 0x11d   : > { %2354 = vmatpush3.bf16.msra.mxu0 %v2467_v26  ;;  %2275 = vmatprep.subr.bf16.mxu1 %v2488_v2 }
 0x11e   : > { %2355 = vmatprep.subr.bf16.mxu0 %v2582_v1 }
 0x120   : > { %2276 = vmatpush3.bf16.msra.mxu1 %v2490_v4 }
 0x121   : > { %2356 = vmatpush3.bf16.msra.mxu0 %v2468_v27  ;;  %2277 = vmatprep.subr.bf16.mxu1 %v2491_v6 }
 0x122   : > { %2357 = vmatprep.subr.bf16.mxu0 %v2582_v1 }
 0x124   : > { %2278 = vmatpush3.bf16.msra.mxu1 %v2493_v9 }
 0x125   : > { %2358 = vmatpush3.bf16.msra.mxu0 %v2469_v28  ;;  %2383 = vmatprep.subr.bf16.mxu1 %v2582_v1  ;;  %v2496_v28 = vld [vmem:[%s3198_s9 + $0x28] sm:$0xff]  }
 0x126   : > { %2363 = vmatprep.subr.bf16.mxu0 %v2582_v1 }
 0x1c7   : > { %v1029_v35 = vpop.f32.mrf.mxu1 }
 0x1c8   : > { %v2239_v36 = vpop.f32.mrf.mxu0 }
 0x1c9   : > { %v2341_v37 = vpop.f32.mrf.mxu1 }
 0x1ca   : > { %v2240_v39 = vpop.f32.mrf.mxu0  ;;  %v2510_v37 = vld [vmem:[%s3200_s11 + $0x54] ss:$8 sps:$4 sm:$0xff]  }
 0x1cb   : > { %v2241_v40 = vadd.f32 %v2240_v39, %v2239_v36  ;;  %v1032_v41 = vpop.f32.mrf.mxu1  ;;  %v2507_v36 = vld [vmem:[%s3200_s11 + $0x64] ss:$8 sps:$4 sm:$0xff]   ;;  %v2508_v39 = vld [vmem:[%s3200_s11 + $0x50] ss:$8 sps:$4 sm:$0xff]  }
 0x1cc   : > { %v2242_v42 = vpop.f32.mrf.mxu0 }
 0x1cd   : > { %v989_v43 = vadd.f32 %v2241_v40, %v2068_v38  ;;  %v2342_v44 = vpop.f32.mrf.mxu1  ;;  %v2513_v40 = vld [vmem:[%s3200_s11 + $0x44] ss:$8 sps:$4 sm:$0xff]  }
 0x1ce   : > { %v2243_v45 = vpop.f32.mrf.mxu0  ;;  %v2519_v44 = vld [vmem:[%s3200_s11 + $0x24] ss:$8 sps:$4 sm:$0xff]  }
 0x1cf   : > { %v2244_v46 = vadd.f32 %v2243_v45, %v2242_v42  ;;  %v1030_v47 = vadd.f32 %v1029_v35, %v989_v43  ;;  %v2504_v35 = vld [vmem:[%s3200_s11 + $0x74] ss:$8 sps:$4 sm:$0xff]   ;;  %v2514_v43 = vld [vmem:[%s3200_s11 + $0x30] ss:$8 sps:$4 sm:$0xff]   ;;  %v2517_v45 = vld [vmem:[%s3200_s11 + $0x20] ss:$8 sps:$4 sm:$0xff]  }
 0x1d0   : > { %v2516_v42 = vld [vmem:[%s3200_s11 + $0x34] ss:$8 sps:$4 sm:$0xff]  }
 0x1d1   : > { %v992_v48 = vadd.f32 %v2244_v46, %v2068_v38  ;;  %v1036_v50 = vmax.f32 %v1030_v47, 0.0  ;;  %v2528_v38 = vld [vmem:[%s3200_s11 + $0x174] ss:$8 sps:$4 sm:$0xff]   ;;  %v2520_v47 = vld [vmem:[%s3200_s11 + $0x10] ss:$8 sps:$4 sm:$0xff]  }
 0x1d2   : > { %v2522_v46 = vld [vmem:[%s3200_s11 + $0x14] ss:$8 sps:$4 sm:$0xff]  }
 0x1d3   : > { %v1033_v49 = vadd.f32 %v1032_v41, %v992_v48  ;;  %v2511_v41 = vld [vmem:[%s3200_s11 + $0x40] ss:$8 sps:$4 sm:$0xff]   ;;  %v2525_v48 = vld [vmem:[%s3200_s11 + $0x4] ss:$8 sps:$4 sm:$0xff]  }
 0x1d5   : > { %v1037_v51 = vmax.f32 %v1033_v49, 0.0  ;;  %v2523_v49 = vld [vmem:[%s3200_s11] ss:$8 sps:$4 sm:$0xff]  }
 0x1d7   : > { %v1038_v53 = vpack.c.bf16 %v1037_v51, %v1036_v50  ;;  %v2531_v50 = vld [vmem:[%s3200_s11 + $0xf4] ss:$8 sps:$4 sm:$0xff]   ;;  %v2529_v51 = vld [vmem:[%s3200_s11 + $0xf0] ss:$8 sps:$4 sm:$0xff]  }
 0x1d9   : > { %2360 = vmatmul.mubr.bf16.vlgmr.msra.gmra.mxu0 %v1038_v53  ;;  %v2535_v53 = vld [vmem:[%s3200_s11 + $0xe0] ss:$8 sps:$4 sm:$0xff]  }
 0x1da   : > { %2364 = vmatpush3.bf16.msra.mxu0 %v2471_v52  ;;  %2379 = vmatprep.mubr.msk.bf16.mxu0 %vm2583_vm0, %v2582_v1  ;;  %v2537_v52 = vld [vmem:[%s3200_s11 + $0xe4] ss:$8 sps:$4 sm:$0xff]  }
 0x1db   : > { %2365 = vmatprep.subr.bf16.mxu0 %v2582_v1 }
 0x1de   : > { %2366 = vmatpush3.bf16.msra.mxu0 %v2474_v54  ;;  %v2543_v54 = vld [vmem:[%s3200_s11 + $0xd4] ss:$8 sps:$4 sm:$0xff]  }
 0x1df   : > { %2367 = vmatprep.subr.bf16.mxu0 %v2582_v1 }
 0x1e2   : > { %2368 = vmatpush3.bf16.msra.mxu0 %v2477_v55  ;;  %v2541_v55 = vld [vmem:[%s3200_s11 + $0xd0] ss:$8 sps:$4 sm:$0xff]  }
 0x1e3   : > { %2369 = vmatprep.subr.bf16.mxu0 %v2582_v1 }
 0x1e6   : > { %2370 = vmatpush3.bf16.msra.mxu0 %v2480_v57 }
 0x1e7   : > { %2371 = vmatprep.subr.bf16.mxu0 %v2582_v1 }
 0x1ea   : > { %2372 = vmatpush3.bf16.msra.mxu0 %v2483_v60 }
 0x1eb   : > { %2373 = vmatprep.subr.bf16.mxu0 %v2582_v1 }
 0x1ee   : > { %2374 = vmatpush3.bf16.msra.mxu0 %v2486_v63 }
 0x1ef   : > { %2375 = vmatprep.subr.bf16.mxu0 %v2582_v1 }
 0x1f2   : > { %2376 = vmatpush3.bf16.msra.mxu0 %v2489_v3 }
 0x1f3   : > { %2377 = vmatprep.subr.bf16.mxu0 %v2582_v1 }
 0x1f6   : > { %2378 = vmatpush3.bf16.msra.mxu0 %v2492_v7 }
 0x1f7   : > { %1879 = vmatprep.subr.bf16.mxu0 %v2504_v35  ;;  %v2573_v35 = vld [vmem:[%s3200_s11 + $0x84] ss:$8 sps:$4 sm:$0xff]  }
 0x299   : > { %v1144_v13 = vpop.f32.mrf.mxu0 }
 0x29a   : > { %v1145_v14 = vadd.f32 %v2093_v10, %v1144_v13 }
 0x29b   : > { %v2361_v15 = vpop.f32.mrf.mxu0 }
 0x29c   : > { %v2983_v16 = vadd.f32 %v1145_v14, %v738_v8  ;;  %v2526_v14 = vld [vmem:[%s3200_s11 + $0x170] ss:$8 sps:$4 sm:$0xff]  }
 0x29d   : > { %v1147_v17 = vpop.f32.mrf.mxu0 }
 0x29e   : > { %v1153_v18 = vmax.f32 %v2983_v16, 0.0  ;;  %v1148_v19 = vadd.f32 %v2093_v10, %v1147_v17  ;;  %v2534_v17 = vld [vmem:[%s3200_s11 + $0x164] ss:$8 sps:$4 sm:$0xff]  }
 0x29f   : > { %v2362_v20 = vpop.f32.mrf.mxu0 }
 0x2a0   : > { %1157 = vst [vmem:[#allocation2 + $0x1] sm:$0xff] %v1153_v18  ;;  %v2988_v21 = vadd.f32 %v1148_v19, %v739_v12  ;;  %v2495_v12 = vld [vmem:[%s3198_s9 + $0x30] sm:$0xff]  }
 0x2a1   : > { %v2540_v19 = vld [vmem:[%s3200_s11 + $0x154] ss:$8 sps:$4 sm:$0xff]   ;;  %v2538_v20 = vld [vmem:[%s3200_s11 + $0x150] ss:$8 sps:$4 sm:$0xff]  }
 0x2a2   : > { %v1154_v22 = vmax.f32 %v2988_v21, 0.0 }
 0x2a4   : > { %1158 = vst [vmem:[#allocation2 + $0x9] sm:$0xff] %v1154_v22  ;;  %v1164_v23 = vpack.c.bf16 %v1154_v22, %v1153_v18  ;;  %v2532_v18 = vld [vmem:[%s3200_s11 + $0x160] ss:$8 sps:$4 sm:$0xff]   ;;  %v2546_v22 = vld [vmem:[%s3200_s11 + $0x144] ss:$8 sps:$4 sm:$0xff]  }
 0x2a6   : > { %1399 = vmatprep.mubr.bf16.mxu1 %v1164_v23  ;;  %v2544_v23 = vld [vmem:[%s3200_s11 + $0x140] ss:$8 sps:$4 sm:$0xff]  }
 0x2a7   : > { %v1159_v24 = vld [vmem:[#allocation2] sm:$0xff] }
 0x2a8   : > { %1566 = vst [vmem:[#allocation2] sm:$0x1] %v2582_v1 }
 0x2ab   : > { %v1165_v8 = vld [vmem:[#allocation2 + $0x2] sm:$0xff]  ;;  %v1166_v25 = vld [vmem:[#allocation2 + $0xa] sm:$0xff] }
 0x2ac   : > { %v1160_v26 = vld [vmem:[#allocation2 + $0x8] sm:$0xff]  ;;  %v1167_v27 = vpack.c.bf16 %v1166_v25, %v1165_v8  ;;  %1567 = vst [vmem:[#allocation2 + $0x11] sm:$0x1] %v2582_v1  ;;  %v2552_v8 = vld [vmem:[%s3200_s11 + $0x134] ss:$8 sps:$4 sm:$0xff]  }
 0x2ad   : > { %v1161_v11 = vpack.c.bf16 %v1160_v26, %v1159_v24  ;;  %v2549_v24 = vld [vmem:[%s3200_s11 + $0xc4] ss:$8 sps:$4 sm:$0xff]   ;;  %v2555_v25 = vld [vmem:[%s3200_s11 + $0xb4] ss:$8 sps:$4 sm:$0xff]   ;;  %v2550_v26 = vld [vmem:[%s3200_s11 + $0x130] ss:$8 sps:$4 sm:$0xff]  }
 0x2ae   : > { %2380 = vmatmul.mubr.bf16.vlgmr.msra.gmra.mxu0 %v1167_v27  ;;  %v2553_v27 = vld [vmem:[%s3200_s11 + $0xb0] ss:$8 sps:$4 sm:$0xff]  }
 0x2af   : > { %1400 = vmatmul.mubr.bf16.vlgmr.msra.gmra.mxu1 %v1161_v11  ;;  %1880 = vmatpush1.bf16.msra.mxu0 %v2502_v34  ;;  %v2558_v11 = vld [vmem:[%s3200_s11 + $0x124] ss:$8 sps:$4 sm:$0xff]  }
 0x2b0   : > { %2384 = vmatpush3.bf16.msra.mxu1 %v2494_v5  ;;  %2399 = vmatprep.mubr.msk.bf16.mxu1 %vm2583_vm0, %v2582_v1  ;;  %v2547_v5 = vld [vmem:[%s3200_s11 + $0xc0] ss:$8 sps:$4 sm:$0xff]   ;;  %v2570_v34 = vld [vmem:[%s3200_s11 + $0x104] ss:$8 sps:$4 sm:$0xff]  }
 0x2b1   : > { %2385 = vmatprep.subr.bf16.mxu1 %v2582_v1  ;;  %1881 = vmatprep.subr.bf16.mxu0 %v2507_v36  ;;  %v2584_v36 = vmov 0  }
 0x2b4   : > { %2386 = vmatpush3.bf16.msra.mxu1 %v2495_v12  ;;  %v2561_v12 = vld [vmem:[%s3200_s11 + $0xa4] ss:$8 sps:$4 sm:$0xff]  }
 0x2b5   : > { %2387 = vmatprep.subr.bf16.mxu1 %v2582_v1 }
 0x2b8   : > { %2388 = vmatpush3.bf16.msra.mxu1 %v2496_v28  ;;  %v2556_v28 = vld [vmem:[%s3200_s11 + $0x120] ss:$8 sps:$4 sm:$0xff]  }
 0x2b9   : > { %2389 = vmatprep.subr.bf16.mxu1 %v2582_v1 }
 0x2bc   : > { %2390 = vmatpush3.bf16.msra.mxu1 %v2497_v29  ;;  %v2559_v29 = vld [vmem:[%s3200_s11 + $0xa0] ss:$8 sps:$4 sm:$0xff]  }
 0x2bd   : > { %2391 = vmatprep.subr.bf16.mxu1 %v2582_v1 }
 0x2c0   : > { %2392 = vmatpush3.bf16.msra.mxu1 %v2498_v30  ;;  %v2562_v30 = vld [vmem:[%s3200_s11 + $0x110] ss:$8 sps:$4 sm:$0xff]  }
 0x2c1   : > { %2393 = vmatprep.subr.bf16.mxu1 %v2582_v1 }
 0x2c4   : > { %2394 = vmatpush3.bf16.msra.mxu1 %v2499_v31  ;;  %v2564_v31 = vld [vmem:[%s3200_s11 + $0x114] ss:$8 sps:$4 sm:$0xff]  }
 0x2c5   : > { %2395 = vmatprep.subr.bf16.mxu1 %v2582_v1 }
 0x2c8   : > { %2396 = vmatpush3.bf16.msra.mxu1 %v2500_v32  ;;  %v2565_v32 = vld [vmem:[%s3200_s11 + $0x90] ss:$8 sps:$4 sm:$0xff]  }
 0x2c9   : > { %2397 = vmatprep.subr.bf16.mxu1 %v2582_v1  ;;  %v2505_v1 = vld [vmem:[%s3200_s11 + $0x60] ss:$8 sps:$4 sm:$0xff]  }
 0x2ca   : > { %1882 = vmatpush1.bf16.msra.mxu0 %v2505_v1  ;;  %v2568_v1 = vld [vmem:[%s3200_s11 + $0x100] ss:$8 sps:$4 sm:$0xff]  }
 0x2cb   : > { %1883 = vmatprep.subr.bf16.mxu0 %v2510_v37  ;;  %v2571_v37 = vld [vmem:[%s3200_s11 + $0x80] ss:$8 sps:$4 sm:$0xff]  }
 0x2cc   : > { %2398 = vmatpush3.bf16.msra.mxu1 %v2501_v33  ;;  %v2567_v33 = vld [vmem:[%s3200_s11 + $0x94] ss:$8 sps:$4 sm:$0xff]  }
 0x2cd   : > { %1922 = vmatprep.subr.bf16.mxu1 %v2528_v38  ;;  %v2127_v38 = vld [vmem:[%s3199_s10] ss:$0 sm:$0xff] }
 0x2ce   : > { %1884 = vmatpush1.bf16.msra.mxu0 %v2508_v39 }
 0x2cf   : > { %1885 = vmatprep.subr.bf16.mxu0 %v2513_v40 }
 0x2d2   : > { %1886 = vmatpush1.bf16.msra.mxu0 %v2511_v41 }
 0x2d3   : > { %1887 = vmatprep.subr.bf16.mxu0 %v2516_v42 }
 0x2d6   : > { %1888 = vmatpush1.bf16.msra.mxu0 %v2514_v43 }
 0x2d7   : > { %1889 = vmatprep.subr.bf16.mxu0 %v2519_v44 }
 0x2da   : > { %1890 = vmatpush1.bf16.msra.mxu0 %v2517_v45 }
 0x2db   : > { %1891 = vmatprep.subr.bf16.mxu0 %v2522_v46 }
 0x2de   : > { %1892 = vmatpush1.bf16.msra.mxu0 %v2520_v47 }
 0x2df   : > { %1893 = vmatprep.subr.bf16.mxu0 %v2525_v48 }
 0x2e2   : > { %1894 = vmatpush1.bf16.msra.mxu0 %v2523_v49 }
 0x2e3   : > { %1895 = vmatprep.subr.bf16.mxu0 %v2531_v50 }
 0x2e6   : > { %1896 = vmatpush2.bf16.msra.mxu0 %v2529_v51 }
 0x2e7   : > { %1897 = vmatprep.subr.bf16.mxu0 %v2537_v52 }
 0x2ea   : > { %1898 = vmatpush2.bf16.msra.mxu0 %v2535_v53 }
 0x2eb   : > { %1899 = vmatprep.subr.bf16.mxu0 %v2543_v54  ;;  %v1629_v54 = vlaneseq }
 0x2ee   : > { %1900 = vmatpush2.bf16.msra.mxu0 %v2541_v55  ;;  %v1630_v55 = vshrl.u32 %v1629_v54, 7 }
 0x2ef   : > { %1901 = vmatprep.subr.bf16.mxu0 %v2549_v24 }
 0x2f2   : > { %1902 = vmatpush2.bf16.msra.mxu0 %v2547_v5 }
 0x2f3   : > { %1903 = vmatprep.subr.bf16.mxu0 %v2555_v25 }
 0x2f6   : > { %1904 = vmatpush2.bf16.msra.mxu0 %v2553_v27 }
 0x2f7   : > { %1905 = vmatprep.subr.bf16.mxu0 %v2561_v12 }
 0x2fa   : > { %1906 = vmatpush2.bf16.msra.mxu0 %v2559_v29 }
 0x2fb   : > { %1907 = vmatprep.subr.bf16.mxu0 %v2567_v33 }
 0x2fe   : > { %1908 = vmatpush2.bf16.msra.mxu0 %v2565_v32 }
 0x2ff   : > { %1909 = vmatprep.subr.bf16.mxu0 %v2573_v35 }
 0x302   : > { %1910 = vmatpush2.bf16.msra.mxu0 %v2571_v37 }
 0x36e   : > { %v1442_v56 = vpop.f32.mrf.mxu0 }
 0x36f   : > { %v2279_v57 = vpop.f32.mrf.mxu1 }
 0x370   : > { %v2381_v58 = vpop.f32.mrf.mxu0 }
 0x371   : > { %v2280_v60 = vpop.f32.mrf.mxu1 }
 0x372   : > { %v2281_v61 = vadd.f32 %v2280_v60, %v2279_v57  ;;  %v1445_v62 = vpop.f32.mrf.mxu0 }
 0x373   : > { %v2282_v63 = vpop.f32.mrf.mxu1 }
 0x374   : > { %v1402_v0 = vadd.f32 %v2281_v61, %v2102_v59  ;;  %v2382_v2 = vpop.f32.mrf.mxu0 }
 0x375   : > { %v2283_v3 = vpop.f32.mrf.mxu1 }
 0x376   : > { %v2284_v4 = vadd.f32 %v2283_v3, %v2282_v63  ;;  %v1443_v6 = vadd.f32 %v1442_v56, %v1402_v0  ;;  %v1627_v56 = vld [vmem:[%s3201_s12] sm:$0x3] }
 0x378   : > { %v1405_v7 = vadd.f32 %v2284_v4, %v2102_v59  ;;  %v1449_v10 = vmax.f32 %v1443_v6, 0.0 }
 0x37a   : > { %v1446_v9 = vadd.f32 %v1445_v62, %v1405_v7 }
 0x37c   : > { %v1450_v13 = vmax.f32 %v1446_v9, 0.0 }
 0x37e   : > { %v1451_v15 = vpack.c.bf16 %v1450_v13, %v1449_v10 }
 0x380   : > { %2400 = vmatmul.mubr.bf16.vlgmr.msra.gmra.mxu1 %v1451_v15 }
 0x381   : > { %1923 = vmatpush1.bf16.msra.mxu1 %v2526_v14  ;;  %1954 = vmatprep.mubr.bf16.mxu1 %v2584_v36 }
 0x382   : > { %1924 = vmatprep.subr.bf16.mxu1 %v2534_v17 }
 0x385   : > { %1925 = vmatpush1.bf16.msra.mxu1 %v2532_v18 }
 0x386   : > { %1926 = vmatprep.subr.bf16.mxu1 %v2540_v19 }
 0x389   : > { %1927 = vmatpush1.bf16.msra.mxu1 %v2538_v20 }
 0x38a   : > { %1928 = vmatprep.subr.bf16.mxu1 %v2546_v22 }
 0x38d   : > { %1929 = vmatpush1.bf16.msra.mxu1 %v2544_v23 }
 0x38e   : > { %1930 = vmatprep.subr.bf16.mxu1 %v2552_v8 }
 0x391   : > { %1931 = vmatpush1.bf16.msra.mxu1 %v2550_v26 }
 0x392   : > { %1932 = vmatprep.subr.bf16.mxu1 %v2558_v11 }
 0x395   : > { %1933 = vmatpush1.bf16.msra.mxu1 %v2556_v28 }
 0x396   : > { %1934 = vmatprep.subr.bf16.mxu1 %v2564_v31 }
 0x399   : > { %1935 = vmatpush1.bf16.msra.mxu1 %v2562_v30 }
 0x39a   : > { %1936 = vmatprep.subr.bf16.mxu1 %v2570_v34 }
 0x39d   : > { %1937 = vmatpush1.bf16.msra.mxu1 %v2568_v1 }
 0x440   : > { %v1557_v39 = vpop.f32.mrf.mxu1 }
 0x441   : > { %v1558_v40 = vadd.f32 %v2127_v38, %v1557_v39 }
 0x442   : > { %v2401_v41 = vpop.f32.mrf.mxu1 }
 0x443   : > { %v1564_v42 = vadd.f32 %v1558_v40, %v2983_v16  ;;  %v1631_v16 = vsub.s32 0, %v1630_v55 }
 0x444   : > { %v1560_v43 = vpop.f32.mrf.mxu1 }
 0x445   : > { %1568 = vst [vmem:[#allocation2 + $0x1] sm:$0xff] %v1564_v42  ;;  %v1561_v44 = vadd.f32 %v2127_v38, %v1560_v43  ;;  %v1632_v57 = vrot.slane %v1627_v56, %v1631_v16 }
 0x446   : > { %v2402_v45 = vpop.f32.mrf.mxu1 }
 0x447   : > { %v1565_v46 = vadd.f32 %v1561_v44, %v2988_v21  ;;  %v1635_v21 = vsub.s32 1, %v1630_v55 }
 0x449   : > { %1569 = vst [vmem:[#allocation2 + $0x9] sm:$0xff] %v1565_v46  ;;  %v1575_v47 = vpack.c.bf16 %v1565_v46, %v1564_v42  ;;  %v1636_v58 = vrot.slane %v1627_v56, %v1635_v21 }
 0x44b   : > { %1911 = vmatprep.mubr.bf16.mxu0 %v1575_v47 }
 0x44c   : > { %v1570_v48 = vld [vmem:[#allocation2] sm:$0xff] }
 0x450   : > { %v1576_v49 = vld [vmem:[#allocation2 + $0x2] sm:$0xff]  ;;  %v1577_v50 = vld [vmem:[#allocation2 + $0xa] sm:$0xff] }
 0x451   : > { %v1571_v51 = vld [vmem:[#allocation2 + $0x8] sm:$0xff]  ;;  %v1578_v52 = vpack.c.bf16 %v1577_v50, %v1576_v49 }
 0x452   : > { %v1572_v53 = vpack.c.bf16 %v1571_v51, %v1570_v48 }
 0x453   : > { %1955 = vmatmul.mubr.bf16.vlgmr.msra.gmra.mxu1 %v1578_v52 }
 0x454   : > { %1912 = vmatmul.mubr.bf16.vlgmr.msra.gmra.mxu0 %v1572_v53 }
 0x513   : > { %v1956_v59 = vpop.f32.mrf.mxu1 }
 0x514   : > { %v1913_v60 = vpop.f32.mrf.mxu0 }
 0x515   : > { %v1914_v61 = vadd.f32 %v1913_v60, %v1632_v57  ;;  %v1958_v62 = vpop.f32.mrf.mxu1 }
 0x516   : > { %v1915_v63 = vpop.f32.mrf.mxu0 }
 0x517   : > { %v1916_v0 = vadd.f32 %v1915_v63, %v1636_v58  ;;  %v1960_v2 = vpop.f32.mrf.mxu1  ;;  %v1957_v4 = vadd.f32 %v1956_v59, %v1914_v61 }
 0x518   : > { %v1917_v3 = vpop.f32.mrf.mxu0 }
 0x519   : > { %v1959_v6 = vadd.f32 %v1958_v62, %v1916_v0  ;;  %v1918_v7 = vadd.f32 %v1917_v3, %v1632_v57  ;;  %v1962_v14 = vpop.f32.mrf.mxu1 }
 0x51a   : > { %v1919_v9 = vpop.f32.mrf.mxu0 }
 0x51b   : > { %v2190_v10 = vpack.c.bf16 %v1959_v6, %v1957_v4  ;;  %v1920_v13 = vadd.f32 %v1919_v9, %v1636_v58  ;;  %v1961_v15 = vadd.f32 %v1960_v2, %v1918_v7 }
 0x51d   : > { %1977 = vst [vmem:[%s440_s18] sm:$0xff] %v2190_v10  ;;  %v1963_v17 = vadd.f32 %v1962_v14, %v1920_v13 }
 0x51f   : > { %v2191_v18 = vpack.c.bf16 %v1963_v17, %v1961_v15 }
 0x521   : > { %1978 = vst [vmem:[%s440_s18 + $0x8] sm:$0xff] %v2191_v18 }
 0x522 PF: > { %s23_s25 = sadd.s32 1, %s2580_s25  }
 0x523   : > { %p20_p4 = scmp.ge.s32.totalorder %s23_s25, 4  }
 0x525   :  { %22 = sbr.rel (!%p20_p4) target bundleno = 1 (0x1), region = 102 }

// kernel: vqvae_forward.13
= control target key start
LH: loop header
LB: loop body
LE: loop exit
PB: predicated region body
PF: predicated region fallthrough
CT: control target
= control target key end

     0   :  { %10 = vsyncpa [#allocation4], 0  ;;  %s2024_s0 = inlined_call_operand.vmem [shape: bf16[2,64,128], index: 0, kind: input, shape index: {}]   ;;  %s2025_s1 = inlined_call_operand.vmem [shape: bf16[384,128], index: 1, kind: input, shape index: {}]   ;;  %s2026_s2 = inlined_call_operand.vmem [shape: f32[1,128], index: 2, kind: input, shape index: {}]   ;;  %s2027_s3 = inlined_call_operand.vmem [shape: bf16[384,256], index: 3, kind: input, shape index: {}]   ;;  %s2028_s4 = inlined_call_operand.vmem [shape: f32[1,256], index: 4, kind: input, shape index: {}]   ;;  %s2029_s5 = inlined_call_operand.hbm [shape: f32[2,64,256], index: 5, kind: output, shape index: {}]  }
   0x1   :  { %12 = vsyncpa [#allocation4 + $0x1], 0  ;;  %s1629_s18 = smov 0   ;;  %s1631_s19 = smov 0  }
   0x2   :  { %s1633_s20 = smov 0   ;;  %s1635_s21 = smov 0  }
   0x3 LB: > { %s1650_s22 = sadd.s32 4294967295, %s1592_s21   ;;  %s1207_s23 = sadd.s32 4294967294, %s1592_s21   ;;  %s1592_s21 = sphi %s1635_s21, %s2035_s21   ;;  %s1588_s20 = sphi %s1633_s20, %s2034_s20   ;;  %s1584_s19 = sphi %s1631_s19, %s2033_s19   ;;  %s1580_s18 = sphi %s1629_s18, %s2032_s18  }
   0x4   : > { %s1654_s24 = sadd.s32 1, %s1592_s21   ;;  %s135_s25 = sadd.s32 1, %s1588_s20 }
   0x5   : > { %s132_s26 = ssub.s32 %s1592_s21, %s1654_s24  ;;  %p145_p0 = scmp.ne.s32.totalorder %s1588_s20, %s1584_s19 }
   0x6   : > { %p133_p1 = scmp.eq.s32.totalorder %s132_s26, 0  ;;  %p146_p2 = scmp.eq.s32.totalorder %s1650_s22, 1 }
   0x7   : > { %p151_p3 = scmp.ne.s32.totalorder %s1584_s19, %s1580_s18  ;;  %p152_p4 = scmp.eq.s32.totalorder %s1207_s23, 1 }
   0x8   : > { %s1665_s27 = scalar_select %p133_p1, %s1588_s20, %s135_s25  }
   0x9   : > { %p1667_p5 = por %p146_p2, %p145_p0  ;;  %p1671_p6 = por %p152_p4, %p151_p3 }
   0xa   : > { %p1210_p7 = scmp.ge.s32.totalorder %s1592_s21, 1  ;;  %p190_p8 = scmp.lt.s32.totalorder %s1592_s21, 3 }
   0xc   : > { %p191_p9 = pnand %p1210_p7, %p190_p8 }
   0xd   : > { %p218_p10 = scmp.lt.s32.totalorder (!%p191_p9), %s1650_s22, 1  ;;  %s215_s15 = sand.u32 (!%p191_p9), 1, %s1584_s19  }
   0xe   : > { %194 = sbr.rel (%p191_p9) target bundleno = 513 (0x201), region = 40  ;;  %s1211_s16 = sshll.u32 (!%p191_p9), %s215_s15, 7 }
   0xf   : > { %s1941_s23 = scalar_lea.vmem (!%p191_p9), [#allocation3], %s1211_s16  ;;  %s1293_s25 = sshll.u32 (!%p191_p9), %s1650_s22, 11 }
  0x10   : > { %s1145_s26 = sshll.u32 (!%p191_p9), %s1941_s23, 4  ;;  %s1976_s7 = scalar_lea.hbm (!%p191_p9), %s2029_s5, %s1293_s25  ;;  %s1978_s26 = int_to_ptr.vmem [resolvable:$true] %s1145_s26 }
  0x13   : > { %v1432_v0 = vld [vmem:[%s2025_s1 + $0x78] sm:$0xff]   ;;  %v1594_v3 = vmov 0.0   ;;  %v1435_v4 = vld [vmem:[%s2025_s1 + $0x70] sm:$0xff]   ;;  %v1438_v7 = vld [vmem:[%s2025_s1 + $0x68] sm:$0xff]   ;;  %s219_s17 = scalar_select %p218_p10, %s1650_s22, 1 }
  0x14   : > { %v1433_v1 = vld [vmem:[%s2025_s1 + $0xb8] sm:$0xff]   ;;  %1313 = vmatprep.subr.bf16.mxu0 %v1432_v0  ;;  %240 = vst [vmem:[#allocation2] sm:$0x1] %v1594_v3  ;;  %241 = vst [vmem:[#allocation2 + $0x41] sm:$0x1] %v1594_v3  ;;  %v1436_v5 = vld [vmem:[%s2025_s1 + $0xb0] sm:$0xff]  }
  0x15   : > { %v1434_v2 = vld [vmem:[%s2025_s1 + $0x38] sm:$0xff]   ;;  %1365 = vmatprep.subr.bf16.mxu1 %v1433_v1  ;;  %v1437_v6 = vld [vmem:[%s2025_s1 + $0x30] sm:$0xff]   ;;  %v1439_v8 = vld [vmem:[%s2025_s1 + $0xa8] sm:$0xff]   ;;  %s1292_s8 = sshll.u32 %s219_s17, 5  ;;  %s1984_s22 = scalar_lea.sflag [#allocation4], %s215_s15 }
  0x16   : > { %1314 = vmatpush3.bf16.msra.mxu0 %v1434_v2  ;;  %1366 = vmatpush3.bf16.msra.mxu1 %v1433_v1  ;;  %v1440_v9 = vld [vmem:[%s2025_s1 + $0x28] sm:$0xff]   ;;  %v1441_v10 = vld [vmem:[%s2025_s1 + $0x60] sm:$0xff]   ;;  %v1444_v13 = vld [vmem:[%s2025_s1 + $0x58] sm:$0xff]   ;;  %s1744_s17 = scalar_lea.vmem %s2024_s0, %s1292_s8  ;;  %s1596_s8 = smov [#allocation3]  }
  0x17   : > { %1315 = vmatprep.subr.bf16.mxu0 %v1435_v4  ;;  %1367 = vmatprep.subr.bf16.mxu1 %v1436_v5  ;;  %v1442_v11 = vld [vmem:[%s2025_s1 + $0xa0] sm:$0xff]   ;;  %v1445_v14 = vld [vmem:[%s2025_s1 + $0x98] sm:$0xff]   ;;  %v1447_v16 = vld [vmem:[%s2025_s1 + $0x50] sm:$0xff]   ;;  %s1536_s9 = sshll.u32 %s1596_s8, 4  ;;  %s1537_s9 = int_to_ptr.vmem [resolvable:$false] %s1536_s9 }
  0x18   : > { %v1443_v12 = vld [vmem:[%s2025_s1 + $0x20] sm:$0xff]   ;;  %v1446_v15 = vld [vmem:[%s2025_s1 + $0x18] sm:$0xff]   ;;  %v1448_v17 = vld [vmem:[%s2025_s1 + $0x90] sm:$0xff]   ;;  %s1538_s10 = scalar_lea.vmem %s1537_s9, 4096  ;;  %p1539_p0 = scmp.lt.s32.totalorder %s1978_s26, %s1537_s9 }
  0x19   : > { %v1449_v18 = vld [vmem:[%s2025_s1 + $0x10] sm:$0xff]   ;;  %v1450_v19 = vld [vmem:[%s2025_s1 + $0x48] sm:$0xff]   ;;  %v1453_v22 = vld [vmem:[%s2025_s1 + $0x40] sm:$0xff]  }
  0x1a   : > { %1316 = vmatpush3.bf16.msra.mxu0 %v1437_v6  ;;  %1368 = vmatpush3.bf16.msra.mxu1 %v1436_v5  ;;  %v1451_v20 = vld [vmem:[%s2025_s1 + $0x88] sm:$0xff]   ;;  %v1295_v23 = vld [vmem:[%s1744_s17] sm:$0xff]   ;;  %v1311_v31 = vld [vmem:[%s1744_s17 + $0x10] sm:$0xff]  }
  0x1b   : > { %1317 = vmatprep.subr.bf16.mxu0 %v1438_v7  ;;  %1369 = vmatprep.subr.bf16.mxu1 %v1439_v8  ;;  %v1452_v21 = vld [vmem:[%s2025_s1 + $0x8] sm:$0xff]   ;;  %v1456_v24 = vld [vmem:[%s1744_s17] sm:$0xff]  ;;  %v1296_v27 = vunpack.c.l.bf16 %v1295_v23  ;;  %v1297_v28 = vunpack.c.h.bf16 %v1295_v23  ;;  %v1312_v32 = vld [vmem:[%s1744_s17 + $0x18] sm:$0xff]   ;;  %v1304_v33 = vunpack.c.l.bf16 %v1311_v31  ;;  %v1305_v34 = vunpack.c.h.bf16 %v1311_v31 }
  0x1c   : > { %v1310_v25 = vld [vmem:[%s1744_s17 + $0x8] sm:$0xff]   ;;  %v1454_v26 = vld [vmem:[%s2025_s1 + $0x80] sm:$0xff]   ;;  %517 = vmatprep.mubr.bf16.mxu0 %v1456_v24  ;;  %v1308_v35 = vunpack.c.l.bf16 %v1312_v32  ;;  %v1309_v36 = vunpack.c.h.bf16 %v1312_v32  ;;  %v1462_v38 = vld [vmem:[%s2027_s3 + $0x74] ss:$8 sps:$4 sm:$0xff]  }
  0x1d   : > { %v1300_v29 = vunpack.c.l.bf16 %v1310_v25  ;;  %v1301_v30 = vunpack.c.h.bf16 %v1310_v25  ;;  %242 = vst [vmem:[#allocation2 + $0x1] sm:$0xff] %v1296_v27  ;;  %243 = vst [vmem:[#allocation2 + $0x9] sm:$0xff] %v1297_v28  ;;  %v1455_v37 = vld [vmem:[%s2025_s1] sm:$0xff]   ;;  %v1457_v39 = vld [vmem:[%s1744_s17 + $0x8] sm:$0xff] }
  0x1e   : > { %1318 = vmatpush3.bf16.msra.mxu0 %v1440_v9  ;;  %1370 = vmatpush3.bf16.msra.mxu1 %v1439_v8  ;;  %246 = vst [vmem:[#allocation2 + $0x21] sm:$0xff] %v1304_v33  ;;  %247 = vst [vmem:[#allocation2 + $0x29] sm:$0xff] %v1305_v34  ;;  %v1460_v40 = vld [vmem:[%s2027_s3 + $0x70] ss:$8 sps:$4 sm:$0xff]   ;;  %v1465_v51 = vld [vmem:[%s2027_s3 + $0x64] ss:$8 sps:$4 sm:$0xff]  }
  0x1f   : > { %1319 = vmatprep.subr.bf16.mxu0 %v1441_v10  ;;  %1371 = vmatprep.subr.bf16.mxu1 %v1442_v11  ;;  %244 = vst [vmem:[#allocation2 + $0x11] sm:$0xff] %v1300_v29  ;;  %245 = vst [vmem:[#allocation2 + $0x19] sm:$0xff] %v1301_v30  ;;  %v1463_v55 = vld [vmem:[%s2027_s3 + $0x60] ss:$8 sps:$4 sm:$0xff]   ;;  %v1468_v59 = vld [vmem:[%s2027_s3 + $0x54] ss:$8 sps:$4 sm:$0xff]  }
  0x20   : > { %248 = vst [vmem:[#allocation2 + $0x31] sm:$0xff] %v1308_v35  ;;  %249 = vst [vmem:[#allocation2 + $0x39] sm:$0xff] %v1309_v36  ;;  %v1458_v62 = vld [vmem:[%s1744_s17 + $0x10] sm:$0xff]  ;;  %v1471_v0 = vld [vmem:[%s2027_s3 + $0x44] ss:$8 sps:$4 sm:$0xff]  }
  0x21   : > { %v1466_v63 = vld [vmem:[%s2027_s3 + $0x50] ss:$8 sps:$4 sm:$0xff]   ;;  %v1469_v2 = vld [vmem:[%s2027_s3 + $0x40] ss:$8 sps:$4 sm:$0xff]   ;;  %v1474_v6 = vld [vmem:[%s2027_s3 + $0x34] ss:$8 sps:$4 sm:$0xff]  }
  0x22   : > { %1320 = vmatpush3.bf16.msra.mxu0 %v1443_v12  ;;  %1372 = vmatpush3.bf16.msra.mxu1 %v1442_v11  ;;  %v1487_v1 = vld [vmem:[%s2027_s3 + $0x170] ss:$8 sps:$4 sm:$0xff]   ;;  %v1477_v10 = vld [vmem:[%s2027_s3 + $0x24] ss:$8 sps:$4 sm:$0xff]   ;;  %v1498_v24 = vld [vmem:[%s2027_s3 + $0xd4] ss:$8 sps:$4 sm:$0xff]  }
  0x23   : > { %1321 = vmatprep.subr.bf16.mxu0 %v1444_v13  ;;  %1373 = vmatprep.subr.bf16.mxu1 %v1445_v14  ;;  %v1459_v7 = vld [vmem:[%s1744_s17 + $0x18] sm:$0xff]  ;;  %v1475_v13 = vld [vmem:[%s2027_s3 + $0x20] ss:$8 sps:$4 sm:$0xff]   ;;  %v1495_v23 = vld [vmem:[%s2027_s3 + $0x164] ss:$8 sps:$4 sm:$0xff]   ;;  %s1532_s17 = scalar_lea.vmem %s1978_s26, 2048 }
  0x24   : > { %v274_v41 = vld [vmem:[#allocation2 + $0x2] sm:$0xff]  ;;  %v1472_v8 = vld [vmem:[%s2027_s3 + $0x30] ss:$8 sps:$4 sm:$0xff]   ;;  %v1501_v27 = vld [vmem:[%s2027_s3 + $0x154] ss:$8 sps:$4 sm:$0xff]   ;;  %p1533_p11 = scmp.ne.s32.totalorder %s1978_s26, %s1532_s17  ;;  %p1540_p1 = scmp.lt.s32.totalorder %s1538_s10, %s1532_s17 }
  0x25   : > { %v250_v43 = vld [vmem:[#allocation2] sm:$0xff]  ;;  %v251_v45 = vld [vmem:[#allocation2 + $0x8] sm:$0xff]  ;;  %v1499_v29 = vld [vmem:[%s2027_s3 + $0x150] ss:$8 sps:$4 sm:$0xff]  }
  0x26   : > { %1322 = vmatpush3.bf16.msra.mxu0 %v1446_v15  ;;  %1374 = vmatpush3.bf16.msra.mxu1 %v1445_v14  ;;  %v275_v42 = vld [vmem:[#allocation2 + $0xa] sm:$0xff]  ;;  %623 = vst [vmem:[#allocation2] sm:$0x1] %v1594_v3  ;;  %v276_v46 = vld [vmem:[#allocation2 + $0x12] sm:$0xff]  ;;  %v277_v47 = vld [vmem:[#allocation2 + $0x1a] sm:$0xff]  ;;  %v258_v48 = vpack.c.bf16 %v251_v45, %v250_v43  ;;  %p1534_p12 = pnand %p1533_p11, %p1667_p5  ;;  %p1541_p2 = por %p1540_p1, %p1539_p0 }
  0x27   : > { %1323 = vmatprep.subr.bf16.mxu0 %v1447_v16  ;;  %1375 = vmatprep.subr.bf16.mxu1 %v1448_v17  ;;  %v282_v44 = vpack.c.bf16 %v275_v42, %v274_v41  ;;  %v283_v49 = vpack.c.bf16 %v277_v47, %v276_v46  ;;  %v278_v50 = vld [vmem:[#allocation2 + $0x22] sm:$0xff]  ;;  %v279_v52 = vld [vmem:[#allocation2 + $0x2a] sm:$0xff]  ;;  %v281_v53 = vld [vmem:[#allocation2 + $0x3a] sm:$0xff] }
  0x28   : > { %v284_v54 = vpack.c.bf16 %v279_v52, %v278_v50  ;;  %624 = vst [vmem:[#allocation2 + $0x41] sm:$0x1] %v1594_v3  ;;  %v252_v56 = vld [vmem:[#allocation2 + $0x10] sm:$0xff]  ;;  %v253_v57 = vld [vmem:[#allocation2 + $0x18] sm:$0xff]  ;;  %v254_v4 = vld [vmem:[#allocation2 + $0x20] sm:$0xff]  ;;  %p1535_p13 = pneg %p1534_p12 }
  0x29   : > { %1381 = vmatprep.mubr.bf16.mxu1 %v282_v44  ;;  %v280_v58 = vld [vmem:[#allocation2 + $0x32] sm:$0xff]  ;;  %v259_v60 = vpack.c.bf16 %v253_v57, %v252_v56  ;;  %v255_v5 = vld [vmem:[#allocation2 + $0x28] sm:$0xff] }
  0x2a   : > { %1324 = vmatpush3.bf16.msra.mxu0 %v1449_v18  ;;  %1376 = vmatpush3.bf16.msra.mxu1 %v1448_v17  ;;  %v285_v61 = vpack.c.bf16 %v281_v53, %v280_v58  ;;  %v1489_v3 = vld [vmem:[%s2027_s3 + $0x174] ss:$8 sps:$4 sm:$0xff]   ;;  %v260_v9 = vpack.c.bf16 %v255_v5, %v254_v4  ;;  %v1478_v16 = vld [vmem:[%s2027_s3 + $0x10] ss:$8 sps:$4 sm:$0xff]   ;;  %v1483_v17 = vld [vmem:[%s2027_s3 + $0x4] ss:$8 sps:$4 sm:$0xff]   ;;  %p1542_p3 = pnand %p1541_p2, %p1535_p13 }
  0x2b   : > { %1325 = vmatprep.subr.bf16.mxu0 %v1450_v19  ;;  %1377 = vmatprep.subr.bf16.mxu1 %v1451_v20  ;;  %v256_v11 = vld [vmem:[#allocation2 + $0x30] sm:$0xff]  ;;  %v257_v12 = vld [vmem:[#allocation2 + $0x38] sm:$0xff]  ;;  %v1481_v18 = vld [vmem:[%s2027_s3] ss:$8 sps:$4 sm:$0xff]  }
  0x2c   : > { %v1480_v14 = vld [vmem:[%s2027_s3 + $0x14] ss:$8 sps:$4 sm:$0xff]   ;;  %v261_v15 = vpack.c.bf16 %v257_v12, %v256_v11  ;;  %v1493_v25 = vld [vmem:[%s2027_s3 + $0x160] ss:$8 sps:$4 sm:$0xff]   ;;  %v1504_v28 = vld [vmem:[%s2027_s3 + $0xc4] ss:$8 sps:$4 sm:$0xff]  }
  0x2d   : > { %v1486_v19 = vld [vmem:[%s2027_s3 + $0xf4] ss:$8 sps:$4 sm:$0xff]   ;;  %v1502_v30 = vld [vmem:[%s2027_s3 + $0xc0] ss:$8 sps:$4 sm:$0xff]   ;;  %v1507_v31 = vld [vmem:[%s2027_s3 + $0x144] ss:$8 sps:$4 sm:$0xff]  }
  0x2e   : > { %1326 = vmatpush3.bf16.msra.mxu0 %v1452_v21  ;;  %1378 = vmatpush3.bf16.msra.mxu1 %v1451_v20  ;;  %v1484_v20 = vld [vmem:[%s2027_s3 + $0xf0] ss:$8 sps:$4 sm:$0xff]   ;;  %v1492_v21 = vld [vmem:[%s2027_s3 + $0xe4] ss:$8 sps:$4 sm:$0xff]   ;;  %v1510_v32 = vld [vmem:[%s2027_s3 + $0xb4] ss:$8 sps:$4 sm:$0xff]  }
  0x2f   : > { %1327 = vmatprep.subr.bf16.mxu0 %v1453_v22  ;;  %1379 = vmatprep.subr.bf16.mxu1 %v1454_v26  ;;  %v1490_v22 = vld [vmem:[%s2027_s3 + $0xe0] ss:$8 sps:$4 sm:$0xff]   ;;  %v1508_v34 = vld [vmem:[%s2027_s3 + $0xb0] ss:$8 sps:$4 sm:$0xff]   ;;  %v1513_v35 = vld [vmem:[%s2027_s3 + $0x134] ss:$8 sps:$4 sm:$0xff]  }
  0x30   : > { %v1505_v33 = vld [vmem:[%s2027_s3 + $0x140] ss:$8 sps:$4 sm:$0xff]   ;;  %v1516_v36 = vld [vmem:[%s2027_s3 + $0xa4] ss:$8 sps:$4 sm:$0xff]   ;;  %v1520_v42 = vld [vmem:[%s2027_s3 + $0x90] ss:$8 sps:$4 sm:$0xff]  }
  0x31   : > { %v1517_v41 = vld [vmem:[%s2027_s3 + $0x120] ss:$8 sps:$4 sm:$0xff]   ;;  %v1525_v43 = vld [vmem:[%s2027_s3 + $0x114] ss:$8 sps:$4 sm:$0xff]   ;;  %v1528_v44 = vld [vmem:[%s2027_s3 + $0x84] ss:$8 sps:$4 sm:$0xff]  }
  0x32   : > { %1328 = vmatpush3.bf16.msra.mxu0 %v1455_v37  ;;  %1380 = vmatpush3.bf16.msra.mxu1 %v1454_v26  ;;  %v1496_v26 = vld [vmem:[%s2027_s3 + $0xd0] ss:$8 sps:$4 sm:$0xff]   ;;  %v1526_v46 = vld [vmem:[%s2027_s3 + $0x80] ss:$8 sps:$4 sm:$0xff]   ;;  %v1531_v47 = vld [vmem:[%s2027_s3 + $0x104] ss:$8 sps:$4 sm:$0xff]  }
  0x33   : > { %969 = vmatprep.subr.bf16.mxu0 %v1462_v38  ;;  %1042 = vmatprep.subr.bf16.mxu1 %v1489_v3  ;;  %v1511_v37 = vld [vmem:[%s2027_s3 + $0x130] ss:$8 sps:$4 sm:$0xff]   ;;  %v1514_v38 = vld [vmem:[%s2027_s3 + $0xa0] ss:$8 sps:$4 sm:$0xff]  }
  0x34   : > { %v1523_v45 = vld [vmem:[%s2027_s3 + $0x110] ss:$8 sps:$4 sm:$0xff]   ;;  %v1916_v53 = vld [vmem:[%s2026_s2] ss:$0 sm:$0xff] }
  0x35   : > { %518 = vmatmul.mubr.bf16.vlgmr.msra.gmra.mxu0 %v258_v48  ;;  %1382 = vmatmul.mubr.bf16.vlgmr.msra.gmra.mxu1 %v283_v49  ;;  %v1529_v48 = vld [vmem:[%s2027_s3 + $0x100] ss:$8 sps:$4 sm:$0xff]   ;;  %v1595_v49 = vmov 0  }
  0x36   : > { %525 = vmatprep.mubr.bf16.mxu0 %v1457_v39  ;;  %970 = vmatpush1.bf16.msra.mxu0 %v1460_v40  ;;  %v1519_v39 = vld [vmem:[%s2027_s3 + $0x124] ss:$8 sps:$4 sm:$0xff]   ;;  %v1522_v40 = vld [vmem:[%s2027_s3 + $0x94] ss:$8 sps:$4 sm:$0xff]  }
  0x37   : > { %1385 = vmatprep.mubr.bf16.mxu1 %v284_v54  ;;  %971 = vmatprep.subr.bf16.mxu0 %v1465_v51 }
  0x38   : > { %1043 = vmatpush1.bf16.msra.mxu1 %v1487_v1 }
  0x39   : > { %1044 = vmatprep.subr.bf16.mxu1 %v1495_v23 }
  0x3a   : > { %972 = vmatpush1.bf16.msra.mxu0 %v1463_v55 }
  0x3b   : > { %973 = vmatprep.subr.bf16.mxu0 %v1468_v59 }
  0x3c   : > { %1045 = vmatpush1.bf16.msra.mxu1 %v1493_v25 }
  0x3d   : > { %526 = vmatmul.mubr.bf16.gmra.mxu0 %v259_v60  ;;  %1386 = vmatmul.mubr.bf16.gmra.mxu1 %v285_v61 }
  0x3e   : > { %533 = vmatprep.mubr.bf16.mxu0 %v1458_v62  ;;  %974 = vmatpush1.bf16.msra.mxu0 %v1466_v63 }
  0x3f   : > { %975 = vmatprep.subr.bf16.mxu0 %v1471_v0  ;;  %1046 = vmatprep.subr.bf16.mxu1 %v1501_v27 }
  0x40   : > { %1047 = vmatpush1.bf16.msra.mxu1 %v1499_v29  ;;  %1074 = vmatprep.mubr.bf16.mxu1 %v1595_v49 }
  0x41   : > { %1048 = vmatprep.subr.bf16.mxu1 %v1507_v31 }
  0x42   : > { %976 = vmatpush1.bf16.msra.mxu0 %v1469_v2 }
  0x43   : > { %977 = vmatprep.subr.bf16.mxu0 %v1474_v6 }
  0x44   : > { %1049 = vmatpush1.bf16.msra.mxu1 %v1505_v33 }
  0x45   : > { %534 = vmatmul.mubr.bf16.gmra.mxu0 %v260_v9  ;;  %1050 = vmatprep.subr.bf16.mxu1 %v1513_v35 }
  0x46   : > { %541 = vmatprep.mubr.bf16.mxu0 %v1459_v7  ;;  %978 = vmatpush1.bf16.msra.mxu0 %v1472_v8 }
  0x47   : > { %979 = vmatprep.subr.bf16.mxu0 %v1477_v10 }
  0x48   : > { %1051 = vmatpush1.bf16.msra.mxu1 %v1511_v37 }
  0x49   : > { %1052 = vmatprep.subr.bf16.mxu1 %v1519_v39 }
  0x4a   : > { %980 = vmatpush1.bf16.msra.mxu0 %v1475_v13 }
  0x4b   : > { %981 = vmatprep.subr.bf16.mxu0 %v1480_v14 }
  0x4c   : > { %1053 = vmatpush1.bf16.msra.mxu1 %v1517_v41 }
  0x4d   : > { %542 = vmatmul.mubr.bf16.gmra.mxu0 %v261_v15  ;;  %1054 = vmatprep.subr.bf16.mxu1 %v1525_v43 }
  0x4e   : > { %982 = vmatpush1.bf16.msra.mxu0 %v1478_v16 }
  0x4f   : > { %983 = vmatprep.subr.bf16.mxu0 %v1483_v17 }
  0x50   : > { %1055 = vmatpush1.bf16.msra.mxu1 %v1523_v45 }
  0x51   : > { %1056 = vmatprep.subr.bf16.mxu1 %v1531_v47 }
  0x52   : > { %984 = vmatpush1.bf16.msra.mxu0 %v1481_v18 }
  0x53   : > { %985 = vmatprep.subr.bf16.mxu0 %v1486_v19 }
  0x54   : > { %1057 = vmatpush1.bf16.msra.mxu1 %v1529_v48 }
  0x56   : > { %986 = vmatpush2.bf16.msra.mxu0 %v1484_v20 }
  0x57   : > { %987 = vmatprep.subr.bf16.mxu0 %v1492_v21 }
  0x5a   : > { %988 = vmatpush2.bf16.msra.mxu0 %v1490_v22 }
  0x5b   : > { %989 = vmatprep.subr.bf16.mxu0 %v1498_v24 }
  0x5e   : > { %990 = vmatpush2.bf16.msra.mxu0 %v1496_v26 }
  0x5f   : > { %991 = vmatprep.subr.bf16.mxu0 %v1504_v28 }
  0x62   : > { %992 = vmatpush2.bf16.msra.mxu0 %v1502_v30 }
  0x63   : > { %993 = vmatprep.subr.bf16.mxu0 %v1510_v32 }
  0x66   : > { %994 = vmatpush2.bf16.msra.mxu0 %v1508_v34 }
  0x67   : > { %995 = vmatprep.subr.bf16.mxu0 %v1516_v36 }
  0x6a   : > { %996 = vmatpush2.bf16.msra.mxu0 %v1514_v38 }
  0x6b   : > { %997 = vmatprep.subr.bf16.mxu0 %v1522_v40 }
  0x6e   : > { %998 = vmatpush2.bf16.msra.mxu0 %v1520_v42 }
  0x6f   : > { %999 = vmatprep.subr.bf16.mxu0 %v1528_v44 }
  0x72   : > { %1000 = vmatpush2.bf16.msra.mxu0 %v1526_v46 }
  0xf5   : > { %v1329_v50 = vpop.f32.mrf.mxu0  ;;  %v1383_v51 = vpop.f32.mrf.mxu1 }
  0xf7   : > { %v1330_v52 = vpop.f32.mrf.mxu0  ;;  %v584_v54 = vpop.f32.mrf.mxu1 }
  0xf8   : > { %v1331_v55 = vadd.f32 %v1330_v52, %v1329_v50 }
  0xf9   : > { %v1332_v56 = vpop.f32.mrf.mxu0  ;;  %v1384_v58 = vpop.f32.mrf.mxu1 }
  0xfa   : > { %v520_v57 = vadd.f32 %v1331_v55, %v1916_v53 }
  0xfb   : > { %v1333_v59 = vpop.f32.mrf.mxu0  ;;  %v587_v1 = vpop.f32.mrf.mxu1 }
  0xfc   : > { %v585_v60 = vadd.f32 %v584_v54, %v520_v57  ;;  %v1334_v61 = vadd.f32 %v1333_v59, %v1332_v56 }
  0xfd   : > { %v1335_v62 = vpop.f32.mrf.mxu0  ;;  %v1387_v9 = vpop.f32.mrf.mxu1 }
  0xfe   : > { %v615_v63 = vmax.f32 %v585_v60, 0.0  ;;  %v523_v0 = vadd.f32 %v1334_v61, %v1916_v53 }
  0xff   : > { %v1336_v2 = vpop.f32.mrf.mxu0  ;;  %v600_v16 = vpop.f32.mrf.mxu1 }
 0x100   : > { %625 = vst [vmem:[#allocation2 + $0x1] sm:$0xff] %v615_v63  ;;  %v588_v3 = vadd.f32 %v587_v1, %v523_v0  ;;  %v1337_v4 = vadd.f32 %v1336_v2, %v1335_v62 }
 0x101   : > { %v1338_v5 = vpop.f32.mrf.mxu0  ;;  %v1388_v23 = vpop.f32.mrf.mxu1 }
 0x102   : > { %v616_v6 = vmax.f32 %v588_v3, 0.0  ;;  %v528_v7 = vadd.f32 %v1337_v4, %v1916_v53 }
 0x103   : > { %v1339_v8 = vpop.f32.mrf.mxu0  ;;  %v603_v34 = vpop.f32.mrf.mxu1 }
 0x104   : > { %626 = vst [vmem:[#allocation2 + $0x9] sm:$0xff] %v616_v6  ;;  %v593_v10 = vadd.f32 %v1383_v51, %v528_v7  ;;  %v1340_v11 = vadd.f32 %v1339_v8, %v1338_v5  ;;  %v653_v12 = vpack.c.bf16 %v616_v6, %v615_v63  ;;  %v719_v8 = vlaneseq }
 0x105   : > { %v1341_v13 = vpop.f32.mrf.mxu0 }
 0x106   : > { %v617_v14 = vmax.f32 %v593_v10, 0.0  ;;  %v531_v15 = vadd.f32 %v1340_v11, %v1916_v53  ;;  %1001 = vmatprep.mubr.bf16.mxu0 %v653_v12  ;;  %v717_v11 = vld [vmem:[%s2028_s4] sm:$0x3] }
 0x107   : > { %v1342_v17 = vpop.f32.mrf.mxu0  ;;  %v633_v25 = vld [vmem:[#allocation2] sm:$0xff] }
 0x108   : > { %627 = vst [vmem:[#allocation2 + $0x11] sm:$0xff] %v617_v14  ;;  %v596_v18 = vadd.f32 %v1384_v58, %v531_v15  ;;  %v1343_v19 = vadd.f32 %v1342_v17, %v1341_v13 }
 0x109   : > { %v1344_v20 = vpop.f32.mrf.mxu0 }
 0x10a   : > { %v618_v21 = vmax.f32 %v596_v18, 0.0  ;;  %v536_v22 = vadd.f32 %v1343_v19, %v1916_v53 }
 0x10b   : > { %v1345_v24 = vpop.f32.mrf.mxu0  ;;  %v634_v26 = vld [vmem:[#allocation2 + $0x8] sm:$0xff] }
 0x10c   : > { %628 = vst [vmem:[#allocation2 + $0x19] sm:$0xff] %v618_v21  ;;  %v601_v27 = vadd.f32 %v600_v16, %v536_v22  ;;  %v1346_v28 = vadd.f32 %v1345_v24, %v1344_v20  ;;  %v641_v29 = vpack.c.bf16 %v634_v26, %v633_v25  ;;  %v654_v30 = vpack.c.bf16 %v618_v21, %v617_v14  ;;  %v657_v36 = vld [vmem:[#allocation2 + $0x2] sm:$0xff] }
 0x10d   : > { %v1347_v31 = vpop.f32.mrf.mxu0 }
 0x10e   : > { %v619_v32 = vmax.f32 %v601_v27, 0.0  ;;  %v539_v33 = vadd.f32 %v1346_v28, %v1916_v53  ;;  %1002 = vmatmul.mubr.bf16.vlgmr.msra.gmra.mxu0 %v641_v29 }
 0x10f   : > { %v1348_v35 = vpop.f32.mrf.mxu0  ;;  %v658_v37 = vld [vmem:[#allocation2 + $0xa] sm:$0xff]  ;;  %1011 = vmatprep.mubr.bf16.mxu0 %v654_v30 }
 0x110   : > { %629 = vst [vmem:[#allocation2 + $0x21] sm:$0xff] %v619_v32  ;;  %v604_v38 = vadd.f32 %v603_v34, %v539_v33  ;;  %v1349_v39 = vadd.f32 %v1348_v35, %v1347_v31  ;;  %v665_v40 = vpack.c.bf16 %v658_v37, %v657_v36  ;;  %v635_v45 = vld [vmem:[#allocation2 + $0x10] sm:$0xff] }
 0x111   : > { %v1350_v41 = vpop.f32.mrf.mxu0 }
 0x112   : > { %v620_v42 = vmax.f32 %v604_v38, 0.0  ;;  %v544_v43 = vadd.f32 %v1349_v39, %v1916_v53  ;;  %1075 = vmatmul.mubr.bf16.vlgmr.msra.gmra.mxu1 %v665_v40 }
 0x113   : > { %v1351_v44 = vpop.f32.mrf.mxu0  ;;  %v636_v46 = vld [vmem:[#allocation2 + $0x18] sm:$0xff]  ;;  %1084 = vmatprep.mubr.bf16.mxu1 %v1595_v49 }
 0x114   : > { %630 = vst [vmem:[#allocation2 + $0x29] sm:$0xff] %v620_v42  ;;  %v609_v47 = vadd.f32 %v1387_v9, %v544_v43  ;;  %v1352_v48 = vadd.f32 %v1351_v44, %v1350_v41  ;;  %v642_v50 = vpack.c.bf16 %v636_v46, %v635_v45  ;;  %v655_v51 = vpack.c.bf16 %v620_v42, %v619_v32  ;;  %v659_v55 = vld [vmem:[#allocation2 + $0x12] sm:$0xff] }
 0x115   : > { %v720_v9 = vshrl.u32 %v719_v8, 7 }
 0x116   : > { %v621_v52 = vmax.f32 %v609_v47, 0.0  ;;  %v547_v54 = vadd.f32 %v1352_v48, %v1916_v53  ;;  %1012 = vmatmul.mubr.bf16.gmra.mxu0 %v642_v50 }
 0x117   : > { %v660_v56 = vld [vmem:[#allocation2 + $0x1a] sm:$0xff]  ;;  %1021 = vmatprep.mubr.bf16.mxu0 %v655_v51  ;;  %v721_v10 = vsub.s32 0, %v720_v9  ;;  %v725_v12 = vsub.s32 1, %v720_v9 }
 0x118   : > { %631 = vst [vmem:[#allocation2 + $0x31] sm:$0xff] %v621_v52  ;;  %v612_v57 = vadd.f32 %v1388_v23, %v547_v54  ;;  %v666_v58 = vpack.c.bf16 %v660_v56, %v659_v55  ;;  %v637_v60 = vld [vmem:[#allocation2 + $0x20] sm:$0xff] }
 0x119   : > { %v1933_v13 = vrot.slane %v717_v11, %v721_v10 }
 0x11a   : > { %v622_v59 = vmax.f32 %v612_v57, 0.0  ;;  %1085 = vmatmul.mubr.bf16.gmra.mxu1 %v666_v58 }
 0x11b   : > { %v638_v61 = vld [vmem:[#allocation2 + $0x28] sm:$0xff]  ;;  %1094 = vmatprep.mubr.bf16.mxu1 %v1595_v49 }
 0x11c   : > { %632 = vst [vmem:[#allocation2 + $0x39] sm:$0xff] %v622_v59  ;;  %v643_v62 = vpack.c.bf16 %v638_v61, %v637_v60  ;;  %v656_v63 = vpack.c.bf16 %v622_v59, %v621_v52  ;;  %v661_v0 = vld [vmem:[#allocation2 + $0x22] sm:$0xff] }
 0x11e   : > { %1022 = vmatmul.mubr.bf16.gmra.mxu0 %v643_v62 }
 0x11f   : > { %v662_v1 = vld [vmem:[#allocation2 + $0x2a] sm:$0xff]  ;;  %1031 = vmatprep.mubr.bf16.mxu0 %v656_v63 }
 0x120   : > { %v667_v53 = vpack.c.bf16 %v662_v1, %v661_v0  ;;  %v639_v2 = vld [vmem:[#allocation2 + $0x30] sm:$0xff] }
 0x122   : > { %1095 = vmatmul.mubr.bf16.gmra.mxu1 %v667_v53 }
 0x123   : > { %v640_v3 = vld [vmem:[#allocation2 + $0x38] sm:$0xff]  ;;  %1104 = vmatprep.mubr.bf16.mxu1 %v1595_v49  ;;  %v1935_v49 = vrot.slane %v717_v11, %v725_v12 }
 0x124   : > { %v644_v4 = vpack.c.bf16 %v640_v3, %v639_v2  ;;  %v663_v5 = vld [vmem:[#allocation2 + $0x32] sm:$0xff]  ;;  %v664_v6 = vld [vmem:[#allocation2 + $0x3a] sm:$0xff] }
 0x125   : > { %v668_v7 = vpack.c.bf16 %v664_v6, %v663_v5 }
 0x126   : > { %1032 = vmatmul.mubr.bf16.gmra.mxu0 %v644_v4 }
 0x12a   : > { %1105 = vmatmul.mubr.bf16.gmra.mxu1 %v668_v7 }
 0x1ce   : > { %v1003_v14 = vpop.f32.mrf.mxu0 }
 0x1cf   : > { %v1004_v16 = vadd.f32 %v1003_v14, %v1933_v13 }
 0x1d0   : > { %v1005_v15 = vpop.f32.mrf.mxu0 }
 0x1d1   : > { %v1006_v19 = vadd.f32 %v1005_v15, %v1935_v49 }
 0x1d2   : > { %v1076_v17 = vpop.f32.mrf.mxu1  ;;  %v1007_v18 = vpop.f32.mrf.mxu0 }
 0x1d3   : > { %v1077_v20 = vadd.f32 %v1076_v17, %v1004_v16  ;;  %v1008_v23 = vadd.f32 %v1007_v18, %v1933_v13 }
 0x1d4   : > { %v1078_v21 = vpop.f32.mrf.mxu1  ;;  %v1009_v22 = vpop.f32.mrf.mxu0 }
 0x1d5   : > { %1115 = vst [vmem:[%s1941_s23] sm:$0xff] %v1077_v20  ;;  %v1079_v24 = vadd.f32 %v1078_v21, %v1006_v19  ;;  %v1010_v27 = vadd.f32 %v1009_v22, %v1935_v49 }
 0x1d6   : > { %v1080_v25 = vpop.f32.mrf.mxu1  ;;  %v1013_v26 = vpop.f32.mrf.mxu0 }
 0x1d7   : > { %1116 = vst [vmem:[%s1941_s23 + $0x8] sm:$0xff] %v1079_v24  ;;  %v1081_v28 = vadd.f32 %v1080_v25, %v1008_v23  ;;  %v1014_v31 = vadd.f32 %v1013_v26, %v1933_v13 }
 0x1d8   : > { %v1082_v29 = vpop.f32.mrf.mxu1  ;;  %v1015_v30 = vpop.f32.mrf.mxu0 }
 0x1d9   : > { %1117 = vst [vmem:[%s1941_s23 + $0x10] sm:$0xff] %v1081_v28  ;;  %v1083_v32 = vadd.f32 %v1082_v29, %v1010_v27  ;;  %v1016_v35 = vadd.f32 %v1015_v30, %v1935_v49 }
 0x1da   : > { %v1086_v33 = vpop.f32.mrf.mxu1  ;;  %v1017_v34 = vpop.f32.mrf.mxu0 }
 0x1db   : > { %1118 = vst [vmem:[%s1941_s23 + $0x18] sm:$0xff] %v1083_v32  ;;  %v1087_v36 = vadd.f32 %v1086_v33, %v1014_v31  ;;  %v1018_v39 = vadd.f32 %v1017_v34, %v1933_v13 }
 0x1dc   : > { %v1088_v37 = vpop.f32.mrf.mxu1  ;;  %v1019_v38 = vpop.f32.mrf.mxu0 }
 0x1dd   : > { %1119 = vst [vmem:[%s1941_s23 + $0x20] sm:$0xff] %v1087_v36  ;;  %v1089_v40 = vadd.f32 %v1088_v37, %v1016_v35  ;;  %v1020_v43 = vadd.f32 %v1019_v38, %v1935_v49 }
 0x1de   : > { %v1090_v41 = vpop.f32.mrf.mxu1  ;;  %v1023_v42 = vpop.f32.mrf.mxu0 }
 0x1df   : > { %1120 = vst [vmem:[%s1941_s23 + $0x28] sm:$0xff] %v1089_v40  ;;  %v1091_v44 = vadd.f32 %v1090_v41, %v1018_v39  ;;  %v1024_v47 = vadd.f32 %v1023_v42, %v1933_v13 }
 0x1e0   : > { %v1092_v45 = vpop.f32.mrf.mxu1  ;;  %v1025_v46 = vpop.f32.mrf.mxu0 }
 0x1e1   : > { %1121 = vst [vmem:[%s1941_s23 + $0x30] sm:$0xff] %v1091_v44  ;;  %v1093_v48 = vadd.f32 %v1092_v45, %v1020_v43  ;;  %v1026_v52 = vadd.f32 %v1025_v46, %v1935_v49 }
 0x1e2   : > { %v1096_v50 = vpop.f32.mrf.mxu1  ;;  %v1027_v51 = vpop.f32.mrf.mxu0 }
 0x1e3   : > { %1122 = vst [vmem:[%s1941_s23 + $0x38] sm:$0xff] %v1093_v48  ;;  %v1097_v54 = vadd.f32 %v1096_v50, %v1024_v47  ;;  %v1028_v57 = vadd.f32 %v1027_v51, %v1933_v13 }
 0x1e4   : > { %v1098_v55 = vpop.f32.mrf.mxu1  ;;  %v1029_v56 = vpop.f32.mrf.mxu0 }
 0x1e5   : > { %1123 = vst [vmem:[%s1941_s23 + $0x40] sm:$0xff] %v1097_v54  ;;  %v1099_v58 = vadd.f32 %v1098_v55, %v1026_v52  ;;  %v1030_v61 = vadd.f32 %v1029_v56, %v1935_v49 }
 0x1e6   : > { %v1100_v59 = vpop.f32.mrf.mxu1  ;;  %v1033_v60 = vpop.f32.mrf.mxu0 }
 0x1e7   : > { %1124 = vst [vmem:[%s1941_s23 + $0x48] sm:$0xff] %v1099_v58  ;;  %v1101_v62 = vadd.f32 %v1100_v59, %v1028_v57  ;;  %v1034_v1 = vadd.f32 %v1033_v60, %v1933_v13 }
 0x1e8   : > { %v1102_v63 = vpop.f32.mrf.mxu1  ;;  %v1035_v0 = vpop.f32.mrf.mxu0 }
 0x1e9   : > { %1125 = vst [vmem:[%s1941_s23 + $0x50] sm:$0xff] %v1101_v62  ;;  %v1103_v53 = vadd.f32 %v1102_v63, %v1030_v61  ;;  %v1036_v4 = vadd.f32 %v1035_v0, %v1935_v49 }
 0x1ea   : > { %v1106_v2 = vpop.f32.mrf.mxu1  ;;  %v1037_v3 = vpop.f32.mrf.mxu0 }
 0x1eb   : > { %1126 = vst [vmem:[%s1941_s23 + $0x58] sm:$0xff] %v1103_v53  ;;  %v1107_v5 = vadd.f32 %v1106_v2, %v1034_v1  ;;  %v1038_v8 = vadd.f32 %v1037_v3, %v1933_v13 }
 0x1ec   : > { %v1108_v6 = vpop.f32.mrf.mxu1  ;;  %v1039_v7 = vpop.f32.mrf.mxu0 }
 0x1ed   : > { %1127 = vst [vmem:[%s1941_s23 + $0x60] sm:$0xff] %v1107_v5  ;;  %v1109_v9 = vadd.f32 %v1108_v6, %v1036_v4  ;;  %v1040_v11 = vadd.f32 %v1039_v7, %v1935_v49 }
 0x1ee   : > { %v1110_v10 = vpop.f32.mrf.mxu1 }
 0x1ef   : > { %1128 = vst [vmem:[%s1941_s23 + $0x68] sm:$0xff] %v1109_v9  ;;  %v1111_v12 = vadd.f32 %v1110_v10, %v1038_v8 }
 0x1f0   : > { %v1112_v14 = vpop.f32.mrf.mxu1 }
 0x1f1   : > { %1129 = vst [vmem:[%s1941_s23 + $0x70] sm:$0xff] %v1111_v12  ;;  %v1113_v13 = vadd.f32 %v1112_v14, %v1040_v11 }
 0x1f3   : > { %1130 = vst [vmem:[%s1941_s23 + $0x78] sm:$0xff] %v1113_v13 }
 0x1f4   : > { %1545 = shalt.err (!%p1542_p3)
}
 0x1f5   : > { %s1546_s11 = scalar_lea.hbm %s1976_s7, 2048  ;;  %s1550_s14 = scalar_lea.hbm %s2029_s5, 4096 }
 0x1f6   : > { %p1547_p4 = scmp.ne.s32.totalorder %s1976_s7, %s1546_s11  ;;  %p1551_p9 = scmp.lt.s32.totalorder %s1976_s7, %s2029_s5 }
 0x1f7   : > { %p1552_p10 = scmp.lt.s32.totalorder %s1550_s14, %s1546_s11 }
 0x1f8   : > { %p1548_p7 = pnand %p1547_p4, %p1667_p5 }
 0x1f9   : > { %p1553_p11 = por %p1552_p10, %p1551_p9 }
 0x1fa   : > { %p1549_p8 = pneg %p1548_p7 }
 0x1fc   : > { %p1554_p12 = pnand %p1553_p11, %p1549_p8 }
 0x1fe   : > { %1557 = shalt.err (!%p1554_p12)
}
 0x1ff   : > { %s1597_s23 = smov 256   ;;  %s1598_s25 = smov 16  }
 0x200   : > { %1389 = dma.vmem_to_hbm [thread:$0]  (%p1667_p5), %s1978_s26, 2048, %s1976_s7, %s1984_s22, %s1597_s23, %s1597_s23, %s1598_s25  }
 0x201 PF: > { %p1395_p13 = scmp.ge.s32.totalorder %s1592_s21, 2  ;;  %s1160_s30 = sand.u32 1, %s1580_s18  }
 0x202   : > { %s1161_s6 = scalar_lea.sflag [#allocation4], %s1160_s30 }
 0x203   : > { %p1392_p0 = pnand %p1395_p13, %p1671_p6 }
 0x205   : > { %p1393_p1 = pneg %p1392_p0 }
 0x207   : > { %1575 = dma.done.wait (%p1393_p1), %s1161_s6, 2048  }
 0x208   : > { %1577 = vsyncadd (%p1393_p1), %s1161_s6, 4294965248  ;;  %p15_p2 = scmp.ge.s32.totalorder %s1654_s24, 4   ;;  %s2032_s18 = smov %s1584_s19 }
 0x209   : > { %s2033_s19 = smov %s1588_s20  ;;  %s2034_s20 = smov %s1665_s27 }
 0x20a   : > { %s2035_s21 = smov %s1654_s24  ;;  %17 = sbr.rel (!%p15_p2) target bundleno = 3 (0x3), region = 75 }
 0x20f   :  { %1166 = vsyncpa [#allocation4], 1 }
 0x210   :  { %1168 = vsyncpa [#allocation4 + $0x1], 1 }

</bundles_post_ra>
